<compile_context>
chip_gen: v7x
topology: tpu7x:2x2x1
jax: 0.10.0
libtpu: 0.0.40
codegen_flags: <defaults>
</compile_context>

<pallas_src>
import jax
import jax.numpy as jnp
from jax.experimental import pallas as pl
from jax.experimental.pallas import tpu as pltpu

EPS = 1e-5


def conv1x1_bn_kernel(w_ref, x_ref, g_ref, b_ref, o_ref):
    # w_ref: (tn, Cin) f32  -- native PyTorch (Cout, Cin) layout, no transpose;
    #                          cast to bf16 here (no separate convert HLO in HBM).
    # x_ref: (Cin, M)  f32  -- NCHW (N=1) viewed as (Cin, H*W); grid-resident.
    # g_ref/b_ref: (tn, 1) f32
    # o_ref: (tn, M)   f32  -- reshapes directly back to NCHW.
    w_bf16 = w_ref[...].astype(jnp.bfloat16)
    # Grid is only 2 parallel steps (one per TensorCore on v7x), so this cast of
    # the resident activation slab runs at most once per core -- no hoist needed.
    x_bf16 = x_ref[...].astype(jnp.bfloat16)
    y = jnp.dot(w_bf16, x_bf16, preferred_element_type=jnp.float32)  # (tn, M) f32

    # Training-mode BatchNorm2d statistics over the spatial/batch axis (M) in a
    # SINGLE pass: var = E[y^2] - E[y]^2 (biased).  M = 49 is the true, unpadded
    # element count, so the statistics are exact.
    m = y.shape[1]
    inv_m = 1.0 / m
    mean = jnp.sum(y, axis=1, keepdims=True) * inv_m                # (tn, 1)
    mean_sq = jnp.sum(y * y, axis=1, keepdims=True) * inv_m         # (tn, 1)
    var = jnp.maximum(mean_sq - mean * mean, 0.0)   # guard tiny cancellation
    # Fold the affine transform into one per-channel scale/shift.
    scale = jax.lax.rsqrt(var + EPS) * g_ref[...]                   # (tn, 1)
    shift = b_ref[...] - mean * scale                               # (tn, 1)
    o_ref[...] = (y * scale + shift).astype(o_ref.dtype)


def conv1x1_bn(x_nchw, w_oihw, gamma, beta, *, tn=512):
    N, Cin, H, W = x_nchw.shape
    Cout = w_oihw.shape[0]
    assert N == 1, "kernel exploits the free NCHW <-> (Cin, M) view for N=1"
    assert w_oihw.shape == (Cout, Cin, 1, 1)
    assert Cout % tn == 0

    M = H * W
    # Free views only: no activation/weight transposes and no wrapper-side casts
    # (a wrapper bf16 cast would add a full extra read+write pass over the 8 MiB
    # weight, roughly doubling HBM traffic for this bandwidth-bound op).
    x2d = x_nchw.reshape(Cin, M)                                    # (Cin, M) free view
    w2d = w_oihw.reshape(Cout, Cin)                                 # (Cout, Cin) f32 free view
    g2d = gamma.reshape(Cout, 1).astype(jnp.float32)
    b2d = beta.reshape(Cout, 1).astype(jnp.float32)

    grid = (Cout // tn,)                                            # 2 parallel steps (v7x: both TCs)
    cost = pl.CostEstimate(
        flops=2 * M * Cin * Cout,
        transcendentals=Cout,
        bytes_accessed=(w2d.size * 4 + x2d.size * 4 + 2 * Cout * 4 + Cout * M * 4),
    )

    out2d = pl.pallas_call(
        conv1x1_bn_kernel,
        out_shape=jax.ShapeDtypeStruct((Cout, M), jnp.float32),
        grid_spec=pltpu.PrefetchScalarGridSpec(
            num_scalar_prefetch=0,
            grid=grid,
            in_specs=[
                pl.BlockSpec((tn, Cin), lambda j: (j, 0)),          # f32 weight row tile
                pl.BlockSpec((Cin, M), lambda j: (0, 0)),           # full activations, resident
                pl.BlockSpec((tn, 1), lambda j: (j, 0)),            # gamma tile
                pl.BlockSpec((tn, 1), lambda j: (j, 0)),            # beta tile
            ],
            out_specs=pl.BlockSpec((tn, M), lambda j: (j, 0)),
        ),
        compiler_params=pltpu.CompilerParams(
            dimension_semantics=("parallel",),
        ),
        cost_estimate=cost,
    )(w2d, x2d, g2d, b2d)

    return out2d.reshape(N, Cout, H, W)                             # free view back to NCHW


def reference(x_nchw, w_oihw, gamma, beta, *, matmul_dtype=jnp.float32):
    # Pure-JAX reference of conv1x1 + training-mode BatchNorm2d (two-pass stats).
    N, Cin, H, W = x_nchw.shape
    Cout = w_oihw.shape[0]
    x2d = x_nchw.reshape(Cin, H * W)
    w2d = w_oihw.reshape(Cout, Cin)
    y = jnp.dot(w2d.astype(matmul_dtype), x2d.astype(matmul_dtype),
                preferred_element_type=jnp.float32)
    mean = jnp.mean(y, axis=1, keepdims=True)
    var = jnp.mean((y - mean) ** 2, axis=1, keepdims=True)
    yn = (y - mean) * jax.lax.rsqrt(var + EPS) * gamma[:, None] + beta[:, None]
    return yn.reshape(N, Cout, H, W)


if __name__ == "__main__":
    key = jax.random.PRNGKey(0)
    kx, kw = jax.random.split(key)

    N, Cin, Cout, H, W = 1, 2048, 1024, 7, 7
    x = jax.random.normal(kx, (N, Cin, H, W), dtype=jnp.float32)
    w = jax.random.normal(kw, (Cout, Cin, 1, 1), dtype=jnp.float32) * 0.02
    gamma = jnp.ones((Cout,), dtype=jnp.float32)   # PyTorch BatchNorm2d default affine init
    beta = jnp.zeros((Cout,), dtype=jnp.float32)

    out = jax.block_until_ready(conv1x1_bn(x, w, gamma, beta))
    assert out.shape == (N, Cout, H, W)

    # Numerics-matched check (bf16 matmul, f32 accumulation) -- tight tolerance;
    # also validates the one-pass variance against the two-pass reference.
    ref_bf16 = reference(x, w, gamma, beta, matmul_dtype=jnp.bfloat16)
    assert jnp.allclose(out, ref_bf16, atol=2e-3, rtol=2e-3)

    # Semantic sanity check vs the full-f32 PyTorch-equivalent math.
    ref_f32 = reference(x, w, gamma, beta, matmul_dtype=jnp.float32)
    assert jnp.allclose(out, ref_f32, atol=5e-2, rtol=5e-2)

    # TODO(synk): BatchNorm running_mean/running_var momentum(0.1) update is module
    # state, not part of the forward output, so it is not materialized here.
    print("KERNEL_OK")
</pallas_src>

<mosaic_0001>
module attributes {stable_mosaic.version = 11 : i64} {
  func.func @conv1x1_bn_kernel(%arg0: i32, %arg1: memref<512x2048xf32, #tpu.memory_space<vmem>>, %arg2: memref<2048x49xf32, #tpu.memory_space<vmem>>, %arg3: memref<512x1xf32, #tpu.memory_space<vmem>>, %arg4: memref<512x1xf32, #tpu.memory_space<vmem>>, %arg5: memref<512x49xf32, #tpu.memory_space<vmem>>) attributes {dimension_semantics = [#tpu.dimension_semantics<parallel>], iteration_bounds = array<i64: 2>, scalar_prefetch = 0 : i64, scratch_operands = 0 : i64, tpu.core_type = #tpu.core_type<tc>, window_params = [{transform_indices = @transform_0, window_bounds = array<i64: 512, 2048>}, {pipeline_mode = #tpu.pipeline_mode<synchronous>, transform_indices = @transform_1, window_bounds = array<i64: 2048, 49>}, {transform_indices = @transform_2, window_bounds = array<i64: 512, 1>}, {transform_indices = @transform_3, window_bounds = array<i64: 512, 1>}, {transform_indices = @transform_4, window_bounds = array<i64: 512, 49>}]} {
    %c0 = arith.constant 0 : index
    %c0_0 = arith.constant 0 : index
    %0 = vector.load %arg1[%c0, %c0_0] : memref<512x2048xf32, #tpu.memory_space<vmem>>, vector<512x2048xf32>
    %1 = arith.truncf %0 : vector<512x2048xf32> to vector<512x2048xbf16>
    %c0_1 = arith.constant 0 : index
    %c0_2 = arith.constant 0 : index
    %2 = vector.load %arg2[%c0_1, %c0_2] : memref<2048x49xf32, #tpu.memory_space<vmem>>, vector<2048x49xf32>
    %3 = arith.truncf %2 : vector<2048x49xf32> to vector<2048x49xbf16>
    %cst = arith.constant dense<0.000000e+00> : vector<512x49xf32>
    %4 = tpu.matmul %1, %3, %cst {dimension_numbers = #tpu.dot_dimension_numbers<[1], [0], [0], [1], [0, 0, 1, 1], [], []>} : vector<512x2048xbf16>, vector<2048x49xbf16>, vector<512x49xf32> -> vector<512x49xf32>
    %cst_3 = arith.constant dense<0.000000e+00> : vector<512xf32>
    %5 = vector.multi_reduction <add>, %4, %cst_3 [1] : vector<512x49xf32> to vector<512xf32>
    %6 = vector.shape_cast %5 : vector<512xf32> to vector<512x1xf32>
    %cst_4 = arith.constant 0.0204081628 : f32
    %7 = vector.broadcast %cst_4 : f32 to vector<512x1xf32>
    %8 = arith.mulf %6, %7 : vector<512x1xf32>
    %9 = arith.mulf %4, %4 : vector<512x49xf32>
    %cst_5 = arith.constant dense<0.000000e+00> : vector<512xf32>
    %10 = vector.multi_reduction <add>, %9, %cst_5 [1] : vector<512x49xf32> to vector<512xf32>
    %11 = vector.shape_cast %10 : vector<512xf32> to vector<512x1xf32>
    %cst_6 = arith.constant 0.0204081628 : f32
    %12 = vector.broadcast %cst_6 : f32 to vector<512x1xf32>
    %13 = arith.mulf %11, %12 : vector<512x1xf32>
    %14 = arith.mulf %8, %8 : vector<512x1xf32>
    %15 = arith.subf %13, %14 : vector<512x1xf32>
    %cst_7 = arith.constant 0.000000e+00 : f32
    %16 = vector.broadcast %cst_7 : f32 to vector<512x1xf32>
    %17 = arith.maximumf %15, %16 : vector<512x1xf32>
    %cst_8 = arith.constant 9.99999974E-6 : f32
    %18 = vector.broadcast %cst_8 : f32 to vector<512x1xf32>
    %19 = arith.addf %17, %18 : vector<512x1xf32>
    %20 = math.rsqrt %19 : vector<512x1xf32>
    %c0_9 = arith.constant 0 : index
    %c0_10 = arith.constant 0 : index
    %21 = vector.load %arg3[%c0_9, %c0_10] : memref<512x1xf32, #tpu.memory_space<vmem>>, vector<512x1xf32>
    %22 = arith.mulf %20, %21 : vector<512x1xf32>
    %c0_11 = arith.constant 0 : index
    %c0_12 = arith.constant 0 : index
    %23 = vector.load %arg4[%c0_11, %c0_12] : memref<512x1xf32, #tpu.memory_space<vmem>>, vector<512x1xf32>
    %24 = arith.mulf %8, %22 : vector<512x1xf32>
    %25 = arith.subf %23, %24 : vector<512x1xf32>
    %26 = vector.broadcast %22 : vector<512x1xf32> to vector<512x49xf32>
    %27 = arith.mulf %4, %26 : vector<512x49xf32>
    %28 = vector.broadcast %25 : vector<512x1xf32> to vector<512x49xf32>
    %29 = arith.addf %27, %28 : vector<512x49xf32>
    %c0_13 = arith.constant 0 : index
    %c0_14 = arith.constant 0 : index
    %30 = vector.load %arg5[%c0_13, %c0_14] : memref<512x49xf32, #tpu.memory_space<vmem>>, vector<512x49xf32>
    tpu.vector_store %arg5[%c0_13, %c0_14], %29 {strides = array<i32>} : memref<512x49xf32, #tpu.memory_space<vmem>>, vector<512x49xf32>,
    return
  }
  func.func @transform_0(%arg0: i32) -> (i32, i32) {
    %c0_i32 = arith.constant 0 : i32
    %c0_i32_0 = arith.constant 0 : i32
    return %arg0, %c0_i32 : i32, i32
  }
  func.func @transform_1(%arg0: i32) -> (i32, i32) {
    %c0_i32 = arith.constant 0 : i32
    %c0_i32_0 = arith.constant 0 : i32
    %c0_i32_1 = arith.constant 0 : i32
    return %c0_i32, %c0_i32_0 : i32, i32
  }
  func.func @transform_2(%arg0: i32) -> (i32, i32) {
    %c0_i32 = arith.constant 0 : i32
    %c0_i32_0 = arith.constant 0 : i32
    return %arg0, %c0_i32 : i32, i32
  }
  func.func @transform_3(%arg0: i32) -> (i32, i32) {
    %c0_i32 = arith.constant 0 : i32
    %c0_i32_0 = arith.constant 0 : i32
    return %arg0, %c0_i32 : i32, i32
  }
  func.func @transform_4(%arg0: i32) -> (i32, i32) {
    %c0_i32 = arith.constant 0 : i32
    %c0_i32_0 = arith.constant 0 : i32
    return %arg0, %c0_i32 : i32, i32
  }
}

</mosaic_0001>

<bundles_post_ra>
// kernel: tpu_custom_call.1
= control target key start
LH: loop header
LB: loop body
LE: loop exit
PB: predicated region body
PF: predicated region fallthrough
CT: control target
= control target key end

     0   :  { %9 = vsyncpa [#allocation3], 0  ;;  %s11213_s0 = inlined_call_operand.hbm [shape: f32[1024,2048], index: 0, kind: input, shape index: {}]   ;;  %s11214_s1 = inlined_call_operand.vmem [shape: f32[2048,49], index: 1, kind: input, shape index: {}]   ;;  %s11215_s2 = inlined_call_operand.vmem [shape: f32[1024,1], index: 2, kind: input, shape index: {}]   ;;  %s11216_s3 = inlined_call_operand.vmem [shape: f32[1024,1], index: 3, kind: input, shape index: {}]   ;;  %s11217_s4 = inlined_call_operand.vmem [shape: f32[1024,49], index: 4, kind: output, shape index: {}]  }
   0x1   :  { %11 = vsyncpa [#allocation3 + $0x1], 0  ;;  %s7757_s15 = smov 0   ;;  %s7759_s16 = smov 0  }
   0x2   :  { %s7761_s17 = smov 0   ;;  %s7763_s18 = smov 0  }
   0x3 LB: > { %s6638_s19 = sadd.s32 4294967295, %s7726_s18   ;;  %s7777_s20 = sadd.s32 1, %s7726_s18   ;;  %s7726_s18 = sphi %s7763_s18, %s11512_s18   ;;  %s7722_s17 = sphi %s7761_s17, %s11511_s17   ;;  %s7718_s16 = sphi %s7759_s16, %s11510_s16   ;;  %s7714_s15 = sphi %s7757_s15, %s11509_s15  }
   0x4   : > { %s21_s21 = ssub.s32 %s7726_s18, %s7777_s20  ;;  %s24_s22 = sadd.s32 1, %s7722_s17 }
   0x5   : > { %p22_p0 = scmp.eq.s32.totalorder %s21_s21, 0  ;;  %p31_p1 = scmp.ne.s32.totalorder %s7722_s17, %s7718_s16 }
   0x6   : > { %p32_p2 = scmp.eq.s32.totalorder %s7726_s18, 0  ;;  %p37_p3 = scmp.ne.s32.totalorder %s7718_s16, %s7714_s15 }
   0x7   : > { %s7787_s23 = scalar_select %p22_p0, %s7722_s17, %s24_s22  }
   0x8   : > { %p33_p4 = por %p32_p2, %p31_p1  ;;  %p38_p5 = scmp.eq.s32.totalorder %s6638_s19, 0 }
   0x9   : > { %p7496_p6 = scmp.lt.s32.totalorder %s7726_s18, 2  ;;  %s163_s25 = sand.u32 1, %s7722_s17  }
   0xa   : > { %p7792_p7 = por %p38_p5, %p37_p3  ;;  %s6642_s26 = sshll.u32 %s163_s25, 13 }
   0xb   : > { %s6657_s27 = sshll.u32 %s7726_s18, 17  ;;  %s167_s5 = scalar_lea.vmem [#allocation2], %s6642_s26 }
   0xc   : > { %s7801_s30 = scalar_lea.hbm %s11213_s0, %s6657_s27  ;;  %s175_s6 = sshll.u32 %s167_s5, 4  ;;  %s7803_s6 = int_to_ptr.vmem [resolvable:$true] %s175_s6 }
   0xd   : > { %p7805_p8 = pnand %p7496_p6, %p33_p4  ;;  %s7810_s8 = scalar_lea.sflag [#allocation3], %s163_s25 }
   0xe   : > { %s7662_s9 = scalar_lea.hbm %s7801_s30, 131072  ;;  %s7667_s12 = scalar_lea.hbm %s11213_s0, 262144 }
   0xf   : > { %p7663_p10 = scmp.ne.s32.totalorder %s7801_s30, %s7662_s9  ;;  %p7664_p11 = pneg %p7805_p8 }
  0x10   : > { %p7668_p0 = scmp.lt.u32.totalorder %s7801_s30, %s11213_s0  ;;  %p7669_p1 = scmp.lt.u32.totalorder %s7667_s12, %s7662_s9 }
  0x11   : > { %p7665_p12 = pnand %p7664_p11, %p7663_p10  ;;  %p7671_p3 = scmp.lt.u32.totalorder %s7662_s9, %s7801_s30 }
  0x12   : > { %p7670_p2 = por %p7669_p1, %p7668_p0 }
  0x13   : > { %p7666_p13 = pneg %p7665_p12 }
  0x14   : > { %p7672_p4 = por %p7671_p3, %p7670_p2 }
  0x16   : > { %p7673_p5 = pnand %p7672_p4, %p7666_p13 }
  0x18   : > { %7676 = shalt.err (!%p7673_p5)
}
  0x19   : > { %s7677_s15 = scalar_lea.vmem %s7803_s6, 131072  ;;  %s7728_s21 = smov [#allocation2]  }
  0x1a   : > { %p7678_p6 = scmp.ne.s32.totalorder %s7803_s6, %s7677_s15  ;;  %s7682_s22 = sshll.u32 %s7728_s21, 4  ;;  %s7683_s22 = int_to_ptr.vmem [resolvable:$false] %s7682_s22 }
  0x1b   : > { %s7684_s25 = scalar_lea.vmem %s7683_s22, 262144  ;;  %p7685_p9 = scmp.lt.s32.totalorder %s7803_s6, %s7683_s22 }
  0x1c   : > { %p7680_p10 = pnand %p7678_p6, %p7664_p11  ;;  %p7686_p0 = scmp.lt.s32.totalorder %s7684_s25, %s7677_s15 }
  0x1e   : > { %p7681_p12 = pneg %p7680_p10  ;;  %p7687_p1 = por %p7686_p0, %p7685_p9 }
  0x20   : > { %p7688_p2 = pnand %p7687_p1, %p7681_p12 }
  0x22   : > { %7691 = shalt.err (!%p7688_p2)
}
  0x23   : > { %s7729_s26 = smov 2048   ;;  %s7730_s27 = smov 128  }
  0x24   : > { %7495 = dma.hbm_to_vmem [thread:$0]  (!%p7805_p8), %s7801_s30, 131072, %s7803_s6, %s7810_s8, %s7729_s26, %s7729_s26, %s7730_s27  }
  0x25   : > { %p201_p11 = scmp.lt.s32.totalorder %s7726_s18, 3  ;;  %p11281_p13 = scmp.ge.s32.totalorder %s7726_s18, 1 }
  0x27   : > { %p202_p3 = pnand %p11281_p13, %p201_p11 }
  0x29   : > { %205 = sbr.rel (%p202_p3) target bundleno = 2266 (0x8da), region = 36 }
  0x30   : > { %s207_s28 = sand.u32 1, %s7718_s16  }
  0x31   : > { %s6647_s29 = sshll.u32 %s207_s28, 13  ;;  %s208_s5 = scalar_lea.sflag [#allocation3], %s207_s28 }
  0x32   : > { %s7842_s9 = scalar_lea.vmem [#allocation2], %s6647_s29 }
  0x33   : > { %7709 = dma.done.wait (%p7792_p7), %s208_s5, 131072  }
  0x34   : > { %7711 = vsyncadd (%p7792_p7), %s208_s5, 4294836224  ;;  %v7731_v0 = vmov 0   ;;  %v1802_v1 = vld [vmem:[%s11214_s1] sm:$0xff]  ;;  %v1803_v2 = vld [vmem:[%s11214_s1 + $0x8] sm:$0xff]  ;;  %vm4498_vm0 = vcmask 400384  }
  0x35   : > { %2186 = vmatprep.subr.bf16.mxu1 %v7731_v0  ;;  %3342 = vmatprep.subr.bf16.mxu0 %v7731_v0  ;;  %v1930_v3 = vld [vmem:[%s11214_s1 + $0x400] sm:$0xff]  ;;  %v2058_v4 = vpack.c.bf16 %v1803_v2, %v1802_v1  ;;  %v1931_v5 = vld [vmem:[%s11214_s1 + $0x408] sm:$0xff]  ;;  %v1804_v6 = vld [vmem:[%s11214_s1 + $0x10] sm:$0xff] }
  0x36   : > { %7533 = vset.pattern.permute.xlu1 %v7731_v0  ;;  %7532 = vset.pattern.permute.xlu0 %v7731_v0  ;;  %v1805_v7 = vld [vmem:[%s11214_s1 + $0x18] sm:$0xff]  ;;  %v2122_v8 = vpack.c.bf16 %v1931_v5, %v1930_v3  ;;  %v1932_v9 = vld [vmem:[%s11214_s1 + $0x410] sm:$0xff]  ;;  %v1806_v13 = vld [vmem:[%s11214_s1 + $0x20] sm:$0xff] }
  0x37   : > { %v1933_v10 = vld [vmem:[%s11214_s1 + $0x418] sm:$0xff]  ;;  %2187 = vmatpush1.bf16.msra.mxu1 %v2058_v4  ;;  %v2059_v11 = vpack.c.bf16 %v1805_v7, %v1804_v6  ;;  %v1807_v14 = vld [vmem:[%s11214_s1 + $0x28] sm:$0xff]  ;;  %v1934_v15 = vld [vmem:[%s11214_s1 + $0x420] sm:$0xff] }
  0x38   : > { %3343 = vmatpush1.bf16.msra.mxu0 %v2122_v8  ;;  %2188 = vmatprep.subr.bf16.mxu1 %v7731_v0  ;;  %v2123_v12 = vpack.c.bf16 %v1933_v10, %v1932_v9  ;;  %v1935_v16 = vld [vmem:[%s11214_s1 + $0x428] sm:$0xff]  ;;  %v2060_v17 = vpack.c.bf16 %v1807_v14, %v1806_v13  ;;  %v1808_v19 = vld [vmem:[%s11214_s1 + $0x30] sm:$0xff]  ;;  %v1809_v20 = vld [vmem:[%s11214_s1 + $0x38] sm:$0xff] }
  0x39   : > { %3344 = vmatprep.subr.bf16.mxu0 %v7731_v0  ;;  %v2124_v18 = vpack.c.bf16 %v1935_v16, %v1934_v15  ;;  %v1936_v21 = vld [vmem:[%s11214_s1 + $0x430] sm:$0xff]  ;;  %v1937_v22 = vld [vmem:[%s11214_s1 + $0x438] sm:$0xff]  ;;  %v2061_v23 = vpack.c.bf16 %v1809_v20, %v1808_v19  ;;  %v1810_v25 = vld [vmem:[%s11214_s1 + $0x40] sm:$0xff] }
  0x3a   : > { %v2125_v24 = vpack.c.bf16 %v1937_v22, %v1936_v21  ;;  %v1811_v26 = vld [vmem:[%s11214_s1 + $0x48] sm:$0xff]  ;;  %v1938_v27 = vld [vmem:[%s11214_s1 + $0x440] sm:$0xff]  ;;  %v1812_v31 = vld [vmem:[%s11214_s1 + $0x50] sm:$0xff] }
  0x3b   : > { %2189 = vmatpush1.bf16.msra.mxu1 %v2059_v11  ;;  %v1939_v28 = vld [vmem:[%s11214_s1 + $0x448] sm:$0xff]  ;;  %v2062_v29 = vpack.c.bf16 %v1811_v26, %v1810_v25  ;;  %v1813_v32 = vld [vmem:[%s11214_s1 + $0x58] sm:$0xff]  ;;  %v1940_v33 = vld [vmem:[%s11214_s1 + $0x450] sm:$0xff] }
  0x3c   : > { %3345 = vmatpush1.bf16.msra.mxu0 %v2123_v12  ;;  %2190 = vmatprep.subr.bf16.mxu1 %v7731_v0  ;;  %v2126_v30 = vpack.c.bf16 %v1939_v28, %v1938_v27  ;;  %v1941_v34 = vld [vmem:[%s11214_s1 + $0x458] sm:$0xff]  ;;  %v2063_v35 = vpack.c.bf16 %v1813_v32, %v1812_v31  ;;  %v1814_v37 = vld [vmem:[%s11214_s1 + $0x60] sm:$0xff]  ;;  %v1815_v38 = vld [vmem:[%s11214_s1 + $0x68] sm:$0xff] }
  0x3d   : > { %3346 = vmatprep.subr.bf16.mxu0 %v7731_v0  ;;  %v2127_v36 = vpack.c.bf16 %v1941_v34, %v1940_v33  ;;  %v1942_v39 = vld [vmem:[%s11214_s1 + $0x460] sm:$0xff]  ;;  %v1943_v40 = vld [vmem:[%s11214_s1 + $0x468] sm:$0xff]  ;;  %v2064_v46 = vpack.c.bf16 %v1815_v38, %v1814_v37  ;;  %v1816_v49 = vld [vmem:[%s11214_s1 + $0x70] sm:$0xff] }
  0x3e   : > { %v267_v41 = vld [vmem:[%s7842_s9 + $0x8] sm:$0xff]  ;;  %v2128_v48 = vpack.c.bf16 %v1943_v40, %v1942_v39  ;;  %v1817_v50 = vld [vmem:[%s11214_s1 + $0x78] sm:$0xff]  ;;  %v1944_v51 = vld [vmem:[%s11214_s1 + $0x470] sm:$0xff] }
  0x3f   : > { %2191 = vmatpush1.bf16.msra.mxu1 %v2060_v17  ;;  %v283_v42 = vld [vmem:[%s7842_s9 + $0x88] sm:$0xff]  ;;  %v1945_v52 = vld [vmem:[%s11214_s1 + $0x478] sm:$0xff]  ;;  %v2065_v53 = vpack.c.bf16 %v1817_v50, %v1816_v49  ;;  %v1818_v55 = vld [vmem:[%s11214_s1 + $0x80] sm:$0xff] }
  0x40   : > { %3347 = vmatpush1.bf16.msra.mxu0 %v2124_v18  ;;  %2192 = vmatprep.subr.bf16.mxu1 %v7731_v0  ;;  %v1291_v43 = vpack.c.bf16 %v283_v42, %v267_v41  ;;  %v275_v44 = vld [vmem:[%s7842_s9 + $0x48] sm:$0xff]  ;;  %v2129_v54 = vpack.c.bf16 %v1945_v52, %v1944_v51  ;;  %v1946_v57 = vld [vmem:[%s11214_s1 + $0x480] sm:$0xff]  ;;  %v1820_v61 = vld [vmem:[%s11214_s1 + $0x90] sm:$0xff] }
  0x41   : > { %3348 = vmatprep.subr.bf16.mxu0 %v7731_v0  ;;  %v291_v45 = vld [vmem:[%s7842_s9 + $0xc8] sm:$0xff]  ;;  %v1821_v62 = vld [vmem:[%s11214_s1 + $0x98] sm:$0xff]  ;;  %v1948_v63 = vld [vmem:[%s11214_s1 + $0x490] sm:$0xff] }
  0x42   : > { %v1299_v47 = vpack.c.bf16 %v291_v45, %v275_v44  ;;  %2218 = vmatprep.mubr.bf16.mxu1 %v1291_v43  ;;  %v1819_v56 = vld [vmem:[%s11214_s1 + $0x88] sm:$0xff]  ;;  %v1949_v1 = vld [vmem:[%s11214_s1 + $0x498] sm:$0xff]  ;;  %v2067_v2 = vpack.c.bf16 %v1821_v62, %v1820_v61  ;;  %v1822_v4 = vld [vmem:[%s11214_s1 + $0xa0] sm:$0xff] }
  0x43   : > { %2193 = vmatpush1.bf16.msra.mxu1 %v2061_v23  ;;  %v1947_v58 = vld [vmem:[%s11214_s1 + $0x488] sm:$0xff]  ;;  %v2066_v59 = vpack.c.bf16 %v1819_v56, %v1818_v55  ;;  %v2131_v3 = vpack.c.bf16 %v1949_v1, %v1948_v63  ;;  %v1950_v6 = vld [vmem:[%s11214_s1 + $0x4a0] sm:$0xff]  ;;  %v1824_v10 = vld [vmem:[%s11214_s1 + $0xb0] sm:$0xff] }
  0x44   : > { %3349 = vmatpush1.bf16.msra.mxu0 %v2125_v24  ;;  %2194 = vmatprep.subr.bf16.mxu1 %v7731_v0  ;;  %v2130_v60 = vpack.c.bf16 %v1947_v58, %v1946_v57  ;;  %v1823_v5 = vld [vmem:[%s11214_s1 + $0xa8] sm:$0xff]  ;;  %v1825_v11 = vld [vmem:[%s11214_s1 + $0xb8] sm:$0xff]  ;;  %v1952_v12 = vld [vmem:[%s11214_s1 + $0x4b0] sm:$0xff] }
  0x45   : > { %3350 = vmatprep.subr.bf16.mxu0 %v7731_v0  ;;  %3374 = vmatprep.mubr.bf16.mxu0 %v1299_v47  ;;  %v1951_v7 = vld [vmem:[%s11214_s1 + $0x4a8] sm:$0xff]  ;;  %v2068_v8 = vpack.c.bf16 %v1823_v5, %v1822_v4  ;;  %v1953_v13 = vld [vmem:[%s11214_s1 + $0x4b8] sm:$0xff]  ;;  %v2069_v14 = vpack.c.bf16 %v1825_v11, %v1824_v10  ;;  %v1826_v16 = vld [vmem:[%s11214_s1 + $0xc0] sm:$0xff] }
  0x46   : > { %v2132_v9 = vpack.c.bf16 %v1951_v7, %v1950_v6  ;;  %v2133_v15 = vpack.c.bf16 %v1953_v13, %v1952_v12  ;;  %v1827_v17 = vld [vmem:[%s11214_s1 + $0xc8] sm:$0xff]  ;;  %v1954_v18 = vld [vmem:[%s11214_s1 + $0x4c0] sm:$0xff]  ;;  %v1828_v22 = vld [vmem:[%s11214_s1 + $0xd0] sm:$0xff] }
  0x47   : > { %2195 = vmatpush1.bf16.msra.mxu1 %v2062_v29  ;;  %v1955_v19 = vld [vmem:[%s11214_s1 + $0x4c8] sm:$0xff]  ;;  %v2070_v20 = vpack.c.bf16 %v1827_v17, %v1826_v16  ;;  %v1829_v23 = vld [vmem:[%s11214_s1 + $0xd8] sm:$0xff]  ;;  %v1956_v24 = vld [vmem:[%s11214_s1 + $0x4d0] sm:$0xff] }
  0x48   : > { %3351 = vmatpush1.bf16.msra.mxu0 %v2126_v30  ;;  %2196 = vmatprep.subr.bf16.mxu1 %v7731_v0  ;;  %v2134_v21 = vpack.c.bf16 %v1955_v19, %v1954_v18  ;;  %v1957_v25 = vld [vmem:[%s11214_s1 + $0x4d8] sm:$0xff]  ;;  %v2071_v26 = vpack.c.bf16 %v1829_v23, %v1828_v22  ;;  %v1830_v28 = vld [vmem:[%s11214_s1 + $0xe0] sm:$0xff]  ;;  %v1831_v29 = vld [vmem:[%s11214_s1 + $0xe8] sm:$0xff] }
  0x49   : > { %3352 = vmatprep.subr.bf16.mxu0 %v7731_v0  ;;  %v2135_v27 = vpack.c.bf16 %v1957_v25, %v1956_v24  ;;  %v1958_v30 = vld [vmem:[%s11214_s1 + $0x4e0] sm:$0xff]  ;;  %v1959_v31 = vld [vmem:[%s11214_s1 + $0x4e8] sm:$0xff]  ;;  %v2072_v32 = vpack.c.bf16 %v1831_v29, %v1830_v28  ;;  %v1832_v34 = vld [vmem:[%s11214_s1 + $0xf0] sm:$0xff] }
  0x4a   : > { %v2136_v33 = vpack.c.bf16 %v1959_v31, %v1958_v30  ;;  %v1961_v37 = vld [vmem:[%s11214_s1 + $0x4f8] sm:$0xff]  ;;  %v266_v38 = vld [vmem:[%s7842_s9] sm:$0xff]  ;;  %v1835_v45 = vld [vmem:[%s11214_s1 + $0x108] sm:$0xff] }
  0x4b   : > { %2197 = vmatpush1.bf16.msra.mxu1 %v2063_v35  ;;  %v1833_v35 = vld [vmem:[%s11214_s1 + $0xf8] sm:$0xff]  ;;  %v282_v40 = vld [vmem:[%s7842_s9 + $0x80] sm:$0xff]  ;;  %v1963_v47 = vld [vmem:[%s11214_s1 + $0x508] sm:$0xff] }
  0x4c   : > { %3353 = vmatpush1.bf16.msra.mxu0 %v2127_v36  ;;  %2198 = vmatprep.subr.bf16.mxu1 %v7731_v0  ;;  %v1960_v36 = vld [vmem:[%s11214_s1 + $0x4f0] sm:$0xff]  ;;  %v2073_v39 = vpack.c.bf16 %v1833_v35, %v1832_v34  ;;  %v274_v41 = vld [vmem:[%s7842_s9 + $0x40] sm:$0xff]  ;;  %v315_v49 = vld [vmem:[%s7842_s9 + $0x188] sm:$0xff]  ;;  %v1290_v50 = vpack.c.bf16 %v282_v40, %v266_v38 }
  0x4d   : > { %3354 = vmatprep.subr.bf16.mxu0 %v7731_v0  ;;  %v290_v42 = vld [vmem:[%s7842_s9 + $0xc0] sm:$0xff]  ;;  %v2137_v43 = vpack.c.bf16 %v1961_v37, %v1960_v36  ;;  %v307_v51 = vld [vmem:[%s7842_s9 + $0x148] sm:$0xff]  ;;  %v1836_v57 = vld [vmem:[%s11214_s1 + $0x110] sm:$0xff] }
  0x4e   : > { %v1834_v44 = vld [vmem:[%s11214_s1 + $0x100] sm:$0xff]  ;;  %v323_v52 = vld [vmem:[%s7842_s9 + $0x1c8] sm:$0xff]  ;;  %v1837_v58 = vld [vmem:[%s11214_s1 + $0x118] sm:$0xff] }
  0x4f   : > { %2199 = vmatpush1.bf16.msra.mxu1 %v2064_v46  ;;  %v1962_v46 = vld [vmem:[%s11214_s1 + $0x500] sm:$0xff]  ;;  %v1965_v61 = vld [vmem:[%s11214_s1 + $0x518] sm:$0xff]  ;;  %v331_v4 = vld [vmem:[%s7842_s9 + $0x208] sm:$0xff] }
  0x50   : > { %3355 = vmatpush1.bf16.msra.mxu0 %v2128_v48  ;;  %2200 = vmatprep.subr.bf16.mxu1 %v7731_v0  ;;  %v299_v48 = vld [vmem:[%s7842_s9 + $0x108] sm:$0xff]  ;;  %v2138_v55 = vpack.c.bf16 %v1963_v47, %v1962_v46  ;;  %v298_v62 = vld [vmem:[%s7842_s9 + $0x100] sm:$0xff]  ;;  %v1840_v19 = vld [vmem:[%s11214_s1 + $0x130] sm:$0xff] }
  0x51   : > { %3356 = vmatprep.subr.bf16.mxu0 %v7731_v0  ;;  %v1307_v56 = vpack.c.bf16 %v315_v49, %v299_v48  ;;  %v314_v63 = vld [vmem:[%s7842_s9 + $0x180] sm:$0xff]  ;;  %v347_v5 = vld [vmem:[%s7842_s9 + $0x288] sm:$0xff]  ;;  %v1968_v22 = vld [vmem:[%s11214_s1 + $0x530] sm:$0xff] }
  0x52   : > { %v306_v1 = vld [vmem:[%s7842_s9 + $0x140] sm:$0xff]  ;;  %v339_v6 = vld [vmem:[%s7842_s9 + $0x248] sm:$0xff]  ;;  %v1306_v11 = vpack.c.bf16 %v314_v63, %v298_v62  ;;  %v1969_v23 = vld [vmem:[%s11214_s1 + $0x538] sm:$0xff] }
  0x53   : > { %2201 = vmatpush1.bf16.msra.mxu1 %v2065_v53  ;;  %v1298_v53 = vpack.c.bf16 %v290_v42, %v274_v41  ;;  %v1839_v10 = vld [vmem:[%s11214_s1 + $0x128] sm:$0xff]  ;;  %v1966_v12 = vld [vmem:[%s11214_s1 + $0x520] sm:$0xff]  ;;  %v1972_v46 = vld [vmem:[%s11214_s1 + $0x550] sm:$0xff] }
  0x54   : > { %3357 = vmatpush1.bf16.msra.mxu0 %v2129_v54  ;;  %2202 = vmatprep.subr.bf16.mxu1 %v7731_v0  ;;  %v2074_v54 = vpack.c.bf16 %v1835_v45, %v1834_v44  ;;  %v1967_v13 = vld [vmem:[%s11214_s1 + $0x528] sm:$0xff]  ;;  %v346_v24 = vld [vmem:[%s7842_s9 + $0x280] sm:$0xff]  ;;  %v1845_v44 = vld [vmem:[%s11214_s1 + $0x158] sm:$0xff] }
  0x55   : > { %3358 = vmatprep.subr.bf16.mxu0 %v7731_v0  ;;  %v2140_v18 = vpack.c.bf16 %v1967_v13, %v1966_v12  ;;  %v338_v25 = vld [vmem:[%s7842_s9 + $0x240] sm:$0xff]  ;;  %v379_v28 = vld [vmem:[%s7842_s9 + $0x388] sm:$0xff]  ;;  %v1973_v47 = vld [vmem:[%s11214_s1 + $0x558] sm:$0xff] }
  0x56   : > { %v371_v29 = vld [vmem:[%s7842_s9 + $0x348] sm:$0xff]  ;;  %v1970_v36 = vld [vmem:[%s11214_s1 + $0x540] sm:$0xff] }
  0x57   : > { %2203 = vmatpush1.bf16.msra.mxu1 %v2066_v59  ;;  %v1315_v59 = vpack.c.bf16 %v323_v52, %v307_v51  ;;  %v387_v31 = vld [vmem:[%s7842_s9 + $0x3c8] sm:$0xff]  ;;  %v362_v45 = vld [vmem:[%s7842_s9 + $0x300] sm:$0xff] }
  0x58   : > { %3359 = vmatpush1.bf16.msra.mxu0 %v2130_v60  ;;  %2204 = vmatprep.subr.bf16.mxu1 %v7731_v0  ;;  %v1964_v60 = vld [vmem:[%s11214_s1 + $0x510] sm:$0xff]  ;;  %v1843_v34 = vld [vmem:[%s11214_s1 + $0x148] sm:$0xff]  ;;  %v1347_v40 = vpack.c.bf16 %v387_v31, %v371_v29  ;;  %v378_v48 = vld [vmem:[%s7842_s9 + $0x380] sm:$0xff] }
  0x59   : > { %3360 = vmatprep.subr.bf16.mxu0 %v7731_v0  ;;  %v2139_v7 = vpack.c.bf16 %v1965_v61, %v1964_v60  ;;  %v1971_v37 = vld [vmem:[%s11214_s1 + $0x548] sm:$0xff]  ;;  %v370_v49 = vld [vmem:[%s7842_s9 + $0x340] sm:$0xff]  ;;  %v1853_v29 = vld [vmem:[%s11214_s1 + $0x198] sm:$0xff] }
  0x5a   : > { %v2142_v42 = vpack.c.bf16 %v1971_v37, %v1970_v36  ;;  %v395_v51 = vld [vmem:[%s7842_s9 + $0x408] sm:$0xff]  ;;  %v1974_v60 = vld [vmem:[%s11214_s1 + $0x560] sm:$0xff]  ;;  %v1980_v31 = vld [vmem:[%s11214_s1 + $0x590] sm:$0xff] }
  0x5b   : > { %2205 = vmatpush1.bf16.msra.mxu1 %v2067_v2  ;;  %v322_v2 = vld [vmem:[%s7842_s9 + $0x1c0] sm:$0xff]  ;;  %v411_v52 = vld [vmem:[%s7842_s9 + $0x488] sm:$0xff] }
  0x5c   : > { %3361 = vmatpush1.bf16.msra.mxu0 %v2131_v3  ;;  %2206 = vmatprep.subr.bf16.mxu1 %v7731_v0  ;;  %v2075_v3 = vpack.c.bf16 %v1837_v58, %v1836_v57  ;;  %v1846_v57 = vld [vmem:[%s11214_s1 + $0x160] sm:$0xff]  ;;  %v1847_v58 = vld [vmem:[%s11214_s1 + $0x168] sm:$0xff]  ;;  %v1355_v63 = vpack.c.bf16 %v411_v52, %v395_v51 }
  0x5d   : > { %3362 = vmatprep.subr.bf16.mxu0 %v7731_v0  ;;  %v1975_v61 = vld [vmem:[%s11214_s1 + $0x568] sm:$0xff]  ;;  %v458_v52 = vld [vmem:[%s7842_s9 + $0x600] sm:$0xff] }
  0x5e   : > { %v427_v12 = vld [vmem:[%s7842_s9 + $0x508] sm:$0xff] }
  0x5f   : > { %2207 = vmatpush1.bf16.msra.mxu1 %v2068_v8  ;;  %v355_v8 = vld [vmem:[%s7842_s9 + $0x2c8] sm:$0xff] }
  0x60   : > { %3363 = vmatpush1.bf16.msra.mxu0 %v2132_v9  ;;  %2208 = vmatprep.subr.bf16.mxu1 %v7731_v0  ;;  %v1838_v9 = vld [vmem:[%s11214_s1 + $0x120] sm:$0xff]  ;;  %v1331_v16 = vpack.c.bf16 %v355_v8, %v339_v6  ;;  %v1977_v8 = vld [vmem:[%s11214_s1 + $0x578] sm:$0xff]  ;;  %v443_v13 = vld [vmem:[%s7842_s9 + $0x588] sm:$0xff] }
  0x61   : > { %3364 = vmatprep.subr.bf16.mxu0 %v7731_v0  ;;  %v2076_v17 = vpack.c.bf16 %v1839_v10, %v1838_v9  ;;  %v394_v6 = vld [vmem:[%s7842_s9 + $0x400] sm:$0xff]  ;;  %v459_v36 = vld [vmem:[%s7842_s9 + $0x608] sm:$0xff] }
  0x62   : > { %v410_v9 = vld [vmem:[%s7842_s9 + $0x480] sm:$0xff]  ;;  %v475_v37 = vld [vmem:[%s7842_s9 + $0x688] sm:$0xff] }
  0x63   : > { %2209 = vmatpush1.bf16.msra.mxu1 %v2069_v14  ;;  %v1314_v14 = vpack.c.bf16 %v322_v2, %v306_v1  ;;  %v2080_v2 = vpack.c.bf16 %v1847_v58, %v1846_v57  ;;  %v402_v10 = vld [vmem:[%s7842_s9 + $0x440] sm:$0xff]  ;;  %v507_v57 = vld [vmem:[%s7842_s9 + $0x788] sm:$0xff] }
  0x64   : > { %3365 = vmatpush1.bf16.msra.mxu0 %v2133_v15  ;;  %2210 = vmatprep.subr.bf16.mxu1 %v7731_v0  ;;  %v1323_v15 = vpack.c.bf16 %v347_v5, %v331_v4  ;;  %v1848_v4 = vld [vmem:[%s11214_s1 + $0x170] sm:$0xff]  ;;  %v1849_v5 = vld [vmem:[%s11214_s1 + $0x178] sm:$0xff]  ;;  %v499_v58 = vld [vmem:[%s7842_s9 + $0x748] sm:$0xff] }
  0x65   : > { %3366 = vmatprep.subr.bf16.mxu0 %v7731_v0 }
  0x67   : > { %2211 = vmatpush1.bf16.msra.mxu1 %v2070_v20  ;;  %v1841_v20 = vld [vmem:[%s11214_s1 + $0x138] sm:$0xff] }
  0x68   : > { %3367 = vmatpush1.bf16.msra.mxu0 %v2134_v21  ;;  %2212 = vmatprep.subr.bf16.mxu1 %v7731_v0  ;;  %v330_v21 = vld [vmem:[%s7842_s9 + $0x200] sm:$0xff]  ;;  %v2077_v30 = vpack.c.bf16 %v1841_v20, %v1840_v19  ;;  %v1851_v19 = vld [vmem:[%s11214_s1 + $0x188] sm:$0xff]  ;;  %v1354_v20 = vpack.c.bf16 %v410_v9, %v394_v6  ;;  %v1857_v6 = vld [vmem:[%s11214_s1 + $0x1b8] sm:$0xff] }
  0x69   : > { %3368 = vmatprep.subr.bf16.mxu0 %v7731_v0  ;;  %v1322_v35 = vpack.c.bf16 %v346_v24, %v330_v21  ;;  %v1978_v21 = vld [vmem:[%s11214_s1 + $0x580] sm:$0xff]  ;;  %v1371_v24 = vpack.c.bf16 %v443_v13, %v427_v12  ;;  %v539_v9 = vld [vmem:[%s7842_s9 + $0x888] sm:$0xff] }
  0x6a   : > { %v531_v12 = vld [vmem:[%s7842_s9 + $0x848] sm:$0xff] }
  0x6b   : > { %2213 = vmatpush1.bf16.msra.mxu1 %v2071_v26  ;;  %v354_v26 = vld [vmem:[%s7842_s9 + $0x2c0] sm:$0xff]  ;;  %v547_v13 = vld [vmem:[%s7842_s9 + $0x8c8] sm:$0xff] }
  0x6c   : > { %3369 = vmatpush1.bf16.msra.mxu0 %v2135_v27  ;;  %2214 = vmatprep.subr.bf16.mxu1 %v7731_v0  ;;  %v363_v27 = vld [vmem:[%s7842_s9 + $0x308] sm:$0xff]  ;;  %v1330_v38 = vpack.c.bf16 %v354_v26, %v338_v25 }
  0x6d   : > { %3370 = vmatprep.subr.bf16.mxu0 %v7731_v0 }
  0x6f   : > { %2215 = vmatpush1.bf16.msra.mxu1 %v2072_v32  ;;  %v2141_v32 = vpack.c.bf16 %v1969_v23, %v1968_v22  ;;  %v1979_v22 = vld [vmem:[%s11214_s1 + $0x588] sm:$0xff] }
  0x70   : > { %3371 = vmatpush1.bf16.msra.mxu0 %v2136_v33  ;;  %2216 = vmatprep.subr.bf16.mxu1 %v7731_v0  ;;  %v1842_v33 = vld [vmem:[%s11214_s1 + $0x140] sm:$0xff] }
  0x71   : > { %3372 = vmatprep.subr.bf16.mxu0 %v7731_v0  ;;  %v2078_v41 = vpack.c.bf16 %v1843_v34, %v1842_v33  ;;  %v442_v33 = vld [vmem:[%s7842_s9 + $0x580] sm:$0xff] }
  0x72   : > { %v434_v34 = vld [vmem:[%s7842_s9 + $0x540] sm:$0xff] }
  0x73   : > { %2217 = vmatpush1.bf16.msra.mxu1 %v2073_v39  ;;  %v1339_v39 = vpack.c.bf16 %v379_v28, %v363_v27  ;;  %v2146_v27 = vpack.c.bf16 %v1979_v22, %v1978_v21  ;;  %v1852_v28 = vld [vmem:[%s11214_s1 + $0x190] sm:$0xff]  ;;  %v530_v21 = vld [vmem:[%s7842_s9 + $0x840] sm:$0xff] }
  0x74   : > { %3373 = vmatpush1.bf16.msra.mxu0 %v2137_v43  ;;  %2475 = vmatprep.subr.bf16.mxu1 %v7731_v0  ;;  %v1844_v43 = vld [vmem:[%s11214_s1 + $0x150] sm:$0xff]  ;;  %v546_v22 = vld [vmem:[%s7842_s9 + $0x8c0] sm:$0xff] }
  0x75   : > { %3631 = vmatprep.subr.bf16.mxu0 %v7731_v0 }
  0x76   : > { %2219 = vmatmul.mubr.bf16.vlgmr.msra.gmra.mrb[0].mxu1 %v1290_v50  ;;  %v386_v50 = vld [vmem:[%s7842_s9 + $0x3c0] sm:$0xff] }
  0x77   : > { %3375 = vmatmul.mubr.bf16.vlgmr.msra.gmra.mrb[0].mxu0 %v1298_v53  ;;  %2476 = vmatpush1.bf16.msra.mxu1 %v2074_v54  ;;  %v403_v53 = vld [vmem:[%s7842_s9 + $0x448] sm:$0xff]  ;;  %v2079_v54 = vpack.c.bf16 %v1845_v44, %v1844_v43  ;;  %v1346_v62 = vpack.c.bf16 %v386_v50, %v370_v49 }
  0x78   : > { %3632 = vmatpush1.bf16.msra.mxu0 %v2138_v55  ;;  %2226 = vmatprep.mubr.bf16.mxu1 %v1307_v56  ;;  %v419_v55 = vld [vmem:[%s7842_s9 + $0x4c8] sm:$0xff]  ;;  %v2143_v56 = vpack.c.bf16 %v1973_v47, %v1972_v46 }
  0x79   : > { %3382 = vmatprep.mubr.bf16.mxu0 %v1315_v59  ;;  %2477 = vmatprep.subr.bf16.mxu1 %v7731_v0  ;;  %v1338_v59 = vpack.c.bf16 %v378_v48, %v362_v45  ;;  %v1363_v1 = vpack.c.bf16 %v419_v55, %v403_v53  ;;  %v1855_v43 = vld [vmem:[%s11214_s1 + $0x1a8] sm:$0xff]  ;;  %v1982_v45 = vld [vmem:[%s11214_s1 + $0x5a0] sm:$0xff]  ;;  %v1387_v48 = vpack.c.bf16 %v475_v37, %v459_v36 }
  0x7a   : > { %3633 = vmatprep.subr.bf16.mxu0 %v7731_v0  ;;  %v1983_v46 = vld [vmem:[%s11214_s1 + $0x5a8] sm:$0xff]  ;;  %v474_v53 = vld [vmem:[%s7842_s9 + $0x680] sm:$0xff] }
  0x7b   : > { %2478 = vmatpush1.bf16.msra.mxu1 %v2075_v3  ;;  %v2144_v3 = vpack.c.bf16 %v1975_v61, %v1974_v60  ;;  %v2148_v51 = vpack.c.bf16 %v1983_v46, %v1982_v45  ;;  %v482_v55 = vld [vmem:[%s7842_s9 + $0x6c0] sm:$0xff]  ;;  %v1386_v60 = vpack.c.bf16 %v474_v53, %v458_v52  ;;  %v1859_v36 = vld [vmem:[%s11214_s1 + $0x1c8] sm:$0xff] }
  0x7c   : > { %3634 = vmatpush1.bf16.msra.mxu0 %v2139_v7  ;;  %2479 = vmatprep.subr.bf16.mxu1 %v7731_v0  ;;  %v1976_v7 = vld [vmem:[%s11214_s1 + $0x570] sm:$0xff]  ;;  %v1986_v37 = vld [vmem:[%s11214_s1 + $0x5c0] sm:$0xff]  ;;  %v619_v53 = vld [vmem:[%s7842_s9 + $0xb08] sm:$0xff] }
  0x7d   : > { %3635 = vmatprep.subr.bf16.mxu0 %v7731_v0  ;;  %v610_v52 = vld [vmem:[%s7842_s9 + $0xac0] sm:$0xff] }
  0x7e   : > { %2227 = vmatmul.mubr.bf16.gmra.mrb[4].mxu1 %v1306_v11  ;;  %v418_v11 = vld [vmem:[%s7842_s9 + $0x4c0] sm:$0xff] }
  0x7f   : > { %3383 = vmatmul.mubr.bf16.gmra.mrb[4].mxu0 %v1314_v14  ;;  %2234 = vmatprep.mubr.bf16.mxu1 %v1323_v15  ;;  %v435_v14 = vld [vmem:[%s7842_s9 + $0x548] sm:$0xff]  ;;  %v2081_v15 = vpack.c.bf16 %v1849_v5, %v1848_v4  ;;  %v1362_v23 = vpack.c.bf16 %v418_v11, %v402_v10  ;;  %v514_v4 = vld [vmem:[%s7842_s9 + $0x7c0] sm:$0xff]  ;;  %v1856_v5 = vld [vmem:[%s11214_s1 + $0x1b0] sm:$0xff] }
  0x80   : > { %3390 = vmatprep.mubr.bf16.mxu0 %v1331_v16  ;;  %2480 = vmatpush1.bf16.msra.mxu1 %v2076_v17  ;;  %v451_v16 = vld [vmem:[%s7842_s9 + $0x5c8] sm:$0xff]  ;;  %v2145_v17 = vpack.c.bf16 %v1977_v8, %v1976_v7  ;;  %v1984_v7 = vld [vmem:[%s11214_s1 + $0x5b0] sm:$0xff]  ;;  %v2085_v10 = vpack.c.bf16 %v1857_v6, %v1856_v5  ;;  %v1985_v11 = vld [vmem:[%s11214_s1 + $0x5b8] sm:$0xff] }
  0x81   : > { %3636 = vmatpush1.bf16.msra.mxu0 %v2140_v18  ;;  %2481 = vmatprep.subr.bf16.mxu1 %v7731_v0  ;;  %v1850_v18 = vld [vmem:[%s11214_s1 + $0x180] sm:$0xff]  ;;  %v1379_v25 = vpack.c.bf16 %v451_v16, %v435_v14  ;;  %v523_v8 = vld [vmem:[%s7842_s9 + $0x808] sm:$0xff]  ;;  %v2149_v14 = vpack.c.bf16 %v1985_v11, %v1984_v7 }
  0x82   : > { %3637 = vmatprep.subr.bf16.mxu0 %v7731_v0  ;;  %v2082_v26 = vpack.c.bf16 %v1851_v19, %v1850_v18  ;;  %v1427_v18 = vpack.c.bf16 %v547_v13, %v531_v12  ;;  %v522_v19 = vld [vmem:[%s7842_s9 + $0x800] sm:$0xff]  ;;  %v651_v5 = vld [vmem:[%s7842_s9 + $0xc08] sm:$0xff] }
  0x83   : > { %v667_v6 = vld [vmem:[%s7842_s9 + $0xc88] sm:$0xff] }
  0x84   : > { %2482 = vmatpush1.bf16.msra.mxu1 %v2077_v30  ;;  %v426_v30 = vld [vmem:[%s7842_s9 + $0x500] sm:$0xff] }
  0x85   : > { %3638 = vmatpush1.bf16.msra.mxu0 %v2141_v32  ;;  %2483 = vmatprep.subr.bf16.mxu1 %v7731_v0  ;;  %v1981_v32 = vld [vmem:[%s11214_s1 + $0x598] sm:$0xff]  ;;  %v1370_v44 = vpack.c.bf16 %v442_v33, %v426_v30  ;;  %v562_v33 = vld [vmem:[%s7842_s9 + $0x940] sm:$0xff] }
  0x86   : > { %2235 = vmatmul.mubr.bf16.gmra.mrb[8].mxu1 %v1322_v35  ;;  %3639 = vmatprep.subr.bf16.mxu0 %v7731_v0  ;;  %v450_v35 = vld [vmem:[%s7842_s9 + $0x5c0] sm:$0xff] }
  0x87   : > { %3391 = vmatmul.mubr.bf16.gmra.mrb[8].mxu0 %v1330_v38  ;;  %2242 = vmatprep.mubr.bf16.mxu1 %v1339_v39  ;;  %v467_v38 = vld [vmem:[%s7842_s9 + $0x648] sm:$0xff]  ;;  %v2083_v39 = vpack.c.bf16 %v1853_v29, %v1852_v28  ;;  %v1378_v47 = vpack.c.bf16 %v450_v35, %v434_v34  ;;  %v1426_v28 = vpack.c.bf16 %v546_v22, %v530_v21  ;;  %v578_v34 = vld [vmem:[%s7842_s9 + $0x9c0] sm:$0xff] }
  0x88   : > { %3398 = vmatprep.mubr.bf16.mxu0 %v1347_v40  ;;  %2484 = vmatpush1.bf16.msra.mxu1 %v2078_v41  ;;  %v483_v40 = vld [vmem:[%s7842_s9 + $0x6c8] sm:$0xff]  ;;  %v2147_v41 = vpack.c.bf16 %v1981_v32, %v1980_v31  ;;  %v554_v31 = vld [vmem:[%s7842_s9 + $0x900] sm:$0xff]  ;;  %v1442_v46 = vpack.c.bf16 %v578_v34, %v562_v33 }
  0x89   : > { %3640 = vmatpush1.bf16.msra.mxu0 %v2142_v42  ;;  %2485 = vmatprep.subr.bf16.mxu1 %v7731_v0  ;;  %v1854_v42 = vld [vmem:[%s11214_s1 + $0x1a0] sm:$0xff]  ;;  %v1395_v49 = vpack.c.bf16 %v483_v40, %v467_v38  ;;  %v587_v38 = vld [vmem:[%s7842_s9 + $0xa08] sm:$0xff] }
  0x8a   : > { %3641 = vmatprep.subr.bf16.mxu0 %v7731_v0  ;;  %v2084_v50 = vpack.c.bf16 %v1855_v43, %v1854_v42  ;;  %v570_v32 = vld [vmem:[%s7842_s9 + $0x980] sm:$0xff]  ;;  %v595_v42 = vld [vmem:[%s7842_s9 + $0xa48] sm:$0xff] }
  0x8b   : > { %v1858_v35 = vld [vmem:[%s11214_s1 + $0x1c0] sm:$0xff]  ;;  %v611_v43 = vld [vmem:[%s7842_s9 + $0xac8] sm:$0xff]  ;;  %v1434_v45 = vpack.c.bf16 %v570_v32, %v554_v31 }
  0x8c   : > { %2486 = vmatpush1.bf16.msra.mxu1 %v2079_v54  ;;  %v466_v54 = vld [vmem:[%s7842_s9 + $0x640] sm:$0xff]  ;;  %v2086_v40 = vpack.c.bf16 %v1859_v36, %v1858_v35  ;;  %v699_v21 = vld [vmem:[%s7842_s9 + $0xd88] sm:$0xff] }
  0x8d   : > { %3642 = vmatpush1.bf16.msra.mxu0 %v2143_v56  ;;  %2487 = vmatprep.subr.bf16.mxu1 %v7731_v0  ;;  %v491_v56 = vld [vmem:[%s7842_s9 + $0x708] sm:$0xff]  ;;  %v1394_v61 = vpack.c.bf16 %v482_v55, %v466_v54  ;;  %v706_v31 = vld [vmem:[%s7842_s9 + $0xdc0] sm:$0xff] }
  0x8e   : > { %2243 = vmatmul.mubr.bf16.gmra.mrb[12].mxu1 %v1338_v59  ;;  %3643 = vmatprep.subr.bf16.mxu0 %v7731_v0  ;;  %v515_v59 = vld [vmem:[%s7842_s9 + $0x7c8] sm:$0xff]  ;;  %v1862_v32 = vld [vmem:[%s11214_s1 + $0x1e0] sm:$0xff] }
  0x8f   : > { %3399 = vmatmul.mubr.bf16.gmra.mrb[12].mxu0 %v1346_v62  ;;  %2250 = vmatprep.mubr.bf16.mxu1 %v1355_v63  ;;  %v1403_v62 = vpack.c.bf16 %v507_v57, %v491_v56  ;;  %v1411_v63 = vpack.c.bf16 %v515_v59, %v499_v58  ;;  %v635_v54 = vld [vmem:[%s7842_s9 + $0xb88] sm:$0xff]  ;;  %v1990_v34 = vld [vmem:[%s11214_s1 + $0x5e0] sm:$0xff] }
  0x90   : > { %3406 = vmatprep.mubr.bf16.mxu0 %v1363_v1  ;;  %2488 = vmatpush1.bf16.msra.mxu1 %v2080_v2  ;;  %v490_v1 = vld [vmem:[%s7842_s9 + $0x700] sm:$0xff]  ;;  %v627_v55 = vld [vmem:[%s7842_s9 + $0xb48] sm:$0xff]  ;;  %v1467_v59 = vpack.c.bf16 %v635_v54, %v619_v53 }
  0x91   : > { %3644 = vmatpush1.bf16.msra.mxu0 %v2144_v3  ;;  %2489 = vmatprep.subr.bf16.mxu1 %v7731_v0  ;;  %v506_v2 = vld [vmem:[%s7842_s9 + $0x780] sm:$0xff]  ;;  %v643_v56 = vld [vmem:[%s7842_s9 + $0xbc8] sm:$0xff] }
  0x92   : > { %3645 = vmatprep.subr.bf16.mxu0 %v7731_v0  ;;  %v498_v3 = vld [vmem:[%s7842_s9 + $0x740] sm:$0xff]  ;;  %v691_v22 = vld [vmem:[%s7842_s9 + $0xd48] sm:$0xff] }
  0x93   : > { %v1410_v16 = vpack.c.bf16 %v514_v4, %v498_v3  ;;  %v1861_v3 = vld [vmem:[%s11214_s1 + $0x1d8] sm:$0xff]  ;;  %v1988_v4 = vld [vmem:[%s11214_s1 + $0x5d0] sm:$0xff]  ;;  %v1863_v33 = vld [vmem:[%s11214_s1 + $0x1e8] sm:$0xff] }
  0x94   : > { %2490 = vmatpush1.bf16.msra.mxu1 %v2081_v15  ;;  %v1402_v15 = vpack.c.bf16 %v506_v2, %v490_v1  ;;  %v642_v1 = vld [vmem:[%s7842_s9 + $0xbc0] sm:$0xff]  ;;  %v1860_v2 = vld [vmem:[%s11214_s1 + $0x1d0] sm:$0xff]  ;;  %v715_v35 = vld [vmem:[%s7842_s9 + $0xe08] sm:$0xff] }
  0x95   : > { %3646 = vmatpush1.bf16.msra.mxu0 %v2145_v17  ;;  %2491 = vmatprep.subr.bf16.mxu1 %v7731_v0  ;;  %v1419_v17 = vpack.c.bf16 %v539_v9, %v523_v8  ;;  %v2087_v7 = vpack.c.bf16 %v1861_v3, %v1860_v2  ;;  %v1989_v8 = vld [vmem:[%s11214_s1 + $0x5d8] sm:$0xff]  ;;  %v659_v9 = vld [vmem:[%s7842_s9 + $0xc48] sm:$0xff] }
  0x96   : > { %2251 = vmatmul.mubr.bf16.gmra.mrb[16].mxu1 %v1354_v20  ;;  %3647 = vmatprep.subr.bf16.mxu0 %v7731_v0  ;;  %v538_v20 = vld [vmem:[%s7842_s9 + $0x880] sm:$0xff]  ;;  %v2151_v11 = vpack.c.bf16 %v1989_v8, %v1988_v4  ;;  %v731_v36 = vld [vmem:[%s7842_s9 + $0xe88] sm:$0xff] }
  0x97   : > { %3407 = vmatmul.mubr.bf16.gmra.mrb[16].mxu0 %v1362_v23  ;;  %2258 = vmatprep.mubr.bf16.mxu1 %v1371_v24  ;;  %v555_v23 = vld [vmem:[%s7842_s9 + $0x908] sm:$0xff] }
  0x98   : > { %3414 = vmatprep.mubr.bf16.mxu0 %v1379_v25  ;;  %2492 = vmatpush1.bf16.msra.mxu1 %v2082_v26  ;;  %v571_v24 = vld [vmem:[%s7842_s9 + $0x988] sm:$0xff] }
  0x99   : > { %3648 = vmatpush1.bf16.msra.mxu0 %v2146_v27  ;;  %2493 = vmatprep.subr.bf16.mxu1 %v7731_v0  ;;  %v563_v25 = vld [vmem:[%s7842_s9 + $0x948] sm:$0xff]  ;;  %v1418_v27 = vpack.c.bf16 %v538_v20, %v522_v19  ;;  %v1435_v29 = vpack.c.bf16 %v571_v24, %v555_v23  ;;  %v674_v19 = vld [vmem:[%s7842_s9 + $0xcc0] sm:$0xff] }
  0x9a   : > { %3649 = vmatprep.subr.bf16.mxu0 %v7731_v0  ;;  %v579_v26 = vld [vmem:[%s7842_s9 + $0x9c8] sm:$0xff] }
  0x9b   : > { %v1443_v30 = vpack.c.bf16 %v579_v26, %v563_v25  ;;  %v683_v20 = vld [vmem:[%s7842_s9 + $0xd08] sm:$0xff] }
  0x9c   : > { %2494 = vmatpush1.bf16.msra.mxu1 %v2083_v39  ;;  %v603_v39 = vld [vmem:[%s7842_s9 + $0xa88] sm:$0xff]  ;;  %v1499_v26 = vpack.c.bf16 %v699_v21, %v683_v20 }
  0x9d   : > { %3650 = vmatpush1.bf16.msra.mxu0 %v2147_v41  ;;  %2495 = vmatprep.subr.bf16.mxu1 %v7731_v0  ;;  %v1987_v41 = vld [vmem:[%s11214_s1 + $0x5c8] sm:$0xff] }
  0x9e   : > { %2259 = vmatmul.mubr.bf16.gmra.mrb[20].mxu1 %v1370_v44  ;;  %3651 = vmatprep.subr.bf16.mxu0 %v7731_v0  ;;  %v2150_v44 = vpack.c.bf16 %v1987_v41, %v1986_v37  ;;  %v707_v23 = vld [vmem:[%s7842_s9 + $0xdc8] sm:$0xff]  ;;  %v2088_v37 = vpack.c.bf16 %v1863_v33, %v1862_v32 }
  0x9f   : > { %3415 = vmatmul.mubr.bf16.gmra.mrb[20].mxu0 %v1378_v47  ;;  %2266 = vmatprep.mubr.bf16.mxu1 %v1387_v48  ;;  %v1451_v47 = vpack.c.bf16 %v603_v39, %v587_v38  ;;  %v1459_v48 = vpack.c.bf16 %v611_v43, %v595_v42  ;;  %v1991_v38 = vld [vmem:[%s11214_s1 + $0x5e8] sm:$0xff] }
  0xa0   : > { %3422 = vmatprep.mubr.bf16.mxu0 %v1395_v49  ;;  %2496 = vmatpush1.bf16.msra.mxu1 %v2084_v50  ;;  %v586_v49 = vld [vmem:[%s7842_s9 + $0xa00] sm:$0xff]  ;;  %v723_v39 = vld [vmem:[%s7842_s9 + $0xe48] sm:$0xff]  ;;  %v2152_v41 = vpack.c.bf16 %v1991_v38, %v1990_v34 }
  0xa1   : > { %3652 = vmatpush1.bf16.msra.mxu0 %v2148_v51  ;;  %2497 = vmatprep.subr.bf16.mxu1 %v7731_v0  ;;  %v602_v50 = vld [vmem:[%s7842_s9 + $0xa80] sm:$0xff]  ;;  %v771_v53 = vld [vmem:[%s7842_s9 + $0xfc8] sm:$0xff] }
  0xa2   : > { %3653 = vmatprep.subr.bf16.mxu0 %v7731_v0  ;;  %v594_v51 = vld [vmem:[%s7842_s9 + $0xa40] sm:$0xff]  ;;  %v1450_v57 = vpack.c.bf16 %v602_v50, %v586_v49  ;;  %v747_v50 = vld [vmem:[%s7842_s9 + $0xf08] sm:$0xff] }
  0xa3   : > { %v1458_v58 = vpack.c.bf16 %v610_v52, %v594_v51  ;;  %v738_v49 = vld [vmem:[%s7842_s9 + $0xec0] sm:$0xff]  ;;  %v763_v51 = vld [vmem:[%s7842_s9 + $0xf88] sm:$0xff] }
  0xa4   : > { %2498 = vmatpush1.bf16.msra.mxu1 %v2085_v10  ;;  %v675_v10 = vld [vmem:[%s7842_s9 + $0xcc8] sm:$0xff]  ;;  %v858_v38 = vld [vmem:[%s7842_s9 + $0x1280] sm:$0xff] }
  0xa5   : > { %3654 = vmatpush1.bf16.msra.mxu0 %v2149_v14  ;;  %2499 = vmatprep.subr.bf16.mxu1 %v7731_v0  ;;  %v1483_v14 = vpack.c.bf16 %v667_v6, %v651_v5  ;;  %v755_v52 = vld [vmem:[%s7842_s9 + $0xf48] sm:$0xff]  ;;  %v1993_v5 = vld [vmem:[%s11214_s1 + $0x5f8] sm:$0xff] }
  0xa6   : > { %2267 = vmatmul.mubr.bf16.gmra.mrb[24].mxu1 %v1386_v60  ;;  %3655 = vmatprep.subr.bf16.mxu0 %v7731_v0  ;;  %v1475_v60 = vpack.c.bf16 %v643_v56, %v627_v55  ;;  %v1531_v56 = vpack.c.bf16 %v763_v51, %v747_v50  ;;  %v779_v2 = vld [vmem:[%s7842_s9 + $0x1008] sm:$0xff]  ;;  %v890_v50 = vld [vmem:[%s7842_s9 + $0x1380] sm:$0xff] }
  0xa7   : > { %3423 = vmatmul.mubr.bf16.gmra.mrb[24].mxu0 %v1394_v61  ;;  %2274 = vmatprep.mubr.bf16.mxu1 %v1403_v62  ;;  %v618_v61 = vld [vmem:[%s7842_s9 + $0xb00] sm:$0xff]  ;;  %v795_v3 = vld [vmem:[%s7842_s9 + $0x1088] sm:$0xff] }
  0xa8   : > { %3430 = vmatprep.mubr.bf16.mxu0 %v1411_v63  ;;  %2500 = vmatpush1.bf16.msra.mxu1 %v2086_v40  ;;  %v634_v62 = vld [vmem:[%s7842_s9 + $0xb80] sm:$0xff]  ;;  %v739_v40 = vld [vmem:[%s7842_s9 + $0xec8] sm:$0xff] }
  0xa9   : > { %3656 = vmatpush1.bf16.msra.mxu0 %v2150_v44  ;;  %2501 = vmatprep.subr.bf16.mxu1 %v7731_v0  ;;  %v626_v63 = vld [vmem:[%s7842_s9 + $0xb40] sm:$0xff]  ;;  %v1466_v12 = vpack.c.bf16 %v634_v62, %v618_v61  ;;  %v1515_v44 = vpack.c.bf16 %v731_v36, %v715_v35  ;;  %v1864_v62 = vld [vmem:[%s11214_s1 + $0x1f0] sm:$0xff]  ;;  %v787_v6 = vld [vmem:[%s7842_s9 + $0x1048] sm:$0xff] }
  0xaa   : > { %3657 = vmatprep.subr.bf16.mxu0 %v7731_v0  ;;  %v1474_v13 = vpack.c.bf16 %v642_v1, %v626_v63  ;;  %v770_v61 = vld [vmem:[%s7842_s9 + $0xfc0] sm:$0xff]  ;;  %v1865_v63 = vld [vmem:[%s11214_s1 + $0x1f8] sm:$0xff]  ;;  %v1992_v1 = vld [vmem:[%s11214_s1 + $0x5f0] sm:$0xff] }
  0xab   : > { %v2089_v4 = vpack.c.bf16 %v1865_v63, %v1864_v62  ;;  %v2153_v8 = vpack.c.bf16 %v1993_v5, %v1992_v1  ;;  %v835_v20 = vld [vmem:[%s7842_s9 + $0x11c8] sm:$0xff]  ;;  %v882_v51 = vld [vmem:[%s7842_s9 + $0x1340] sm:$0xff] }
  0xac   : > { %2502 = vmatpush1.bf16.msra.mxu1 %v2087_v7  ;;  %v803_v7 = vld [vmem:[%s7842_s9 + $0x10c8] sm:$0xff]  ;;  %v922_v62 = vld [vmem:[%s7842_s9 + $0x1480] sm:$0xff] }
  0xad   : > { %3658 = vmatpush1.bf16.msra.mxu0 %v2151_v11  ;;  %2503 = vmatprep.subr.bf16.mxu1 %v7731_v0  ;;  %v1547_v11 = vpack.c.bf16 %v795_v3, %v779_v2  ;;  %v867_v32 = vld [vmem:[%s7842_s9 + $0x12c8] sm:$0xff]  ;;  %v914_v63 = vld [vmem:[%s7842_s9 + $0x1440] sm:$0xff] }
  0xae   : > { %2275 = vmatmul.mubr.bf16.gmra.mrb[28].mxu1 %v1402_v15  ;;  %v1491_v15 = vpack.c.bf16 %v675_v10, %v659_v9  ;;  %3659 = vmatprep.subr.bf16.mxu0 %v7731_v0  ;;  %v930_v1 = vld [vmem:[%s7842_s9 + $0x14c0] sm:$0xff]  ;;  %v939_v2 = vld [vmem:[%s7842_s9 + $0x1508] sm:$0xff] }
  0xaf   : > { %3431 = vmatmul.mubr.bf16.gmra.mrb[28].mxu0 %v1410_v16  ;;  %2282 = vmatprep.mubr.bf16.mxu1 %v1419_v17  ;;  %v650_v16 = vld [vmem:[%s7842_s9 + $0xc00] sm:$0xff]  ;;  %v955_v3 = vld [vmem:[%s7842_s9 + $0x1588] sm:$0xff] }
  0xb0   : > { %3438 = vmatprep.mubr.bf16.mxu0 %v1427_v18  ;;  %v666_v17 = vld [vmem:[%s7842_s9 + $0xc80] sm:$0xff]  ;;  %2504 = vmatpush1.bf16.msra.mxu1 %v2088_v37  ;;  %v963_v5 = vld [vmem:[%s7842_s9 + $0x15c8] sm:$0xff] }
  0xb1   : > { %v658_v18 = vld [vmem:[%s7842_s9 + $0xc40] sm:$0xff]  ;;  %v1482_v24 = vpack.c.bf16 %v666_v17, %v650_v16  ;;  %3660 = vmatpush1.bf16.msra.mxu0 %v2152_v41  ;;  %2505 = vmatprep.subr.bf16.mxu1 %v7731_v0  ;;  %v811_v17 = vld [vmem:[%s7842_s9 + $0x1108] sm:$0xff] }
  0xb2   : > { %v1490_v25 = vpack.c.bf16 %v674_v19, %v658_v18  ;;  %3661 = vmatprep.subr.bf16.mxu0 %v7731_v0  ;;  %v802_v16 = vld [vmem:[%s7842_s9 + $0x10c0] sm:$0xff]  ;;  %v827_v18 = vld [vmem:[%s7842_s9 + $0x1188] sm:$0xff] }
  0xb3   : > { %v819_v19 = vld [vmem:[%s7842_s9 + $0x1148] sm:$0xff]  ;;  %v842_v37 = vld [vmem:[%s7842_s9 + $0x1200] sm:$0xff] }
  0xb4   : > { %2506 = vmatpush1.bf16.msra.mxu1 %v2089_v4  ;;  %v875_v41 = vld [vmem:[%s7842_s9 + $0x1308] sm:$0xff] }
  0xb5   : > { %3662 = vmatpush1.bf16.msra.mxu0 %v2153_v8  ;;  %2764 = vmatprep.subr.bf16.mxu1 %v7731_v0  ;;  %v947_v4 = vld [vmem:[%s7842_s9 + $0x1548] sm:$0xff]  ;;  %v1627_v8 = vpack.c.bf16 %v955_v3, %v939_v2 }
  0xb6   : > { %2283 = vmatmul.mubr.bf16.gmra.mrb[32].mxu1 %v1418_v27  ;;  %v1507_v27 = vpack.c.bf16 %v707_v23, %v691_v22  ;;  %3920 = vmatprep.subr.bf16.mxu0 %v7731_v0  ;;  %v1563_v23 = vpack.c.bf16 %v827_v18, %v811_v17  ;;  %v995_v17 = vld [vmem:[%s7842_s9 + $0x16c8] sm:$0xff] }
  0xb7   : > { %3439 = vmatmul.mubr.bf16.gmra.mrb[32].mxu0 %v1426_v28  ;;  %2290 = vmatprep.mubr.bf16.mxu1 %v1435_v29  ;;  %v682_v28 = vld [vmem:[%s7842_s9 + $0xd00] sm:$0xff]  ;;  %v1123_v2 = vld [vmem:[%s7842_s9 + $0x1ac8] sm:$0xff] }
  0xb8   : > { %3446 = vmatprep.mubr.bf16.mxu0 %v1443_v30  ;;  %v698_v29 = vld [vmem:[%s7842_s9 + $0xd80] sm:$0xff] }
  0xb9   : > { %v690_v30 = vld [vmem:[%s7842_s9 + $0xd40] sm:$0xff]  ;;  %v1498_v42 = vpack.c.bf16 %v698_v29, %v682_v28  ;;  %v843_v29 = vld [vmem:[%s7842_s9 + $0x1208] sm:$0xff] }
  0xba   : > { %v1506_v43 = vpack.c.bf16 %v706_v31, %v690_v30  ;;  %v834_v28 = vld [vmem:[%s7842_s9 + $0x11c0] sm:$0xff]  ;;  %v859_v30 = vld [vmem:[%s7842_s9 + $0x1288] sm:$0xff] }
  0xbb   : > { %v851_v31 = vld [vmem:[%s7842_s9 + $0x1248] sm:$0xff]  ;;  %v1579_v35 = vpack.c.bf16 %v859_v30, %v843_v29 }
  0xbc   : > { %v1587_v36 = vpack.c.bf16 %v867_v32, %v851_v31  ;;  %v1027_v29 = vld [vmem:[%s7842_s9 + $0x17c8] sm:$0xff] }
  0xbe   : > { %2291 = vmatmul.mubr.bf16.gmra.mrb[36].mxu1 %v1434_v45  ;;  %v1523_v45 = vpack.c.bf16 %v739_v40, %v723_v39  ;;  %v850_v39 = vld [vmem:[%s7842_s9 + $0x1240] sm:$0xff] }
  0xbf   : > { %3447 = vmatmul.mubr.bf16.gmra.mrb[36].mxu0 %v1442_v46  ;;  %2298 = vmatprep.mubr.bf16.mxu1 %v1451_v47  ;;  %v714_v46 = vld [vmem:[%s7842_s9 + $0xe00] sm:$0xff] }
  0xc0   : > { %3454 = vmatprep.mubr.bf16.mxu0 %v1459_v48  ;;  %v730_v47 = vld [vmem:[%s7842_s9 + $0xe80] sm:$0xff] }
  0xc1   : > { %v722_v48 = vld [vmem:[%s7842_s9 + $0xe40] sm:$0xff]  ;;  %v1514_v54 = vpack.c.bf16 %v730_v47, %v714_v46 }
  0xc2   : > { %v1522_v55 = vpack.c.bf16 %v738_v49, %v722_v48  ;;  %v866_v40 = vld [vmem:[%s7842_s9 + $0x12c0] sm:$0xff] }
  0xc3   : > { %v1586_v46 = vpack.c.bf16 %v866_v40, %v850_v39  ;;  %v874_v49 = vld [vmem:[%s7842_s9 + $0x1300] sm:$0xff]  ;;  %v1051_v39 = vld [vmem:[%s7842_s9 + $0x1888] sm:$0xff] }
  0xc4   : > { %v1043_v40 = vld [vmem:[%s7842_s9 + $0x1848] sm:$0xff] }
  0xc6   : > { %2299 = vmatmul.mubr.bf16.gmra.mrb[40].mxu1 %v1450_v57  ;;  %v1539_v57 = vpack.c.bf16 %v771_v53, %v755_v52  ;;  %v898_v52 = vld [vmem:[%s7842_s9 + $0x13c0] sm:$0xff]  ;;  %v907_v53 = vld [vmem:[%s7842_s9 + $0x1408] sm:$0xff] }
  0xc7   : > { %3455 = vmatmul.mubr.bf16.gmra.mrb[40].mxu0 %v1458_v58  ;;  %2306 = vmatprep.mubr.bf16.mxu1 %v1467_v59  ;;  %v746_v58 = vld [vmem:[%s7842_s9 + $0xf00] sm:$0xff] }
  0xc8   : > { %3462 = vmatprep.mubr.bf16.mxu0 %v1475_v60  ;;  %v762_v59 = vld [vmem:[%s7842_s9 + $0xf80] sm:$0xff] }
  0xc9   : > { %v754_v60 = vld [vmem:[%s7842_s9 + $0xf40] sm:$0xff]  ;;  %v1530_v9 = vpack.c.bf16 %v762_v59, %v746_v58  ;;  %v1602_v58 = vpack.c.bf16 %v898_v52, %v882_v51  ;;  %v1083_v51 = vld [vmem:[%s7842_s9 + $0x1988] sm:$0xff] }
  0xca   : > { %v1538_v10 = vpack.c.bf16 %v770_v61, %v754_v60  ;;  %v906_v61 = vld [vmem:[%s7842_s9 + $0x1400] sm:$0xff]  ;;  %v1075_v52 = vld [vmem:[%s7842_s9 + $0x1948] sm:$0xff] }
  0xce   : > { %2307 = vmatmul.mubr.bf16.gmra.mrb[44].mxu1 %v1466_v12  ;;  %v1555_v12 = vpack.c.bf16 %v803_v7, %v787_v6  ;;  %v1610_v6 = vpack.c.bf16 %v922_v62, %v906_v61  ;;  %v1618_v7 = vpack.c.bf16 %v930_v1, %v914_v63  ;;  %v1090_v61 = vld [vmem:[%s7842_s9 + $0x19c0] sm:$0xff]  ;;  %v1099_v62 = vld [vmem:[%s7842_s9 + $0x1a08] sm:$0xff] }
  0xcf   : > { %3463 = vmatmul.mubr.bf16.gmra.mrb[44].mxu0 %v1474_v13  ;;  %2314 = vmatprep.mubr.bf16.mxu1 %v1483_v14  ;;  %v778_v13 = vld [vmem:[%s7842_s9 + $0x1000] sm:$0xff]  ;;  %v1115_v63 = vld [vmem:[%s7842_s9 + $0x1a88] sm:$0xff] }
  0xd0   : > { %3470 = vmatprep.mubr.bf16.mxu0 %v1491_v15  ;;  %v794_v14 = vld [vmem:[%s7842_s9 + $0x1080] sm:$0xff]  ;;  %v1107_v1 = vld [vmem:[%s7842_s9 + $0x1a48] sm:$0xff] }
  0xd1   : > { %v786_v15 = vld [vmem:[%s7842_s9 + $0x1040] sm:$0xff]  ;;  %v1546_v21 = vpack.c.bf16 %v794_v14, %v778_v13  ;;  %v971_v14 = vld [vmem:[%s7842_s9 + $0x1608] sm:$0xff] }
  0xd2   : > { %v1554_v22 = vpack.c.bf16 %v802_v16, %v786_v15  ;;  %v962_v13 = vld [vmem:[%s7842_s9 + $0x15c0] sm:$0xff]  ;;  %v987_v15 = vld [vmem:[%s7842_s9 + $0x1688] sm:$0xff] }
  0xd3   : > { %v979_v16 = vld [vmem:[%s7842_s9 + $0x1648] sm:$0xff] }
  0xd6   : > { %2315 = vmatmul.mubr.bf16.gmra.mrb[48].mxu1 %v1482_v24  ;;  %v1571_v24 = vpack.c.bf16 %v835_v20, %v819_v19  ;;  %v1643_v20 = vpack.c.bf16 %v987_v15, %v971_v14  ;;  %v1155_v14 = vld [vmem:[%s7842_s9 + $0x1bc8] sm:$0xff] }
  0xd7   : > { %3471 = vmatmul.mubr.bf16.gmra.mrb[48].mxu0 %v1490_v25  ;;  %2322 = vmatprep.mubr.bf16.mxu1 %v1499_v26  ;;  %v810_v25 = vld [vmem:[%s7842_s9 + $0x1100] sm:$0xff] }
  0xd8   : > { %3478 = vmatprep.mubr.bf16.mxu0 %v1507_v27  ;;  %v826_v26 = vld [vmem:[%s7842_s9 + $0x1180] sm:$0xff] }
  0xd9   : > { %v818_v27 = vld [vmem:[%s7842_s9 + $0x1140] sm:$0xff]  ;;  %v1562_v33 = vpack.c.bf16 %v826_v26, %v810_v25  ;;  %v1003_v26 = vld [vmem:[%s7842_s9 + $0x1708] sm:$0xff] }
  0xda   : > { %v1570_v34 = vpack.c.bf16 %v834_v28, %v818_v27  ;;  %v994_v25 = vld [vmem:[%s7842_s9 + $0x16c0] sm:$0xff]  ;;  %v1019_v27 = vld [vmem:[%s7842_s9 + $0x1788] sm:$0xff] }
  0xdb   : > { %v1011_v28 = vld [vmem:[%s7842_s9 + $0x1748] sm:$0xff]  ;;  %v1659_v32 = vpack.c.bf16 %v1019_v27, %v1003_v26 }
  0xdc   : > { %v1187_v26 = vld [vmem:[%s7842_s9 + $0x1cc8] sm:$0xff] }
  0xde   : > { %2323 = vmatmul.mubr.bf16.gmra.mrb[52].mxu1 %v1498_v42  ;;  %v891_v42 = vld [vmem:[%s7842_s9 + $0x1388] sm:$0xff] }
  0xdf   : > { %3479 = vmatmul.mubr.bf16.gmra.mrb[52].mxu0 %v1506_v43  ;;  %2330 = vmatprep.mubr.bf16.mxu1 %v1515_v44  ;;  %v883_v43 = vld [vmem:[%s7842_s9 + $0x1348] sm:$0xff]  ;;  %v1595_v47 = vpack.c.bf16 %v891_v42, %v875_v41 }
  0xe0   : > { %3486 = vmatprep.mubr.bf16.mxu0 %v1523_v45  ;;  %v899_v44 = vld [vmem:[%s7842_s9 + $0x13c8] sm:$0xff]  ;;  %v1578_v45 = vpack.c.bf16 %v858_v38, %v842_v37  ;;  %v1026_v37 = vld [vmem:[%s7842_s9 + $0x17c0] sm:$0xff] }
  0xe1   : > { %v1603_v48 = vpack.c.bf16 %v899_v44, %v883_v43  ;;  %v1035_v38 = vld [vmem:[%s7842_s9 + $0x1808] sm:$0xff] }
  0xe2   : > { %v1059_v41 = vld [vmem:[%s7842_s9 + $0x18c8] sm:$0xff]  ;;  %v1675_v44 = vpack.c.bf16 %v1051_v39, %v1035_v38 }
  0xe3   : > { %v1219_v38 = vld [vmem:[%s7842_s9 + $0x1dc8] sm:$0xff] }
  0xe6   : > { %2331 = vmatmul.mubr.bf16.gmra.mrb[56].mxu1 %v1514_v54  ;;  %v923_v54 = vld [vmem:[%s7842_s9 + $0x1488] sm:$0xff] }
  0xe7   : > { %3487 = vmatmul.mubr.bf16.gmra.mrb[56].mxu0 %v1522_v55  ;;  %2338 = vmatprep.mubr.bf16.mxu1 %v1531_v56  ;;  %v915_v55 = vld [vmem:[%s7842_s9 + $0x1448] sm:$0xff]  ;;  %v1611_v59 = vpack.c.bf16 %v923_v54, %v907_v53 }
  0xe8   : > { %3494 = vmatprep.mubr.bf16.mxu0 %v1539_v57  ;;  %v931_v56 = vld [vmem:[%s7842_s9 + $0x14c8] sm:$0xff]  ;;  %v1594_v57 = vpack.c.bf16 %v890_v50, %v874_v49  ;;  %v1058_v49 = vld [vmem:[%s7842_s9 + $0x18c0] sm:$0xff] }
  0xe9   : > { %v1619_v60 = vpack.c.bf16 %v931_v56, %v915_v55  ;;  %v1067_v50 = vld [vmem:[%s7842_s9 + $0x1908] sm:$0xff] }
  0xea   : > { %v1091_v53 = vld [vmem:[%s7842_s9 + $0x19c8] sm:$0xff]  ;;  %v1691_v56 = vpack.c.bf16 %v1083_v51, %v1067_v50 }
  0xeb   : > { %v1251_v50 = vld [vmem:[%s7842_s9 + $0x1ec8] sm:$0xff] }
  0xee   : > { %2339 = vmatmul.mubr.bf16.gmra.mrb[60].mxu1 %v1530_v9  ;;  %v1635_v9 = vpack.c.bf16 %v963_v5, %v947_v4  ;;  %v1707_v5 = vpack.c.bf16 %v1115_v63, %v1099_v62  ;;  %v1283_v62 = vld [vmem:[%s7842_s9 + $0x1fc8] sm:$0xff] }
  0xef   : > { %3495 = vmatmul.mubr.bf16.gmra.mrb[60].mxu0 %v1538_v10  ;;  %2346 = vmatprep.mubr.bf16.mxu1 %v1547_v11  ;;  %v938_v10 = vld [vmem:[%s7842_s9 + $0x1500] sm:$0xff] }
  0xf0   : > { %3502 = vmatprep.mubr.bf16.mxu0 %v1555_v12  ;;  %v954_v11 = vld [vmem:[%s7842_s9 + $0x1580] sm:$0xff] }
  0xf1   : > { %v946_v12 = vld [vmem:[%s7842_s9 + $0x1540] sm:$0xff]  ;;  %v1626_v18 = vpack.c.bf16 %v954_v11, %v938_v10  ;;  %v1131_v11 = vld [vmem:[%s7842_s9 + $0x1b08] sm:$0xff] }
  0xf2   : > { %v1634_v19 = vpack.c.bf16 %v962_v13, %v946_v12  ;;  %v1122_v10 = vld [vmem:[%s7842_s9 + $0x1ac0] sm:$0xff]  ;;  %v1147_v12 = vld [vmem:[%s7842_s9 + $0x1b88] sm:$0xff] }
  0xf3   : > { %v1139_v13 = vld [vmem:[%s7842_s9 + $0x1b48] sm:$0xff] }
  0xf6   : > { %2347 = vmatmul.mubr.bf16.gmra.mrb[64].mxu1 %v1546_v21  ;;  %v1651_v21 = vpack.c.bf16 %v995_v17, %v979_v16  ;;  %v1723_v17 = vpack.c.bf16 %v1147_v12, %v1131_v11  ;;  %v293_v11 = vld [vmem:[%s7842_s9 + $0xd8] sm:$0xff] }
  0xf7   : > { %3503 = vmatmul.mubr.bf16.gmra.mrb[64].mxu0 %v1554_v22  ;;  %2354 = vmatprep.mubr.bf16.mxu1 %v1563_v23  ;;  %v970_v22 = vld [vmem:[%s7842_s9 + $0x1600] sm:$0xff] }
  0xf8   : > { %3510 = vmatprep.mubr.bf16.mxu0 %v1571_v24  ;;  %v986_v23 = vld [vmem:[%s7842_s9 + $0x1680] sm:$0xff] }
  0xf9   : > { %v978_v24 = vld [vmem:[%s7842_s9 + $0x1640] sm:$0xff]  ;;  %v1642_v30 = vpack.c.bf16 %v986_v23, %v970_v22  ;;  %v1163_v23 = vld [vmem:[%s7842_s9 + $0x1c08] sm:$0xff] }
  0xfa   : > { %v1650_v31 = vpack.c.bf16 %v994_v25, %v978_v24  ;;  %v1154_v22 = vld [vmem:[%s7842_s9 + $0x1bc0] sm:$0xff]  ;;  %v1179_v24 = vld [vmem:[%s7842_s9 + $0x1c88] sm:$0xff] }
  0xfb   : > { %v1171_v25 = vld [vmem:[%s7842_s9 + $0x1c48] sm:$0xff] }
  0xfe   : > { %2355 = vmatmul.mubr.bf16.gmra.mrb[68].mxu1 %v1562_v33  ;;  %v1667_v33 = vpack.c.bf16 %v1027_v29, %v1011_v28  ;;  %v1739_v29 = vpack.c.bf16 %v1179_v24, %v1163_v23  ;;  %v1995_v23 = vld [vmem:[%s11214_s1 + $0x608] sm:$0xff]  ;;  %v301_v24 = vld [vmem:[%s7842_s9 + $0x118] sm:$0xff] }
  0xff   : > { %3511 = vmatmul.mubr.bf16.gmra.mrb[68].mxu0 %v1570_v34  ;;  %2362 = vmatprep.mubr.bf16.mxu1 %v1579_v35  ;;  %v1002_v34 = vld [vmem:[%s7842_s9 + $0x1700] sm:$0xff] }
 0x100   : > { %3518 = vmatprep.mubr.bf16.mxu0 %v1587_v36  ;;  %v1018_v35 = vld [vmem:[%s7842_s9 + $0x1780] sm:$0xff] }
 0x101   : > { %v1010_v36 = vld [vmem:[%s7842_s9 + $0x1740] sm:$0xff]  ;;  %v1658_v42 = vpack.c.bf16 %v1018_v35, %v1002_v34  ;;  %v1195_v35 = vld [vmem:[%s7842_s9 + $0x1d08] sm:$0xff] }
 0x102   : > { %v1666_v43 = vpack.c.bf16 %v1026_v37, %v1010_v36  ;;  %v1186_v34 = vld [vmem:[%s7842_s9 + $0x1cc0] sm:$0xff]  ;;  %v1211_v36 = vld [vmem:[%s7842_s9 + $0x1d88] sm:$0xff] }
 0x103   : > { %v1203_v37 = vld [vmem:[%s7842_s9 + $0x1d48] sm:$0xff] }
 0x106   : > { %2363 = vmatmul.mubr.bf16.gmra.mrb[72].mxu1 %v1578_v45  ;;  %v1683_v45 = vpack.c.bf16 %v1059_v41, %v1043_v40  ;;  %v1755_v41 = vpack.c.bf16 %v1211_v36, %v1195_v35  ;;  %v1996_v36 = vld [vmem:[%s11214_s1 + $0x610] sm:$0xff] }
 0x107   : > { %3519 = vmatmul.mubr.bf16.gmra.mrb[72].mxu0 %v1586_v46  ;;  %2370 = vmatprep.mubr.bf16.mxu1 %v1595_v47  ;;  %v1034_v46 = vld [vmem:[%s7842_s9 + $0x1800] sm:$0xff] }
 0x108   : > { %3526 = vmatprep.mubr.bf16.mxu0 %v1603_v48  ;;  %v1050_v47 = vld [vmem:[%s7842_s9 + $0x1880] sm:$0xff] }
 0x109   : > { %v1042_v48 = vld [vmem:[%s7842_s9 + $0x1840] sm:$0xff]  ;;  %v1674_v54 = vpack.c.bf16 %v1050_v47, %v1034_v46  ;;  %v1227_v47 = vld [vmem:[%s7842_s9 + $0x1e08] sm:$0xff] }
 0x10a   : > { %v1682_v55 = vpack.c.bf16 %v1058_v49, %v1042_v48  ;;  %v1218_v46 = vld [vmem:[%s7842_s9 + $0x1dc0] sm:$0xff]  ;;  %v1243_v48 = vld [vmem:[%s7842_s9 + $0x1e88] sm:$0xff] }
 0x10b   : > { %v1235_v49 = vld [vmem:[%s7842_s9 + $0x1e48] sm:$0xff] }
 0x10e   : > { %2371 = vmatmul.mubr.bf16.gmra.mrb[76].mxu1 %v1594_v57  ;;  %v1699_v57 = vpack.c.bf16 %v1091_v53, %v1075_v52  ;;  %v1771_v53 = vpack.c.bf16 %v1243_v48, %v1227_v47  ;;  %v357_v47 = vld [vmem:[%s7842_s9 + $0x2d8] sm:$0xff]  ;;  %v1870_v48 = vld [vmem:[%s11214_s1 + $0x220] sm:$0xff] }
 0x10f   : > { %3527 = vmatmul.mubr.bf16.gmra.mrb[76].mxu0 %v1602_v58  ;;  %2378 = vmatprep.mubr.bf16.mxu1 %v1611_v59  ;;  %v1066_v58 = vld [vmem:[%s7842_s9 + $0x1900] sm:$0xff] }
 0x110   : > { %3534 = vmatprep.mubr.bf16.mxu0 %v1619_v60  ;;  %v1082_v59 = vld [vmem:[%s7842_s9 + $0x1980] sm:$0xff] }
 0x111   : > { %v1074_v60 = vld [vmem:[%s7842_s9 + $0x1940] sm:$0xff]  ;;  %v1690_v3 = vpack.c.bf16 %v1082_v59, %v1066_v58  ;;  %v1259_v59 = vld [vmem:[%s7842_s9 + $0x1f08] sm:$0xff] }
 0x112   : > { %v1698_v4 = vpack.c.bf16 %v1090_v61, %v1074_v60  ;;  %v1250_v58 = vld [vmem:[%s7842_s9 + $0x1ec0] sm:$0xff]  ;;  %v1275_v60 = vld [vmem:[%s7842_s9 + $0x1f88] sm:$0xff] }
 0x113   : > { %v1267_v61 = vld [vmem:[%s7842_s9 + $0x1f48] sm:$0xff] }
 0x116   : > { %2379 = vmatmul.mubr.bf16.gmra.mrb[80].mxu1 %v1610_v6  ;;  %v1715_v6 = vpack.c.bf16 %v1123_v2, %v1107_v1  ;;  %v1787_v2 = vpack.c.bf16 %v1275_v60, %v1259_v59  ;;  %v1873_v59 = vld [vmem:[%s11214_s1 + $0x238] sm:$0xff]  ;;  %v332_v60 = vld [vmem:[%s7842_s9 + $0x210] sm:$0xff] }
 0x117   : > { %3535 = vmatmul.mubr.bf16.gmra.mrb[80].mxu0 %v1618_v7  ;;  %2386 = vmatprep.mubr.bf16.mxu1 %v1627_v8  ;;  %v1098_v7 = vld [vmem:[%s7842_s9 + $0x1a00] sm:$0xff] }
 0x118   : > { %3542 = vmatprep.mubr.bf16.mxu0 %v1635_v9  ;;  %v1114_v8 = vld [vmem:[%s7842_s9 + $0x1a80] sm:$0xff] }
 0x119   : > { %v1106_v9 = vld [vmem:[%s7842_s9 + $0x1a40] sm:$0xff]  ;;  %v1706_v15 = vpack.c.bf16 %v1114_v8, %v1098_v7  ;;  %v269_v8 = vld [vmem:[%s7842_s9 + $0x18] sm:$0xff] }
 0x11a   : > { %v1714_v16 = vpack.c.bf16 %v1122_v10, %v1106_v9  ;;  %v1282_v7 = vld [vmem:[%s7842_s9 + $0x1fc0] sm:$0xff]  ;;  %v285_v9 = vld [vmem:[%s7842_s9 + $0x98] sm:$0xff] }
 0x11b   : > { %v277_v10 = vld [vmem:[%s7842_s9 + $0x58] sm:$0xff] }
 0x11e   : > { %2387 = vmatmul.mubr.bf16.gmra.mrb[84].mxu1 %v1626_v18  ;;  %v1731_v18 = vpack.c.bf16 %v1155_v14, %v1139_v13  ;;  %v1293_v14 = vpack.c.bf16 %v285_v9, %v269_v8  ;;  %v1874_v9 = vld [vmem:[%s11214_s1 + $0x240] sm:$0xff] }
 0x11f   : > { %3543 = vmatmul.mubr.bf16.gmra.mrb[84].mxu0 %v1634_v19  ;;  %2394 = vmatprep.mubr.bf16.mxu1 %v1643_v20  ;;  %v1130_v19 = vld [vmem:[%s7842_s9 + $0x1b00] sm:$0xff] }
 0x120   : > { %3550 = vmatprep.mubr.bf16.mxu0 %v1651_v21  ;;  %v1146_v20 = vld [vmem:[%s7842_s9 + $0x1b80] sm:$0xff] }
 0x121   : > { %v1138_v21 = vld [vmem:[%s7842_s9 + $0x1b40] sm:$0xff]  ;;  %v1722_v27 = vpack.c.bf16 %v1146_v20, %v1130_v19  ;;  %v292_v19 = vld [vmem:[%s7842_s9 + $0xd0] sm:$0xff] }
 0x122   : > { %v1730_v28 = vpack.c.bf16 %v1154_v22, %v1138_v21  ;;  %v1866_v20 = vld [vmem:[%s11214_s1 + $0x200] sm:$0xff]  ;;  %v1867_v21 = vld [vmem:[%s11214_s1 + $0x208] sm:$0xff] }
 0x123   : > { %v1994_v22 = vld [vmem:[%s11214_s1 + $0x600] sm:$0xff] }
 0x126   : > { %2395 = vmatmul.mubr.bf16.gmra.mrb[88].mxu1 %v1642_v30  ;;  %v1747_v30 = vpack.c.bf16 %v1187_v26, %v1171_v25  ;;  %v317_v25 = vld [vmem:[%s7842_s9 + $0x198] sm:$0xff] }
 0x127   : > { %3551 = vmatmul.mubr.bf16.gmra.mrb[88].mxu0 %v1650_v31  ;;  %2402 = vmatprep.mubr.bf16.mxu1 %v1659_v32  ;;  %v1162_v31 = vld [vmem:[%s7842_s9 + $0x1c00] sm:$0xff] }
 0x128   : > { %3558 = vmatprep.mubr.bf16.mxu0 %v1667_v33  ;;  %v1178_v32 = vld [vmem:[%s7842_s9 + $0x1c80] sm:$0xff] }
 0x129   : > { %v1170_v33 = vld [vmem:[%s7842_s9 + $0x1c40] sm:$0xff]  ;;  %v1738_v39 = vpack.c.bf16 %v1178_v32, %v1162_v31  ;;  %v2154_v31 = vpack.c.bf16 %v1995_v23, %v1994_v22  ;;  %v1309_v32 = vpack.c.bf16 %v317_v25, %v301_v24  ;;  %v2004_v22 = vld [vmem:[%s11214_s1 + $0x650] sm:$0xff]  ;;  %v2005_v23 = vld [vmem:[%s11214_s1 + $0x658] sm:$0xff] }
 0x12a   : > { %v1746_v40 = vpack.c.bf16 %v1186_v34, %v1170_v33  ;;  %v1868_v33 = vld [vmem:[%s11214_s1 + $0x210] sm:$0xff]  ;;  %v1869_v34 = vld [vmem:[%s11214_s1 + $0x218] sm:$0xff] }
 0x12b   : > { %v380_v24 = vld [vmem:[%s7842_s9 + $0x390] sm:$0xff] }
 0x12c   : > { %v372_v25 = vld [vmem:[%s7842_s9 + $0x350] sm:$0xff] }
 0x12e   : > { %2403 = vmatmul.mubr.bf16.gmra.mrb[92].mxu1 %v1658_v42  ;;  %v1763_v42 = vpack.c.bf16 %v1219_v38, %v1203_v37  ;;  %v1997_v37 = vld [vmem:[%s11214_s1 + $0x618] sm:$0xff]  ;;  %v300_v38 = vld [vmem:[%s7842_s9 + $0x110] sm:$0xff] }
 0x12f   : > { %3559 = vmatmul.mubr.bf16.gmra.mrb[92].mxu0 %v1666_v43  ;;  %2410 = vmatprep.mubr.bf16.mxu1 %v1675_v44  ;;  %v1194_v43 = vld [vmem:[%s7842_s9 + $0x1d00] sm:$0xff] }
 0x130   : > { %3566 = vmatprep.mubr.bf16.mxu0 %v1683_v45  ;;  %v1210_v44 = vld [vmem:[%s7842_s9 + $0x1d80] sm:$0xff] }
 0x131   : > { %v1202_v45 = vld [vmem:[%s7842_s9 + $0x1d40] sm:$0xff]  ;;  %v1754_v51 = vpack.c.bf16 %v1210_v44, %v1194_v43  ;;  %v333_v43 = vld [vmem:[%s7842_s9 + $0x218] sm:$0xff] }
 0x132   : > { %v1762_v52 = vpack.c.bf16 %v1218_v46, %v1202_v45  ;;  %v349_v44 = vld [vmem:[%s7842_s9 + $0x298] sm:$0xff]  ;;  %v2155_v46 = vpack.c.bf16 %v1997_v37, %v1996_v36  ;;  %v2006_v36 = vld [vmem:[%s11214_s1 + $0x660] sm:$0xff]  ;;  %v2007_v37 = vld [vmem:[%s11214_s1 + $0x668] sm:$0xff] }
 0x133   : > { %v341_v45 = vld [vmem:[%s7842_s9 + $0x258] sm:$0xff] }
 0x136   : > { %2411 = vmatmul.mubr.bf16.gmra.mrb[96].mxu1 %v1674_v54  ;;  %v1779_v54 = vpack.c.bf16 %v1251_v50, %v1235_v49  ;;  %v1871_v49 = vld [vmem:[%s11214_s1 + $0x228] sm:$0xff] }
 0x137   : > { %3567 = vmatmul.mubr.bf16.gmra.mrb[96].mxu0 %v1682_v55  ;;  %2418 = vmatprep.mubr.bf16.mxu1 %v1691_v56  ;;  %v1226_v55 = vld [vmem:[%s7842_s9 + $0x1e00] sm:$0xff] }
 0x138   : > { %3574 = vmatprep.mubr.bf16.mxu0 %v1699_v57  ;;  %v1242_v56 = vld [vmem:[%s7842_s9 + $0x1e80] sm:$0xff] }
 0x139   : > { %v1234_v57 = vld [vmem:[%s7842_s9 + $0x1e40] sm:$0xff]  ;;  %v1770_v63 = vpack.c.bf16 %v1242_v56, %v1226_v55  ;;  %v1333_v55 = vpack.c.bf16 %v357_v47, %v341_v45  ;;  %v2092_v56 = vpack.c.bf16 %v1871_v49, %v1870_v48  ;;  %v396_v45 = vld [vmem:[%s7842_s9 + $0x410] sm:$0xff]  ;;  %v2009_v47 = vld [vmem:[%s11214_s1 + $0x678] sm:$0xff] }
 0x13a   : > { %v1778_v1 = vpack.c.bf16 %v1250_v58, %v1234_v57  ;;  %v1872_v58 = vld [vmem:[%s11214_s1 + $0x230] sm:$0xff] }
 0x13b   : > { %v412_v48 = vld [vmem:[%s7842_s9 + $0x490] sm:$0xff] }
 0x13c   : > { %v404_v49 = vld [vmem:[%s7842_s9 + $0x450] sm:$0xff] }
 0x13e   : > { %2419 = vmatmul.mubr.bf16.gmra.mrb[100].mxu1 %v1690_v3  ;;  %v1795_v3 = vpack.c.bf16 %v1283_v62, %v1267_v61  ;;  %v2000_v61 = vld [vmem:[%s11214_s1 + $0x630] sm:$0xff]  ;;  %v2001_v62 = vld [vmem:[%s11214_s1 + $0x638] sm:$0xff] }
 0x13f   : > { %3575 = vmatmul.mubr.bf16.gmra.mrb[100].mxu0 %v1698_v4  ;;  %2426 = vmatprep.mubr.bf16.mxu1 %v1707_v5  ;;  %v1258_v4 = vld [vmem:[%s7842_s9 + $0x1f00] sm:$0xff]  ;;  %v2157_v8 = vpack.c.bf16 %v2001_v62, %v2000_v61  ;;  %v2011_v61 = vld [vmem:[%s11214_s1 + $0x688] sm:$0xff] }
 0x140   : > { %3582 = vmatprep.mubr.bf16.mxu0 %v1715_v6  ;;  %v1274_v5 = vld [vmem:[%s7842_s9 + $0x1f80] sm:$0xff] }
 0x141   : > { %v1266_v6 = vld [vmem:[%s7842_s9 + $0x1f40] sm:$0xff]  ;;  %v1786_v12 = vpack.c.bf16 %v1274_v5, %v1258_v4  ;;  %v381_v4 = vld [vmem:[%s7842_s9 + $0x398] sm:$0xff] }
 0x142   : > { %v1794_v13 = vpack.c.bf16 %v1282_v7, %v1266_v6  ;;  %v373_v5 = vld [vmem:[%s7842_s9 + $0x358] sm:$0xff]  ;;  %v2093_v6 = vpack.c.bf16 %v1873_v59, %v1872_v58  ;;  %v1883_v58 = vld [vmem:[%s11214_s1 + $0x288] sm:$0xff]  ;;  %v1356_v59 = vpack.c.bf16 %v412_v48, %v396_v45 }
 0x143   : > { %v389_v7 = vld [vmem:[%s7842_s9 + $0x3d8] sm:$0xff] }
 0x144   : > { %v1889_v45 = vld [vmem:[%s11214_s1 + $0x2b8] sm:$0xff] }
 0x145   : > { %v541_v48 = vld [vmem:[%s7842_s9 + $0x898] sm:$0xff] }
 0x146   : > { %2427 = vmatmul.mubr.bf16.gmra.mrb[104].mxu1 %v1706_v15  ;;  %v1301_v15 = vpack.c.bf16 %v293_v11, %v277_v10  ;;  %v1875_v10 = vld [vmem:[%s11214_s1 + $0x248] sm:$0xff] }
 0x147   : > { %3583 = vmatmul.mubr.bf16.gmra.mrb[104].mxu0 %v1714_v16  ;;  %2434 = vmatprep.mubr.bf16.mxu1 %v1723_v17  ;;  %v268_v16 = vld [vmem:[%s7842_s9 + $0x10] sm:$0xff] }
 0x148   : > { %3590 = vmatprep.mubr.bf16.mxu0 %v1731_v18  ;;  %v284_v17 = vld [vmem:[%s7842_s9 + $0x90] sm:$0xff] }
 0x149   : > { %v276_v18 = vld [vmem:[%s7842_s9 + $0x50] sm:$0xff]  ;;  %v1292_v26 = vpack.c.bf16 %v284_v17, %v268_v16  ;;  %v1349_v16 = vpack.c.bf16 %v389_v7, %v373_v5  ;;  %v2094_v17 = vpack.c.bf16 %v1875_v10, %v1874_v9  ;;  %v1885_v5 = vld [vmem:[%s11214_s1 + $0x298] sm:$0xff] }
 0x14a   : > { %v2012_v7 = vld [vmem:[%s11214_s1 + $0x690] sm:$0xff] }
 0x14b   : > { %v444_v9 = vld [vmem:[%s7842_s9 + $0x590] sm:$0xff] }
 0x14c   : > { %v436_v10 = vld [vmem:[%s7842_s9 + $0x550] sm:$0xff] }
 0x14e   : > { %2435 = vmatmul.mubr.bf16.gmra.mrb[108].mxu1 %v1722_v27  ;;  %v309_v27 = vld [vmem:[%s7842_s9 + $0x158] sm:$0xff] }
 0x14f   : > { %3591 = vmatmul.mubr.bf16.gmra.mrb[108].mxu0 %v1730_v28  ;;  %2442 = vmatprep.mubr.bf16.mxu1 %v1739_v29  ;;  %v325_v28 = vld [vmem:[%s7842_s9 + $0x1d8] sm:$0xff]  ;;  %v1300_v29 = vpack.c.bf16 %v292_v19, %v276_v18  ;;  %v1876_v19 = vld [vmem:[%s11214_s1 + $0x250] sm:$0xff] }
 0x150   : > { %3598 = vmatprep.mubr.bf16.mxu0 %v1747_v30  ;;  %v2090_v30 = vpack.c.bf16 %v1867_v21, %v1866_v20  ;;  %v1317_v35 = vpack.c.bf16 %v325_v28, %v309_v27  ;;  %v1877_v20 = vld [vmem:[%s11214_s1 + $0x258] sm:$0xff]  ;;  %v364_v21 = vld [vmem:[%s7842_s9 + $0x310] sm:$0xff] }
 0x151   : > { %v397_v27 = vld [vmem:[%s7842_s9 + $0x418] sm:$0xff] }
 0x152   : > { %v413_v28 = vld [vmem:[%s7842_s9 + $0x498] sm:$0xff] }
 0x156   : > { %2443 = vmatmul.mubr.bf16.gmra.mrb[112].mxu1 %v1738_v39  ;;  %v316_v39 = vld [vmem:[%s7842_s9 + $0x190] sm:$0xff] }
 0x157   : > { %3599 = vmatmul.mubr.bf16.gmra.mrb[112].mxu0 %v1746_v40  ;;  %2450 = vmatprep.mubr.bf16.mxu1 %v1755_v41  ;;  %v308_v40 = vld [vmem:[%s7842_s9 + $0x150] sm:$0xff]  ;;  %v1308_v50 = vpack.c.bf16 %v316_v39, %v300_v38  ;;  %v1357_v39 = vpack.c.bf16 %v413_v28, %v397_v27 }
 0x158   : > { %3606 = vmatprep.mubr.bf16.mxu0 %v1763_v42  ;;  %v324_v41 = vld [vmem:[%s7842_s9 + $0x1d0] sm:$0xff]  ;;  %v2091_v42 = vpack.c.bf16 %v1869_v34, %v1868_v33  ;;  %v1878_v33 = vld [vmem:[%s11214_s1 + $0x260] sm:$0xff]  ;;  %v1879_v34 = vld [vmem:[%s11214_s1 + $0x268] sm:$0xff] }
 0x159   : > { %v460_v28 = vld [vmem:[%s7842_s9 + $0x610] sm:$0xff] }
 0x15e   : > { %2451 = vmatmul.mubr.bf16.gmra.mrb[116].mxu1 %v1754_v51  ;;  %v1998_v51 = vld [vmem:[%s11214_s1 + $0x620] sm:$0xff] }
 0x15f   : > { %3607 = vmatmul.mubr.bf16.gmra.mrb[116].mxu0 %v1762_v52  ;;  %2458 = vmatprep.mubr.bf16.mxu1 %v1771_v53  ;;  %v1999_v52 = vld [vmem:[%s11214_s1 + $0x628] sm:$0xff]  ;;  %v1316_v53 = vpack.c.bf16 %v324_v41, %v308_v40  ;;  %v2096_v41 = vpack.c.bf16 %v1879_v34, %v1878_v33  ;;  %v509_v33 = vld [vmem:[%s7842_s9 + $0x798] sm:$0xff] }
 0x160   : > { %3614 = vmatprep.mubr.bf16.mxu0 %v1779_v54  ;;  %v1325_v54 = vpack.c.bf16 %v349_v44, %v333_v43  ;;  %v2156_v57 = vpack.c.bf16 %v1999_v52, %v1998_v51  ;;  %v1880_v43 = vld [vmem:[%s11214_s1 + $0x270] sm:$0xff]  ;;  %v1881_v44 = vld [vmem:[%s11214_s1 + $0x278] sm:$0xff] }
 0x161   : > { %v429_v51 = vld [vmem:[%s7842_s9 + $0x518] sm:$0xff] }
 0x162   : > { %v445_v52 = vld [vmem:[%s7842_s9 + $0x598] sm:$0xff] }
 0x163   : > { %v501_v34 = vld [vmem:[%s7842_s9 + $0x758] sm:$0xff] }
 0x166   : > { %2459 = vmatmul.mubr.bf16.gmra.mrb[120].mxu1 %v1770_v63  ;;  %v348_v63 = vld [vmem:[%s7842_s9 + $0x290] sm:$0xff] }
 0x167   : > { %3615 = vmatmul.mubr.bf16.gmra.mrb[120].mxu0 %v1778_v1  ;;  %2466 = vmatprep.mubr.bf16.mxu1 %v1787_v2  ;;  %v340_v1 = vld [vmem:[%s7842_s9 + $0x250] sm:$0xff]  ;;  %v1324_v11 = vpack.c.bf16 %v348_v63, %v332_v60  ;;  %v2010_v60 = vld [vmem:[%s11214_s1 + $0x680] sm:$0xff]  ;;  %v1373_v63 = vpack.c.bf16 %v445_v52, %v429_v51  ;;  %v533_v51 = vld [vmem:[%s7842_s9 + $0x858] sm:$0xff] }
 0x168   : > { %3622 = vmatprep.mubr.bf16.mxu0 %v1795_v3  ;;  %v356_v2 = vld [vmem:[%s7842_s9 + $0x2d0] sm:$0xff]  ;;  %v365_v3 = vld [vmem:[%s7842_s9 + $0x318] sm:$0xff] }
 0x169   : > { %v549_v52 = vld [vmem:[%s7842_s9 + $0x8d8] sm:$0xff] }
 0x16e   : > { %2467 = vmatmul.mubr.bf16.gmra.mrb[124].mxu1 %v1786_v12  ;;  %v2002_v12 = vld [vmem:[%s11214_s1 + $0x640] sm:$0xff] }
 0x16f   : > { %3623 = vmatmul.mubr.bf16.gmra.mrb[124].mxu0 %v1794_v13  ;;  %2507 = vmatprep.mubr.bf16.mxu1 %v1293_v14  ;;  %v2003_v13 = vld [vmem:[%s11214_s1 + $0x648] sm:$0xff]  ;;  %v1332_v14 = vpack.c.bf16 %v356_v2, %v340_v1 }
 0x170   : > { %3663 = vmatprep.mubr.bf16.mxu0 %v1301_v15  ;;  %v1341_v15 = vpack.c.bf16 %v381_v4, %v365_v3  ;;  %v2158_v18 = vpack.c.bf16 %v2003_v13, %v2002_v12  ;;  %v2162_v3 = vpack.c.bf16 %v2011_v61, %v2010_v60  ;;  %v1884_v4 = vld [vmem:[%s11214_s1 + $0x290] sm:$0xff]  ;;  %v461_v12 = vld [vmem:[%s7842_s9 + $0x618] sm:$0xff] }
 0x171   : > { %v477_v13 = vld [vmem:[%s7842_s9 + $0x698] sm:$0xff]  ;;  %v532_v60 = vld [vmem:[%s7842_s9 + $0x850] sm:$0xff] }
 0x172   : > { %v548_v61 = vld [vmem:[%s7842_s9 + $0x8d0] sm:$0xff] }
 0x176   : > { %2508 = vmatmul.mubr.bf16.vlgmr.msra.gmra.mrb[0].mxu1 %v1292_v26  ;;  %v388_v26 = vld [vmem:[%s7842_s9 + $0x3d0] sm:$0xff] }
 0x177   : > { %3664 = vmatmul.mubr.bf16.vlgmr.msra.gmra.mrb[0].mxu0 %v1300_v29  ;;  %2765 = vmatpush1.bf16.msra.mxu1 %v2090_v30  ;;  %v405_v29 = vld [vmem:[%s7842_s9 + $0x458] sm:$0xff]  ;;  %v2095_v30 = vpack.c.bf16 %v1877_v20, %v1876_v19  ;;  %v1348_v38 = vpack.c.bf16 %v388_v26, %v372_v25  ;;  %v1887_v19 = vld [vmem:[%s11214_s1 + $0x2a8] sm:$0xff] }
 0x178   : > { %3921 = vmatpush1.bf16.msra.mxu0 %v2154_v31  ;;  %2515 = vmatprep.mubr.bf16.mxu1 %v1309_v32  ;;  %v421_v31 = vld [vmem:[%s7842_s9 + $0x4d8] sm:$0xff]  ;;  %v2159_v32 = vpack.c.bf16 %v2005_v23, %v2004_v22  ;;  %v2015_v22 = vld [vmem:[%s11214_s1 + $0x6a8] sm:$0xff] }
 0x179   : > { %3671 = vmatprep.mubr.bf16.mxu0 %v1317_v35  ;;  %2766 = vmatprep.subr.bf16.mxu1 %v7731_v0  ;;  %v1340_v35 = vpack.c.bf16 %v380_v24, %v364_v21  ;;  %v1365_v40 = vpack.c.bf16 %v421_v31, %v405_v29  ;;  %v2014_v21 = vld [vmem:[%s11214_s1 + $0x6a0] sm:$0xff]  ;;  %v1389_v24 = vpack.c.bf16 %v477_v13, %v461_v12  ;;  %v476_v29 = vld [vmem:[%s7842_s9 + $0x690] sm:$0xff]  ;;  %v1891_v12 = vld [vmem:[%s11214_s1 + $0x2c8] sm:$0xff] }
 0x17a   : > { %3922 = vmatprep.subr.bf16.mxu0 %v7731_v0  ;;  %v2164_v27 = vpack.c.bf16 %v2015_v22, %v2014_v21  ;;  %v484_v31 = vld [vmem:[%s7842_s9 + $0x6d0] sm:$0xff]  ;;  %v2018_v13 = vld [vmem:[%s11214_s1 + $0x6c0] sm:$0xff] }
 0x17b   : > { %2767 = vmatpush1.bf16.msra.mxu1 %v2091_v42  ;;  %v2160_v42 = vpack.c.bf16 %v2007_v37, %v2006_v36  ;;  %v1388_v36 = vpack.c.bf16 %v476_v29, %v460_v28  ;;  %v612_v28 = vld [vmem:[%s7842_s9 + $0xad0] sm:$0xff]  ;;  %v621_v29 = vld [vmem:[%s7842_s9 + $0xb18] sm:$0xff] }
 0x17c   : > { %3923 = vmatpush1.bf16.msra.mxu0 %v2155_v46  ;;  %2768 = vmatprep.subr.bf16.mxu1 %v7731_v0  ;;  %v2008_v46 = vld [vmem:[%s11214_s1 + $0x670] sm:$0xff] }
 0x17d   : > { %3924 = vmatprep.subr.bf16.mxu0 %v7731_v0 }
 0x17e   : > { %2516 = vmatmul.mubr.bf16.gmra.mrb[4].mxu1 %v1308_v50  ;;  %v420_v50 = vld [vmem:[%s7842_s9 + $0x4d0] sm:$0xff] }
 0x17f   : > { %3672 = vmatmul.mubr.bf16.gmra.mrb[4].mxu0 %v1316_v53  ;;  %2523 = vmatprep.mubr.bf16.mxu1 %v1325_v54  ;;  %v437_v53 = vld [vmem:[%s7842_s9 + $0x558] sm:$0xff]  ;;  %v2097_v54 = vpack.c.bf16 %v1881_v44, %v1880_v43  ;;  %v1364_v62 = vpack.c.bf16 %v420_v50, %v404_v49  ;;  %v516_v43 = vld [vmem:[%s7842_s9 + $0x7d0] sm:$0xff] }
 0x180   : > { %3679 = vmatprep.mubr.bf16.mxu0 %v1333_v55  ;;  %2769 = vmatpush1.bf16.msra.mxu1 %v2092_v56  ;;  %v453_v55 = vld [vmem:[%s7842_s9 + $0x5d8] sm:$0xff]  ;;  %v2161_v56 = vpack.c.bf16 %v2009_v47, %v2008_v46  ;;  %v1888_v44 = vld [vmem:[%s11214_s1 + $0x2b0] sm:$0xff] }
 0x181   : > { %3925 = vmatpush1.bf16.msra.mxu0 %v2156_v57  ;;  %2770 = vmatprep.subr.bf16.mxu1 %v7731_v0  ;;  %v1882_v57 = vld [vmem:[%s11214_s1 + $0x280] sm:$0xff]  ;;  %v1381_v1 = vpack.c.bf16 %v453_v55, %v437_v53  ;;  %v2016_v46 = vld [vmem:[%s11214_s1 + $0x6b0] sm:$0xff]  ;;  %v525_v47 = vld [vmem:[%s7842_s9 + $0x818] sm:$0xff]  ;;  %v2101_v49 = vpack.c.bf16 %v1889_v45, %v1888_v44 }
 0x182   : > { %3926 = vmatprep.subr.bf16.mxu0 %v7731_v0  ;;  %v2098_v2 = vpack.c.bf16 %v1883_v58, %v1882_v57  ;;  %v2017_v50 = vld [vmem:[%s11214_s1 + $0x6b8] sm:$0xff]  ;;  %v1429_v57 = vpack.c.bf16 %v549_v52, %v533_v51  ;;  %v524_v58 = vld [vmem:[%s7842_s9 + $0x810] sm:$0xff] }
 0x183   : > { %v2165_v53 = vpack.c.bf16 %v2017_v50, %v2016_v46  ;;  %v653_v44 = vld [vmem:[%s7842_s9 + $0xc18] sm:$0xff] }
 0x184   : > { %2771 = vmatpush1.bf16.msra.mxu1 %v2093_v6  ;;  %v428_v6 = vld [vmem:[%s7842_s9 + $0x510] sm:$0xff]  ;;  %v669_v45 = vld [vmem:[%s7842_s9 + $0xc98] sm:$0xff] }
 0x185   : > { %3927 = vmatpush1.bf16.msra.mxu0 %v2157_v8  ;;  %2772 = vmatprep.subr.bf16.mxu1 %v7731_v0  ;;  %v2013_v8 = vld [vmem:[%s11214_s1 + $0x698] sm:$0xff]  ;;  %v1372_v20 = vpack.c.bf16 %v444_v9, %v428_v6  ;;  %v564_v9 = vld [vmem:[%s7842_s9 + $0x950] sm:$0xff] }
 0x186   : > { %2524 = vmatmul.mubr.bf16.gmra.mrb[8].mxu1 %v1324_v11  ;;  %3928 = vmatprep.subr.bf16.mxu0 %v7731_v0  ;;  %v452_v11 = vld [vmem:[%s7842_s9 + $0x5d0] sm:$0xff] }
 0x187   : > { %3680 = vmatmul.mubr.bf16.gmra.mrb[8].mxu0 %v1332_v14  ;;  %2531 = vmatprep.mubr.bf16.mxu1 %v1341_v15  ;;  %v469_v14 = vld [vmem:[%s7842_s9 + $0x658] sm:$0xff]  ;;  %v2099_v15 = vpack.c.bf16 %v1885_v5, %v1884_v4  ;;  %v1380_v23 = vpack.c.bf16 %v452_v11, %v436_v10  ;;  %v1428_v4 = vpack.c.bf16 %v548_v61, %v532_v60  ;;  %v580_v10 = vld [vmem:[%s7842_s9 + $0x9d0] sm:$0xff]  ;;  %v1890_v11 = vld [vmem:[%s11214_s1 + $0x2c0] sm:$0xff] }
 0x188   : > { %3687 = vmatprep.mubr.bf16.mxu0 %v1349_v16  ;;  %2773 = vmatpush1.bf16.msra.mxu1 %v2094_v17  ;;  %v485_v16 = vld [vmem:[%s7842_s9 + $0x6d8] sm:$0xff]  ;;  %v2163_v17 = vpack.c.bf16 %v2013_v8, %v2012_v7  ;;  %v556_v7 = vld [vmem:[%s7842_s9 + $0x910] sm:$0xff]  ;;  %v1444_v22 = vpack.c.bf16 %v580_v10, %v564_v9  ;;  %v1895_v9 = vld [vmem:[%s11214_s1 + $0x2e8] sm:$0xff] }
 0x189   : > { %3929 = vmatpush1.bf16.msra.mxu0 %v2158_v18  ;;  %2774 = vmatprep.subr.bf16.mxu1 %v7731_v0  ;;  %v1886_v18 = vld [vmem:[%s11214_s1 + $0x2a0] sm:$0xff]  ;;  %v1397_v25 = vpack.c.bf16 %v485_v16, %v469_v14  ;;  %v572_v8 = vld [vmem:[%s7842_s9 + $0x990] sm:$0xff]  ;;  %v589_v14 = vld [vmem:[%s7842_s9 + $0xa18] sm:$0xff]  ;;  %v2102_v16 = vpack.c.bf16 %v1891_v12, %v1890_v11 }
 0x18a   : > { %3930 = vmatprep.subr.bf16.mxu0 %v7731_v0  ;;  %v2100_v26 = vpack.c.bf16 %v1887_v19, %v1886_v18  ;;  %v597_v18 = vld [vmem:[%s7842_s9 + $0xa58] sm:$0xff]  ;;  %v1436_v21 = vpack.c.bf16 %v572_v8, %v556_v7  ;;  %v708_v7 = vld [vmem:[%s7842_s9 + $0xdd0] sm:$0xff]  ;;  %v1894_v8 = vld [vmem:[%s11214_s1 + $0x2e0] sm:$0xff] }
 0x18b   : > { %v613_v19 = vld [vmem:[%s7842_s9 + $0xad8] sm:$0xff]  ;;  %v2022_v10 = vld [vmem:[%s11214_s1 + $0x6e0] sm:$0xff] }
 0x18c   : > { %2775 = vmatpush1.bf16.msra.mxu1 %v2095_v30  ;;  %v468_v30 = vld [vmem:[%s7842_s9 + $0x650] sm:$0xff]  ;;  %v701_v60 = vld [vmem:[%s7842_s9 + $0xd98] sm:$0xff] }
 0x18d   : > { %3931 = vmatpush1.bf16.msra.mxu0 %v2159_v32  ;;  %2776 = vmatprep.subr.bf16.mxu1 %v7731_v0  ;;  %v493_v32 = vld [vmem:[%s7842_s9 + $0x718] sm:$0xff]  ;;  %v1396_v37 = vpack.c.bf16 %v484_v31, %v468_v30 }
 0x18e   : > { %2532 = vmatmul.mubr.bf16.gmra.mrb[12].mxu1 %v1340_v35  ;;  %3932 = vmatprep.subr.bf16.mxu0 %v7731_v0  ;;  %v517_v35 = vld [vmem:[%s7842_s9 + $0x7d8] sm:$0xff] }
 0x18f   : > { %3688 = vmatmul.mubr.bf16.gmra.mrb[12].mxu0 %v1348_v38  ;;  %2539 = vmatprep.mubr.bf16.mxu1 %v1357_v39  ;;  %v1405_v38 = vpack.c.bf16 %v509_v33, %v493_v32  ;;  %v1413_v39 = vpack.c.bf16 %v517_v35, %v501_v34  ;;  %v637_v30 = vld [vmem:[%s7842_s9 + $0xb98] sm:$0xff] }
 0x190   : > { %3695 = vmatprep.mubr.bf16.mxu0 %v1365_v40  ;;  %2777 = vmatpush1.bf16.msra.mxu1 %v2096_v41  ;;  %v492_v40 = vld [vmem:[%s7842_s9 + $0x710] sm:$0xff]  ;;  %v629_v31 = vld [vmem:[%s7842_s9 + $0xb58] sm:$0xff]  ;;  %v1469_v35 = vpack.c.bf16 %v637_v30, %v621_v29 }
 0x191   : > { %3933 = vmatpush1.bf16.msra.mxu0 %v2160_v42  ;;  %2778 = vmatprep.subr.bf16.mxu1 %v7731_v0  ;;  %v508_v41 = vld [vmem:[%s7842_s9 + $0x790] sm:$0xff]  ;;  %v645_v32 = vld [vmem:[%s7842_s9 + $0xbd8] sm:$0xff] }
 0x192   : > { %3934 = vmatprep.subr.bf16.mxu0 %v7731_v0  ;;  %v500_v42 = vld [vmem:[%s7842_s9 + $0x750] sm:$0xff]  ;;  %v693_v61 = vld [vmem:[%s7842_s9 + $0xd58] sm:$0xff] }
 0x193   : > { %v1412_v55 = vpack.c.bf16 %v516_v43, %v500_v42  ;;  %v1893_v42 = vld [vmem:[%s11214_s1 + $0x2d8] sm:$0xff]  ;;  %v2020_v43 = vld [vmem:[%s11214_s1 + $0x6d0] sm:$0xff] }
 0x194   : > { %2779 = vmatpush1.bf16.msra.mxu1 %v2097_v54  ;;  %v1404_v54 = vpack.c.bf16 %v508_v41, %v492_v40  ;;  %v644_v40 = vld [vmem:[%s7842_s9 + $0xbd0] sm:$0xff]  ;;  %v717_v11 = vld [vmem:[%s7842_s9 + $0xe18] sm:$0xff] }
 0x195   : > { %3935 = vmatpush1.bf16.msra.mxu0 %v2161_v56  ;;  %2780 = vmatprep.subr.bf16.mxu1 %v7731_v0  ;;  %v1421_v56 = vpack.c.bf16 %v541_v48, %v525_v47  ;;  %v1892_v41 = vld [vmem:[%s11214_s1 + $0x2d0] sm:$0xff]  ;;  %v2021_v47 = vld [vmem:[%s11214_s1 + $0x6d8] sm:$0xff] }
 0x196   : > { %2540 = vmatmul.mubr.bf16.gmra.mrb[16].mxu1 %v1356_v59  ;;  %3936 = vmatprep.subr.bf16.mxu0 %v7731_v0  ;;  %v540_v59 = vld [vmem:[%s7842_s9 + $0x890] sm:$0xff]  ;;  %v2103_v46 = vpack.c.bf16 %v1893_v42, %v1892_v41  ;;  %v661_v48 = vld [vmem:[%s7842_s9 + $0xc58] sm:$0xff]  ;;  %v2167_v50 = vpack.c.bf16 %v2021_v47, %v2020_v43 }
 0x197   : > { %3696 = vmatmul.mubr.bf16.gmra.mrb[16].mxu0 %v1364_v62  ;;  %2547 = vmatprep.mubr.bf16.mxu1 %v1373_v63  ;;  %v557_v62 = vld [vmem:[%s7842_s9 + $0x918] sm:$0xff] }
 0x198   : > { %3703 = vmatprep.mubr.bf16.mxu0 %v1381_v1  ;;  %2781 = vmatpush1.bf16.msra.mxu1 %v2098_v2  ;;  %v573_v63 = vld [vmem:[%s7842_s9 + $0x998] sm:$0xff] }
 0x199   : > { %3937 = vmatpush1.bf16.msra.mxu0 %v2162_v3  ;;  %2782 = vmatprep.subr.bf16.mxu1 %v7731_v0  ;;  %v565_v1 = vld [vmem:[%s7842_s9 + $0x958] sm:$0xff]  ;;  %v1420_v3 = vpack.c.bf16 %v540_v59, %v524_v58  ;;  %v1437_v5 = vpack.c.bf16 %v573_v63, %v557_v62  ;;  %v676_v58 = vld [vmem:[%s7842_s9 + $0xcd0] sm:$0xff] }
 0x19a   : > { %3938 = vmatprep.subr.bf16.mxu0 %v7731_v0  ;;  %v581_v2 = vld [vmem:[%s7842_s9 + $0x9d8] sm:$0xff] }
 0x19b   : > { %v1445_v6 = vpack.c.bf16 %v581_v2, %v565_v1  ;;  %v685_v59 = vld [vmem:[%s7842_s9 + $0xd18] sm:$0xff] }
 0x19c   : > { %2783 = vmatpush1.bf16.msra.mxu1 %v2099_v15  ;;  %v605_v15 = vld [vmem:[%s7842_s9 + $0xa98] sm:$0xff]  ;;  %v1501_v2 = vpack.c.bf16 %v701_v60, %v685_v59 }
 0x19d   : > { %3939 = vmatpush1.bf16.msra.mxu0 %v2163_v17  ;;  %2784 = vmatprep.subr.bf16.mxu1 %v7731_v0  ;;  %v2019_v17 = vld [vmem:[%s11214_s1 + $0x6c8] sm:$0xff]  ;;  %v709_v62 = vld [vmem:[%s7842_s9 + $0xdd8] sm:$0xff] }
 0x19e   : > { %2548 = vmatmul.mubr.bf16.gmra.mrb[20].mxu1 %v1372_v20  ;;  %3940 = vmatprep.subr.bf16.mxu0 %v7731_v0  ;;  %v2166_v20 = vpack.c.bf16 %v2019_v17, %v2018_v13  ;;  %v733_v12 = vld [vmem:[%s7842_s9 + $0xe98] sm:$0xff]  ;;  %v2104_v13 = vpack.c.bf16 %v1895_v9, %v1894_v8 }
 0x19f   : > { %3704 = vmatmul.mubr.bf16.gmra.mrb[20].mxu0 %v1380_v23  ;;  %2555 = vmatprep.mubr.bf16.mxu1 %v1389_v24  ;;  %v1453_v23 = vpack.c.bf16 %v605_v15, %v589_v14  ;;  %v1461_v24 = vpack.c.bf16 %v613_v19, %v597_v18  ;;  %v2023_v14 = vld [vmem:[%s11214_s1 + $0x6e8] sm:$0xff]  ;;  %v725_v15 = vld [vmem:[%s7842_s9 + $0xe58] sm:$0xff] }
 0x1a0   : > { %3711 = vmatprep.mubr.bf16.mxu0 %v1397_v25  ;;  %2785 = vmatpush1.bf16.msra.mxu1 %v2100_v26  ;;  %v588_v25 = vld [vmem:[%s7842_s9 + $0xa10] sm:$0xff]  ;;  %v2168_v17 = vpack.c.bf16 %v2023_v14, %v2022_v10  ;;  %v773_v29 = vld [vmem:[%s7842_s9 + $0xfd8] sm:$0xff] }
 0x1a1   : > { %3941 = vmatpush1.bf16.msra.mxu0 %v2164_v27  ;;  %2786 = vmatprep.subr.bf16.mxu1 %v7731_v0  ;;  %v604_v26 = vld [vmem:[%s7842_s9 + $0xa90] sm:$0xff]  ;;  %v781_v41 = vld [vmem:[%s7842_s9 + $0x1018] sm:$0xff] }
 0x1a2   : > { %3942 = vmatprep.subr.bf16.mxu0 %v7731_v0  ;;  %v596_v27 = vld [vmem:[%s7842_s9 + $0xa50] sm:$0xff]  ;;  %v1452_v33 = vpack.c.bf16 %v604_v26, %v588_v25  ;;  %v749_v26 = vld [vmem:[%s7842_s9 + $0xf18] sm:$0xff] }
 0x1a3   : > { %v1460_v34 = vpack.c.bf16 %v612_v28, %v596_v27  ;;  %v740_v25 = vld [vmem:[%s7842_s9 + $0xed0] sm:$0xff]  ;;  %v765_v27 = vld [vmem:[%s7842_s9 + $0xf98] sm:$0xff] }
 0x1a4   : > { %2787 = vmatpush1.bf16.msra.mxu1 %v2101_v49  ;;  %v677_v49 = vld [vmem:[%s7842_s9 + $0xcd8] sm:$0xff]  ;;  %v860_v14 = vld [vmem:[%s7842_s9 + $0x1290] sm:$0xff] }
 0x1a5   : > { %3943 = vmatpush1.bf16.msra.mxu0 %v2165_v53  ;;  %2788 = vmatprep.subr.bf16.mxu1 %v7731_v0  ;;  %v1485_v53 = vpack.c.bf16 %v669_v45, %v653_v44  ;;  %v757_v28 = vld [vmem:[%s7842_s9 + $0xf58] sm:$0xff] }
 0x1a6   : > { %2556 = vmatmul.mubr.bf16.gmra.mrb[24].mxu1 %v1388_v36  ;;  %3944 = vmatprep.subr.bf16.mxu0 %v7731_v0  ;;  %v1477_v36 = vpack.c.bf16 %v645_v32, %v629_v31  ;;  %v1533_v32 = vpack.c.bf16 %v765_v27, %v749_v26  ;;  %v797_v42 = vld [vmem:[%s7842_s9 + $0x1098] sm:$0xff]  ;;  %v892_v26 = vld [vmem:[%s7842_s9 + $0x1390] sm:$0xff] }
 0x1a7   : > { %3712 = vmatmul.mubr.bf16.gmra.mrb[24].mxu0 %v1396_v37  ;;  %2563 = vmatprep.mubr.bf16.mxu1 %v1405_v38  ;;  %v620_v37 = vld [vmem:[%s7842_s9 + $0xb10] sm:$0xff]  ;;  %v2025_v44 = vld [vmem:[%s11214_s1 + $0x6f8] sm:$0xff] }
 0x1a8   : > { %3719 = vmatprep.mubr.bf16.mxu0 %v1413_v39  ;;  %2789 = vmatpush1.bf16.msra.mxu1 %v2102_v16  ;;  %v636_v38 = vld [vmem:[%s7842_s9 + $0xb90] sm:$0xff]  ;;  %v741_v16 = vld [vmem:[%s7842_s9 + $0xed8] sm:$0xff] }
 0x1a9   : > { %3945 = vmatpush1.bf16.msra.mxu0 %v2166_v20  ;;  %2790 = vmatprep.subr.bf16.mxu1 %v7731_v0  ;;  %v628_v39 = vld [vmem:[%s7842_s9 + $0xb50] sm:$0xff]  ;;  %v1468_v51 = vpack.c.bf16 %v636_v38, %v620_v37  ;;  %v1517_v20 = vpack.c.bf16 %v733_v12, %v717_v11  ;;  %v789_v45 = vld [vmem:[%s7842_s9 + $0x1058] sm:$0xff] }
 0x1aa   : > { %3946 = vmatprep.subr.bf16.mxu0 %v7731_v0  ;;  %v1476_v52 = vpack.c.bf16 %v644_v40, %v628_v39  ;;  %v772_v37 = vld [vmem:[%s7842_s9 + $0xfd0] sm:$0xff]  ;;  %v1897_v39 = vld [vmem:[%s11214_s1 + $0x2f8] sm:$0xff] }
 0x1ab   : > { %v1896_v38 = vld [vmem:[%s11214_s1 + $0x2f0] sm:$0xff]  ;;  %v837_v59 = vld [vmem:[%s7842_s9 + $0x11d8] sm:$0xff] }
 0x1ac   : > { %2791 = vmatpush1.bf16.msra.mxu1 %v2103_v46  ;;  %v2024_v40 = vld [vmem:[%s11214_s1 + $0x6f0] sm:$0xff]  ;;  %v2105_v43 = vpack.c.bf16 %v1897_v39, %v1896_v38  ;;  %v805_v46 = vld [vmem:[%s7842_s9 + $0x10d8] sm:$0xff] }
 0x1ad   : > { %3947 = vmatpush1.bf16.msra.mxu0 %v2167_v50  ;;  %2792 = vmatprep.subr.bf16.mxu1 %v7731_v0  ;;  %v2169_v47 = vpack.c.bf16 %v2025_v44, %v2024_v40  ;;  %v1549_v50 = vpack.c.bf16 %v797_v42, %v781_v41  ;;  %v869_v8 = vld [vmem:[%s7842_s9 + $0x12d8] sm:$0xff]  ;;  %v884_v27 = vld [vmem:[%s7842_s9 + $0x1350] sm:$0xff] }
 0x1ae   : > { %2564 = vmatmul.mubr.bf16.gmra.mrb[28].mxu1 %v1404_v54  ;;  %v1493_v54 = vpack.c.bf16 %v677_v49, %v661_v48  ;;  %3948 = vmatprep.subr.bf16.mxu0 %v7731_v0  ;;  %v924_v38 = vld [vmem:[%s7842_s9 + $0x1490] sm:$0xff]  ;;  %v941_v41 = vld [vmem:[%s7842_s9 + $0x1518] sm:$0xff] }
 0x1af   : > { %3720 = vmatmul.mubr.bf16.gmra.mrb[28].mxu0 %v1412_v55  ;;  %2571 = vmatprep.mubr.bf16.mxu1 %v1421_v56  ;;  %v652_v55 = vld [vmem:[%s7842_s9 + $0xc10] sm:$0xff]  ;;  %v957_v42 = vld [vmem:[%s7842_s9 + $0x1598] sm:$0xff] }
 0x1b0   : > { %3727 = vmatprep.mubr.bf16.mxu0 %v1429_v57  ;;  %v668_v56 = vld [vmem:[%s7842_s9 + $0xc90] sm:$0xff]  ;;  %2793 = vmatpush1.bf16.msra.mxu1 %v2104_v13  ;;  %v965_v44 = vld [vmem:[%s7842_s9 + $0x15d8] sm:$0xff] }
 0x1b1   : > { %v660_v57 = vld [vmem:[%s7842_s9 + $0xc50] sm:$0xff]  ;;  %v1484_v63 = vpack.c.bf16 %v668_v56, %v652_v55  ;;  %3949 = vmatpush1.bf16.msra.mxu0 %v2168_v17  ;;  %2794 = vmatprep.subr.bf16.mxu1 %v7731_v0  ;;  %v813_v56 = vld [vmem:[%s7842_s9 + $0x1118] sm:$0xff] }
 0x1b2   : > { %v1492_v1 = vpack.c.bf16 %v676_v58, %v660_v57  ;;  %3950 = vmatprep.subr.bf16.mxu0 %v7731_v0  ;;  %v804_v55 = vld [vmem:[%s7842_s9 + $0x10d0] sm:$0xff]  ;;  %v829_v57 = vld [vmem:[%s7842_s9 + $0x1198] sm:$0xff] }
 0x1b3   : > { %v821_v58 = vld [vmem:[%s7842_s9 + $0x1158] sm:$0xff]  ;;  %v844_v13 = vld [vmem:[%s7842_s9 + $0x1210] sm:$0xff] }
 0x1b4   : > { %2795 = vmatpush1.bf16.msra.mxu1 %v2105_v43  ;;  %v877_v17 = vld [vmem:[%s7842_s9 + $0x1318] sm:$0xff]  ;;  %v916_v39 = vld [vmem:[%s7842_s9 + $0x1450] sm:$0xff] }
 0x1b5   : > { %3951 = vmatpush1.bf16.msra.mxu0 %v2169_v47  ;;  %3053 = vmatprep.subr.bf16.mxu1 %v7731_v0  ;;  %v932_v40 = vld [vmem:[%s7842_s9 + $0x14d0] sm:$0xff]  ;;  %v949_v43 = vld [vmem:[%s7842_s9 + $0x1558] sm:$0xff]  ;;  %v1629_v47 = vpack.c.bf16 %v957_v42, %v941_v41 }
 0x1b6   : > { %2572 = vmatmul.mubr.bf16.gmra.mrb[32].mxu1 %v1420_v3  ;;  %v1509_v3 = vpack.c.bf16 %v709_v62, %v693_v61  ;;  %4209 = vmatprep.subr.bf16.mxu0 %v7731_v0  ;;  %v1565_v62 = vpack.c.bf16 %v829_v57, %v813_v56  ;;  %v997_v56 = vld [vmem:[%s7842_s9 + $0x16d8] sm:$0xff] }
 0x1b7   : > { %3728 = vmatmul.mubr.bf16.gmra.mrb[32].mxu0 %v1428_v4  ;;  %2579 = vmatprep.mubr.bf16.mxu1 %v1437_v5  ;;  %v684_v4 = vld [vmem:[%s7842_s9 + $0xd10] sm:$0xff]  ;;  %v1125_v41 = vld [vmem:[%s7842_s9 + $0x1ad8] sm:$0xff] }
 0x1b8   : > { %3735 = vmatprep.mubr.bf16.mxu0 %v1445_v6  ;;  %v700_v5 = vld [vmem:[%s7842_s9 + $0xd90] sm:$0xff] }
 0x1b9   : > { %v692_v6 = vld [vmem:[%s7842_s9 + $0xd50] sm:$0xff]  ;;  %v1500_v18 = vpack.c.bf16 %v700_v5, %v684_v4  ;;  %v845_v5 = vld [vmem:[%s7842_s9 + $0x1218] sm:$0xff] }
 0x1ba   : > { %v1508_v19 = vpack.c.bf16 %v708_v7, %v692_v6  ;;  %v836_v4 = vld [vmem:[%s7842_s9 + $0x11d0] sm:$0xff]  ;;  %v861_v6 = vld [vmem:[%s7842_s9 + $0x1298] sm:$0xff] }
 0x1bb   : > { %v853_v7 = vld [vmem:[%s7842_s9 + $0x1258] sm:$0xff]  ;;  %v1581_v11 = vpack.c.bf16 %v861_v6, %v845_v5 }
 0x1bc   : > { %v1589_v12 = vpack.c.bf16 %v869_v8, %v853_v7  ;;  %v1029_v5 = vld [vmem:[%s7842_s9 + $0x17d8] sm:$0xff] }
 0x1be   : > { %2580 = vmatmul.mubr.bf16.gmra.mrb[36].mxu1 %v1436_v21  ;;  %v1525_v21 = vpack.c.bf16 %v741_v16, %v725_v15  ;;  %v852_v15 = vld [vmem:[%s7842_s9 + $0x1250] sm:$0xff] }
 0x1bf   : > { %3736 = vmatmul.mubr.bf16.gmra.mrb[36].mxu0 %v1444_v22  ;;  %2587 = vmatprep.mubr.bf16.mxu1 %v1453_v23  ;;  %v716_v22 = vld [vmem:[%s7842_s9 + $0xe10] sm:$0xff] }
 0x1c0   : > { %3743 = vmatprep.mubr.bf16.mxu0 %v1461_v24  ;;  %v732_v23 = vld [vmem:[%s7842_s9 + $0xe90] sm:$0xff] }
 0x1c1   : > { %v724_v24 = vld [vmem:[%s7842_s9 + $0xe50] sm:$0xff]  ;;  %v1516_v30 = vpack.c.bf16 %v732_v23, %v716_v22 }
 0x1c2   : > { %v1524_v31 = vpack.c.bf16 %v740_v25, %v724_v24  ;;  %v868_v16 = vld [vmem:[%s7842_s9 + $0x12d0] sm:$0xff] }
 0x1c3   : > { %v1588_v22 = vpack.c.bf16 %v868_v16, %v852_v15  ;;  %v876_v25 = vld [vmem:[%s7842_s9 + $0x1310] sm:$0xff]  ;;  %v1053_v15 = vld [vmem:[%s7842_s9 + $0x1898] sm:$0xff] }
 0x1c4   : > { %v1045_v16 = vld [vmem:[%s7842_s9 + $0x1858] sm:$0xff] }
 0x1c6   : > { %2588 = vmatmul.mubr.bf16.gmra.mrb[40].mxu1 %v1452_v33  ;;  %v1541_v33 = vpack.c.bf16 %v773_v29, %v757_v28  ;;  %v900_v28 = vld [vmem:[%s7842_s9 + $0x13d0] sm:$0xff]  ;;  %v909_v29 = vld [vmem:[%s7842_s9 + $0x1418] sm:$0xff] }
 0x1c7   : > { %3744 = vmatmul.mubr.bf16.gmra.mrb[40].mxu0 %v1460_v34  ;;  %2595 = vmatprep.mubr.bf16.mxu1 %v1469_v35  ;;  %v748_v34 = vld [vmem:[%s7842_s9 + $0xf10] sm:$0xff] }
 0x1c8   : > { %3751 = vmatprep.mubr.bf16.mxu0 %v1477_v36  ;;  %v764_v35 = vld [vmem:[%s7842_s9 + $0xf90] sm:$0xff] }
 0x1c9   : > { %v756_v36 = vld [vmem:[%s7842_s9 + $0xf50] sm:$0xff]  ;;  %v1532_v48 = vpack.c.bf16 %v764_v35, %v748_v34  ;;  %v1604_v34 = vpack.c.bf16 %v900_v28, %v884_v27  ;;  %v1085_v27 = vld [vmem:[%s7842_s9 + $0x1998] sm:$0xff] }
 0x1ca   : > { %v1540_v49 = vpack.c.bf16 %v772_v37, %v756_v36  ;;  %v908_v37 = vld [vmem:[%s7842_s9 + $0x1410] sm:$0xff]  ;;  %v1077_v28 = vld [vmem:[%s7842_s9 + $0x1958] sm:$0xff] }
 0x1ce   : > { %2596 = vmatmul.mubr.bf16.gmra.mrb[44].mxu1 %v1468_v51  ;;  %v1557_v51 = vpack.c.bf16 %v805_v46, %v789_v45  ;;  %v1612_v45 = vpack.c.bf16 %v924_v38, %v908_v37  ;;  %v1620_v46 = vpack.c.bf16 %v932_v40, %v916_v39  ;;  %v1092_v37 = vld [vmem:[%s7842_s9 + $0x19d0] sm:$0xff]  ;;  %v1101_v38 = vld [vmem:[%s7842_s9 + $0x1a18] sm:$0xff] }
 0x1cf   : > { %3752 = vmatmul.mubr.bf16.gmra.mrb[44].mxu0 %v1476_v52  ;;  %2603 = vmatprep.mubr.bf16.mxu1 %v1485_v53  ;;  %v780_v52 = vld [vmem:[%s7842_s9 + $0x1010] sm:$0xff]  ;;  %v1117_v39 = vld [vmem:[%s7842_s9 + $0x1a98] sm:$0xff] }
 0x1d0   : > { %3759 = vmatprep.mubr.bf16.mxu0 %v1493_v54  ;;  %v796_v53 = vld [vmem:[%s7842_s9 + $0x1090] sm:$0xff]  ;;  %v1109_v40 = vld [vmem:[%s7842_s9 + $0x1a58] sm:$0xff] }
 0x1d1   : > { %v788_v54 = vld [vmem:[%s7842_s9 + $0x1050] sm:$0xff]  ;;  %v1548_v60 = vpack.c.bf16 %v796_v53, %v780_v52  ;;  %v973_v53 = vld [vmem:[%s7842_s9 + $0x1618] sm:$0xff] }
 0x1d2   : > { %v1556_v61 = vpack.c.bf16 %v804_v55, %v788_v54  ;;  %v964_v52 = vld [vmem:[%s7842_s9 + $0x15d0] sm:$0xff]  ;;  %v989_v54 = vld [vmem:[%s7842_s9 + $0x1698] sm:$0xff] }
 0x1d3   : > { %v981_v55 = vld [vmem:[%s7842_s9 + $0x1658] sm:$0xff] }
 0x1d6   : > { %2604 = vmatmul.mubr.bf16.gmra.mrb[48].mxu1 %v1484_v63  ;;  %v1573_v63 = vpack.c.bf16 %v837_v59, %v821_v58  ;;  %v1645_v59 = vpack.c.bf16 %v989_v54, %v973_v53  ;;  %v1157_v53 = vld [vmem:[%s7842_s9 + $0x1bd8] sm:$0xff] }
 0x1d7   : > { %3760 = vmatmul.mubr.bf16.gmra.mrb[48].mxu0 %v1492_v1  ;;  %2611 = vmatprep.mubr.bf16.mxu1 %v1501_v2  ;;  %v812_v1 = vld [vmem:[%s7842_s9 + $0x1110] sm:$0xff] }
 0x1d8   : > { %3767 = vmatprep.mubr.bf16.mxu0 %v1509_v3  ;;  %v828_v2 = vld [vmem:[%s7842_s9 + $0x1190] sm:$0xff] }
 0x1d9   : > { %v820_v3 = vld [vmem:[%s7842_s9 + $0x1150] sm:$0xff]  ;;  %v1564_v9 = vpack.c.bf16 %v828_v2, %v812_v1  ;;  %v1005_v2 = vld [vmem:[%s7842_s9 + $0x1718] sm:$0xff] }
 0x1da   : > { %v1572_v10 = vpack.c.bf16 %v836_v4, %v820_v3  ;;  %v996_v1 = vld [vmem:[%s7842_s9 + $0x16d0] sm:$0xff]  ;;  %v1021_v3 = vld [vmem:[%s7842_s9 + $0x1798] sm:$0xff] }
 0x1db   : > { %v1013_v4 = vld [vmem:[%s7842_s9 + $0x1758] sm:$0xff]  ;;  %v1661_v8 = vpack.c.bf16 %v1021_v3, %v1005_v2 }
 0x1dc   : > { %v1189_v2 = vld [vmem:[%s7842_s9 + $0x1cd8] sm:$0xff] }
 0x1de   : > { %2612 = vmatmul.mubr.bf16.gmra.mrb[52].mxu1 %v1500_v18  ;;  %v893_v18 = vld [vmem:[%s7842_s9 + $0x1398] sm:$0xff] }
 0x1df   : > { %3768 = vmatmul.mubr.bf16.gmra.mrb[52].mxu0 %v1508_v19  ;;  %2619 = vmatprep.mubr.bf16.mxu1 %v1517_v20  ;;  %v885_v19 = vld [vmem:[%s7842_s9 + $0x1358] sm:$0xff]  ;;  %v1597_v23 = vpack.c.bf16 %v893_v18, %v877_v17 }
 0x1e0   : > { %3775 = vmatprep.mubr.bf16.mxu0 %v1525_v21  ;;  %v901_v20 = vld [vmem:[%s7842_s9 + $0x13d8] sm:$0xff]  ;;  %v1580_v21 = vpack.c.bf16 %v860_v14, %v844_v13  ;;  %v1028_v13 = vld [vmem:[%s7842_s9 + $0x17d0] sm:$0xff] }
 0x1e1   : > { %v1605_v24 = vpack.c.bf16 %v901_v20, %v885_v19  ;;  %v1037_v14 = vld [vmem:[%s7842_s9 + $0x1818] sm:$0xff] }
 0x1e2   : > { %v1061_v17 = vld [vmem:[%s7842_s9 + $0x18d8] sm:$0xff]  ;;  %v1677_v20 = vpack.c.bf16 %v1053_v15, %v1037_v14 }
 0x1e3   : > { %v1221_v14 = vld [vmem:[%s7842_s9 + $0x1dd8] sm:$0xff] }
 0x1e6   : > { %2620 = vmatmul.mubr.bf16.gmra.mrb[56].mxu1 %v1516_v30  ;;  %v925_v30 = vld [vmem:[%s7842_s9 + $0x1498] sm:$0xff] }
 0x1e7   : > { %3776 = vmatmul.mubr.bf16.gmra.mrb[56].mxu0 %v1524_v31  ;;  %2627 = vmatprep.mubr.bf16.mxu1 %v1533_v32  ;;  %v917_v31 = vld [vmem:[%s7842_s9 + $0x1458] sm:$0xff]  ;;  %v1613_v35 = vpack.c.bf16 %v925_v30, %v909_v29 }
 0x1e8   : > { %3783 = vmatprep.mubr.bf16.mxu0 %v1541_v33  ;;  %v933_v32 = vld [vmem:[%s7842_s9 + $0x14d8] sm:$0xff]  ;;  %v1596_v33 = vpack.c.bf16 %v892_v26, %v876_v25  ;;  %v1060_v25 = vld [vmem:[%s7842_s9 + $0x18d0] sm:$0xff] }
 0x1e9   : > { %v1621_v36 = vpack.c.bf16 %v933_v32, %v917_v31  ;;  %v1069_v26 = vld [vmem:[%s7842_s9 + $0x1918] sm:$0xff] }
 0x1ea   : > { %v1093_v29 = vld [vmem:[%s7842_s9 + $0x19d8] sm:$0xff]  ;;  %v1693_v32 = vpack.c.bf16 %v1085_v27, %v1069_v26 }
 0x1eb   : > { %v1253_v26 = vld [vmem:[%s7842_s9 + $0x1ed8] sm:$0xff] }
 0x1ee   : > { %2628 = vmatmul.mubr.bf16.gmra.mrb[60].mxu1 %v1532_v48  ;;  %v1637_v48 = vpack.c.bf16 %v965_v44, %v949_v43  ;;  %v1709_v44 = vpack.c.bf16 %v1117_v39, %v1101_v38  ;;  %v1285_v38 = vld [vmem:[%s7842_s9 + $0x1fd8] sm:$0xff] }
 0x1ef   : > { %3784 = vmatmul.mubr.bf16.gmra.mrb[60].mxu0 %v1540_v49  ;;  %2635 = vmatprep.mubr.bf16.mxu1 %v1549_v50  ;;  %v940_v49 = vld [vmem:[%s7842_s9 + $0x1510] sm:$0xff] }
 0x1f0   : > { %3791 = vmatprep.mubr.bf16.mxu0 %v1557_v51  ;;  %v956_v50 = vld [vmem:[%s7842_s9 + $0x1590] sm:$0xff] }
 0x1f1   : > { %v948_v51 = vld [vmem:[%s7842_s9 + $0x1550] sm:$0xff]  ;;  %v1628_v57 = vpack.c.bf16 %v956_v50, %v940_v49  ;;  %v1133_v50 = vld [vmem:[%s7842_s9 + $0x1b18] sm:$0xff] }
 0x1f2   : > { %v1636_v58 = vpack.c.bf16 %v964_v52, %v948_v51  ;;  %v1124_v49 = vld [vmem:[%s7842_s9 + $0x1ad0] sm:$0xff]  ;;  %v1149_v51 = vld [vmem:[%s7842_s9 + $0x1b98] sm:$0xff] }
 0x1f3   : > { %v1141_v52 = vld [vmem:[%s7842_s9 + $0x1b58] sm:$0xff] }
 0x1f6   : > { %2636 = vmatmul.mubr.bf16.gmra.mrb[64].mxu1 %v1548_v60  ;;  %v1653_v60 = vpack.c.bf16 %v997_v56, %v981_v55  ;;  %v1725_v56 = vpack.c.bf16 %v1149_v51, %v1133_v50  ;;  %v295_v50 = vld [vmem:[%s7842_s9 + $0xe8] sm:$0xff] }
 0x1f7   : > { %3792 = vmatmul.mubr.bf16.gmra.mrb[64].mxu0 %v1556_v61  ;;  %2643 = vmatprep.mubr.bf16.mxu1 %v1565_v62  ;;  %v972_v61 = vld [vmem:[%s7842_s9 + $0x1610] sm:$0xff] }
 0x1f8   : > { %3799 = vmatprep.mubr.bf16.mxu0 %v1573_v63  ;;  %v988_v62 = vld [vmem:[%s7842_s9 + $0x1690] sm:$0xff] }
 0x1f9   : > { %v980_v63 = vld [vmem:[%s7842_s9 + $0x1650] sm:$0xff]  ;;  %v1644_v6 = vpack.c.bf16 %v988_v62, %v972_v61  ;;  %v1165_v62 = vld [vmem:[%s7842_s9 + $0x1c18] sm:$0xff] }
 0x1fa   : > { %v1652_v7 = vpack.c.bf16 %v996_v1, %v980_v63  ;;  %v1156_v61 = vld [vmem:[%s7842_s9 + $0x1bd0] sm:$0xff]  ;;  %v1181_v63 = vld [vmem:[%s7842_s9 + $0x1c98] sm:$0xff] }
 0x1fb   : > { %v1173_v1 = vld [vmem:[%s7842_s9 + $0x1c58] sm:$0xff] }
 0x1fe   : > { %2644 = vmatmul.mubr.bf16.gmra.mrb[68].mxu1 %v1564_v9  ;;  %v1669_v9 = vpack.c.bf16 %v1029_v5, %v1013_v4  ;;  %v1741_v5 = vpack.c.bf16 %v1181_v63, %v1165_v62  ;;  %v2027_v62 = vld [vmem:[%s11214_s1 + $0x708] sm:$0xff] }
 0x1ff   : > { %3800 = vmatmul.mubr.bf16.gmra.mrb[68].mxu0 %v1572_v10  ;;  %2651 = vmatprep.mubr.bf16.mxu1 %v1581_v11  ;;  %v1004_v10 = vld [vmem:[%s7842_s9 + $0x1710] sm:$0xff]  ;;  %v303_v63 = vld [vmem:[%s7842_s9 + $0x128] sm:$0xff] }
 0x200   : > { %3807 = vmatprep.mubr.bf16.mxu0 %v1589_v12  ;;  %v1020_v11 = vld [vmem:[%s7842_s9 + $0x1790] sm:$0xff] }
 0x201   : > { %v1012_v12 = vld [vmem:[%s7842_s9 + $0x1750] sm:$0xff]  ;;  %v1660_v18 = vpack.c.bf16 %v1020_v11, %v1004_v10  ;;  %v1197_v11 = vld [vmem:[%s7842_s9 + $0x1d18] sm:$0xff] }
 0x202   : > { %v1668_v19 = vpack.c.bf16 %v1028_v13, %v1012_v12  ;;  %v1188_v10 = vld [vmem:[%s7842_s9 + $0x1cd0] sm:$0xff]  ;;  %v1213_v12 = vld [vmem:[%s7842_s9 + $0x1d98] sm:$0xff] }
 0x203   : > { %v1205_v13 = vld [vmem:[%s7842_s9 + $0x1d58] sm:$0xff] }
 0x206   : > { %2652 = vmatmul.mubr.bf16.gmra.mrb[72].mxu1 %v1580_v21  ;;  %v1685_v21 = vpack.c.bf16 %v1061_v17, %v1045_v16  ;;  %v1757_v17 = vpack.c.bf16 %v1213_v12, %v1197_v11  ;;  %v2028_v12 = vld [vmem:[%s11214_s1 + $0x710] sm:$0xff] }
 0x207   : > { %3808 = vmatmul.mubr.bf16.gmra.mrb[72].mxu0 %v1588_v22  ;;  %2659 = vmatprep.mubr.bf16.mxu1 %v1597_v23  ;;  %v1036_v22 = vld [vmem:[%s7842_s9 + $0x1810] sm:$0xff] }
 0x208   : > { %3815 = vmatprep.mubr.bf16.mxu0 %v1605_v24  ;;  %v1052_v23 = vld [vmem:[%s7842_s9 + $0x1890] sm:$0xff] }
 0x209   : > { %v1044_v24 = vld [vmem:[%s7842_s9 + $0x1850] sm:$0xff]  ;;  %v1676_v30 = vpack.c.bf16 %v1052_v23, %v1036_v22  ;;  %v1229_v23 = vld [vmem:[%s7842_s9 + $0x1e18] sm:$0xff] }
 0x20a   : > { %v1684_v31 = vpack.c.bf16 %v1060_v25, %v1044_v24  ;;  %v1220_v22 = vld [vmem:[%s7842_s9 + $0x1dd0] sm:$0xff]  ;;  %v1245_v24 = vld [vmem:[%s7842_s9 + $0x1e98] sm:$0xff] }
 0x20b   : > { %v1237_v25 = vld [vmem:[%s7842_s9 + $0x1e58] sm:$0xff] }
 0x20e   : > { %2660 = vmatmul.mubr.bf16.gmra.mrb[76].mxu1 %v1596_v33  ;;  %v1701_v33 = vpack.c.bf16 %v1093_v29, %v1077_v28  ;;  %v1773_v29 = vpack.c.bf16 %v1245_v24, %v1229_v23  ;;  %v359_v23 = vld [vmem:[%s7842_s9 + $0x2e8] sm:$0xff]  ;;  %v1902_v24 = vld [vmem:[%s11214_s1 + $0x320] sm:$0xff] }
 0x20f   : > { %3816 = vmatmul.mubr.bf16.gmra.mrb[76].mxu0 %v1604_v34  ;;  %2667 = vmatprep.mubr.bf16.mxu1 %v1613_v35  ;;  %v1068_v34 = vld [vmem:[%s7842_s9 + $0x1910] sm:$0xff] }
 0x210   : > { %3823 = vmatprep.mubr.bf16.mxu0 %v1621_v36  ;;  %v1084_v35 = vld [vmem:[%s7842_s9 + $0x1990] sm:$0xff] }
 0x211   : > { %v1076_v36 = vld [vmem:[%s7842_s9 + $0x1950] sm:$0xff]  ;;  %v1692_v42 = vpack.c.bf16 %v1084_v35, %v1068_v34  ;;  %v1261_v35 = vld [vmem:[%s7842_s9 + $0x1f18] sm:$0xff] }
 0x212   : > { %v1700_v43 = vpack.c.bf16 %v1092_v37, %v1076_v36  ;;  %v1252_v34 = vld [vmem:[%s7842_s9 + $0x1ed0] sm:$0xff]  ;;  %v1277_v36 = vld [vmem:[%s7842_s9 + $0x1f98] sm:$0xff] }
 0x213   : > { %v1269_v37 = vld [vmem:[%s7842_s9 + $0x1f58] sm:$0xff] }
 0x216   : > { %2668 = vmatmul.mubr.bf16.gmra.mrb[80].mxu1 %v1612_v45  ;;  %v1717_v45 = vpack.c.bf16 %v1125_v41, %v1109_v40  ;;  %v1789_v41 = vpack.c.bf16 %v1277_v36, %v1261_v35  ;;  %v1905_v35 = vld [vmem:[%s11214_s1 + $0x338] sm:$0xff]  ;;  %v334_v36 = vld [vmem:[%s7842_s9 + $0x220] sm:$0xff] }
 0x217   : > { %3824 = vmatmul.mubr.bf16.gmra.mrb[80].mxu0 %v1620_v46  ;;  %2675 = vmatprep.mubr.bf16.mxu1 %v1629_v47  ;;  %v1100_v46 = vld [vmem:[%s7842_s9 + $0x1a10] sm:$0xff] }
 0x218   : > { %3831 = vmatprep.mubr.bf16.mxu0 %v1637_v48  ;;  %v1116_v47 = vld [vmem:[%s7842_s9 + $0x1a90] sm:$0xff] }
 0x219   : > { %v1108_v48 = vld [vmem:[%s7842_s9 + $0x1a50] sm:$0xff]  ;;  %v1708_v54 = vpack.c.bf16 %v1116_v47, %v1100_v46  ;;  %v271_v47 = vld [vmem:[%s7842_s9 + $0x28] sm:$0xff] }
 0x21a   : > { %v1716_v55 = vpack.c.bf16 %v1124_v49, %v1108_v48  ;;  %v1284_v46 = vld [vmem:[%s7842_s9 + $0x1fd0] sm:$0xff]  ;;  %v287_v48 = vld [vmem:[%s7842_s9 + $0xa8] sm:$0xff] }
 0x21b   : > { %v279_v49 = vld [vmem:[%s7842_s9 + $0x68] sm:$0xff] }
 0x21e   : > { %2676 = vmatmul.mubr.bf16.gmra.mrb[84].mxu1 %v1628_v57  ;;  %v1733_v57 = vpack.c.bf16 %v1157_v53, %v1141_v52  ;;  %v1295_v53 = vpack.c.bf16 %v287_v48, %v271_v47  ;;  %v1906_v48 = vld [vmem:[%s11214_s1 + $0x340] sm:$0xff] }
 0x21f   : > { %3832 = vmatmul.mubr.bf16.gmra.mrb[84].mxu0 %v1636_v58  ;;  %2683 = vmatprep.mubr.bf16.mxu1 %v1645_v59  ;;  %v1132_v58 = vld [vmem:[%s7842_s9 + $0x1b10] sm:$0xff] }
 0x220   : > { %3839 = vmatprep.mubr.bf16.mxu0 %v1653_v60  ;;  %v1148_v59 = vld [vmem:[%s7842_s9 + $0x1b90] sm:$0xff] }
 0x221   : > { %v1140_v60 = vld [vmem:[%s7842_s9 + $0x1b50] sm:$0xff]  ;;  %v1724_v3 = vpack.c.bf16 %v1148_v59, %v1132_v58  ;;  %v294_v58 = vld [vmem:[%s7842_s9 + $0xe0] sm:$0xff] }
 0x222   : > { %v1732_v4 = vpack.c.bf16 %v1156_v61, %v1140_v60  ;;  %v1898_v59 = vld [vmem:[%s11214_s1 + $0x300] sm:$0xff]  ;;  %v1899_v60 = vld [vmem:[%s11214_s1 + $0x308] sm:$0xff] }
 0x223   : > { %v2026_v61 = vld [vmem:[%s11214_s1 + $0x700] sm:$0xff] }
 0x226   : > { %2684 = vmatmul.mubr.bf16.gmra.mrb[88].mxu1 %v1644_v6  ;;  %v1749_v6 = vpack.c.bf16 %v1189_v2, %v1173_v1  ;;  %v319_v1 = vld [vmem:[%s7842_s9 + $0x1a8] sm:$0xff] }
 0x227   : > { %3840 = vmatmul.mubr.bf16.gmra.mrb[88].mxu0 %v1652_v7  ;;  %2691 = vmatprep.mubr.bf16.mxu1 %v1661_v8  ;;  %v1164_v7 = vld [vmem:[%s7842_s9 + $0x1c10] sm:$0xff] }
 0x228   : > { %3847 = vmatprep.mubr.bf16.mxu0 %v1669_v9  ;;  %v1180_v8 = vld [vmem:[%s7842_s9 + $0x1c90] sm:$0xff] }
 0x229   : > { %v1172_v9 = vld [vmem:[%s7842_s9 + $0x1c50] sm:$0xff]  ;;  %v1740_v15 = vpack.c.bf16 %v1180_v8, %v1164_v7  ;;  %v2170_v7 = vpack.c.bf16 %v2027_v62, %v2026_v61  ;;  %v1311_v8 = vpack.c.bf16 %v319_v1, %v303_v63  ;;  %v2037_v62 = vld [vmem:[%s11214_s1 + $0x758] sm:$0xff]  ;;  %v382_v63 = vld [vmem:[%s7842_s9 + $0x3a0] sm:$0xff] }
 0x22a   : > { %v1748_v16 = vpack.c.bf16 %v1188_v10, %v1172_v9  ;;  %v1900_v9 = vld [vmem:[%s11214_s1 + $0x310] sm:$0xff]  ;;  %v1901_v10 = vld [vmem:[%s11214_s1 + $0x318] sm:$0xff]  ;;  %v374_v1 = vld [vmem:[%s7842_s9 + $0x360] sm:$0xff] }
 0x22b   : > { %v2036_v61 = vld [vmem:[%s11214_s1 + $0x750] sm:$0xff] }
 0x22e   : > { %2692 = vmatmul.mubr.bf16.gmra.mrb[92].mxu1 %v1660_v18  ;;  %v1765_v18 = vpack.c.bf16 %v1221_v14, %v1205_v13  ;;  %v2029_v13 = vld [vmem:[%s11214_s1 + $0x718] sm:$0xff]  ;;  %v302_v14 = vld [vmem:[%s7842_s9 + $0x120] sm:$0xff] }
 0x22f   : > { %3848 = vmatmul.mubr.bf16.gmra.mrb[92].mxu0 %v1668_v19  ;;  %2699 = vmatprep.mubr.bf16.mxu1 %v1677_v20  ;;  %v1196_v19 = vld [vmem:[%s7842_s9 + $0x1d10] sm:$0xff] }
 0x230   : > { %3855 = vmatprep.mubr.bf16.mxu0 %v1685_v21  ;;  %v1212_v20 = vld [vmem:[%s7842_s9 + $0x1d90] sm:$0xff] }
 0x231   : > { %v1204_v21 = vld [vmem:[%s7842_s9 + $0x1d50] sm:$0xff]  ;;  %v1756_v27 = vpack.c.bf16 %v1212_v20, %v1196_v19  ;;  %v335_v19 = vld [vmem:[%s7842_s9 + $0x228] sm:$0xff] }
 0x232   : > { %v1764_v28 = vpack.c.bf16 %v1220_v22, %v1204_v21  ;;  %v351_v20 = vld [vmem:[%s7842_s9 + $0x2a8] sm:$0xff]  ;;  %v2171_v22 = vpack.c.bf16 %v2029_v13, %v2028_v12  ;;  %v2038_v12 = vld [vmem:[%s11214_s1 + $0x760] sm:$0xff] }
 0x233   : > { %v343_v21 = vld [vmem:[%s7842_s9 + $0x268] sm:$0xff] }
 0x234   : > { %v2039_v13 = vld [vmem:[%s11214_s1 + $0x768] sm:$0xff] }
 0x236   : > { %2700 = vmatmul.mubr.bf16.gmra.mrb[96].mxu1 %v1676_v30  ;;  %v1781_v30 = vpack.c.bf16 %v1253_v26, %v1237_v25  ;;  %v1903_v25 = vld [vmem:[%s11214_s1 + $0x328] sm:$0xff] }
 0x237   : > { %3856 = vmatmul.mubr.bf16.gmra.mrb[96].mxu0 %v1684_v31  ;;  %2707 = vmatprep.mubr.bf16.mxu1 %v1693_v32  ;;  %v1228_v31 = vld [vmem:[%s7842_s9 + $0x1e10] sm:$0xff] }
 0x238   : > { %3863 = vmatprep.mubr.bf16.mxu0 %v1701_v33  ;;  %v1244_v32 = vld [vmem:[%s7842_s9 + $0x1e90] sm:$0xff] }
 0x239   : > { %v1236_v33 = vld [vmem:[%s7842_s9 + $0x1e50] sm:$0xff]  ;;  %v1772_v39 = vpack.c.bf16 %v1244_v32, %v1228_v31  ;;  %v1335_v31 = vpack.c.bf16 %v359_v23, %v343_v21  ;;  %v2108_v32 = vpack.c.bf16 %v1903_v25, %v1902_v24  ;;  %v398_v21 = vld [vmem:[%s7842_s9 + $0x420] sm:$0xff]  ;;  %v2041_v23 = vld [vmem:[%s11214_s1 + $0x778] sm:$0xff] }
 0x23a   : > { %v1780_v40 = vpack.c.bf16 %v1252_v34, %v1236_v33  ;;  %v1904_v34 = vld [vmem:[%s11214_s1 + $0x330] sm:$0xff]  ;;  %v414_v24 = vld [vmem:[%s7842_s9 + $0x4a0] sm:$0xff] }
 0x23b   : > { %v406_v25 = vld [vmem:[%s7842_s9 + $0x460] sm:$0xff] }
 0x23e   : > { %2708 = vmatmul.mubr.bf16.gmra.mrb[100].mxu1 %v1692_v42  ;;  %v1797_v42 = vpack.c.bf16 %v1285_v38, %v1269_v37  ;;  %v2032_v37 = vld [vmem:[%s11214_s1 + $0x730] sm:$0xff]  ;;  %v2033_v38 = vld [vmem:[%s11214_s1 + $0x738] sm:$0xff] }
 0x23f   : > { %3864 = vmatmul.mubr.bf16.gmra.mrb[100].mxu0 %v1700_v43  ;;  %2715 = vmatprep.mubr.bf16.mxu1 %v1709_v44  ;;  %v1260_v43 = vld [vmem:[%s7842_s9 + $0x1f10] sm:$0xff]  ;;  %v2173_v47 = vpack.c.bf16 %v2033_v38, %v2032_v37  ;;  %v2043_v37 = vld [vmem:[%s11214_s1 + $0x788] sm:$0xff] }
 0x240   : > { %3871 = vmatprep.mubr.bf16.mxu0 %v1717_v45  ;;  %v1276_v44 = vld [vmem:[%s7842_s9 + $0x1f90] sm:$0xff] }
 0x241   : > { %v1268_v45 = vld [vmem:[%s7842_s9 + $0x1f50] sm:$0xff]  ;;  %v1788_v51 = vpack.c.bf16 %v1276_v44, %v1260_v43  ;;  %v383_v43 = vld [vmem:[%s7842_s9 + $0x3a8] sm:$0xff] }
 0x242   : > { %v1796_v52 = vpack.c.bf16 %v1284_v46, %v1268_v45  ;;  %v375_v44 = vld [vmem:[%s7842_s9 + $0x368] sm:$0xff]  ;;  %v2109_v45 = vpack.c.bf16 %v1905_v35, %v1904_v34  ;;  %v1358_v35 = vpack.c.bf16 %v414_v24, %v398_v21  ;;  %v1921_v21 = vld [vmem:[%s11214_s1 + $0x3b8] sm:$0xff] }
 0x243   : > { %v391_v46 = vld [vmem:[%s7842_s9 + $0x3e8] sm:$0xff] }
 0x244   : > { %v1915_v34 = vld [vmem:[%s11214_s1 + $0x388] sm:$0xff] }
 0x245   : > { %v543_v24 = vld [vmem:[%s7842_s9 + $0x8a8] sm:$0xff] }
 0x246   : > { %2716 = vmatmul.mubr.bf16.gmra.mrb[104].mxu1 %v1708_v54  ;;  %v1303_v54 = vpack.c.bf16 %v295_v50, %v279_v49  ;;  %v1907_v49 = vld [vmem:[%s11214_s1 + $0x348] sm:$0xff] }
 0x247   : > { %3872 = vmatmul.mubr.bf16.gmra.mrb[104].mxu0 %v1716_v55  ;;  %2723 = vmatprep.mubr.bf16.mxu1 %v1725_v56  ;;  %v270_v55 = vld [vmem:[%s7842_s9 + $0x20] sm:$0xff] }
 0x248   : > { %3879 = vmatprep.mubr.bf16.mxu0 %v1733_v57  ;;  %v286_v56 = vld [vmem:[%s7842_s9 + $0xa0] sm:$0xff] }
 0x249   : > { %v278_v57 = vld [vmem:[%s7842_s9 + $0x60] sm:$0xff]  ;;  %v1294_v2 = vpack.c.bf16 %v286_v56, %v270_v55  ;;  %v1351_v55 = vpack.c.bf16 %v391_v46, %v375_v44  ;;  %v2110_v56 = vpack.c.bf16 %v1907_v49, %v1906_v48  ;;  %v1917_v44 = vld [vmem:[%s11214_s1 + $0x398] sm:$0xff]  ;;  %v2044_v46 = vld [vmem:[%s11214_s1 + $0x790] sm:$0xff] }
 0x24a   : > { %v446_v48 = vld [vmem:[%s7842_s9 + $0x5a0] sm:$0xff] }
 0x24b   : > { %v438_v49 = vld [vmem:[%s7842_s9 + $0x560] sm:$0xff] }
 0x24e   : > { %2724 = vmatmul.mubr.bf16.gmra.mrb[108].mxu1 %v1724_v3  ;;  %v311_v3 = vld [vmem:[%s7842_s9 + $0x168] sm:$0xff] }
 0x24f   : > { %3880 = vmatmul.mubr.bf16.gmra.mrb[108].mxu0 %v1732_v4  ;;  %2731 = vmatprep.mubr.bf16.mxu1 %v1741_v5  ;;  %v327_v4 = vld [vmem:[%s7842_s9 + $0x1e8] sm:$0xff]  ;;  %v1302_v5 = vpack.c.bf16 %v294_v58, %v278_v57  ;;  %v1908_v58 = vld [vmem:[%s11214_s1 + $0x350] sm:$0xff] }
 0x250   : > { %3887 = vmatprep.mubr.bf16.mxu0 %v1749_v6  ;;  %v2106_v6 = vpack.c.bf16 %v1899_v60, %v1898_v59  ;;  %v1319_v11 = vpack.c.bf16 %v327_v4, %v311_v3  ;;  %v1909_v59 = vld [vmem:[%s11214_s1 + $0x358] sm:$0xff]  ;;  %v366_v60 = vld [vmem:[%s7842_s9 + $0x320] sm:$0xff]  ;;  %v399_v3 = vld [vmem:[%s7842_s9 + $0x428] sm:$0xff] }
 0x251   : > { %v415_v4 = vld [vmem:[%s7842_s9 + $0x4a8] sm:$0xff] }
 0x256   : > { %2732 = vmatmul.mubr.bf16.gmra.mrb[112].mxu1 %v1740_v15  ;;  %v318_v15 = vld [vmem:[%s7842_s9 + $0x1a0] sm:$0xff] }
 0x257   : > { %3888 = vmatmul.mubr.bf16.gmra.mrb[112].mxu0 %v1748_v16  ;;  %2739 = vmatprep.mubr.bf16.mxu1 %v1757_v17  ;;  %v310_v16 = vld [vmem:[%s7842_s9 + $0x160] sm:$0xff]  ;;  %v1310_v26 = vpack.c.bf16 %v318_v15, %v302_v14  ;;  %v1359_v15 = vpack.c.bf16 %v415_v4, %v399_v3 }
 0x258   : > { %3895 = vmatprep.mubr.bf16.mxu0 %v1765_v18  ;;  %v326_v17 = vld [vmem:[%s7842_s9 + $0x1e0] sm:$0xff]  ;;  %v2107_v18 = vpack.c.bf16 %v1901_v10, %v1900_v9  ;;  %v1911_v10 = vld [vmem:[%s11214_s1 + $0x368] sm:$0xff] }
 0x259   : > { %v1910_v9 = vld [vmem:[%s11214_s1 + $0x360] sm:$0xff] }
 0x25a   : > { %v462_v4 = vld [vmem:[%s7842_s9 + $0x620] sm:$0xff] }
 0x25e   : > { %2740 = vmatmul.mubr.bf16.gmra.mrb[116].mxu1 %v1756_v27  ;;  %v2030_v27 = vld [vmem:[%s11214_s1 + $0x720] sm:$0xff] }
 0x25f   : > { %3896 = vmatmul.mubr.bf16.gmra.mrb[116].mxu0 %v1764_v28  ;;  %2747 = vmatprep.mubr.bf16.mxu1 %v1773_v29  ;;  %v2031_v28 = vld [vmem:[%s11214_s1 + $0x728] sm:$0xff]  ;;  %v1318_v29 = vpack.c.bf16 %v326_v17, %v310_v16  ;;  %v2112_v17 = vpack.c.bf16 %v1911_v10, %v1910_v9 }
 0x260   : > { %3903 = vmatprep.mubr.bf16.mxu0 %v1781_v30  ;;  %v1327_v30 = vpack.c.bf16 %v351_v20, %v335_v19  ;;  %v2172_v33 = vpack.c.bf16 %v2031_v28, %v2030_v27  ;;  %v1912_v19 = vld [vmem:[%s11214_s1 + $0x370] sm:$0xff]  ;;  %v1913_v20 = vld [vmem:[%s11214_s1 + $0x378] sm:$0xff]  ;;  %v431_v27 = vld [vmem:[%s7842_s9 + $0x528] sm:$0xff] }
 0x261   : > { %v447_v28 = vld [vmem:[%s7842_s9 + $0x5a8] sm:$0xff] }
 0x262   : > { %v511_v9 = vld [vmem:[%s7842_s9 + $0x7a8] sm:$0xff] }
 0x263   : > { %v503_v10 = vld [vmem:[%s7842_s9 + $0x768] sm:$0xff] }
 0x266   : > { %2748 = vmatmul.mubr.bf16.gmra.mrb[120].mxu1 %v1772_v39  ;;  %v350_v39 = vld [vmem:[%s7842_s9 + $0x2a0] sm:$0xff] }
 0x267   : > { %3904 = vmatmul.mubr.bf16.gmra.mrb[120].mxu0 %v1780_v40  ;;  %2755 = vmatprep.mubr.bf16.mxu1 %v1789_v41  ;;  %v342_v40 = vld [vmem:[%s7842_s9 + $0x260] sm:$0xff]  ;;  %v1326_v50 = vpack.c.bf16 %v350_v39, %v334_v36  ;;  %v1375_v39 = vpack.c.bf16 %v447_v28, %v431_v27  ;;  %v535_v27 = vld [vmem:[%s7842_s9 + $0x868] sm:$0xff] }
 0x268   : > { %3911 = vmatprep.mubr.bf16.mxu0 %v1797_v42  ;;  %v358_v41 = vld [vmem:[%s7842_s9 + $0x2e0] sm:$0xff]  ;;  %v367_v42 = vld [vmem:[%s7842_s9 + $0x328] sm:$0xff] }
 0x269   : > { %v2042_v36 = vld [vmem:[%s11214_s1 + $0x780] sm:$0xff]  ;;  %v551_v28 = vld [vmem:[%s7842_s9 + $0x8e8] sm:$0xff] }
 0x26e   : > { %2756 = vmatmul.mubr.bf16.gmra.mrb[124].mxu1 %v1788_v51  ;;  %v2034_v51 = vld [vmem:[%s11214_s1 + $0x740] sm:$0xff] }
 0x26f   : > { %3912 = vmatmul.mubr.bf16.gmra.mrb[124].mxu0 %v1796_v52  ;;  %2796 = vmatprep.mubr.bf16.mxu1 %v1295_v53  ;;  %v2035_v52 = vld [vmem:[%s11214_s1 + $0x748] sm:$0xff]  ;;  %v1334_v53 = vpack.c.bf16 %v358_v41, %v342_v40 }
 0x270   : > { %3952 = vmatprep.mubr.bf16.mxu0 %v1303_v54  ;;  %v1343_v54 = vpack.c.bf16 %v383_v43, %v367_v42  ;;  %v2174_v57 = vpack.c.bf16 %v2035_v52, %v2034_v51  ;;  %v2178_v42 = vpack.c.bf16 %v2043_v37, %v2042_v36  ;;  %v1916_v43 = vld [vmem:[%s11214_s1 + $0x390] sm:$0xff]  ;;  %v463_v51 = vld [vmem:[%s7842_s9 + $0x628] sm:$0xff]  ;;  %v534_v36 = vld [vmem:[%s7842_s9 + $0x860] sm:$0xff] }
 0x271   : > { %v479_v52 = vld [vmem:[%s7842_s9 + $0x6a8] sm:$0xff]  ;;  %v550_v37 = vld [vmem:[%s7842_s9 + $0x8e0] sm:$0xff] }
 0x276   : > { %2797 = vmatmul.mubr.bf16.vlgmr.msra.gmra.mrb[0].mxu1 %v1294_v2  ;;  %v390_v2 = vld [vmem:[%s7842_s9 + $0x3e0] sm:$0xff] }
 0x277   : > { %3953 = vmatmul.mubr.bf16.vlgmr.msra.gmra.mrb[0].mxu0 %v1302_v5  ;;  %3054 = vmatpush1.bf16.msra.mxu1 %v2106_v6  ;;  %v407_v5 = vld [vmem:[%s7842_s9 + $0x468] sm:$0xff]  ;;  %v2111_v6 = vpack.c.bf16 %v1909_v59, %v1908_v58  ;;  %v1350_v14 = vpack.c.bf16 %v390_v2, %v374_v1 }
 0x278   : > { %4210 = vmatpush1.bf16.msra.mxu0 %v2170_v7  ;;  %2804 = vmatprep.mubr.bf16.mxu1 %v1311_v8  ;;  %v423_v7 = vld [vmem:[%s7842_s9 + $0x4e8] sm:$0xff]  ;;  %v2175_v8 = vpack.c.bf16 %v2037_v62, %v2036_v61 }
 0x279   : > { %3960 = vmatprep.mubr.bf16.mxu0 %v1319_v11  ;;  %3055 = vmatprep.subr.bf16.mxu1 %v7731_v0  ;;  %v1342_v11 = vpack.c.bf16 %v382_v63, %v366_v60  ;;  %v1367_v16 = vpack.c.bf16 %v423_v7, %v407_v5  ;;  %v1919_v58 = vld [vmem:[%s11214_s1 + $0x3a8] sm:$0xff]  ;;  %v2046_v60 = vld [vmem:[%s11214_s1 + $0x7a0] sm:$0xff]  ;;  %v1391_v63 = vpack.c.bf16 %v479_v52, %v463_v51 }
 0x27a   : > { %4211 = vmatprep.subr.bf16.mxu0 %v7731_v0  ;;  %v2047_v61 = vld [vmem:[%s11214_s1 + $0x7a8] sm:$0xff]  ;;  %v478_v5 = vld [vmem:[%s7842_s9 + $0x6a0] sm:$0xff] }
 0x27b   : > { %3056 = vmatpush1.bf16.msra.mxu1 %v2107_v18  ;;  %v2176_v18 = vpack.c.bf16 %v2039_v13, %v2038_v12  ;;  %v2180_v3 = vpack.c.bf16 %v2047_v61, %v2046_v60  ;;  %v486_v7 = vld [vmem:[%s7842_s9 + $0x6e0] sm:$0xff]  ;;  %v1390_v12 = vpack.c.bf16 %v478_v5, %v462_v4  ;;  %v1923_v51 = vld [vmem:[%s11214_s1 + $0x3c8] sm:$0xff] }
 0x27c   : > { %4212 = vmatpush1.bf16.msra.mxu0 %v2171_v22  ;;  %3057 = vmatprep.subr.bf16.mxu1 %v7731_v0  ;;  %v2040_v22 = vld [vmem:[%s11214_s1 + $0x770] sm:$0xff]  ;;  %v2050_v52 = vld [vmem:[%s11214_s1 + $0x7c0] sm:$0xff]  ;;  %v623_v5 = vld [vmem:[%s7842_s9 + $0xb28] sm:$0xff] }
 0x27d   : > { %4213 = vmatprep.subr.bf16.mxu0 %v7731_v0  ;;  %v614_v4 = vld [vmem:[%s7842_s9 + $0xae0] sm:$0xff] }
 0x27e   : > { %2805 = vmatmul.mubr.bf16.gmra.mrb[4].mxu1 %v1310_v26  ;;  %v422_v26 = vld [vmem:[%s7842_s9 + $0x4e0] sm:$0xff] }
 0x27f   : > { %3961 = vmatmul.mubr.bf16.gmra.mrb[4].mxu0 %v1318_v29  ;;  %2812 = vmatprep.mubr.bf16.mxu1 %v1327_v30  ;;  %v439_v29 = vld [vmem:[%s7842_s9 + $0x568] sm:$0xff]  ;;  %v2113_v30 = vpack.c.bf16 %v1913_v20, %v1912_v19  ;;  %v1366_v38 = vpack.c.bf16 %v422_v26, %v406_v25  ;;  %v518_v19 = vld [vmem:[%s7842_s9 + $0x7e0] sm:$0xff]  ;;  %v1920_v20 = vld [vmem:[%s11214_s1 + $0x3b0] sm:$0xff] }
 0x280   : > { %3968 = vmatprep.mubr.bf16.mxu0 %v1335_v31  ;;  %3058 = vmatpush1.bf16.msra.mxu1 %v2108_v32  ;;  %v455_v31 = vld [vmem:[%s7842_s9 + $0x5e8] sm:$0xff]  ;;  %v2177_v32 = vpack.c.bf16 %v2041_v23, %v2040_v22  ;;  %v2048_v22 = vld [vmem:[%s11214_s1 + $0x7b0] sm:$0xff]  ;;  %v2117_v25 = vpack.c.bf16 %v1921_v21, %v1920_v20  ;;  %v2049_v26 = vld [vmem:[%s11214_s1 + $0x7b8] sm:$0xff] }
 0x281   : > { %4214 = vmatpush1.bf16.msra.mxu0 %v2172_v33  ;;  %3059 = vmatprep.subr.bf16.mxu1 %v7731_v0  ;;  %v1914_v33 = vld [vmem:[%s11214_s1 + $0x380] sm:$0xff]  ;;  %v1383_v40 = vpack.c.bf16 %v455_v31, %v439_v29  ;;  %v527_v23 = vld [vmem:[%s7842_s9 + $0x828] sm:$0xff]  ;;  %v2181_v29 = vpack.c.bf16 %v2049_v26, %v2048_v22 }
 0x282   : > { %4215 = vmatprep.subr.bf16.mxu0 %v7731_v0  ;;  %v2114_v41 = vpack.c.bf16 %v1915_v34, %v1914_v33  ;;  %v1431_v33 = vpack.c.bf16 %v551_v28, %v535_v27  ;;  %v526_v34 = vld [vmem:[%s7842_s9 + $0x820] sm:$0xff]  ;;  %v655_v20 = vld [vmem:[%s7842_s9 + $0xc28] sm:$0xff] }
 0x283   : > { %v671_v21 = vld [vmem:[%s7842_s9 + $0xca8] sm:$0xff] }
 0x284   : > { %3060 = vmatpush1.bf16.msra.mxu1 %v2109_v45  ;;  %v430_v45 = vld [vmem:[%s7842_s9 + $0x520] sm:$0xff] }
 0x285   : > { %4216 = vmatpush1.bf16.msra.mxu0 %v2173_v47  ;;  %3061 = vmatprep.subr.bf16.mxu1 %v7731_v0  ;;  %v2045_v47 = vld [vmem:[%s11214_s1 + $0x798] sm:$0xff]  ;;  %v1374_v59 = vpack.c.bf16 %v446_v48, %v430_v45  ;;  %v566_v48 = vld [vmem:[%s7842_s9 + $0x960] sm:$0xff] }
 0x286   : > { %2813 = vmatmul.mubr.bf16.gmra.mrb[8].mxu1 %v1326_v50  ;;  %4217 = vmatprep.subr.bf16.mxu0 %v7731_v0  ;;  %v454_v50 = vld [vmem:[%s7842_s9 + $0x5e0] sm:$0xff] }
 0x287   : > { %3969 = vmatmul.mubr.bf16.gmra.mrb[8].mxu0 %v1334_v53  ;;  %2820 = vmatprep.mubr.bf16.mxu1 %v1343_v54  ;;  %v471_v53 = vld [vmem:[%s7842_s9 + $0x668] sm:$0xff]  ;;  %v2115_v54 = vpack.c.bf16 %v1917_v44, %v1916_v43  ;;  %v1382_v62 = vpack.c.bf16 %v454_v50, %v438_v49  ;;  %v1430_v43 = vpack.c.bf16 %v550_v37, %v534_v36  ;;  %v582_v49 = vld [vmem:[%s7842_s9 + $0x9e0] sm:$0xff] }
 0x288   : > { %3976 = vmatprep.mubr.bf16.mxu0 %v1351_v55  ;;  %3062 = vmatpush1.bf16.msra.mxu1 %v2110_v56  ;;  %v487_v55 = vld [vmem:[%s7842_s9 + $0x6e8] sm:$0xff]  ;;  %v2179_v56 = vpack.c.bf16 %v2045_v47, %v2044_v46  ;;  %v558_v46 = vld [vmem:[%s7842_s9 + $0x920] sm:$0xff]  ;;  %v1446_v61 = vpack.c.bf16 %v582_v49, %v566_v48 }
 0x289   : > { %4218 = vmatpush1.bf16.msra.mxu0 %v2174_v57  ;;  %3063 = vmatprep.subr.bf16.mxu1 %v7731_v0  ;;  %v1918_v57 = vld [vmem:[%s11214_s1 + $0x3a0] sm:$0xff]  ;;  %v1399_v1 = vpack.c.bf16 %v487_v55, %v471_v53  ;;  %v591_v53 = vld [vmem:[%s7842_s9 + $0xa28] sm:$0xff] }
 0x28a   : > { %4219 = vmatprep.subr.bf16.mxu0 %v7731_v0  ;;  %v2116_v2 = vpack.c.bf16 %v1919_v58, %v1918_v57  ;;  %v574_v47 = vld [vmem:[%s7842_s9 + $0x9a0] sm:$0xff]  ;;  %v599_v57 = vld [vmem:[%s7842_s9 + $0xa68] sm:$0xff] }
 0x28b   : > { %v1922_v50 = vld [vmem:[%s11214_s1 + $0x3c0] sm:$0xff]  ;;  %v615_v58 = vld [vmem:[%s7842_s9 + $0xae8] sm:$0xff]  ;;  %v1438_v60 = vpack.c.bf16 %v574_v47, %v558_v46 }
 0x28c   : > { %3064 = vmatpush1.bf16.msra.mxu1 %v2111_v6  ;;  %v470_v6 = vld [vmem:[%s7842_s9 + $0x660] sm:$0xff]  ;;  %v2118_v55 = vpack.c.bf16 %v1923_v51, %v1922_v50  ;;  %v703_v36 = vld [vmem:[%s7842_s9 + $0xda8] sm:$0xff] }
 0x28d   : > { %4220 = vmatpush1.bf16.msra.mxu0 %v2175_v8  ;;  %3065 = vmatprep.subr.bf16.mxu1 %v7731_v0  ;;  %v495_v8 = vld [vmem:[%s7842_s9 + $0x728] sm:$0xff]  ;;  %v1398_v13 = vpack.c.bf16 %v486_v7, %v470_v6  ;;  %v710_v46 = vld [vmem:[%s7842_s9 + $0xde0] sm:$0xff] }
 0x28e   : > { %2821 = vmatmul.mubr.bf16.gmra.mrb[12].mxu1 %v1342_v11  ;;  %4221 = vmatprep.subr.bf16.mxu0 %v7731_v0  ;;  %v519_v11 = vld [vmem:[%s7842_s9 + $0x7e8] sm:$0xff]  ;;  %v1926_v47 = vld [vmem:[%s11214_s1 + $0x3e0] sm:$0xff] }
 0x28f   : > { %3977 = vmatmul.mubr.bf16.gmra.mrb[12].mxu0 %v1350_v14  ;;  %2828 = vmatprep.mubr.bf16.mxu1 %v1359_v15  ;;  %v1407_v14 = vpack.c.bf16 %v511_v9, %v495_v8  ;;  %v1415_v15 = vpack.c.bf16 %v519_v11, %v503_v10  ;;  %v639_v6 = vld [vmem:[%s7842_s9 + $0xba8] sm:$0xff]  ;;  %v2054_v49 = vld [vmem:[%s11214_s1 + $0x7e0] sm:$0xff] }
 0x290   : > { %3984 = vmatprep.mubr.bf16.mxu0 %v1367_v16  ;;  %3066 = vmatpush1.bf16.msra.mxu1 %v2112_v17  ;;  %v494_v16 = vld [vmem:[%s7842_s9 + $0x720] sm:$0xff]  ;;  %v631_v7 = vld [vmem:[%s7842_s9 + $0xb68] sm:$0xff]  ;;  %v1471_v11 = vpack.c.bf16 %v639_v6, %v623_v5 }
 0x291   : > { %4222 = vmatpush1.bf16.msra.mxu0 %v2176_v18  ;;  %3067 = vmatprep.subr.bf16.mxu1 %v7731_v0  ;;  %v510_v17 = vld [vmem:[%s7842_s9 + $0x7a0] sm:$0xff]  ;;  %v647_v8 = vld [vmem:[%s7842_s9 + $0xbe8] sm:$0xff] }
 0x292   : > { %4223 = vmatprep.subr.bf16.mxu0 %v7731_v0  ;;  %v502_v18 = vld [vmem:[%s7842_s9 + $0x760] sm:$0xff]  ;;  %v695_v37 = vld [vmem:[%s7842_s9 + $0xd68] sm:$0xff] }
 0x293   : > { %v1414_v31 = vpack.c.bf16 %v518_v19, %v502_v18  ;;  %v1925_v18 = vld [vmem:[%s11214_s1 + $0x3d8] sm:$0xff]  ;;  %v2052_v19 = vld [vmem:[%s11214_s1 + $0x7d0] sm:$0xff]  ;;  %v1927_v48 = vld [vmem:[%s11214_s1 + $0x3e8] sm:$0xff] }
 0x294   : > { %3068 = vmatpush1.bf16.msra.mxu1 %v2113_v30  ;;  %v1406_v30 = vpack.c.bf16 %v510_v17, %v494_v16  ;;  %v646_v16 = vld [vmem:[%s7842_s9 + $0xbe0] sm:$0xff]  ;;  %v1924_v17 = vld [vmem:[%s11214_s1 + $0x3d0] sm:$0xff]  ;;  %v719_v50 = vld [vmem:[%s7842_s9 + $0xe28] sm:$0xff] }
 0x295   : > { %4224 = vmatpush1.bf16.msra.mxu0 %v2177_v32  ;;  %3069 = vmatprep.subr.bf16.mxu1 %v7731_v0  ;;  %v1423_v32 = vpack.c.bf16 %v543_v24, %v527_v23  ;;  %v2119_v22 = vpack.c.bf16 %v1925_v18, %v1924_v17  ;;  %v2053_v23 = vld [vmem:[%s11214_s1 + $0x7d8] sm:$0xff]  ;;  %v663_v24 = vld [vmem:[%s7842_s9 + $0xc68] sm:$0xff] }
 0x296   : > { %2829 = vmatmul.mubr.bf16.gmra.mrb[16].mxu1 %v1358_v35  ;;  %4225 = vmatprep.subr.bf16.mxu0 %v7731_v0  ;;  %v542_v35 = vld [vmem:[%s7842_s9 + $0x8a0] sm:$0xff]  ;;  %v2183_v26 = vpack.c.bf16 %v2053_v23, %v2052_v19  ;;  %v735_v51 = vld [vmem:[%s7842_s9 + $0xea8] sm:$0xff]  ;;  %v2057_v19 = vld [vmem:[%s11214_s1 + $0x7f8] sm:$0xff] }
 0x297   : > { %3985 = vmatmul.mubr.bf16.gmra.mrb[16].mxu0 %v1366_v38  ;;  %2836 = vmatprep.mubr.bf16.mxu1 %v1375_v39  ;;  %v559_v38 = vld [vmem:[%s7842_s9 + $0x928] sm:$0xff] }
 0x298   : > { %3992 = vmatprep.mubr.bf16.mxu0 %v1383_v40  ;;  %3070 = vmatpush1.bf16.msra.mxu1 %v2114_v41  ;;  %v575_v39 = vld [vmem:[%s7842_s9 + $0x9a8] sm:$0xff] }
 0x299   : > { %4226 = vmatpush1.bf16.msra.mxu0 %v2178_v42  ;;  %3071 = vmatprep.subr.bf16.mxu1 %v7731_v0  ;;  %v567_v40 = vld [vmem:[%s7842_s9 + $0x968] sm:$0xff]  ;;  %v1422_v42 = vpack.c.bf16 %v542_v35, %v526_v34  ;;  %v1439_v44 = vpack.c.bf16 %v575_v39, %v559_v38  ;;  %v678_v34 = vld [vmem:[%s7842_s9 + $0xce0] sm:$0xff] }
 0x29a   : > { %4227 = vmatprep.subr.bf16.mxu0 %v7731_v0  ;;  %v583_v41 = vld [vmem:[%s7842_s9 + $0x9e8] sm:$0xff] }
 0x29b   : > { %v1447_v45 = vpack.c.bf16 %v583_v41, %v567_v40  ;;  %v687_v35 = vld [vmem:[%s7842_s9 + $0xd28] sm:$0xff] }
 0x29c   : > { %3072 = vmatpush1.bf16.msra.mxu1 %v2115_v54  ;;  %v607_v54 = vld [vmem:[%s7842_s9 + $0xaa8] sm:$0xff]  ;;  %v1503_v41 = vpack.c.bf16 %v703_v36, %v687_v35 }
 0x29d   : > { %4228 = vmatpush1.bf16.msra.mxu0 %v2179_v56  ;;  %3073 = vmatprep.subr.bf16.mxu1 %v7731_v0  ;;  %v2051_v56 = vld [vmem:[%s11214_s1 + $0x7c8] sm:$0xff] }
 0x29e   : > { %2837 = vmatmul.mubr.bf16.gmra.mrb[20].mxu1 %v1374_v59  ;;  %4229 = vmatprep.subr.bf16.mxu0 %v7731_v0  ;;  %v2182_v59 = vpack.c.bf16 %v2051_v56, %v2050_v52  ;;  %v711_v38 = vld [vmem:[%s7842_s9 + $0xde8] sm:$0xff]  ;;  %v2120_v52 = vpack.c.bf16 %v1927_v48, %v1926_v47 }
 0x29f   : > { %3993 = vmatmul.mubr.bf16.gmra.mrb[20].mxu0 %v1382_v62  ;;  %2844 = vmatprep.mubr.bf16.mxu1 %v1391_v63  ;;  %v1455_v62 = vpack.c.bf16 %v607_v54, %v591_v53  ;;  %v1463_v63 = vpack.c.bf16 %v615_v58, %v599_v57  ;;  %v2055_v53 = vld [vmem:[%s11214_s1 + $0x7e8] sm:$0xff] }
 0x2a0   : > { %4000 = vmatprep.mubr.bf16.mxu0 %v1399_v1  ;;  %3074 = vmatpush1.bf16.msra.mxu1 %v2116_v2  ;;  %v590_v1 = vld [vmem:[%s7842_s9 + $0xa20] sm:$0xff]  ;;  %v727_v54 = vld [vmem:[%s7842_s9 + $0xe68] sm:$0xff]  ;;  %v2184_v56 = vpack.c.bf16 %v2055_v53, %v2054_v49 }
 0x2a1   : > { %4230 = vmatpush1.bf16.msra.mxu0 %v2180_v3  ;;  %3075 = vmatprep.subr.bf16.mxu1 %v7731_v0  ;;  %v606_v2 = vld [vmem:[%s7842_s9 + $0xaa0] sm:$0xff]  ;;  %v775_v5 = vld [vmem:[%s7842_s9 + $0xfe8] sm:$0xff] }
 0x2a2   : > { %4231 = vmatprep.subr.bf16.mxu0 %v7731_v0  ;;  %v598_v3 = vld [vmem:[%s7842_s9 + $0xa60] sm:$0xff]  ;;  %v1454_v9 = vpack.c.bf16 %v606_v2, %v590_v1  ;;  %v751_v2 = vld [vmem:[%s7842_s9 + $0xf28] sm:$0xff] }
 0x2a3   : > { %v1462_v10 = vpack.c.bf16 %v614_v4, %v598_v3  ;;  %v742_v1 = vld [vmem:[%s7842_s9 + $0xee0] sm:$0xff]  ;;  %v767_v3 = vld [vmem:[%s7842_s9 + $0xfa8] sm:$0xff] }
 0x2a4   : > { %3076 = vmatpush1.bf16.msra.mxu1 %v2117_v25  ;;  %v679_v25 = vld [vmem:[%s7842_s9 + $0xce8] sm:$0xff]  ;;  %v854_v53 = vld [vmem:[%s7842_s9 + $0x1260] sm:$0xff] }
 0x2a5   : > { %4232 = vmatpush1.bf16.msra.mxu0 %v2181_v29  ;;  %3077 = vmatprep.subr.bf16.mxu1 %v7731_v0  ;;  %v1487_v29 = vpack.c.bf16 %v671_v21, %v655_v20  ;;  %v759_v4 = vld [vmem:[%s7842_s9 + $0xf68] sm:$0xff] }
 0x2a6   : > { %2845 = vmatmul.mubr.bf16.gmra.mrb[24].mxu1 %v1390_v12  ;;  %4233 = vmatprep.subr.bf16.mxu0 %v7731_v0  ;;  %v1479_v12 = vpack.c.bf16 %v647_v8, %v631_v7  ;;  %v1535_v7 = vpack.c.bf16 %v767_v3, %v751_v2  ;;  %v1543_v8 = vpack.c.bf16 %v775_v5, %v759_v4  ;;  %v799_v17 = vld [vmem:[%s7842_s9 + $0x10a8] sm:$0xff]  ;;  %v886_v2 = vld [vmem:[%s7842_s9 + $0x1360] sm:$0xff] }
 0x2a7   : > { %4001 = vmatmul.mubr.bf16.gmra.mrb[24].mxu0 %v1398_v13  ;;  %2852 = vmatprep.mubr.bf16.mxu1 %v1407_v14  ;;  %v622_v13 = vld [vmem:[%s7842_s9 + $0xb20] sm:$0xff]  ;;  %v791_v20 = vld [vmem:[%s7842_s9 + $0x1068] sm:$0xff] }
 0x2a8   : > { %4008 = vmatprep.mubr.bf16.mxu0 %v1415_v15  ;;  %3078 = vmatpush1.bf16.msra.mxu1 %v2118_v55  ;;  %v638_v14 = vld [vmem:[%s7842_s9 + $0xba0] sm:$0xff]  ;;  %v743_v55 = vld [vmem:[%s7842_s9 + $0xee8] sm:$0xff] }
 0x2a9   : > { %4234 = vmatpush1.bf16.msra.mxu0 %v2182_v59  ;;  %3079 = vmatprep.subr.bf16.mxu1 %v7731_v0  ;;  %v630_v15 = vld [vmem:[%s7842_s9 + $0xb60] sm:$0xff]  ;;  %v1470_v27 = vpack.c.bf16 %v638_v14, %v622_v13  ;;  %v1519_v59 = vpack.c.bf16 %v735_v51, %v719_v50  ;;  %v1928_v13 = vld [vmem:[%s11214_s1 + $0x3f0] sm:$0xff]  ;;  %v1929_v14 = vld [vmem:[%s11214_s1 + $0x3f8] sm:$0xff] }
 0x2aa   : > { %4235 = vmatprep.subr.bf16.mxu0 %v7731_v0  ;;  %v1478_v28 = vpack.c.bf16 %v646_v16, %v630_v15  ;;  %v2056_v15 = vld [vmem:[%s11214_s1 + $0x7f0] sm:$0xff]  ;;  %v783_v16 = vld [vmem:[%s7842_s9 + $0x1028] sm:$0xff]  ;;  %v2121_v18 = vpack.c.bf16 %v1929_v14, %v1928_v13  ;;  %v846_v51 = vld [vmem:[%s7842_s9 + $0x1220] sm:$0xff] }
 0x2ab   : > { %v807_v21 = vld [vmem:[%s7842_s9 + $0x10e8] sm:$0xff]  ;;  %v902_v3 = vld [vmem:[%s7842_s9 + $0x13e0] sm:$0xff] }
 0x2ac   : > { %3080 = vmatpush1.bf16.msra.mxu1 %v2119_v22  ;;  %v2185_v22 = vpack.c.bf16 %v2057_v19, %v2056_v15  ;;  %v911_v4 = vld [vmem:[%s7842_s9 + $0x1428] sm:$0xff]  ;;  %v918_v13 = vld [vmem:[%s7842_s9 + $0x1460] sm:$0xff] }
 0x2ad   : > { %4236 = vmatpush1.bf16.msra.mxu0 %v2183_v26  ;;  %3081 = vmatprep.subr.bf16.mxu1 %v7731_v0  ;;  %v1559_v26 = vpack.c.bf16 %v807_v21, %v791_v20  ;;  %v927_v5 = vld [vmem:[%s7842_s9 + $0x14a8] sm:$0xff]  ;;  %v934_v14 = vld [vmem:[%s7842_s9 + $0x14e0] sm:$0xff] }
 0x2ae   : > { %2853 = vmatmul.mubr.bf16.gmra.mrb[28].mxu1 %v1406_v30  ;;  %v1495_v30 = vpack.c.bf16 %v679_v25, %v663_v24  ;;  %4237 = vmatprep.subr.bf16.mxu0 %v7731_v0  ;;  %v1551_v25 = vpack.c.bf16 %v799_v17, %v783_v16  ;;  %v943_v15 = vld [vmem:[%s7842_s9 + $0x1528] sm:$0xff]  ;;  %v1622_v20 = vpack.c.bf16 %v934_v14, %v918_v13 }
 0x2af   : > { %4009 = vmatmul.mubr.bf16.gmra.mrb[28].mxu0 %v1414_v31  ;;  %2860 = vmatprep.mubr.bf16.mxu1 %v1423_v32  ;;  %v654_v31 = vld [vmem:[%s7842_s9 + $0xc20] sm:$0xff]  ;;  %v959_v16 = vld [vmem:[%s7842_s9 + $0x15a8] sm:$0xff] }
 0x2b0   : > { %4016 = vmatprep.mubr.bf16.mxu0 %v1431_v33  ;;  %v670_v32 = vld [vmem:[%s7842_s9 + $0xca0] sm:$0xff]  ;;  %3082 = vmatpush1.bf16.msra.mxu1 %v2120_v52  ;;  %v951_v17 = vld [vmem:[%s7842_s9 + $0x1568] sm:$0xff]  ;;  %v1631_v21 = vpack.c.bf16 %v959_v16, %v943_v15 }
 0x2b1   : > { %v662_v33 = vld [vmem:[%s7842_s9 + $0xc60] sm:$0xff]  ;;  %v1486_v39 = vpack.c.bf16 %v670_v32, %v654_v31  ;;  %4238 = vmatpush1.bf16.msra.mxu0 %v2184_v56  ;;  %3083 = vmatprep.subr.bf16.mxu1 %v7731_v0  ;;  %v815_v31 = vld [vmem:[%s7842_s9 + $0x1128] sm:$0xff] }
 0x2b2   : > { %v1494_v40 = vpack.c.bf16 %v678_v34, %v662_v33  ;;  %4239 = vmatprep.subr.bf16.mxu0 %v7731_v0  ;;  %v831_v32 = vld [vmem:[%s7842_s9 + $0x11a8] sm:$0xff]  ;;  %v862_v52 = vld [vmem:[%s7842_s9 + $0x12a0] sm:$0xff] }
 0x2b3   : > { %v823_v33 = vld [vmem:[%s7842_s9 + $0x1168] sm:$0xff] }
 0x2b4   : > { %3084 = vmatpush1.bf16.msra.mxu1 %v2121_v18  ;;  %v839_v34 = vld [vmem:[%s7842_s9 + $0x11e8] sm:$0xff] }
 0x2b5   : > { %4240 = vmatpush1.bf16.msra.mxu0 %v2185_v22  ;;  %v895_v56 = vld [vmem:[%s7842_s9 + $0x13a8] sm:$0xff] }
 0x2b6   : > { %2861 = vmatmul.mubr.bf16.gmra.mrb[32].mxu1 %v1422_v42  ;;  %v1511_v42 = vpack.c.bf16 %v711_v38, %v695_v37  ;;  %v1567_v37 = vpack.c.bf16 %v831_v32, %v815_v31  ;;  %v1575_v38 = vpack.c.bf16 %v839_v34, %v823_v33  ;;  %v967_v18 = vld [vmem:[%s7842_s9 + $0x15e8] sm:$0xff] }
 0x2b7   : > { %4017 = vmatmul.mubr.bf16.gmra.mrb[32].mxu0 %v1430_v43  ;;  %2868 = vmatprep.mubr.bf16.mxu1 %v1439_v44  ;;  %v686_v43 = vld [vmem:[%s7842_s9 + $0xd20] sm:$0xff]  ;;  %v1639_v22 = vpack.c.bf16 %v967_v18, %v951_v17  ;;  %v1111_v13 = vld [vmem:[%s7842_s9 + $0x1a68] sm:$0xff] }
 0x2b8   : > { %4024 = vmatprep.mubr.bf16.mxu0 %v1447_v45  ;;  %v702_v44 = vld [vmem:[%s7842_s9 + $0xda0] sm:$0xff]  ;;  %v1127_v14 = vld [vmem:[%s7842_s9 + $0x1ae8] sm:$0xff] }
 0x2b9   : > { %v694_v45 = vld [vmem:[%s7842_s9 + $0xd60] sm:$0xff]  ;;  %v1502_v57 = vpack.c.bf16 %v702_v44, %v686_v43  ;;  %v847_v43 = vld [vmem:[%s7842_s9 + $0x1228] sm:$0xff]  ;;  %v1719_v18 = vpack.c.bf16 %v1127_v14, %v1111_v13 }
 0x2ba   : > { %v1510_v58 = vpack.c.bf16 %v710_v46, %v694_v45  ;;  %v863_v44 = vld [vmem:[%s7842_s9 + $0x12a8] sm:$0xff] }
 0x2bb   : > { %v855_v45 = vld [vmem:[%s7842_s9 + $0x1268] sm:$0xff]  ;;  %v1583_v49 = vpack.c.bf16 %v863_v44, %v847_v43 }
 0x2bc   : > { %v871_v46 = vld [vmem:[%s7842_s9 + $0x12e8] sm:$0xff] }
 0x2bd   : > { %v1591_v50 = vpack.c.bf16 %v871_v46, %v855_v45 }
 0x2be   : > { %2869 = vmatmul.mubr.bf16.gmra.mrb[36].mxu1 %v1438_v60  ;;  %v1527_v60 = vpack.c.bf16 %v743_v55, %v727_v54  ;;  %v870_v54 = vld [vmem:[%s7842_s9 + $0x12e0] sm:$0xff]  ;;  %v879_v55 = vld [vmem:[%s7842_s9 + $0x1328] sm:$0xff] }
 0x2bf   : > { %4025 = vmatmul.mubr.bf16.gmra.mrb[36].mxu0 %v1446_v61  ;;  %2876 = vmatprep.mubr.bf16.mxu1 %v1455_v62  ;;  %v718_v61 = vld [vmem:[%s7842_s9 + $0xe20] sm:$0xff] }
 0x2c0   : > { %4032 = vmatprep.mubr.bf16.mxu0 %v1463_v63  ;;  %v734_v62 = vld [vmem:[%s7842_s9 + $0xea0] sm:$0xff] }
 0x2c1   : > { %v726_v63 = vld [vmem:[%s7842_s9 + $0xe60] sm:$0xff]  ;;  %v1518_v6 = vpack.c.bf16 %v734_v62, %v718_v61  ;;  %v1599_v61 = vpack.c.bf16 %v895_v56, %v879_v55 }
 0x2c2   : > { %v1526_v0 = vpack.c.bf16 %v742_v1, %v726_v63  ;;  %v878_v63 = vld [vmem:[%s7842_s9 + $0x1320] sm:$0xff] }
 0x2c3   : > { %v894_v1 = vld [vmem:[%s7842_s9 + $0x13a0] sm:$0xff] }
 0x2c6   : > { %2877 = vmatmul.mubr.bf16.gmra.mrb[40].mxu1 %v1454_v9  ;;  %v750_v9 = vld [vmem:[%s7842_s9 + $0xf20] sm:$0xff] }
 0x2c7   : > { %4033 = vmatmul.mubr.bf16.gmra.mrb[40].mxu0 %v1462_v10  ;;  %2884 = vmatprep.mubr.bf16.mxu1 %v1471_v11  ;;  %v766_v10 = vld [vmem:[%s7842_s9 + $0xfa0] sm:$0xff] }
 0x2c8   : > { %4040 = vmatprep.mubr.bf16.mxu0 %v1479_v12  ;;  %v758_v11 = vld [vmem:[%s7842_s9 + $0xf60] sm:$0xff]  ;;  %v1534_v23 = vpack.c.bf16 %v766_v10, %v750_v9  ;;  %v1615_v9 = vpack.c.bf16 %v927_v5, %v911_v4 }
 0x2c9   : > { %v774_v12 = vld [vmem:[%s7842_s9 + $0xfe0] sm:$0xff] }
 0x2ca   : > { %v1542_v24 = vpack.c.bf16 %v774_v12, %v758_v11  ;;  %v910_v11 = vld [vmem:[%s7842_s9 + $0x1420] sm:$0xff] }
 0x2cb   : > { %v926_v12 = vld [vmem:[%s7842_s9 + $0x14a0] sm:$0xff] }
 0x2cc   : > { %v1614_v19 = vpack.c.bf16 %v926_v12, %v910_v11  ;;  %v1103_v11 = vld [vmem:[%s7842_s9 + $0x1a28] sm:$0xff] }
 0x2cd   : > { %v1119_v12 = vld [vmem:[%s7842_s9 + $0x1aa8] sm:$0xff] }
 0x2ce   : > { %2885 = vmatmul.mubr.bf16.gmra.mrb[44].mxu1 %v1470_v27  ;;  %v782_v27 = vld [vmem:[%s7842_s9 + $0x1020] sm:$0xff]  ;;  %v1711_v17 = vpack.c.bf16 %v1119_v12, %v1103_v11 }
 0x2cf   : > { %4041 = vmatmul.mubr.bf16.gmra.mrb[44].mxu0 %v1478_v28  ;;  %2892 = vmatprep.mubr.bf16.mxu1 %v1487_v29  ;;  %v798_v28 = vld [vmem:[%s7842_s9 + $0x10a0] sm:$0xff] }
 0x2d0   : > { %4048 = vmatprep.mubr.bf16.mxu0 %v1495_v30  ;;  %v790_v29 = vld [vmem:[%s7842_s9 + $0x1060] sm:$0xff]  ;;  %v1550_v35 = vpack.c.bf16 %v798_v28, %v782_v27  ;;  %v975_v27 = vld [vmem:[%s7842_s9 + $0x1628] sm:$0xff] }
 0x2d1   : > { %v806_v30 = vld [vmem:[%s7842_s9 + $0x10e0] sm:$0xff]  ;;  %v991_v28 = vld [vmem:[%s7842_s9 + $0x16a8] sm:$0xff] }
 0x2d2   : > { %v1558_v36 = vpack.c.bf16 %v806_v30, %v790_v29  ;;  %v983_v29 = vld [vmem:[%s7842_s9 + $0x1668] sm:$0xff]  ;;  %v1647_v33 = vpack.c.bf16 %v991_v28, %v975_v27 }
 0x2d3   : > { %v999_v30 = vld [vmem:[%s7842_s9 + $0x16e8] sm:$0xff] }
 0x2d4   : > { %v1655_v34 = vpack.c.bf16 %v999_v30, %v983_v29 }
 0x2d6   : > { %2893 = vmatmul.mubr.bf16.gmra.mrb[48].mxu1 %v1486_v39  ;;  %v814_v39 = vld [vmem:[%s7842_s9 + $0x1120] sm:$0xff] }
 0x2d7   : > { %4049 = vmatmul.mubr.bf16.gmra.mrb[48].mxu0 %v1494_v40  ;;  %2900 = vmatprep.mubr.bf16.mxu1 %v1503_v41  ;;  %v830_v40 = vld [vmem:[%s7842_s9 + $0x11a0] sm:$0xff] }
 0x2d8   : > { %4056 = vmatprep.mubr.bf16.mxu0 %v1511_v42  ;;  %v822_v41 = vld [vmem:[%s7842_s9 + $0x1160] sm:$0xff]  ;;  %v1566_v47 = vpack.c.bf16 %v830_v40, %v814_v39  ;;  %v1007_v39 = vld [vmem:[%s7842_s9 + $0x1728] sm:$0xff] }
 0x2d9   : > { %v838_v42 = vld [vmem:[%s7842_s9 + $0x11e0] sm:$0xff]  ;;  %v1023_v40 = vld [vmem:[%s7842_s9 + $0x17a8] sm:$0xff] }
 0x2da   : > { %v1574_v48 = vpack.c.bf16 %v838_v42, %v822_v41  ;;  %v1015_v41 = vld [vmem:[%s7842_s9 + $0x1768] sm:$0xff]  ;;  %v1663_v45 = vpack.c.bf16 %v1023_v40, %v1007_v39 }
 0x2db   : > { %v1031_v42 = vld [vmem:[%s7842_s9 + $0x17e8] sm:$0xff] }
 0x2dc   : > { %v1671_v46 = vpack.c.bf16 %v1031_v42, %v1015_v41 }
 0x2de   : > { %2901 = vmatmul.mubr.bf16.gmra.mrb[52].mxu1 %v1502_v57  ;;  %v887_v57 = vld [vmem:[%s7842_s9 + $0x1368] sm:$0xff] }
 0x2df   : > { %4057 = vmatmul.mubr.bf16.gmra.mrb[52].mxu0 %v1510_v58  ;;  %2908 = vmatprep.mubr.bf16.mxu1 %v1519_v59  ;;  %v903_v58 = vld [vmem:[%s7842_s9 + $0x13e8] sm:$0xff]  ;;  %v1582_v59 = vpack.c.bf16 %v862_v52, %v846_v51 }
 0x2e0   : > { %4064 = vmatprep.mubr.bf16.mxu0 %v1527_v60  ;;  %v1590_v60 = vpack.c.bf16 %v870_v54, %v854_v53  ;;  %v1607_v62 = vpack.c.bf16 %v903_v58, %v887_v57  ;;  %v1039_v51 = vld [vmem:[%s7842_s9 + $0x1828] sm:$0xff] }
 0x2e1   : > { %v1055_v52 = vld [vmem:[%s7842_s9 + $0x18a8] sm:$0xff] }
 0x2e2   : > { %v1047_v53 = vld [vmem:[%s7842_s9 + $0x1868] sm:$0xff]  ;;  %v1679_v57 = vpack.c.bf16 %v1055_v52, %v1039_v51 }
 0x2e3   : > { %v1063_v54 = vld [vmem:[%s7842_s9 + $0x18e8] sm:$0xff] }
 0x2e4   : > { %v1687_v58 = vpack.c.bf16 %v1063_v54, %v1047_v53 }
 0x2e6   : > { %2909 = vmatmul.mubr.bf16.gmra.mrb[56].mxu1 %v1518_v6  ;;  %v919_v6 = vld [vmem:[%s7842_s9 + $0x1468] sm:$0xff] }
 0x2e7   : > { %4065 = vmatmul.mubr.bf16.gmra.mrb[56].mxu0 %v1526_v0  ;;  %2916 = vmatprep.mubr.bf16.mxu1 %v1535_v7  ;;  %v935_v0 = vld [vmem:[%s7842_s9 + $0x14e8] sm:$0xff]  ;;  %v1598_v7 = vpack.c.bf16 %v894_v1, %v878_v63 }
 0x2e8   : > { %4072 = vmatprep.mubr.bf16.mxu0 %v1543_v8  ;;  %v1606_v8 = vpack.c.bf16 %v902_v3, %v886_v2  ;;  %v1623_v10 = vpack.c.bf16 %v935_v0, %v919_v6  ;;  %v1071_v63 = vld [vmem:[%s7842_s9 + $0x1928] sm:$0xff] }
 0x2e9   : > { %v1087_v1 = vld [vmem:[%s7842_s9 + $0x19a8] sm:$0xff] }
 0x2ea   : > { %v1079_v2 = vld [vmem:[%s7842_s9 + $0x1968] sm:$0xff]  ;;  %v1695_v6 = vpack.c.bf16 %v1087_v1, %v1071_v63 }
 0x2eb   : > { %v1095_v3 = vld [vmem:[%s7842_s9 + $0x19e8] sm:$0xff] }
 0x2ec   : > { %v1703_v0 = vpack.c.bf16 %v1095_v3, %v1079_v2 }
 0x2ee   : > { %2917 = vmatmul.mubr.bf16.gmra.mrb[60].mxu1 %v1534_v23  ;;  %v942_v23 = vld [vmem:[%s7842_s9 + $0x1520] sm:$0xff] }
 0x2ef   : > { %4073 = vmatmul.mubr.bf16.gmra.mrb[60].mxu0 %v1542_v24  ;;  %2924 = vmatprep.mubr.bf16.mxu1 %v1551_v25  ;;  %v958_v24 = vld [vmem:[%s7842_s9 + $0x15a0] sm:$0xff] }
 0x2f0   : > { %4080 = vmatprep.mubr.bf16.mxu0 %v1559_v26  ;;  %v950_v25 = vld [vmem:[%s7842_s9 + $0x1560] sm:$0xff]  ;;  %v1630_v31 = vpack.c.bf16 %v958_v24, %v942_v23  ;;  %v1135_v23 = vld [vmem:[%s7842_s9 + $0x1b28] sm:$0xff] }
 0x2f1   : > { %v966_v26 = vld [vmem:[%s7842_s9 + $0x15e0] sm:$0xff]  ;;  %v1151_v24 = vld [vmem:[%s7842_s9 + $0x1ba8] sm:$0xff] }
 0x2f2   : > { %v1638_v32 = vpack.c.bf16 %v966_v26, %v950_v25  ;;  %v1143_v25 = vld [vmem:[%s7842_s9 + $0x1b68] sm:$0xff]  ;;  %v1727_v29 = vpack.c.bf16 %v1151_v24, %v1135_v23 }
 0x2f3   : > { %v1159_v26 = vld [vmem:[%s7842_s9 + $0x1be8] sm:$0xff] }
 0x2f4   : > { %v1735_v30 = vpack.c.bf16 %v1159_v26, %v1143_v25 }
 0x2f6   : > { %2925 = vmatmul.mubr.bf16.gmra.mrb[64].mxu1 %v1550_v35  ;;  %v974_v35 = vld [vmem:[%s7842_s9 + $0x1620] sm:$0xff] }
 0x2f7   : > { %4081 = vmatmul.mubr.bf16.gmra.mrb[64].mxu0 %v1558_v36  ;;  %2932 = vmatprep.mubr.bf16.mxu1 %v1567_v37  ;;  %v990_v36 = vld [vmem:[%s7842_s9 + $0x16a0] sm:$0xff] }
 0x2f8   : > { %4088 = vmatprep.mubr.bf16.mxu0 %v1575_v38  ;;  %v982_v37 = vld [vmem:[%s7842_s9 + $0x1660] sm:$0xff]  ;;  %v1646_v43 = vpack.c.bf16 %v990_v36, %v974_v35  ;;  %v1167_v35 = vld [vmem:[%s7842_s9 + $0x1c28] sm:$0xff] }
 0x2f9   : > { %v998_v38 = vld [vmem:[%s7842_s9 + $0x16e0] sm:$0xff]  ;;  %v1183_v36 = vld [vmem:[%s7842_s9 + $0x1ca8] sm:$0xff] }
 0x2fa   : > { %v1654_v44 = vpack.c.bf16 %v998_v38, %v982_v37  ;;  %v1175_v37 = vld [vmem:[%s7842_s9 + $0x1c68] sm:$0xff]  ;;  %v1743_v41 = vpack.c.bf16 %v1183_v36, %v1167_v35 }
 0x2fb   : > { %v1191_v38 = vld [vmem:[%s7842_s9 + $0x1ce8] sm:$0xff] }
 0x2fc   : > { %v1751_v42 = vpack.c.bf16 %v1191_v38, %v1175_v37 }
 0x2fe   : > { %2933 = vmatmul.mubr.bf16.gmra.mrb[68].mxu1 %v1566_v47  ;;  %v1006_v47 = vld [vmem:[%s7842_s9 + $0x1720] sm:$0xff] }
 0x2ff   : > { %4089 = vmatmul.mubr.bf16.gmra.mrb[68].mxu0 %v1574_v48  ;;  %2940 = vmatprep.mubr.bf16.mxu1 %v1583_v49  ;;  %v1022_v48 = vld [vmem:[%s7842_s9 + $0x17a0] sm:$0xff] }
 0x300   : > { %4096 = vmatprep.mubr.bf16.mxu0 %v1591_v50  ;;  %v1014_v49 = vld [vmem:[%s7842_s9 + $0x1760] sm:$0xff]  ;;  %v1662_v55 = vpack.c.bf16 %v1022_v48, %v1006_v47  ;;  %v1199_v47 = vld [vmem:[%s7842_s9 + $0x1d28] sm:$0xff] }
 0x301   : > { %v1030_v50 = vld [vmem:[%s7842_s9 + $0x17e0] sm:$0xff]  ;;  %v1215_v48 = vld [vmem:[%s7842_s9 + $0x1da8] sm:$0xff] }
 0x302   : > { %v1670_v56 = vpack.c.bf16 %v1030_v50, %v1014_v49  ;;  %v1207_v49 = vld [vmem:[%s7842_s9 + $0x1d68] sm:$0xff]  ;;  %v1759_v53 = vpack.c.bf16 %v1215_v48, %v1199_v47 }
 0x303   : > { %v1223_v50 = vld [vmem:[%s7842_s9 + $0x1de8] sm:$0xff] }
 0x304   : > { %v1767_v54 = vpack.c.bf16 %v1223_v50, %v1207_v49 }
 0x306   : > { %2941 = vmatmul.mubr.bf16.gmra.mrb[72].mxu1 %v1582_v59  ;;  %v1038_v59 = vld [vmem:[%s7842_s9 + $0x1820] sm:$0xff] }
 0x307   : > { %4097 = vmatmul.mubr.bf16.gmra.mrb[72].mxu0 %v1590_v60  ;;  %2948 = vmatprep.mubr.bf16.mxu1 %v1599_v61  ;;  %v1054_v60 = vld [vmem:[%s7842_s9 + $0x18a0] sm:$0xff] }
 0x308   : > { %4104 = vmatprep.mubr.bf16.mxu0 %v1607_v62  ;;  %v1046_v61 = vld [vmem:[%s7842_s9 + $0x1860] sm:$0xff]  ;;  %v1678_v4 = vpack.c.bf16 %v1054_v60, %v1038_v59  ;;  %v1231_v59 = vld [vmem:[%s7842_s9 + $0x1e28] sm:$0xff] }
 0x309   : > { %v1062_v62 = vld [vmem:[%s7842_s9 + $0x18e0] sm:$0xff]  ;;  %v1247_v60 = vld [vmem:[%s7842_s9 + $0x1ea8] sm:$0xff] }
 0x30a   : > { %v1686_v5 = vpack.c.bf16 %v1062_v62, %v1046_v61  ;;  %v1239_v61 = vld [vmem:[%s7842_s9 + $0x1e68] sm:$0xff]  ;;  %v1775_v2 = vpack.c.bf16 %v1247_v60, %v1231_v59 }
 0x30b   : > { %v1255_v62 = vld [vmem:[%s7842_s9 + $0x1ee8] sm:$0xff] }
 0x30c   : > { %v1783_v3 = vpack.c.bf16 %v1255_v62, %v1239_v61 }
 0x30e   : > { %2949 = vmatmul.mubr.bf16.gmra.mrb[76].mxu1 %v1598_v7  ;;  %v1070_v7 = vld [vmem:[%s7842_s9 + $0x1920] sm:$0xff] }
 0x30f   : > { %4105 = vmatmul.mubr.bf16.gmra.mrb[76].mxu0 %v1606_v8  ;;  %2956 = vmatprep.mubr.bf16.mxu1 %v1615_v9  ;;  %v1086_v8 = vld [vmem:[%s7842_s9 + $0x19a0] sm:$0xff] }
 0x310   : > { %4112 = vmatprep.mubr.bf16.mxu0 %v1623_v10  ;;  %v1078_v9 = vld [vmem:[%s7842_s9 + $0x1960] sm:$0xff]  ;;  %v1694_v15 = vpack.c.bf16 %v1086_v8, %v1070_v7  ;;  %v1263_v7 = vld [vmem:[%s7842_s9 + $0x1f28] sm:$0xff] }
 0x311   : > { %v1094_v10 = vld [vmem:[%s7842_s9 + $0x19e0] sm:$0xff]  ;;  %v1279_v8 = vld [vmem:[%s7842_s9 + $0x1fa8] sm:$0xff] }
 0x312   : > { %v1702_v16 = vpack.c.bf16 %v1094_v10, %v1078_v9  ;;  %v1271_v9 = vld [vmem:[%s7842_s9 + $0x1f68] sm:$0xff]  ;;  %v1791_v13 = vpack.c.bf16 %v1279_v8, %v1263_v7 }
 0x313   : > { %v1287_v10 = vld [vmem:[%s7842_s9 + $0x1fe8] sm:$0xff] }
 0x314   : > { %v1799_v14 = vpack.c.bf16 %v1287_v10, %v1271_v9 }
 0x316   : > { %2957 = vmatmul.mubr.bf16.gmra.mrb[80].mxu1 %v1614_v19  ;;  %v1102_v19 = vld [vmem:[%s7842_s9 + $0x1a20] sm:$0xff] }
 0x317   : > { %4113 = vmatmul.mubr.bf16.gmra.mrb[80].mxu0 %v1622_v20  ;;  %2964 = vmatprep.mubr.bf16.mxu1 %v1631_v21  ;;  %v1118_v20 = vld [vmem:[%s7842_s9 + $0x1aa0] sm:$0xff] }
 0x318   : > { %4120 = vmatprep.mubr.bf16.mxu0 %v1639_v22  ;;  %v1110_v21 = vld [vmem:[%s7842_s9 + $0x1a60] sm:$0xff]  ;;  %v1710_v27 = vpack.c.bf16 %v1118_v20, %v1102_v19  ;;  %v273_v19 = vld [vmem:[%s7842_s9 + $0x38] sm:$0xff] }
 0x319   : > { %v1126_v22 = vld [vmem:[%s7842_s9 + $0x1ae0] sm:$0xff]  ;;  %v289_v20 = vld [vmem:[%s7842_s9 + $0xb8] sm:$0xff] }
 0x31a   : > { %v1718_v28 = vpack.c.bf16 %v1126_v22, %v1110_v21  ;;  %v281_v21 = vld [vmem:[%s7842_s9 + $0x78] sm:$0xff]  ;;  %v1297_v25 = vpack.c.bf16 %v289_v20, %v273_v19 }
 0x31b   : > { %v297_v22 = vld [vmem:[%s7842_s9 + $0xf8] sm:$0xff] }
 0x31c   : > { %v1305_v26 = vpack.c.bf16 %v297_v22, %v281_v21 }
 0x31e   : > { %2965 = vmatmul.mubr.bf16.gmra.mrb[84].mxu1 %v1630_v31  ;;  %v1134_v31 = vld [vmem:[%s7842_s9 + $0x1b20] sm:$0xff] }
 0x31f   : > { %4121 = vmatmul.mubr.bf16.gmra.mrb[84].mxu0 %v1638_v32  ;;  %2972 = vmatprep.mubr.bf16.mxu1 %v1647_v33  ;;  %v1150_v32 = vld [vmem:[%s7842_s9 + $0x1ba0] sm:$0xff] }
 0x320   : > { %4128 = vmatprep.mubr.bf16.mxu0 %v1655_v34  ;;  %v1142_v33 = vld [vmem:[%s7842_s9 + $0x1b60] sm:$0xff]  ;;  %v1726_v39 = vpack.c.bf16 %v1150_v32, %v1134_v31  ;;  %v305_v31 = vld [vmem:[%s7842_s9 + $0x138] sm:$0xff] }
 0x321   : > { %v1158_v34 = vld [vmem:[%s7842_s9 + $0x1be0] sm:$0xff]  ;;  %v321_v32 = vld [vmem:[%s7842_s9 + $0x1b8] sm:$0xff] }
 0x322   : > { %v1734_v40 = vpack.c.bf16 %v1158_v34, %v1142_v33  ;;  %v313_v33 = vld [vmem:[%s7842_s9 + $0x178] sm:$0xff]  ;;  %v1313_v37 = vpack.c.bf16 %v321_v32, %v305_v31 }
 0x323   : > { %v329_v34 = vld [vmem:[%s7842_s9 + $0x1f8] sm:$0xff] }
 0x324   : > { %v1321_v38 = vpack.c.bf16 %v329_v34, %v313_v33 }
 0x326   : > { %2973 = vmatmul.mubr.bf16.gmra.mrb[88].mxu1 %v1646_v43  ;;  %v1166_v43 = vld [vmem:[%s7842_s9 + $0x1c20] sm:$0xff] }
 0x327   : > { %4129 = vmatmul.mubr.bf16.gmra.mrb[88].mxu0 %v1654_v44  ;;  %2980 = vmatprep.mubr.bf16.mxu1 %v1663_v45  ;;  %v1182_v44 = vld [vmem:[%s7842_s9 + $0x1ca0] sm:$0xff] }
 0x328   : > { %4136 = vmatprep.mubr.bf16.mxu0 %v1671_v46  ;;  %v1174_v45 = vld [vmem:[%s7842_s9 + $0x1c60] sm:$0xff]  ;;  %v1742_v51 = vpack.c.bf16 %v1182_v44, %v1166_v43  ;;  %v337_v43 = vld [vmem:[%s7842_s9 + $0x238] sm:$0xff] }
 0x329   : > { %v1190_v46 = vld [vmem:[%s7842_s9 + $0x1ce0] sm:$0xff]  ;;  %v353_v44 = vld [vmem:[%s7842_s9 + $0x2b8] sm:$0xff] }
 0x32a   : > { %v1750_v52 = vpack.c.bf16 %v1190_v46, %v1174_v45  ;;  %v345_v45 = vld [vmem:[%s7842_s9 + $0x278] sm:$0xff]  ;;  %v1329_v49 = vpack.c.bf16 %v353_v44, %v337_v43 }
 0x32b   : > { %v361_v46 = vld [vmem:[%s7842_s9 + $0x2f8] sm:$0xff] }
 0x32c   : > { %v1337_v50 = vpack.c.bf16 %v361_v46, %v345_v45 }
 0x32e   : > { %2981 = vmatmul.mubr.bf16.gmra.mrb[92].mxu1 %v1662_v55  ;;  %v1198_v55 = vld [vmem:[%s7842_s9 + $0x1d20] sm:$0xff] }
 0x32f   : > { %4137 = vmatmul.mubr.bf16.gmra.mrb[92].mxu0 %v1670_v56  ;;  %2988 = vmatprep.mubr.bf16.mxu1 %v1679_v57  ;;  %v1214_v56 = vld [vmem:[%s7842_s9 + $0x1da0] sm:$0xff] }
 0x330   : > { %4144 = vmatprep.mubr.bf16.mxu0 %v1687_v58  ;;  %v1206_v57 = vld [vmem:[%s7842_s9 + $0x1d60] sm:$0xff]  ;;  %v1758_v63 = vpack.c.bf16 %v1214_v56, %v1198_v55  ;;  %v369_v55 = vld [vmem:[%s7842_s9 + $0x338] sm:$0xff] }
 0x331   : > { %v1222_v58 = vld [vmem:[%s7842_s9 + $0x1de0] sm:$0xff]  ;;  %v385_v56 = vld [vmem:[%s7842_s9 + $0x3b8] sm:$0xff] }
 0x332   : > { %v1766_v1 = vpack.c.bf16 %v1222_v58, %v1206_v57  ;;  %v377_v57 = vld [vmem:[%s7842_s9 + $0x378] sm:$0xff]  ;;  %v1345_v61 = vpack.c.bf16 %v385_v56, %v369_v55 }
 0x333   : > { %v393_v58 = vld [vmem:[%s7842_s9 + $0x3f8] sm:$0xff] }
 0x334   : > { %v1353_v62 = vpack.c.bf16 %v393_v58, %v377_v57 }
 0x336   : > { %2989 = vmatmul.mubr.bf16.gmra.mrb[96].mxu1 %v1678_v4  ;;  %v1230_v4 = vld [vmem:[%s7842_s9 + $0x1e20] sm:$0xff] }
 0x337   : > { %4145 = vmatmul.mubr.bf16.gmra.mrb[96].mxu0 %v1686_v5  ;;  %2996 = vmatprep.mubr.bf16.mxu1 %v1695_v6  ;;  %v1246_v5 = vld [vmem:[%s7842_s9 + $0x1ea0] sm:$0xff] }
 0x338   : > { %4152 = vmatprep.mubr.bf16.mxu0 %v1703_v0  ;;  %v1238_v6 = vld [vmem:[%s7842_s9 + $0x1e60] sm:$0xff]  ;;  %v1774_v11 = vpack.c.bf16 %v1246_v5, %v1230_v4  ;;  %v401_v4 = vld [vmem:[%s7842_s9 + $0x438] sm:$0xff] }
 0x339   : > { %v1254_v0 = vld [vmem:[%s7842_s9 + $0x1ee0] sm:$0xff]  ;;  %v417_v5 = vld [vmem:[%s7842_s9 + $0x4b8] sm:$0xff] }
 0x33a   : > { %v1782_v12 = vpack.c.bf16 %v1254_v0, %v1238_v6  ;;  %v409_v6 = vld [vmem:[%s7842_s9 + $0x478] sm:$0xff]  ;;  %v1361_v9 = vpack.c.bf16 %v417_v5, %v401_v4 }
 0x33b   : > { %v425_v0 = vld [vmem:[%s7842_s9 + $0x4f8] sm:$0xff] }
 0x33c   : > { %v1369_v10 = vpack.c.bf16 %v425_v0, %v409_v6 }
 0x33e   : > { %2997 = vmatmul.mubr.bf16.gmra.mrb[100].mxu1 %v1694_v15  ;;  %v1262_v15 = vld [vmem:[%s7842_s9 + $0x1f20] sm:$0xff] }
 0x33f   : > { %4153 = vmatmul.mubr.bf16.gmra.mrb[100].mxu0 %v1702_v16  ;;  %3004 = vmatprep.mubr.bf16.mxu1 %v1711_v17  ;;  %v1278_v16 = vld [vmem:[%s7842_s9 + $0x1fa0] sm:$0xff] }
 0x340   : > { %4160 = vmatprep.mubr.bf16.mxu0 %v1719_v18  ;;  %v1270_v17 = vld [vmem:[%s7842_s9 + $0x1f60] sm:$0xff]  ;;  %v1790_v23 = vpack.c.bf16 %v1278_v16, %v1262_v15  ;;  %v433_v15 = vld [vmem:[%s7842_s9 + $0x538] sm:$0xff] }
 0x341   : > { %v1286_v18 = vld [vmem:[%s7842_s9 + $0x1fe0] sm:$0xff]  ;;  %v449_v16 = vld [vmem:[%s7842_s9 + $0x5b8] sm:$0xff] }
 0x342   : > { %v1798_v24 = vpack.c.bf16 %v1286_v18, %v1270_v17  ;;  %v441_v17 = vld [vmem:[%s7842_s9 + $0x578] sm:$0xff]  ;;  %v1377_v21 = vpack.c.bf16 %v449_v16, %v433_v15 }
 0x343   : > { %v457_v18 = vld [vmem:[%s7842_s9 + $0x5f8] sm:$0xff] }
 0x344   : > { %v1385_v22 = vpack.c.bf16 %v457_v18, %v441_v17 }
 0x346   : > { %3005 = vmatmul.mubr.bf16.gmra.mrb[104].mxu1 %v1710_v27  ;;  %v272_v27 = vld [vmem:[%s7842_s9 + $0x30] sm:$0xff] }
 0x347   : > { %4161 = vmatmul.mubr.bf16.gmra.mrb[104].mxu0 %v1718_v28  ;;  %3012 = vmatprep.mubr.bf16.mxu1 %v1727_v29  ;;  %v288_v28 = vld [vmem:[%s7842_s9 + $0xb0] sm:$0xff] }
 0x348   : > { %4168 = vmatprep.mubr.bf16.mxu0 %v1735_v30  ;;  %v280_v29 = vld [vmem:[%s7842_s9 + $0x70] sm:$0xff]  ;;  %v1296_v35 = vpack.c.bf16 %v288_v28, %v272_v27  ;;  %v465_v27 = vld [vmem:[%s7842_s9 + $0x638] sm:$0xff] }
 0x349   : > { %v296_v30 = vld [vmem:[%s7842_s9 + $0xf0] sm:$0xff]  ;;  %v481_v28 = vld [vmem:[%s7842_s9 + $0x6b8] sm:$0xff] }
 0x34a   : > { %v1304_v36 = vpack.c.bf16 %v296_v30, %v280_v29  ;;  %v473_v29 = vld [vmem:[%s7842_s9 + $0x678] sm:$0xff]  ;;  %v1393_v33 = vpack.c.bf16 %v481_v28, %v465_v27 }
 0x34b   : > { %v489_v30 = vld [vmem:[%s7842_s9 + $0x6f8] sm:$0xff] }
 0x34c   : > { %v1401_v34 = vpack.c.bf16 %v489_v30, %v473_v29 }
 0x34e   : > { %3013 = vmatmul.mubr.bf16.gmra.mrb[108].mxu1 %v1726_v39  ;;  %v304_v39 = vld [vmem:[%s7842_s9 + $0x130] sm:$0xff] }
 0x34f   : > { %4169 = vmatmul.mubr.bf16.gmra.mrb[108].mxu0 %v1734_v40  ;;  %3020 = vmatprep.mubr.bf16.mxu1 %v1743_v41  ;;  %v320_v40 = vld [vmem:[%s7842_s9 + $0x1b0] sm:$0xff] }
 0x350   : > { %4176 = vmatprep.mubr.bf16.mxu0 %v1751_v42  ;;  %v312_v41 = vld [vmem:[%s7842_s9 + $0x170] sm:$0xff]  ;;  %v1312_v47 = vpack.c.bf16 %v320_v40, %v304_v39  ;;  %v497_v39 = vld [vmem:[%s7842_s9 + $0x738] sm:$0xff] }
 0x351   : > { %v328_v42 = vld [vmem:[%s7842_s9 + $0x1f0] sm:$0xff]  ;;  %v513_v40 = vld [vmem:[%s7842_s9 + $0x7b8] sm:$0xff] }
 0x352   : > { %v1320_v48 = vpack.c.bf16 %v328_v42, %v312_v41  ;;  %v505_v41 = vld [vmem:[%s7842_s9 + $0x778] sm:$0xff]  ;;  %v1409_v45 = vpack.c.bf16 %v513_v40, %v497_v39 }
 0x353   : > { %v521_v42 = vld [vmem:[%s7842_s9 + $0x7f8] sm:$0xff] }
 0x354   : > { %v1417_v46 = vpack.c.bf16 %v521_v42, %v505_v41 }
 0x356   : > { %3021 = vmatmul.mubr.bf16.gmra.mrb[112].mxu1 %v1742_v51  ;;  %v336_v51 = vld [vmem:[%s7842_s9 + $0x230] sm:$0xff] }
 0x357   : > { %4177 = vmatmul.mubr.bf16.gmra.mrb[112].mxu0 %v1750_v52  ;;  %3028 = vmatprep.mubr.bf16.mxu1 %v1759_v53  ;;  %v352_v52 = vld [vmem:[%s7842_s9 + $0x2b0] sm:$0xff] }
 0x358   : > { %4184 = vmatprep.mubr.bf16.mxu0 %v1767_v54  ;;  %v344_v53 = vld [vmem:[%s7842_s9 + $0x270] sm:$0xff]  ;;  %v1328_v59 = vpack.c.bf16 %v352_v52, %v336_v51  ;;  %v529_v51 = vld [vmem:[%s7842_s9 + $0x838] sm:$0xff] }
 0x359   : > { %v360_v54 = vld [vmem:[%s7842_s9 + $0x2f0] sm:$0xff]  ;;  %v545_v52 = vld [vmem:[%s7842_s9 + $0x8b8] sm:$0xff] }
 0x35a   : > { %v1336_v60 = vpack.c.bf16 %v360_v54, %v344_v53  ;;  %v537_v53 = vld [vmem:[%s7842_s9 + $0x878] sm:$0xff]  ;;  %v1425_v57 = vpack.c.bf16 %v545_v52, %v529_v51 }
 0x35b   : > { %v553_v54 = vld [vmem:[%s7842_s9 + $0x8f8] sm:$0xff] }
 0x35c   : > { %v1433_v58 = vpack.c.bf16 %v553_v54, %v537_v53 }
 0x35e   : > { %3029 = vmatmul.mubr.bf16.gmra.mrb[116].mxu1 %v1758_v63  ;;  %v368_v63 = vld [vmem:[%s7842_s9 + $0x330] sm:$0xff] }
 0x35f   : > { %4185 = vmatmul.mubr.bf16.gmra.mrb[116].mxu0 %v1766_v1  ;;  %3036 = vmatprep.mubr.bf16.mxu1 %v1775_v2  ;;  %v384_v1 = vld [vmem:[%s7842_s9 + $0x3b0] sm:$0xff] }
 0x360   : > { %4192 = vmatprep.mubr.bf16.mxu0 %v1783_v3  ;;  %v376_v2 = vld [vmem:[%s7842_s9 + $0x370] sm:$0xff]  ;;  %v1344_v7 = vpack.c.bf16 %v384_v1, %v368_v63  ;;  %v561_v63 = vld [vmem:[%s7842_s9 + $0x938] sm:$0xff] }
 0x361   : > { %v392_v3 = vld [vmem:[%s7842_s9 + $0x3f0] sm:$0xff]  ;;  %v577_v1 = vld [vmem:[%s7842_s9 + $0x9b8] sm:$0xff] }
 0x362   : > { %v1352_v8 = vpack.c.bf16 %v392_v3, %v376_v2  ;;  %v569_v2 = vld [vmem:[%s7842_s9 + $0x978] sm:$0xff]  ;;  %v1441_v6 = vpack.c.bf16 %v577_v1, %v561_v63 }
 0x363   : > { %v585_v3 = vld [vmem:[%s7842_s9 + $0x9f8] sm:$0xff] }
 0x364   : > { %v1449_v0 = vpack.c.bf16 %v585_v3, %v569_v2 }
 0x366   : > { %3037 = vmatmul.mubr.bf16.gmra.mrb[120].mxu1 %v1774_v11  ;;  %v400_v11 = vld [vmem:[%s7842_s9 + $0x430] sm:$0xff] }
 0x367   : > { %4193 = vmatmul.mubr.bf16.gmra.mrb[120].mxu0 %v1782_v12  ;;  %3044 = vmatprep.mubr.bf16.mxu1 %v1791_v13  ;;  %v416_v12 = vld [vmem:[%s7842_s9 + $0x4b0] sm:$0xff] }
 0x368   : > { %4200 = vmatprep.mubr.bf16.mxu0 %v1799_v14  ;;  %v408_v13 = vld [vmem:[%s7842_s9 + $0x470] sm:$0xff]  ;;  %v1360_v19 = vpack.c.bf16 %v416_v12, %v400_v11  ;;  %v593_v11 = vld [vmem:[%s7842_s9 + $0xa38] sm:$0xff] }
 0x369   : > { %v424_v14 = vld [vmem:[%s7842_s9 + $0x4f0] sm:$0xff]  ;;  %v609_v12 = vld [vmem:[%s7842_s9 + $0xab8] sm:$0xff] }
 0x36a   : > { %v1368_v20 = vpack.c.bf16 %v424_v14, %v408_v13  ;;  %v601_v13 = vld [vmem:[%s7842_s9 + $0xa78] sm:$0xff]  ;;  %v1457_v17 = vpack.c.bf16 %v609_v12, %v593_v11 }
 0x36b   : > { %v617_v14 = vld [vmem:[%s7842_s9 + $0xaf8] sm:$0xff] }
 0x36c   : > { %v1465_v18 = vpack.c.bf16 %v617_v14, %v601_v13 }
 0x36e   : > { %3045 = vmatmul.mubr.bf16.gmra.mrb[124].mxu1 %v1790_v23  ;;  %v432_v23 = vld [vmem:[%s7842_s9 + $0x530] sm:$0xff] }
 0x36f   : > { %4201 = vmatmul.mubr.bf16.gmra.mrb[124].mxu0 %v1798_v24  ;;  %3085 = vmatprep.mubr.bf16.mxu1 %v1297_v25  ;;  %v448_v24 = vld [vmem:[%s7842_s9 + $0x5b0] sm:$0xff] }
 0x370   : > { %4241 = vmatprep.mubr.bf16.mxu0 %v1305_v26  ;;  %v440_v25 = vld [vmem:[%s7842_s9 + $0x570] sm:$0xff]  ;;  %v1376_v31 = vpack.c.bf16 %v448_v24, %v432_v23  ;;  %v625_v23 = vld [vmem:[%s7842_s9 + $0xb38] sm:$0xff] }
 0x371   : > { %v456_v26 = vld [vmem:[%s7842_s9 + $0x5f0] sm:$0xff]  ;;  %v641_v24 = vld [vmem:[%s7842_s9 + $0xbb8] sm:$0xff] }
 0x372   : > { %v1384_v32 = vpack.c.bf16 %v456_v26, %v440_v25  ;;  %v633_v25 = vld [vmem:[%s7842_s9 + $0xb78] sm:$0xff]  ;;  %v1473_v29 = vpack.c.bf16 %v641_v24, %v625_v23 }
 0x373   : > { %v649_v26 = vld [vmem:[%s7842_s9 + $0xbf8] sm:$0xff] }
 0x374   : > { %v1481_v30 = vpack.c.bf16 %v649_v26, %v633_v25 }
 0x376   : > { %3086 = vmatmul.mubr.bf16.vlgmr.msra.gmra.mrb[0].mxu1 %v1296_v35  ;;  %v464_v35 = vld [vmem:[%s7842_s9 + $0x630] sm:$0xff] }
 0x377   : > { %4242 = vmatmul.mubr.bf16.vlgmr.msra.gmra.mrb[0].mxu0 %v1304_v36  ;;  %3093 = vmatprep.mubr.bf16.mxu1 %v1313_v37  ;;  %v480_v36 = vld [vmem:[%s7842_s9 + $0x6b0] sm:$0xff] }
 0x378   : > { %4249 = vmatprep.mubr.bf16.mxu0 %v1321_v38  ;;  %v472_v37 = vld [vmem:[%s7842_s9 + $0x670] sm:$0xff]  ;;  %v1392_v43 = vpack.c.bf16 %v480_v36, %v464_v35  ;;  %v657_v35 = vld [vmem:[%s7842_s9 + $0xc38] sm:$0xff] }
 0x379   : > { %v488_v38 = vld [vmem:[%s7842_s9 + $0x6f0] sm:$0xff]  ;;  %v673_v36 = vld [vmem:[%s7842_s9 + $0xcb8] sm:$0xff] }
 0x37a   : > { %v1400_v44 = vpack.c.bf16 %v488_v38, %v472_v37  ;;  %v665_v37 = vld [vmem:[%s7842_s9 + $0xc78] sm:$0xff]  ;;  %v1489_v41 = vpack.c.bf16 %v673_v36, %v657_v35 }
 0x37b   : > { %v681_v38 = vld [vmem:[%s7842_s9 + $0xcf8] sm:$0xff] }
 0x37c   : > { %v1497_v42 = vpack.c.bf16 %v681_v38, %v665_v37 }
 0x37e   : > { %3094 = vmatmul.mubr.bf16.gmra.mrb[4].mxu1 %v1312_v47  ;;  %v496_v47 = vld [vmem:[%s7842_s9 + $0x730] sm:$0xff] }
 0x37f   : > { %4250 = vmatmul.mubr.bf16.gmra.mrb[4].mxu0 %v1320_v48  ;;  %3101 = vmatprep.mubr.bf16.mxu1 %v1329_v49  ;;  %v512_v48 = vld [vmem:[%s7842_s9 + $0x7b0] sm:$0xff] }
 0x380   : > { %4257 = vmatprep.mubr.bf16.mxu0 %v1337_v50  ;;  %v504_v49 = vld [vmem:[%s7842_s9 + $0x770] sm:$0xff]  ;;  %v1408_v55 = vpack.c.bf16 %v512_v48, %v496_v47  ;;  %v689_v47 = vld [vmem:[%s7842_s9 + $0xd38] sm:$0xff] }
 0x381   : > { %v520_v50 = vld [vmem:[%s7842_s9 + $0x7f0] sm:$0xff]  ;;  %v705_v48 = vld [vmem:[%s7842_s9 + $0xdb8] sm:$0xff] }
 0x382   : > { %v1416_v56 = vpack.c.bf16 %v520_v50, %v504_v49  ;;  %v697_v49 = vld [vmem:[%s7842_s9 + $0xd78] sm:$0xff]  ;;  %v1505_v53 = vpack.c.bf16 %v705_v48, %v689_v47 }
 0x383   : > { %v713_v50 = vld [vmem:[%s7842_s9 + $0xdf8] sm:$0xff] }
 0x384   : > { %v1513_v54 = vpack.c.bf16 %v713_v50, %v697_v49 }
 0x386   : > { %3102 = vmatmul.mubr.bf16.gmra.mrb[8].mxu1 %v1328_v59  ;;  %v528_v59 = vld [vmem:[%s7842_s9 + $0x830] sm:$0xff] }
 0x387   : > { %4258 = vmatmul.mubr.bf16.gmra.mrb[8].mxu0 %v1336_v60  ;;  %3109 = vmatprep.mubr.bf16.mxu1 %v1345_v61  ;;  %v544_v60 = vld [vmem:[%s7842_s9 + $0x8b0] sm:$0xff] }
 0x388   : > { %4265 = vmatprep.mubr.bf16.mxu0 %v1353_v62  ;;  %v536_v61 = vld [vmem:[%s7842_s9 + $0x870] sm:$0xff]  ;;  %v1424_v4 = vpack.c.bf16 %v544_v60, %v528_v59  ;;  %v721_v59 = vld [vmem:[%s7842_s9 + $0xe38] sm:$0xff] }
 0x389   : > { %v552_v62 = vld [vmem:[%s7842_s9 + $0x8f0] sm:$0xff]  ;;  %v737_v60 = vld [vmem:[%s7842_s9 + $0xeb8] sm:$0xff] }
 0x38a   : > { %v1432_v5 = vpack.c.bf16 %v552_v62, %v536_v61  ;;  %v729_v61 = vld [vmem:[%s7842_s9 + $0xe78] sm:$0xff]  ;;  %v1521_v2 = vpack.c.bf16 %v737_v60, %v721_v59 }
 0x38b   : > { %v745_v62 = vld [vmem:[%s7842_s9 + $0xef8] sm:$0xff] }
 0x38c   : > { %v1529_v3 = vpack.c.bf16 %v745_v62, %v729_v61 }
 0x38e   : > { %3110 = vmatmul.mubr.bf16.gmra.mrb[12].mxu1 %v1344_v7  ;;  %v560_v7 = vld [vmem:[%s7842_s9 + $0x930] sm:$0xff] }
 0x38f   : > { %4266 = vmatmul.mubr.bf16.gmra.mrb[12].mxu0 %v1352_v8  ;;  %3117 = vmatprep.mubr.bf16.mxu1 %v1361_v9  ;;  %v576_v8 = vld [vmem:[%s7842_s9 + $0x9b0] sm:$0xff] }
 0x390   : > { %4273 = vmatprep.mubr.bf16.mxu0 %v1369_v10  ;;  %v568_v9 = vld [vmem:[%s7842_s9 + $0x970] sm:$0xff]  ;;  %v1440_v15 = vpack.c.bf16 %v576_v8, %v560_v7  ;;  %v753_v7 = vld [vmem:[%s7842_s9 + $0xf38] sm:$0xff] }
 0x391   : > { %v584_v10 = vld [vmem:[%s7842_s9 + $0x9f0] sm:$0xff]  ;;  %v769_v8 = vld [vmem:[%s7842_s9 + $0xfb8] sm:$0xff] }
 0x392   : > { %v1448_v16 = vpack.c.bf16 %v584_v10, %v568_v9  ;;  %v761_v9 = vld [vmem:[%s7842_s9 + $0xf78] sm:$0xff]  ;;  %v1537_v13 = vpack.c.bf16 %v769_v8, %v753_v7 }
 0x393   : > { %v777_v10 = vld [vmem:[%s7842_s9 + $0xff8] sm:$0xff] }
 0x394   : > { %v1545_v14 = vpack.c.bf16 %v777_v10, %v761_v9 }
 0x396   : > { %3118 = vmatmul.mubr.bf16.gmra.mrb[16].mxu1 %v1360_v19  ;;  %v592_v19 = vld [vmem:[%s7842_s9 + $0xa30] sm:$0xff] }
 0x397   : > { %4274 = vmatmul.mubr.bf16.gmra.mrb[16].mxu0 %v1368_v20  ;;  %3125 = vmatprep.mubr.bf16.mxu1 %v1377_v21  ;;  %v608_v20 = vld [vmem:[%s7842_s9 + $0xab0] sm:$0xff] }
 0x398   : > { %4281 = vmatprep.mubr.bf16.mxu0 %v1385_v22  ;;  %v600_v21 = vld [vmem:[%s7842_s9 + $0xa70] sm:$0xff]  ;;  %v1456_v27 = vpack.c.bf16 %v608_v20, %v592_v19  ;;  %v785_v19 = vld [vmem:[%s7842_s9 + $0x1038] sm:$0xff] }
 0x399   : > { %v616_v22 = vld [vmem:[%s7842_s9 + $0xaf0] sm:$0xff]  ;;  %v801_v20 = vld [vmem:[%s7842_s9 + $0x10b8] sm:$0xff] }
 0x39a   : > { %v1464_v28 = vpack.c.bf16 %v616_v22, %v600_v21  ;;  %v793_v21 = vld [vmem:[%s7842_s9 + $0x1078] sm:$0xff]  ;;  %v1553_v25 = vpack.c.bf16 %v801_v20, %v785_v19 }
 0x39b   : > { %v809_v22 = vld [vmem:[%s7842_s9 + $0x10f8] sm:$0xff] }
 0x39c   : > { %v1561_v26 = vpack.c.bf16 %v809_v22, %v793_v21 }
 0x39e   : > { %3126 = vmatmul.mubr.bf16.gmra.mrb[20].mxu1 %v1376_v31  ;;  %v624_v31 = vld [vmem:[%s7842_s9 + $0xb30] sm:$0xff] }
 0x39f   : > { %4282 = vmatmul.mubr.bf16.gmra.mrb[20].mxu0 %v1384_v32  ;;  %3133 = vmatprep.mubr.bf16.mxu1 %v1393_v33  ;;  %v640_v32 = vld [vmem:[%s7842_s9 + $0xbb0] sm:$0xff] }
 0x3a0   : > { %4289 = vmatprep.mubr.bf16.mxu0 %v1401_v34  ;;  %v632_v33 = vld [vmem:[%s7842_s9 + $0xb70] sm:$0xff]  ;;  %v1472_v39 = vpack.c.bf16 %v640_v32, %v624_v31  ;;  %v817_v31 = vld [vmem:[%s7842_s9 + $0x1138] sm:$0xff] }
 0x3a1   : > { %v648_v34 = vld [vmem:[%s7842_s9 + $0xbf0] sm:$0xff]  ;;  %v833_v32 = vld [vmem:[%s7842_s9 + $0x11b8] sm:$0xff] }
 0x3a2   : > { %v1480_v40 = vpack.c.bf16 %v648_v34, %v632_v33  ;;  %v825_v33 = vld [vmem:[%s7842_s9 + $0x1178] sm:$0xff]  ;;  %v1569_v37 = vpack.c.bf16 %v833_v32, %v817_v31 }
 0x3a3   : > { %v841_v34 = vld [vmem:[%s7842_s9 + $0x11f8] sm:$0xff] }
 0x3a4   : > { %v1577_v38 = vpack.c.bf16 %v841_v34, %v825_v33 }
 0x3a6   : > { %3134 = vmatmul.mubr.bf16.gmra.mrb[24].mxu1 %v1392_v43  ;;  %v656_v43 = vld [vmem:[%s7842_s9 + $0xc30] sm:$0xff] }
 0x3a7   : > { %4290 = vmatmul.mubr.bf16.gmra.mrb[24].mxu0 %v1400_v44  ;;  %3141 = vmatprep.mubr.bf16.mxu1 %v1409_v45  ;;  %v672_v44 = vld [vmem:[%s7842_s9 + $0xcb0] sm:$0xff] }
 0x3a8   : > { %4297 = vmatprep.mubr.bf16.mxu0 %v1417_v46  ;;  %v664_v45 = vld [vmem:[%s7842_s9 + $0xc70] sm:$0xff]  ;;  %v1488_v51 = vpack.c.bf16 %v672_v44, %v656_v43  ;;  %v849_v43 = vld [vmem:[%s7842_s9 + $0x1238] sm:$0xff] }
 0x3a9   : > { %v680_v46 = vld [vmem:[%s7842_s9 + $0xcf0] sm:$0xff]  ;;  %v865_v44 = vld [vmem:[%s7842_s9 + $0x12b8] sm:$0xff] }
 0x3aa   : > { %v1496_v52 = vpack.c.bf16 %v680_v46, %v664_v45  ;;  %v857_v45 = vld [vmem:[%s7842_s9 + $0x1278] sm:$0xff]  ;;  %v1585_v49 = vpack.c.bf16 %v865_v44, %v849_v43 }
 0x3ab   : > { %v873_v46 = vld [vmem:[%s7842_s9 + $0x12f8] sm:$0xff] }
 0x3ac   : > { %v1593_v50 = vpack.c.bf16 %v873_v46, %v857_v45 }
 0x3ae   : > { %3142 = vmatmul.mubr.bf16.gmra.mrb[28].mxu1 %v1408_v55  ;;  %v688_v55 = vld [vmem:[%s7842_s9 + $0xd30] sm:$0xff] }
 0x3af   : > { %4298 = vmatmul.mubr.bf16.gmra.mrb[28].mxu0 %v1416_v56  ;;  %3149 = vmatprep.mubr.bf16.mxu1 %v1425_v57  ;;  %v704_v56 = vld [vmem:[%s7842_s9 + $0xdb0] sm:$0xff] }
 0x3b0   : > { %4305 = vmatprep.mubr.bf16.mxu0 %v1433_v58  ;;  %v696_v57 = vld [vmem:[%s7842_s9 + $0xd70] sm:$0xff]  ;;  %v1504_v63 = vpack.c.bf16 %v704_v56, %v688_v55  ;;  %v881_v55 = vld [vmem:[%s7842_s9 + $0x1338] sm:$0xff] }
 0x3b1   : > { %v712_v58 = vld [vmem:[%s7842_s9 + $0xdf0] sm:$0xff]  ;;  %v897_v56 = vld [vmem:[%s7842_s9 + $0x13b8] sm:$0xff] }
 0x3b2   : > { %v1512_v1 = vpack.c.bf16 %v712_v58, %v696_v57  ;;  %v889_v57 = vld [vmem:[%s7842_s9 + $0x1378] sm:$0xff]  ;;  %v1601_v61 = vpack.c.bf16 %v897_v56, %v881_v55 }
 0x3b3   : > { %v905_v58 = vld [vmem:[%s7842_s9 + $0x13f8] sm:$0xff] }
 0x3b4   : > { %v1609_v62 = vpack.c.bf16 %v905_v58, %v889_v57 }
 0x3b6   : > { %3150 = vmatmul.mubr.bf16.gmra.mrb[32].mxu1 %v1424_v4  ;;  %v720_v4 = vld [vmem:[%s7842_s9 + $0xe30] sm:$0xff] }
 0x3b7   : > { %4306 = vmatmul.mubr.bf16.gmra.mrb[32].mxu0 %v1432_v5  ;;  %3157 = vmatprep.mubr.bf16.mxu1 %v1441_v6  ;;  %v736_v5 = vld [vmem:[%s7842_s9 + $0xeb0] sm:$0xff] }
 0x3b8   : > { %4313 = vmatprep.mubr.bf16.mxu0 %v1449_v0  ;;  %v728_v6 = vld [vmem:[%s7842_s9 + $0xe70] sm:$0xff]  ;;  %v1520_v11 = vpack.c.bf16 %v736_v5, %v720_v4  ;;  %v913_v4 = vld [vmem:[%s7842_s9 + $0x1438] sm:$0xff] }
 0x3b9   : > { %v744_v0 = vld [vmem:[%s7842_s9 + $0xef0] sm:$0xff]  ;;  %v929_v5 = vld [vmem:[%s7842_s9 + $0x14b8] sm:$0xff] }
 0x3ba   : > { %v1528_v12 = vpack.c.bf16 %v744_v0, %v728_v6  ;;  %v921_v6 = vld [vmem:[%s7842_s9 + $0x1478] sm:$0xff]  ;;  %v1617_v9 = vpack.c.bf16 %v929_v5, %v913_v4 }
 0x3bb   : > { %v937_v0 = vld [vmem:[%s7842_s9 + $0x14f8] sm:$0xff] }
 0x3bc   : > { %v1625_v10 = vpack.c.bf16 %v937_v0, %v921_v6 }
 0x3be   : > { %3158 = vmatmul.mubr.bf16.gmra.mrb[36].mxu1 %v1440_v15  ;;  %v752_v15 = vld [vmem:[%s7842_s9 + $0xf30] sm:$0xff] }
 0x3bf   : > { %4314 = vmatmul.mubr.bf16.gmra.mrb[36].mxu0 %v1448_v16  ;;  %3165 = vmatprep.mubr.bf16.mxu1 %v1457_v17  ;;  %v768_v16 = vld [vmem:[%s7842_s9 + $0xfb0] sm:$0xff] }
 0x3c0   : > { %4321 = vmatprep.mubr.bf16.mxu0 %v1465_v18  ;;  %v760_v17 = vld [vmem:[%s7842_s9 + $0xf70] sm:$0xff]  ;;  %v1536_v23 = vpack.c.bf16 %v768_v16, %v752_v15  ;;  %v945_v15 = vld [vmem:[%s7842_s9 + $0x1538] sm:$0xff] }
 0x3c1   : > { %v776_v18 = vld [vmem:[%s7842_s9 + $0xff0] sm:$0xff]  ;;  %v961_v16 = vld [vmem:[%s7842_s9 + $0x15b8] sm:$0xff] }
 0x3c2   : > { %v1544_v24 = vpack.c.bf16 %v776_v18, %v760_v17  ;;  %v953_v17 = vld [vmem:[%s7842_s9 + $0x1578] sm:$0xff]  ;;  %v1633_v21 = vpack.c.bf16 %v961_v16, %v945_v15 }
 0x3c3   : > { %v969_v18 = vld [vmem:[%s7842_s9 + $0x15f8] sm:$0xff] }
 0x3c4   : > { %v1641_v22 = vpack.c.bf16 %v969_v18, %v953_v17 }
 0x3c6   : > { %3166 = vmatmul.mubr.bf16.gmra.mrb[40].mxu1 %v1456_v27  ;;  %v784_v27 = vld [vmem:[%s7842_s9 + $0x1030] sm:$0xff] }
 0x3c7   : > { %4322 = vmatmul.mubr.bf16.gmra.mrb[40].mxu0 %v1464_v28  ;;  %3173 = vmatprep.mubr.bf16.mxu1 %v1473_v29  ;;  %v800_v28 = vld [vmem:[%s7842_s9 + $0x10b0] sm:$0xff] }
 0x3c8   : > { %4329 = vmatprep.mubr.bf16.mxu0 %v1481_v30  ;;  %v792_v29 = vld [vmem:[%s7842_s9 + $0x1070] sm:$0xff]  ;;  %v1552_v35 = vpack.c.bf16 %v800_v28, %v784_v27  ;;  %v977_v27 = vld [vmem:[%s7842_s9 + $0x1638] sm:$0xff] }
 0x3c9   : > { %v808_v30 = vld [vmem:[%s7842_s9 + $0x10f0] sm:$0xff]  ;;  %v993_v28 = vld [vmem:[%s7842_s9 + $0x16b8] sm:$0xff] }
 0x3ca   : > { %v1560_v36 = vpack.c.bf16 %v808_v30, %v792_v29  ;;  %v985_v29 = vld [vmem:[%s7842_s9 + $0x1678] sm:$0xff]  ;;  %v1649_v33 = vpack.c.bf16 %v993_v28, %v977_v27 }
 0x3cb   : > { %v1001_v30 = vld [vmem:[%s7842_s9 + $0x16f8] sm:$0xff] }
 0x3cc   : > { %v1657_v34 = vpack.c.bf16 %v1001_v30, %v985_v29 }
 0x3ce   : > { %3174 = vmatmul.mubr.bf16.gmra.mrb[44].mxu1 %v1472_v39  ;;  %v816_v39 = vld [vmem:[%s7842_s9 + $0x1130] sm:$0xff] }
 0x3cf   : > { %4330 = vmatmul.mubr.bf16.gmra.mrb[44].mxu0 %v1480_v40  ;;  %3181 = vmatprep.mubr.bf16.mxu1 %v1489_v41  ;;  %v832_v40 = vld [vmem:[%s7842_s9 + $0x11b0] sm:$0xff] }
 0x3d0   : > { %4337 = vmatprep.mubr.bf16.mxu0 %v1497_v42  ;;  %v824_v41 = vld [vmem:[%s7842_s9 + $0x1170] sm:$0xff]  ;;  %v1568_v47 = vpack.c.bf16 %v832_v40, %v816_v39  ;;  %v1009_v39 = vld [vmem:[%s7842_s9 + $0x1738] sm:$0xff] }
 0x3d1   : > { %v840_v42 = vld [vmem:[%s7842_s9 + $0x11f0] sm:$0xff]  ;;  %v1025_v40 = vld [vmem:[%s7842_s9 + $0x17b8] sm:$0xff] }
 0x3d2   : > { %v1576_v48 = vpack.c.bf16 %v840_v42, %v824_v41  ;;  %v1017_v41 = vld [vmem:[%s7842_s9 + $0x1778] sm:$0xff]  ;;  %v1665_v45 = vpack.c.bf16 %v1025_v40, %v1009_v39 }
 0x3d3   : > { %v1033_v42 = vld [vmem:[%s7842_s9 + $0x17f8] sm:$0xff] }
 0x3d4   : > { %v1673_v46 = vpack.c.bf16 %v1033_v42, %v1017_v41  ;;  %v1193_v39 = vld [vmem:[%s7842_s9 + $0x1cf8] sm:$0xff] }
 0x3d6   : > { %3182 = vmatmul.mubr.bf16.gmra.mrb[48].mxu1 %v1488_v51  ;;  %v848_v51 = vld [vmem:[%s7842_s9 + $0x1230] sm:$0xff] }
 0x3d7   : > { %4338 = vmatmul.mubr.bf16.gmra.mrb[48].mxu0 %v1496_v52  ;;  %3189 = vmatprep.mubr.bf16.mxu1 %v1505_v53  ;;  %v864_v52 = vld [vmem:[%s7842_s9 + $0x12b0] sm:$0xff] }
 0x3d8   : > { %4345 = vmatprep.mubr.bf16.mxu0 %v1513_v54  ;;  %v856_v53 = vld [vmem:[%s7842_s9 + $0x1270] sm:$0xff]  ;;  %v1584_v59 = vpack.c.bf16 %v864_v52, %v848_v51  ;;  %v1041_v51 = vld [vmem:[%s7842_s9 + $0x1838] sm:$0xff] }
 0x3d9   : > { %v872_v54 = vld [vmem:[%s7842_s9 + $0x12f0] sm:$0xff]  ;;  %v1057_v52 = vld [vmem:[%s7842_s9 + $0x18b8] sm:$0xff] }
 0x3da   : > { %v1592_v60 = vpack.c.bf16 %v872_v54, %v856_v53  ;;  %v1049_v53 = vld [vmem:[%s7842_s9 + $0x1878] sm:$0xff]  ;;  %v1681_v57 = vpack.c.bf16 %v1057_v52, %v1041_v51 }
 0x3db   : > { %v1065_v54 = vld [vmem:[%s7842_s9 + $0x18f8] sm:$0xff] }
 0x3dc   : > { %v1689_v58 = vpack.c.bf16 %v1065_v54, %v1049_v53 }
 0x3de   : > { %3190 = vmatmul.mubr.bf16.gmra.mrb[52].mxu1 %v1504_v63  ;;  %v880_v63 = vld [vmem:[%s7842_s9 + $0x1330] sm:$0xff] }
 0x3df   : > { %4346 = vmatmul.mubr.bf16.gmra.mrb[52].mxu0 %v1512_v1  ;;  %3197 = vmatprep.mubr.bf16.mxu1 %v1521_v2  ;;  %v896_v1 = vld [vmem:[%s7842_s9 + $0x13b0] sm:$0xff] }
 0x3e0   : > { %4353 = vmatprep.mubr.bf16.mxu0 %v1529_v3  ;;  %v888_v2 = vld [vmem:[%s7842_s9 + $0x1370] sm:$0xff]  ;;  %v1600_v7 = vpack.c.bf16 %v896_v1, %v880_v63  ;;  %v1073_v63 = vld [vmem:[%s7842_s9 + $0x1938] sm:$0xff] }
 0x3e1   : > { %v904_v3 = vld [vmem:[%s7842_s9 + $0x13f0] sm:$0xff]  ;;  %v1089_v1 = vld [vmem:[%s7842_s9 + $0x19b8] sm:$0xff] }
 0x3e2   : > { %v1608_v8 = vpack.c.bf16 %v904_v3, %v888_v2  ;;  %v1081_v2 = vld [vmem:[%s7842_s9 + $0x1978] sm:$0xff]  ;;  %v1697_v6 = vpack.c.bf16 %v1089_v1, %v1073_v63 }
 0x3e3   : > { %v1097_v3 = vld [vmem:[%s7842_s9 + $0x19f8] sm:$0xff] }
 0x3e4   : > { %v1705_v0 = vpack.c.bf16 %v1097_v3, %v1081_v2  ;;  %v1217_v1 = vld [vmem:[%s7842_s9 + $0x1db8] sm:$0xff] }
 0x3e5   : > { %v1209_v2 = vld [vmem:[%s7842_s9 + $0x1d78] sm:$0xff] }
 0x3e6   : > { %3198 = vmatmul.mubr.bf16.gmra.mrb[56].mxu1 %v1520_v11  ;;  %v912_v11 = vld [vmem:[%s7842_s9 + $0x1430] sm:$0xff]  ;;  %v1225_v3 = vld [vmem:[%s7842_s9 + $0x1df8] sm:$0xff] }
 0x3e7   : > { %4354 = vmatmul.mubr.bf16.gmra.mrb[56].mxu0 %v1528_v12  ;;  %3205 = vmatprep.mubr.bf16.mxu1 %v1537_v13  ;;  %v928_v12 = vld [vmem:[%s7842_s9 + $0x14b0] sm:$0xff] }
 0x3e8   : > { %4361 = vmatprep.mubr.bf16.mxu0 %v1545_v14  ;;  %v920_v13 = vld [vmem:[%s7842_s9 + $0x1470] sm:$0xff]  ;;  %v1616_v19 = vpack.c.bf16 %v928_v12, %v912_v11  ;;  %v1105_v11 = vld [vmem:[%s7842_s9 + $0x1a38] sm:$0xff] }
 0x3e9   : > { %v936_v14 = vld [vmem:[%s7842_s9 + $0x14f0] sm:$0xff]  ;;  %v1121_v12 = vld [vmem:[%s7842_s9 + $0x1ab8] sm:$0xff] }
 0x3ea   : > { %v1624_v20 = vpack.c.bf16 %v936_v14, %v920_v13  ;;  %v1113_v13 = vld [vmem:[%s7842_s9 + $0x1a78] sm:$0xff]  ;;  %v1713_v17 = vpack.c.bf16 %v1121_v12, %v1105_v11 }
 0x3eb   : > { %v1129_v14 = vld [vmem:[%s7842_s9 + $0x1af8] sm:$0xff] }
 0x3ec   : > { %v1721_v18 = vpack.c.bf16 %v1129_v14, %v1113_v13  ;;  %v1769_v13 = vpack.c.bf16 %v1225_v3, %v1209_v2 }
 0x3ee   : > { %3206 = vmatmul.mubr.bf16.gmra.mrb[60].mxu1 %v1536_v23  ;;  %v944_v23 = vld [vmem:[%s7842_s9 + $0x1530] sm:$0xff] }
 0x3ef   : > { %4362 = vmatmul.mubr.bf16.gmra.mrb[60].mxu0 %v1544_v24  ;;  %3213 = vmatprep.mubr.bf16.mxu1 %v1553_v25  ;;  %v960_v24 = vld [vmem:[%s7842_s9 + $0x15b0] sm:$0xff] }
 0x3f0   : > { %4369 = vmatprep.mubr.bf16.mxu0 %v1561_v26  ;;  %v952_v25 = vld [vmem:[%s7842_s9 + $0x1570] sm:$0xff]  ;;  %v1632_v31 = vpack.c.bf16 %v960_v24, %v944_v23  ;;  %v1137_v23 = vld [vmem:[%s7842_s9 + $0x1b38] sm:$0xff] }
 0x3f1   : > { %v968_v26 = vld [vmem:[%s7842_s9 + $0x15f0] sm:$0xff]  ;;  %v1153_v24 = vld [vmem:[%s7842_s9 + $0x1bb8] sm:$0xff] }
 0x3f2   : > { %v1640_v32 = vpack.c.bf16 %v968_v26, %v952_v25  ;;  %v1145_v25 = vld [vmem:[%s7842_s9 + $0x1b78] sm:$0xff]  ;;  %v1729_v29 = vpack.c.bf16 %v1153_v24, %v1137_v23 }
 0x3f3   : > { %v1161_v26 = vld [vmem:[%s7842_s9 + $0x1bf8] sm:$0xff] }
 0x3f4   : > { %v1737_v30 = vpack.c.bf16 %v1161_v26, %v1145_v25  ;;  %v1233_v23 = vld [vmem:[%s7842_s9 + $0x1e38] sm:$0xff] }
 0x3f6   : > { %3214 = vmatmul.mubr.bf16.gmra.mrb[64].mxu1 %v1552_v35  ;;  %v976_v35 = vld [vmem:[%s7842_s9 + $0x1630] sm:$0xff] }
 0x3f7   : > { %4370 = vmatmul.mubr.bf16.gmra.mrb[64].mxu0 %v1560_v36  ;;  %3221 = vmatprep.mubr.bf16.mxu1 %v1569_v37  ;;  %v992_v36 = vld [vmem:[%s7842_s9 + $0x16b0] sm:$0xff] }
 0x3f8   : > { %4377 = vmatprep.mubr.bf16.mxu0 %v1577_v38  ;;  %v984_v37 = vld [vmem:[%s7842_s9 + $0x1670] sm:$0xff]  ;;  %v1648_v43 = vpack.c.bf16 %v992_v36, %v976_v35  ;;  %v1169_v35 = vld [vmem:[%s7842_s9 + $0x1c38] sm:$0xff] }
 0x3f9   : > { %v1000_v38 = vld [vmem:[%s7842_s9 + $0x16f0] sm:$0xff]  ;;  %v1185_v36 = vld [vmem:[%s7842_s9 + $0x1cb8] sm:$0xff] }
 0x3fa   : > { %v1656_v44 = vpack.c.bf16 %v1000_v38, %v984_v37  ;;  %v1177_v38 = vld [vmem:[%s7842_s9 + $0x1c78] sm:$0xff] }
 0x3fe   : > { %3222 = vmatmul.mubr.bf16.gmra.mrb[68].mxu1 %v1568_v47  ;;  %v1008_v47 = vld [vmem:[%s7842_s9 + $0x1730] sm:$0xff] }
 0x3ff   : > { %4378 = vmatmul.mubr.bf16.gmra.mrb[68].mxu0 %v1576_v48  ;;  %3229 = vmatprep.mubr.bf16.mxu1 %v1585_v49  ;;  %v1024_v48 = vld [vmem:[%s7842_s9 + $0x17b0] sm:$0xff] }
 0x400   : > { %4385 = vmatprep.mubr.bf16.mxu0 %v1593_v50  ;;  %v1016_v49 = vld [vmem:[%s7842_s9 + $0x1770] sm:$0xff]  ;;  %v1664_v55 = vpack.c.bf16 %v1024_v48, %v1008_v47  ;;  %v1745_v47 = vpack.c.bf16 %v1185_v36, %v1169_v35 }
 0x401   : > { %v1032_v50 = vld [vmem:[%s7842_s9 + $0x17f0] sm:$0xff] }
 0x402   : > { %v1672_v56 = vpack.c.bf16 %v1032_v50, %v1016_v49  ;;  %v1753_v50 = vpack.c.bf16 %v1193_v39, %v1177_v38 }
 0x406   : > { %3230 = vmatmul.mubr.bf16.gmra.mrb[72].mxu1 %v1584_v59  ;;  %v1040_v59 = vld [vmem:[%s7842_s9 + $0x1830] sm:$0xff] }
 0x407   : > { %4386 = vmatmul.mubr.bf16.gmra.mrb[72].mxu0 %v1592_v60  ;;  %3237 = vmatprep.mubr.bf16.mxu1 %v1601_v61  ;;  %v1056_v60 = vld [vmem:[%s7842_s9 + $0x18b0] sm:$0xff] }
 0x408   : > { %4393 = vmatprep.mubr.bf16.mxu0 %v1609_v62  ;;  %v1048_v61 = vld [vmem:[%s7842_s9 + $0x1870] sm:$0xff]  ;;  %v1680_v4 = vpack.c.bf16 %v1056_v60, %v1040_v59  ;;  %v1201_v59 = vld [vmem:[%s7842_s9 + $0x1d38] sm:$0xff] }
 0x409   : > { %v1064_v62 = vld [vmem:[%s7842_s9 + $0x18f0] sm:$0xff]  ;;  %v1761_v12 = vpack.c.bf16 %v1217_v1, %v1201_v59  ;;  %v1273_v59 = vld [vmem:[%s7842_s9 + $0x1f78] sm:$0xff] }
 0x40a   : > { %v1688_v5 = vpack.c.bf16 %v1064_v62, %v1048_v61 }
 0x40e   : > { %3238 = vmatmul.mubr.bf16.gmra.mrb[76].mxu1 %v1600_v7  ;;  %v1072_v7 = vld [vmem:[%s7842_s9 + $0x1930] sm:$0xff] }
 0x40f   : > { %4394 = vmatmul.mubr.bf16.gmra.mrb[76].mxu0 %v1608_v8  ;;  %3245 = vmatprep.mubr.bf16.mxu1 %v1617_v9  ;;  %v1088_v8 = vld [vmem:[%s7842_s9 + $0x19b0] sm:$0xff] }
 0x410   : > { %4401 = vmatprep.mubr.bf16.mxu0 %v1625_v10  ;;  %v1080_v9 = vld [vmem:[%s7842_s9 + $0x1970] sm:$0xff]  ;;  %v1696_v15 = vpack.c.bf16 %v1088_v8, %v1072_v7 }
 0x411   : > { %v1096_v10 = vld [vmem:[%s7842_s9 + $0x19f0] sm:$0xff] }
 0x412   : > { %v1704_v16 = vpack.c.bf16 %v1096_v10, %v1080_v9 }
 0x416   : > { %3246 = vmatmul.mubr.bf16.gmra.mrb[80].mxu1 %v1616_v19  ;;  %v1104_v19 = vld [vmem:[%s7842_s9 + $0x1a30] sm:$0xff] }
 0x417   : > { %4402 = vmatmul.mubr.bf16.gmra.mrb[80].mxu0 %v1624_v20  ;;  %3253 = vmatprep.mubr.bf16.mxu1 %v1633_v21  ;;  %v1120_v20 = vld [vmem:[%s7842_s9 + $0x1ab0] sm:$0xff] }
 0x418   : > { %4409 = vmatprep.mubr.bf16.mxu0 %v1641_v22  ;;  %v1112_v21 = vld [vmem:[%s7842_s9 + $0x1a70] sm:$0xff]  ;;  %v1712_v27 = vpack.c.bf16 %v1120_v20, %v1104_v19 }
 0x419   : > { %v1128_v22 = vld [vmem:[%s7842_s9 + $0x1af0] sm:$0xff] }
 0x41a   : > { %v1720_v28 = vpack.c.bf16 %v1128_v22, %v1112_v21  ;;  %v1200_v19 = vld [vmem:[%s7842_s9 + $0x1d30] sm:$0xff] }
 0x41b   : > { %v1216_v20 = vld [vmem:[%s7842_s9 + $0x1db0] sm:$0xff] }
 0x41c   : > { %v1208_v21 = vld [vmem:[%s7842_s9 + $0x1d70] sm:$0xff]  ;;  %v1760_v36 = vpack.c.bf16 %v1216_v20, %v1200_v19 }
 0x41d   : > { %v1224_v22 = vld [vmem:[%s7842_s9 + $0x1df0] sm:$0xff] }
 0x41e   : > { %3254 = vmatmul.mubr.bf16.gmra.mrb[84].mxu1 %v1632_v31  ;;  %v1136_v31 = vld [vmem:[%s7842_s9 + $0x1b30] sm:$0xff] }
 0x41f   : > { %4410 = vmatmul.mubr.bf16.gmra.mrb[84].mxu0 %v1640_v32  ;;  %3261 = vmatprep.mubr.bf16.mxu1 %v1649_v33  ;;  %v1152_v32 = vld [vmem:[%s7842_s9 + $0x1bb0] sm:$0xff] }
 0x420   : > { %4417 = vmatprep.mubr.bf16.mxu0 %v1657_v34  ;;  %v1144_v33 = vld [vmem:[%s7842_s9 + $0x1b70] sm:$0xff]  ;;  %v1728_v42 = vpack.c.bf16 %v1152_v32, %v1136_v31 }
 0x421   : > { %v1160_v34 = vld [vmem:[%s7842_s9 + $0x1bf0] sm:$0xff] }
 0x426   : > { %3262 = vmatmul.mubr.bf16.gmra.mrb[88].mxu1 %v1648_v43 }
 0x427   : > { %4418 = vmatmul.mubr.bf16.gmra.mrb[88].mxu0 %v1656_v44  ;;  %3269 = vmatprep.mubr.bf16.mxu1 %v1665_v45 }
 0x428   : > { %4425 = vmatprep.mubr.bf16.mxu0 %v1673_v46  ;;  %v1736_v46 = vpack.c.bf16 %v1160_v34, %v1144_v33 }
 0x42e   : > { %3270 = vmatmul.mubr.bf16.gmra.mrb[92].mxu1 %v1664_v55  ;;  %v1168_v55 = vld [vmem:[%s7842_s9 + $0x1c30] sm:$0xff] }
 0x42f   : > { %4426 = vmatmul.mubr.bf16.gmra.mrb[92].mxu0 %v1672_v56  ;;  %3277 = vmatprep.mubr.bf16.mxu1 %v1681_v57  ;;  %v1184_v56 = vld [vmem:[%s7842_s9 + $0x1cb0] sm:$0xff] }
 0x430   : > { %4433 = vmatprep.mubr.bf16.mxu0 %v1689_v58  ;;  %v1176_v57 = vld [vmem:[%s7842_s9 + $0x1c70] sm:$0xff]  ;;  %v1744_v8 = vpack.c.bf16 %v1184_v56, %v1168_v55 }
 0x431   : > { %v1192_v58 = vld [vmem:[%s7842_s9 + $0x1cf0] sm:$0xff] }
 0x432   : > { %v1752_v9 = vpack.c.bf16 %v1192_v58, %v1176_v57  ;;  %v1281_v58 = vld [vmem:[%s7842_s9 + $0x1fb8] sm:$0xff] }
 0x436   : > { %3278 = vmatmul.mubr.bf16.gmra.mrb[96].mxu1 %v1680_v4 }
 0x437   : > { %4434 = vmatmul.mubr.bf16.gmra.mrb[96].mxu0 %v1688_v5  ;;  %3285 = vmatprep.mubr.bf16.mxu1 %v1697_v6 }
 0x438   : > { %4441 = vmatprep.mubr.bf16.mxu0 %v1705_v0 }
 0x43e   : > { %3286 = vmatmul.mubr.bf16.gmra.mrb[100].mxu1 %v1696_v15 }
 0x43f   : > { %4442 = vmatmul.mubr.bf16.gmra.mrb[100].mxu0 %v1704_v16  ;;  %3293 = vmatprep.mubr.bf16.mxu1 %v1713_v17 }
 0x440   : > { %4449 = vmatprep.mubr.bf16.mxu0 %v1721_v18 }
 0x446   : > { %3294 = vmatmul.mubr.bf16.gmra.mrb[104].mxu1 %v1712_v27 }
 0x447   : > { %4450 = vmatmul.mubr.bf16.gmra.mrb[104].mxu0 %v1720_v28  ;;  %3301 = vmatprep.mubr.bf16.mxu1 %v1729_v29  ;;  %v1249_v28 = vld [vmem:[%s7842_s9 + $0x1eb8] sm:$0xff] }
 0x448   : > { %4457 = vmatprep.mubr.bf16.mxu0 %v1737_v30  ;;  %v1241_v29 = vld [vmem:[%s7842_s9 + $0x1e78] sm:$0xff] }
 0x449   : > { %v3087_v37 = vpop.f32.mrb[0].mxu1  ;;  %v1257_v30 = vld [vmem:[%s7842_s9 + $0x1ef8] sm:$0xff] }
 0x44a   : > { %v4243_v40 = vpop.f32.mrb[0].mxu0  ;;  %v3089_v41 = vpop.f32.mrb[1].mxu1 }
 0x44b   : > { %v9742_v43 = vadd.f32 %v4243_v40, %v3087_v37  ;;  %v4245_v44 = vpop.f32.mrb[1].mxu0  ;;  %v3090_v45 = vpop.f32.mrb[2].mxu1  ;;  %v1768_v37 = vpack.c.bf16 %v1224_v22, %v1208_v21  ;;  %v1777_v40 = vpack.c.bf16 %v1249_v28, %v1233_v23  ;;  %v1785_v41 = vpack.c.bf16 %v1257_v30, %v1241_v29 }
 0x44c   : > { %v4246_v48 = vpop.f32.mrb[2].mxu0  ;;  %v3092_v49 = vpop.f32.mrb[3].mxu1 }
 0x44d   : > { %v9744_v51 = vadd.f32 %v4246_v48, %v3090_v45  ;;  %v4248_v52 = vpop.f32.mrb[3].mxu0  ;;  %v4499_v53 = vsel %vm4498_vm0, %v9742_v43, 0.0  ;;  %v4755_v63 = vmul.f32 %v9742_v43, %v9742_v43  ;;  %v1232_v48 = vld [vmem:[%s7842_s9 + $0x1e30] sm:$0xff] }
 0x44e   : > { %4500 = vadd.xlane.f32.xlu0 %v4499_v53  ;;  %3302 = vmatmul.mubr.bf16.gmra.mrb[108].mxu1 %v1728_v42  ;;  %v1248_v49 = vld [vmem:[%s7842_s9 + $0x1eb0] sm:$0xff]  ;;  %v1265_v53 = vld [vmem:[%s7842_s9 + $0x1f38] sm:$0xff] }
 0x44f   : > { %4458 = vmatmul.mubr.bf16.gmra.mrb[108].mxu0 %v1736_v46  ;;  %v4756_v54 = vmul.f32 %v9744_v51, %v9744_v51  ;;  %3309 = vmatprep.mubr.bf16.mxu1 %v1745_v47  ;;  %v4502_v61 = vsel %vm4498_vm0, %v9744_v51, 0.0  ;;  %v4819_v16 = vsel %vm4498_vm0, %v4755_v63, 0.0  ;;  %v1256_v52 = vld [vmem:[%s7842_s9 + $0x1ef0] sm:$0xff]  ;;  %v1776_v3 = vpack.c.bf16 %v1248_v49, %v1232_v48 }
 0x450   : > { %4465 = vmatprep.mubr.bf16.mxu0 %v1753_v50  ;;  %v1240_v50 = vld [vmem:[%s7842_s9 + $0x1e70] sm:$0xff] }
 0x451   : > { %v4822_v60 = vsel %vm4498_vm0, %v4756_v54, 0.0  ;;  %v3095_v62 = vpop.f32.mrb[4].mxu1 }
 0x452   : > { %v4251_v4 = vpop.f32.mrb[4].mxu0  ;;  %4823 = vadd.xlane.f32.xlu1 %v4822_v60  ;;  %4503 = vadd.xlane.f32.xlu0 %v4502_v61  ;;  %v3097_v5 = vpop.f32.mrb[5].mxu1  ;;  %v1289_v60 = vld [vmem:[%s7842_s9 + $0x1ff8] sm:$0xff] }
 0x453   : > { %v9763_v6 = vadd.f32 %v4251_v4, %v3095_v62  ;;  %v4253_v0 = vpop.f32.mrb[5].mxu0  ;;  %v3098_v7 = vpop.f32.mrb[6].mxu1  ;;  %v1784_v4 = vpack.c.bf16 %v1256_v52, %v1240_v50 }
 0x454   : > { %v4254_v10 = vpop.f32.mrb[6].mxu0  ;;  %v3100_v11 = vpop.f32.mrb[7].mxu1 }
 0x455   : > { %v9765_v14 = vadd.f32 %v4254_v10, %v3098_v7  ;;  %v4256_v15 = vpop.f32.mrb[7].mxu0  ;;  %v4505_v17 = vsel %vm4498_vm0, %v9763_v6, 0.0  ;;  %v4757_v18 = vmul.f32 %v9763_v6, %v9763_v6  ;;  %v1793_v7 = vpack.c.bf16 %v1281_v58, %v1265_v53 }
 0x456   : > { %4820 = vadd.xlane.f32.xlu0 %v4819_v16  ;;  %4506 = vadd.xlane.f32.xlu1 %v4505_v17  ;;  %v1264_v15 = vld [vmem:[%s7842_s9 + $0x1f30] sm:$0xff] }
 0x457   : > { %3310 = vmatmul.mubr.bf16.gmra.mrb[112].mxu1 %v1744_v8  ;;  %4466 = vmatmul.mubr.bf16.gmra.mrb[112].mxu0 %v1752_v9  ;;  %v4825_v24 = vsel %vm4498_vm0, %v4757_v18, 0.0  ;;  %v4508_v25 = vsel %vm4498_vm0, %v9765_v14, 0.0  ;;  %v4758_v27 = vmul.f32 %v9765_v14, %v9765_v14  ;;  %v1801_v8 = vpack.c.bf16 %v1289_v60, %v1273_v59  ;;  %v1280_v16 = vld [vmem:[%s7842_s9 + $0x1fb0] sm:$0xff] }
 0x458   : > { %3317 = vmatprep.mubr.bf16.mxu1 %v1761_v12  ;;  %4473 = vmatprep.mubr.bf16.mxu0 %v1769_v13  ;;  %v1272_v17 = vld [vmem:[%s7842_s9 + $0x1f70] sm:$0xff]  ;;  %v1792_v28 = vpack.c.bf16 %v1280_v16, %v1264_v15 }
 0x459   : > { %v3103_v26 = vpop.f32.mrb[8].mxu1  ;;  %v4828_v45 = vsel %vm4498_vm0, %v4758_v27, 0.0  ;;  %v1288_v18 = vld [vmem:[%s7842_s9 + $0x1ff0] sm:$0xff]  ;;  %s6648_s9 = sshll.u32 %s6638_s19, 6 }
 0x45a   : > { %v4259_v31 = vpop.f32.mrb[8].mxu0  ;;  %4826 = vadd.xlane.f32.xlu0 %v4825_v24  ;;  %4509 = vadd.xlane.f32.xlu1 %v4508_v25  ;;  %v3105_v32 = vpop.f32.mrb[9].mxu1  ;;  %v1800_v29 = vpack.c.bf16 %v1288_v18, %v1272_v17  ;;  %p248_p7 = scmp.lt.s32.totalorder %s6648_s9, 127 }
 0x45b   : > { %v9785_v33 = vadd.f32 %v4259_v31, %v3103_v26  ;;  %v4261_v34 = vpop.f32.mrb[9].mxu0  ;;  %v3106_v35 = vpop.f32.mrb[10].mxu1 }
 0x45c   : > { %v4262_v38 = vpop.f32.mrb[10].mxu0  ;;  %v3108_v39 = vpop.f32.mrb[11].mxu1  ;;  %s11514_s9 = smov (!%p248_p7, %s6648_s9), 127 }
 0x45d   : > { %v9787_v42 = vadd.f32 %v4262_v38, %v3106_v35  ;;  %v4264_v44 = vpop.f32.mrb[11].mxu0  ;;  %v4511_v46 = vsel %vm4498_vm0, %v9785_v33, 0.0  ;;  %v4759_v47 = vmul.f32 %v9785_v33, %v9785_v33  ;;  %s10101_s18 = sshll.u32 %s11514_s9, 3 }
 0x45e   : > { %4829 = vadd.xlane.f32.xlu1 %v4828_v45  ;;  %4512 = vadd.xlane.f32.xlu0 %v4511_v46  ;;  %s10113_s30 = scalar_lea.vmem %s11215_s2, %s10101_s18  ;;  %s10135_s8 = scalar_lea.vmem %s11216_s3, %s10101_s18 }
 0x45f   : > { %3318 = vmatmul.mubr.bf16.gmra.mrb[116].mxu1 %v1760_v36  ;;  %4474 = vmatmul.mubr.bf16.gmra.mrb[116].mxu0 %v1768_v37  ;;  %v4831_v54 = vsel %vm4498_vm0, %v4759_v47, 0.0  ;;  %v4514_v55 = vsel %vm4498_vm0, %v9787_v42, 0.0  ;;  %v4760_v57 = vmul.f32 %v9787_v42, %v9787_v42  ;;  %s10357_s11 = scalar_lea.vmem %s11217_s4, %s10101_s18 }
 0x460   : > { %3325 = vmatprep.mubr.bf16.mxu1 %v1777_v40  ;;  %4481 = vmatprep.mubr.bf16.mxu0 %v1785_v41 }
 0x461   : > { %v3111_v56 = vpop.f32.mrb[12].mxu1  ;;  %v4834_v11 = vsel %vm4498_vm0, %v4760_v57, 0.0 }
 0x462   : > { %v4267_v61 = vpop.f32.mrb[12].mxu0  ;;  %4832 = vadd.xlane.f32.xlu0 %v4831_v54  ;;  %4515 = vadd.xlane.f32.xlu1 %v4514_v55  ;;  %v3113_v62 = vpop.f32.mrb[13].mxu1 }
 0x463   : > { %v9807_v63 = vadd.f32 %v4267_v61, %v3111_v56  ;;  %v4269_v1 = vpop.f32.mrb[13].mxu0  ;;  %v3114_v2 = vpop.f32.mrb[14].mxu1 }
 0x464   : > { %v4270_v5 = vpop.f32.mrb[14].mxu0  ;;  %v3116_v0 = vpop.f32.mrb[15].mxu1 }
 0x465   : > { %v9809_v9 = vadd.f32 %v4270_v5, %v3114_v2  ;;  %v4272_v10 = vpop.f32.mrb[15].mxu0  ;;  %v4517_v12 = vsel %vm4498_vm0, %v9807_v63, 0.0  ;;  %v4761_v13 = vmul.f32 %v9807_v63, %v9807_v63 }
 0x466   : > { %4835 = vadd.xlane.f32.xlu1 %v4834_v11  ;;  %4518 = vadd.xlane.f32.xlu0 %v4517_v12 }
 0x467   : > { %3326 = vmatmul.mubr.bf16.gmra.mrb[120].mxu1 %v1776_v3  ;;  %4482 = vmatmul.mubr.bf16.gmra.mrb[120].mxu0 %v1784_v4  ;;  %v4837_v19 = vsel %vm4498_vm0, %v4761_v13, 0.0  ;;  %v4520_v20 = vsel %vm4498_vm0, %v9809_v9, 0.0  ;;  %v4762_v22 = vmul.f32 %v9809_v9, %v9809_v9 }
 0x468   : > { %3333 = vmatprep.mubr.bf16.mxu1 %v1793_v7  ;;  %4489 = vmatprep.mubr.bf16.mxu0 %v1801_v8 }
 0x469   : > { %v3119_v21 = vpop.f32.mrb[16].mxu1  ;;  %v4840_v35 = vsel %vm4498_vm0, %v4762_v22, 0.0 }
 0x46a   : > { %v4275_v23 = vpop.f32.mrb[16].mxu0  ;;  %4838 = vadd.xlane.f32.xlu0 %v4837_v19  ;;  %4521 = vadd.xlane.f32.xlu1 %v4520_v20  ;;  %v3121_v24 = vpop.f32.mrb[17].mxu1 }
 0x46b   : > { %v9825_v25 = vadd.f32 %v4275_v23, %v3119_v21  ;;  %v4277_v26 = vpop.f32.mrb[17].mxu0  ;;  %v3122_v27 = vpop.f32.mrb[18].mxu1 }
 0x46c   : > { %v4278_v30 = vpop.f32.mrb[18].mxu0  ;;  %v3124_v31 = vpop.f32.mrb[19].mxu1 }
 0x46d   : > { %11282 = vst [vmem:[#allocation5_spill] sm:$0xff] %v9825_v25  ;;  %v9827_v32 = vadd.f32 %v4278_v30, %v3122_v27  ;;  %v4280_v34 = vpop.f32.mrb[19].mxu0  ;;  %v4523_v36 = vsel %vm4498_vm0, %v9825_v25, 0.0  ;;  %v4763_v37 = vmul.f32 %v9825_v25, %v9825_v25 }
 0x46e   : > { %4841 = vadd.xlane.f32.xlu1 %v4840_v35  ;;  %4524 = vadd.xlane.f32.xlu0 %v4523_v36 }
 0x46f   : > { %11283 = vst [vmem:[#allocation6_spill] sm:$0xff] %v9827_v32  ;;  %3334 = vmatmul.mubr.bf16.gmra.mrb[124].mxu1 %v1792_v28  ;;  %4490 = vmatmul.mubr.bf16.gmra.mrb[124].mxu0 %v1800_v29  ;;  %v4843_v38 = vsel %vm4498_vm0, %v4763_v37, 0.0  ;;  %v4526_v39 = vsel %vm4498_vm0, %v9827_v32, 0.0  ;;  %v4764_v41 = vmul.f32 %v9827_v32, %v9827_v32 }
 0x471   : > { %v3127_v40 = vpop.f32.mrb[20].mxu1  ;;  %v4846_v54 = vsel %vm4498_vm0, %v4764_v41, 0.0 }
 0x472   : > { %v4283_v44 = vpop.f32.mrb[20].mxu0  ;;  %4844 = vadd.xlane.f32.xlu0 %v4843_v38  ;;  %4527 = vadd.xlane.f32.xlu1 %v4526_v39  ;;  %v3129_v45 = vpop.f32.mrb[21].mxu1 }
 0x473   : > { %v9839_v46 = vadd.f32 %v4283_v44, %v3127_v40  ;;  %v4285_v47 = vpop.f32.mrb[21].mxu0  ;;  %v3130_v48 = vpop.f32.mrb[22].mxu1 }
 0x474   : > { %v4286_v49 = vpop.f32.mrb[22].mxu0  ;;  %v3132_v50 = vpop.f32.mrb[23].mxu1 }
 0x475   : > { %11284 = vst [vmem:[#allocation7_spill] sm:$0xff] %v9839_v46  ;;  %v9841_v52 = vadd.f32 %v4286_v49, %v3130_v48  ;;  %v4288_v53 = vpop.f32.mrb[23].mxu0  ;;  %v4529_v55 = vsel %vm4498_vm0, %v9839_v46, 0.0  ;;  %v4765_v56 = vmul.f32 %v9839_v46, %v9839_v46 }
 0x476   : > { %4847 = vadd.xlane.f32.xlu1 %v4846_v54  ;;  %4530 = vadd.xlane.f32.xlu0 %v4529_v55 }
 0x477   : > { %11285 = vst [vmem:[#allocation8_spill] sm:$0xff] %v9841_v52  ;;  %v4849_v57 = vsel %vm4498_vm0, %v4765_v56, 0.0  ;;  %v4532_v58 = vsel %vm4498_vm0, %v9841_v52, 0.0  ;;  %v4766_v60 = vmul.f32 %v9841_v52, %v9841_v52 }
 0x479   : > { %v3135_v59 = vpop.f32.mrb[24].mxu1  ;;  %v4852_v8 = vsel %vm4498_vm0, %v4766_v60, 0.0 }
 0x47a   : > { %v4291_v61 = vpop.f32.mrb[24].mxu0  ;;  %4850 = vadd.xlane.f32.xlu0 %v4849_v57  ;;  %4533 = vadd.xlane.f32.xlu1 %v4532_v58  ;;  %v3137_v62 = vpop.f32.mrb[25].mxu1 }
 0x47b   : > { %v9853_v1 = vadd.f32 %v4291_v61, %v3135_v59  ;;  %v4293_v2 = vpop.f32.mrb[25].mxu0  ;;  %v3138_v3 = vpop.f32.mrb[26].mxu1 }
 0x47c   : > { %v4294_v4 = vpop.f32.mrb[26].mxu0  ;;  %v3140_v5 = vpop.f32.mrb[27].mxu1 }
 0x47d   : > { %11286 = vst [vmem:[#allocation9_spill] sm:$0xff] %v9853_v1  ;;  %v9855_v0 = vadd.f32 %v4294_v4, %v3138_v3  ;;  %v4296_v7 = vpop.f32.mrb[27].mxu0  ;;  %v4535_v10 = vsel %vm4498_vm0, %v9853_v1, 0.0  ;;  %v4767_v11 = vmul.f32 %v9853_v1, %v9853_v1 }
 0x47e   : > { %4853 = vadd.xlane.f32.xlu1 %v4852_v8  ;;  %4536 = vadd.xlane.f32.xlu0 %v4535_v10 }
 0x47f   : > { %11287 = vst [vmem:[#allocation10_spill] sm:$0xff] %v9855_v0  ;;  %v4855_v12 = vsel %vm4498_vm0, %v4767_v11, 0.0  ;;  %v4538_v13 = vsel %vm4498_vm0, %v9855_v0, 0.0  ;;  %v4768_v16 = vmul.f32 %v9855_v0, %v9855_v0 }
 0x481   : > { %v3143_v15 = vpop.f32.mrb[28].mxu1  ;;  %v4858_v27 = vsel %vm4498_vm0, %v4768_v16, 0.0 }
 0x482   : > { %v4299_v17 = vpop.f32.mrb[28].mxu0  ;;  %4856 = vadd.xlane.f32.xlu0 %v4855_v12  ;;  %4539 = vadd.xlane.f32.xlu1 %v4538_v13  ;;  %v3145_v18 = vpop.f32.mrb[29].mxu1 }
 0x483   : > { %v9867_v19 = vadd.f32 %v4299_v17, %v3143_v15  ;;  %v4301_v20 = vpop.f32.mrb[29].mxu0  ;;  %v3146_v21 = vpop.f32.mrb[30].mxu1 }
 0x484   : > { %v4302_v22 = vpop.f32.mrb[30].mxu0  ;;  %v3148_v23 = vpop.f32.mrb[31].mxu1 }
 0x485   : > { %11288 = vst [vmem:[#allocation11_spill] sm:$0xff] %v9867_v19  ;;  %v9869_v24 = vadd.f32 %v4302_v22, %v3146_v21  ;;  %v4304_v26 = vpop.f32.mrb[31].mxu0  ;;  %v4541_v28 = vsel %vm4498_vm0, %v9867_v19, 0.0  ;;  %v4769_v29 = vmul.f32 %v9867_v19, %v9867_v19 }
 0x486   : > { %4859 = vadd.xlane.f32.xlu1 %v4858_v27  ;;  %4542 = vadd.xlane.f32.xlu0 %v4541_v28 }
 0x487   : > { %11289 = vst [vmem:[#allocation12_spill] sm:$0xff] %v9869_v24  ;;  %v4861_v30 = vsel %vm4498_vm0, %v4769_v29, 0.0  ;;  %v4544_v31 = vsel %vm4498_vm0, %v9869_v24, 0.0  ;;  %v4770_v35 = vmul.f32 %v9869_v24, %v9869_v24 }
 0x489   : > { %v3151_v34 = vpop.f32.mrb[32].mxu1  ;;  %v4864_v48 = vsel %vm4498_vm0, %v4770_v35, 0.0 }
 0x48a   : > { %v4307_v36 = vpop.f32.mrb[32].mxu0  ;;  %4862 = vadd.xlane.f32.xlu0 %v4861_v30  ;;  %4545 = vadd.xlane.f32.xlu1 %v4544_v31  ;;  %v3153_v37 = vpop.f32.mrb[33].mxu1 }
 0x48b   : > { %v9881_v38 = vadd.f32 %v4307_v36, %v3151_v34  ;;  %v4309_v39 = vpop.f32.mrb[33].mxu0  ;;  %v3154_v40 = vpop.f32.mrb[34].mxu1 }
 0x48c   : > { %v4310_v41 = vpop.f32.mrb[34].mxu0  ;;  %v3156_v44 = vpop.f32.mrb[35].mxu1 }
 0x48d   : > { %11290 = vst [vmem:[#allocation13_spill] sm:$0xff] %v9881_v38  ;;  %v9883_v45 = vadd.f32 %v4310_v41, %v3154_v40  ;;  %v4312_v47 = vpop.f32.mrb[35].mxu0  ;;  %v4547_v49 = vsel %vm4498_vm0, %v9881_v38, 0.0  ;;  %v4771_v50 = vmul.f32 %v9881_v38, %v9881_v38 }
 0x48e   : > { %4865 = vadd.xlane.f32.xlu1 %v4864_v48  ;;  %4548 = vadd.xlane.f32.xlu0 %v4547_v49 }
 0x48f   : > { %11291 = vst [vmem:[#allocation14_spill] sm:$0xff] %v9883_v45  ;;  %v4867_v53 = vsel %vm4498_vm0, %v4771_v50, 0.0  ;;  %v4550_v54 = vsel %vm4498_vm0, %v9883_v45, 0.0  ;;  %v4772_v56 = vmul.f32 %v9883_v45, %v9883_v45 }
 0x491   : > { %v3159_v55 = vpop.f32.mrb[36].mxu1  ;;  %v4870_v5 = vsel %vm4498_vm0, %v4772_v56, 0.0 }
 0x492   : > { %v4315_v57 = vpop.f32.mrb[36].mxu0  ;;  %4868 = vadd.xlane.f32.xlu0 %v4867_v53  ;;  %4551 = vadd.xlane.f32.xlu1 %v4550_v54  ;;  %v3161_v58 = vpop.f32.mrb[37].mxu1 }
 0x493   : > { %v9895_v59 = vadd.f32 %v4315_v57, %v3159_v55  ;;  %v4317_v60 = vpop.f32.mrb[37].mxu0  ;;  %v3162_v61 = vpop.f32.mrb[38].mxu1 }
 0x494   : > { %v4318_v62 = vpop.f32.mrb[38].mxu0  ;;  %v3164_v2 = vpop.f32.mrb[39].mxu1 }
 0x495   : > { %11292 = vst [vmem:[#allocation15_spill] sm:$0xff] %v9895_v59  ;;  %v9897_v3 = vadd.f32 %v4318_v62, %v3162_v61  ;;  %v4320_v4 = vpop.f32.mrb[39].mxu0  ;;  %v4553_v7 = vsel %vm4498_vm0, %v9895_v59, 0.0  ;;  %v4773_v8 = vmul.f32 %v9895_v59, %v9895_v59 }
 0x496   : > { %4871 = vadd.xlane.f32.xlu1 %v4870_v5  ;;  %4554 = vadd.xlane.f32.xlu0 %v4553_v7 }
 0x497   : > { %11293 = vst [vmem:[#allocation16_spill] sm:$0xff] %v9897_v3  ;;  %v4873_v10 = vsel %vm4498_vm0, %v4773_v8, 0.0  ;;  %v4556_v11 = vsel %vm4498_vm0, %v9897_v3, 0.0  ;;  %v4774_v13 = vmul.f32 %v9897_v3, %v9897_v3 }
 0x499   : > { %v3167_v12 = vpop.f32.mrb[40].mxu1  ;;  %v4876_v27 = vsel %vm4498_vm0, %v4774_v13, 0.0 }
 0x49a   : > { %v4323_v15 = vpop.f32.mrb[40].mxu0  ;;  %4874 = vadd.xlane.f32.xlu0 %v4873_v10  ;;  %4557 = vadd.xlane.f32.xlu1 %v4556_v11  ;;  %v3169_v16 = vpop.f32.mrb[41].mxu1 }
 0x49b   : > { %v9909_v17 = vadd.f32 %v4323_v15, %v3167_v12  ;;  %v4325_v18 = vpop.f32.mrb[41].mxu0  ;;  %v3170_v20 = vpop.f32.mrb[42].mxu1 }
 0x49c   : > { %v4326_v21 = vpop.f32.mrb[42].mxu0  ;;  %v3172_v22 = vpop.f32.mrb[43].mxu1 }
 0x49d   : > { %11294 = vst [vmem:[#allocation17_spill] sm:$0xff] %v9909_v17  ;;  %v9911_v23 = vadd.f32 %v4326_v21, %v3170_v20  ;;  %v4328_v26 = vpop.f32.mrb[43].mxu0  ;;  %v4559_v28 = vsel %vm4498_vm0, %v9909_v17, 0.0  ;;  %v4775_v29 = vmul.f32 %v9909_v17, %v9909_v17 }
 0x49e   : > { %4877 = vadd.xlane.f32.xlu1 %v4876_v27  ;;  %4560 = vadd.xlane.f32.xlu0 %v4559_v28 }
 0x49f   : > { %11295 = vst [vmem:[#allocation18_spill] sm:$0xff] %v9911_v23  ;;  %v4879_v30 = vsel %vm4498_vm0, %v4775_v29, 0.0  ;;  %v4562_v31 = vsel %vm4498_vm0, %v9911_v23, 0.0  ;;  %v4776_v35 = vmul.f32 %v9911_v23, %v9911_v23 }
 0x4a1   : > { %v3175_v34 = vpop.f32.mrb[44].mxu1  ;;  %v4882_v50 = vsel %vm4498_vm0, %v4776_v35, 0.0 }
 0x4a2   : > { %v4331_v36 = vpop.f32.mrb[44].mxu0  ;;  %4880 = vadd.xlane.f32.xlu0 %v4879_v30  ;;  %4563 = vadd.xlane.f32.xlu1 %v4562_v31  ;;  %v3177_v37 = vpop.f32.mrb[45].mxu1 }
 0x4a3   : > { %v9923_v39 = vadd.f32 %v4331_v36, %v3175_v34  ;;  %v4333_v40 = vpop.f32.mrb[45].mxu0  ;;  %v3178_v41 = vpop.f32.mrb[46].mxu1 }
 0x4a4   : > { %v4334_v44 = vpop.f32.mrb[46].mxu0  ;;  %v3180_v47 = vpop.f32.mrb[47].mxu1 }
 0x4a5   : > { %11296 = vst [vmem:[#allocation19_spill] sm:$0xff] %v9923_v39  ;;  %v9925_v48 = vadd.f32 %v4334_v44, %v3178_v41  ;;  %v4336_v49 = vpop.f32.mrb[47].mxu0  ;;  %v4565_v53 = vsel %vm4498_vm0, %v9923_v39, 0.0  ;;  %v4777_v54 = vmul.f32 %v9923_v39, %v9923_v39 }
 0x4a6   : > { %4883 = vadd.xlane.f32.xlu1 %v4882_v50  ;;  %4566 = vadd.xlane.f32.xlu0 %v4565_v53 }
 0x4a7   : > { %11297 = vst [vmem:[#allocation20_spill] sm:$0xff] %v9925_v48  ;;  %v4885_v55 = vsel %vm4498_vm0, %v4777_v54, 0.0  ;;  %v4568_v56 = vsel %vm4498_vm0, %v9925_v48, 0.0  ;;  %v4778_v58 = vmul.f32 %v9925_v48, %v9925_v48 }
 0x4a9   : > { %v3183_v57 = vpop.f32.mrb[48].mxu1  ;;  %v4888_v11 = vsel %vm4498_vm0, %v4778_v58, 0.0 }
 0x4aa   : > { %v4339_v60 = vpop.f32.mrb[48].mxu0  ;;  %4886 = vadd.xlane.f32.xlu0 %v4885_v55  ;;  %4569 = vadd.xlane.f32.xlu1 %v4568_v56  ;;  %v3185_v61 = vpop.f32.mrb[49].mxu1 }
 0x4ab   : > { %v9937_v62 = vadd.f32 %v4339_v60, %v3183_v57  ;;  %v4341_v2 = vpop.f32.mrb[49].mxu0  ;;  %v3186_v4 = vpop.f32.mrb[50].mxu1 }
 0x4ac   : > { %v4342_v5 = vpop.f32.mrb[50].mxu0  ;;  %v3188_v7 = vpop.f32.mrb[51].mxu1 }
 0x4ad   : > { %11298 = vst [vmem:[#allocation21_spill] sm:$0xff] %v9937_v62  ;;  %v9939_v8 = vadd.f32 %v4342_v5, %v3186_v4  ;;  %v4344_v10 = vpop.f32.mrb[51].mxu0  ;;  %v4571_v12 = vsel %vm4498_vm0, %v9937_v62, 0.0  ;;  %v4779_v13 = vmul.f32 %v9937_v62, %v9937_v62 }
 0x4ae   : > { %4889 = vadd.xlane.f32.xlu1 %v4888_v11  ;;  %4572 = vadd.xlane.f32.xlu0 %v4571_v12 }
 0x4af   : > { %11299 = vst [vmem:[#allocation22_spill] sm:$0xff] %v9939_v8  ;;  %v4891_v15 = vsel %vm4498_vm0, %v4779_v13, 0.0  ;;  %v4574_v16 = vsel %vm4498_vm0, %v9939_v8, 0.0  ;;  %v4780_v20 = vmul.f32 %v9939_v8, %v9939_v8 }
 0x4b1   : > { %v3191_v18 = vpop.f32.mrb[52].mxu1  ;;  %v4894_v35 = vsel %vm4498_vm0, %v4780_v20, 0.0 }
 0x4b2   : > { %v4347_v21 = vpop.f32.mrb[52].mxu0  ;;  %4892 = vadd.xlane.f32.xlu0 %v4891_v15  ;;  %4575 = vadd.xlane.f32.xlu1 %v4574_v16  ;;  %v3193_v22 = vpop.f32.mrb[53].mxu1 }
 0x4b3   : > { %v9951_v26 = vadd.f32 %v4347_v21, %v3191_v18  ;;  %v4349_v27 = vpop.f32.mrb[53].mxu0  ;;  %v3194_v28 = vpop.f32.mrb[54].mxu1 }
 0x4b4   : > { %v4350_v29 = vpop.f32.mrb[54].mxu0  ;;  %v3196_v30 = vpop.f32.mrb[55].mxu1 }
 0x4b5   : > { %11300 = vst [vmem:[#allocation23_spill] sm:$0xff] %v9951_v26  ;;  %v9953_v31 = vadd.f32 %v4350_v29, %v3194_v28  ;;  %v4352_v34 = vpop.f32.mrb[55].mxu0  ;;  %v4577_v36 = vsel %vm4498_vm0, %v9951_v26, 0.0  ;;  %v4781_v37 = vmul.f32 %v9951_v26, %v9951_v26 }
 0x4b6   : > { %4895 = vadd.xlane.f32.xlu1 %v4894_v35  ;;  %4578 = vadd.xlane.f32.xlu0 %v4577_v36 }
 0x4b7   : > { %11301 = vst [vmem:[#allocation24_spill] sm:$0xff] %v9953_v31  ;;  %v4897_v40 = vsel %vm4498_vm0, %v4781_v37, 0.0  ;;  %v4580_v41 = vsel %vm4498_vm0, %v9953_v31, 0.0  ;;  %v4782_v47 = vmul.f32 %v9953_v31, %v9953_v31 }
 0x4b9   : > { %v3199_v44 = vpop.f32.mrb[56].mxu1  ;;  %v4900_v61 = vsel %vm4498_vm0, %v4782_v47, 0.0 }
 0x4ba   : > { %v4355_v49 = vpop.f32.mrb[56].mxu0  ;;  %4898 = vadd.xlane.f32.xlu0 %v4897_v40  ;;  %4581 = vadd.xlane.f32.xlu1 %v4580_v41  ;;  %v3201_v50 = vpop.f32.mrb[57].mxu1 }
 0x4bb   : > { %v9965_v53 = vadd.f32 %v4355_v49, %v3199_v44  ;;  %v4357_v54 = vpop.f32.mrb[57].mxu0  ;;  %v3202_v55 = vpop.f32.mrb[58].mxu1 }
 0x4bc   : > { %v4358_v56 = vpop.f32.mrb[58].mxu0  ;;  %v3204_v57 = vpop.f32.mrb[59].mxu1 }
 0x4bd   : > { %11302 = vst [vmem:[#allocation25_spill] sm:$0xff] %v9965_v53  ;;  %v9967_v58 = vadd.f32 %v4358_v56, %v3202_v55  ;;  %v4360_v60 = vpop.f32.mrb[59].mxu0  ;;  %v4583_v2 = vsel %vm4498_vm0, %v9965_v53, 0.0  ;;  %v4783_v4 = vmul.f32 %v9965_v53, %v9965_v53 }
 0x4be   : > { %4901 = vadd.xlane.f32.xlu1 %v4900_v61  ;;  %4584 = vadd.xlane.f32.xlu0 %v4583_v2 }
 0x4bf   : > { %11303 = vst [vmem:[#allocation26_spill] sm:$0xff] %v9967_v58  ;;  %v4903_v5 = vsel %vm4498_vm0, %v4783_v4, 0.0  ;;  %v4586_v7 = vsel %vm4498_vm0, %v9967_v58, 0.0  ;;  %v4784_v11 = vmul.f32 %v9967_v58, %v9967_v58 }
 0x4c1   : > { %v3207_v10 = vpop.f32.mrb[60].mxu1  ;;  %v4906_v28 = vsel %vm4498_vm0, %v4784_v11, 0.0 }
 0x4c2   : > { %v4363_v12 = vpop.f32.mrb[60].mxu0  ;;  %4904 = vadd.xlane.f32.xlu0 %v4903_v5  ;;  %4587 = vadd.xlane.f32.xlu1 %v4586_v7  ;;  %v3209_v13 = vpop.f32.mrb[61].mxu1 }
 0x4c3   : > { %v9979_v15 = vadd.f32 %v4363_v12, %v3207_v10  ;;  %v4365_v16 = vpop.f32.mrb[61].mxu0  ;;  %v3210_v18 = vpop.f32.mrb[62].mxu1 }
 0x4c4   : > { %v4366_v20 = vpop.f32.mrb[62].mxu0  ;;  %v3212_v21 = vpop.f32.mrb[63].mxu1 }
 0x4c5   : > { %11304 = vst [vmem:[#allocation27_spill] sm:$0xff] %v9979_v15  ;;  %v9981_v22 = vadd.f32 %v4366_v20, %v3210_v18  ;;  %v4368_v27 = vpop.f32.mrb[63].mxu0  ;;  %v4589_v29 = vsel %vm4498_vm0, %v9979_v15, 0.0  ;;  %v4785_v30 = vmul.f32 %v9979_v15, %v9979_v15 }
 0x4c6   : > { %4907 = vadd.xlane.f32.xlu1 %v4906_v28  ;;  %4590 = vadd.xlane.f32.xlu0 %v4589_v29 }
 0x4c7   : > { %11305 = vst [vmem:[#allocation28_spill] sm:$0xff] %v9981_v22  ;;  %v4909_v34 = vsel %vm4498_vm0, %v4785_v30, 0.0  ;;  %v4592_v35 = vsel %vm4498_vm0, %v9981_v22, 0.0  ;;  %v4786_v37 = vmul.f32 %v9981_v22, %v9981_v22 }
 0x4c9   : > { %v3215_v36 = vpop.f32.mrb[64].mxu1  ;;  %v4912_v57 = vsel %vm4498_vm0, %v4786_v37, 0.0 }
 0x4ca   : > { %v4371_v40 = vpop.f32.mrb[64].mxu0  ;;  %4910 = vadd.xlane.f32.xlu0 %v4909_v34  ;;  %4593 = vadd.xlane.f32.xlu1 %v4592_v35  ;;  %v3217_v41 = vpop.f32.mrb[65].mxu1 }
 0x4cb   : > { %v9993_v44 = vadd.f32 %v4371_v40, %v3215_v36  ;;  %v4373_v47 = vpop.f32.mrb[65].mxu0  ;;  %v3218_v49 = vpop.f32.mrb[66].mxu1 }
 0x4cc   : > { %v4374_v50 = vpop.f32.mrb[66].mxu0  ;;  %v3220_v54 = vpop.f32.mrb[67].mxu1 }
 0x4cd   : > { %11306 = vst [vmem:[#allocation29_spill] sm:$0xff] %v9993_v44  ;;  %v9995_v55 = vadd.f32 %v4374_v50, %v3218_v49  ;;  %v4376_v56 = vpop.f32.mrb[67].mxu0  ;;  %v4595_v60 = vsel %vm4498_vm0, %v9993_v44, 0.0  ;;  %v4787_v61 = vmul.f32 %v9993_v44, %v9993_v44 }
 0x4ce   : > { %4913 = vadd.xlane.f32.xlu1 %v4912_v57  ;;  %4596 = vadd.xlane.f32.xlu0 %v4595_v60 }
 0x4cf   : > { %11307 = vst [vmem:[#allocation30_spill] sm:$0xff] %v9995_v55  ;;  %v4915_v2 = vsel %vm4498_vm0, %v4787_v61, 0.0  ;;  %v4598_v4 = vsel %vm4498_vm0, %v9995_v55, 0.0  ;;  %v4788_v7 = vmul.f32 %v9995_v55, %v9995_v55 }
 0x4d1   : > { %v3223_v5 = vpop.f32.mrb[68].mxu1  ;;  %v4918_v28 = vsel %vm4498_vm0, %v4788_v7, 0.0 }
 0x4d2   : > { %v4379_v10 = vpop.f32.mrb[68].mxu0  ;;  %4916 = vadd.xlane.f32.xlu0 %v4915_v2  ;;  %4599 = vadd.xlane.f32.xlu1 %v4598_v4  ;;  %v3225_v11 = vpop.f32.mrb[69].mxu1 }
 0x4d3   : > { %v10007_v12 = vadd.f32 %v4379_v10, %v3223_v5  ;;  %v4381_v13 = vpop.f32.mrb[69].mxu0  ;;  %v3226_v16 = vpop.f32.mrb[70].mxu1 }
 0x4d4   : > { %v4382_v18 = vpop.f32.mrb[70].mxu0  ;;  %v3228_v20 = vpop.f32.mrb[71].mxu1 }
 0x4d5   : > { %11308 = vst [vmem:[#allocation31_spill] sm:$0xff] %v10007_v12  ;;  %v10009_v21 = vadd.f32 %v4382_v18, %v3226_v16  ;;  %v4384_v27 = vpop.f32.mrb[71].mxu0  ;;  %v4601_v29 = vsel %vm4498_vm0, %v10007_v12, 0.0  ;;  %v4789_v30 = vmul.f32 %v10007_v12, %v10007_v12 }
 0x4d6   : > { %4919 = vadd.xlane.f32.xlu1 %v4918_v28  ;;  %4602 = vadd.xlane.f32.xlu0 %v4601_v29 }
 0x4d7   : > { %11309 = vst [vmem:[#allocation32_spill] sm:$0xff] %v10009_v21  ;;  %v4921_v34 = vsel %vm4498_vm0, %v4789_v30, 0.0  ;;  %v4604_v35 = vsel %vm4498_vm0, %v10009_v21, 0.0  ;;  %v4790_v37 = vmul.f32 %v10009_v21, %v10009_v21 }
 0x4d9   : > { %v3231_v36 = vpop.f32.mrb[72].mxu1  ;;  %v4924_v2 = vsel %vm4498_vm0, %v4790_v37, 0.0 }
 0x4da   : > { %v4387_v40 = vpop.f32.mrb[72].mxu0  ;;  %4922 = vadd.xlane.f32.xlu0 %v4921_v34  ;;  %4605 = vadd.xlane.f32.xlu1 %v4604_v35  ;;  %v3233_v41 = vpop.f32.mrb[73].mxu1 }
 0x4db   : > { %v10021_v47 = vadd.f32 %v4387_v40, %v3231_v36  ;;  %v4389_v49 = vpop.f32.mrb[73].mxu0  ;;  %v4501_v50 = vpop.xlane.xlu0 %4500 }
 0x4dc   : > { %v3234_v54 = vpop.f32.mrb[74].mxu1  ;;  %v4390_v56 = vpop.f32.mrb[74].mxu0  ;;  %v10035_v20 = vmul.f32 0.020408163, %v4501_v50 }
 0x4dd   : > { %11310 = vst [vmem:[#allocation33_spill] sm:$0xff] %v10021_v47  ;;  %v10023_v57 = vadd.f32 %v4390_v56, %v3234_v54  ;;  %v3236_v60 = vpop.f32.mrb[75].mxu1  ;;  %v4392_v61 = vpop.f32.mrb[75].mxu0  ;;  %v4607_v4 = vsel %vm4498_vm0, %v10021_v47, 0.0  ;;  %v4791_v5 = vmul.f32 %v10021_v47, %v10021_v47 }
 0x4de   : > { %4925 = vadd.xlane.f32.xlu1 %v4924_v2  ;;  %4608 = vadd.xlane.f32.xlu0 %v4607_v4  ;;  %v5075_v60 = vmul.f32 %v10035_v20, %v10035_v20 }
 0x4df   : > { %11311 = vst [vmem:[#allocation34_spill] sm:$0xff] %v10023_v57  ;;  %v4824_v7 = vpop.xlane.xlu1 %4823  ;;  %v4504_v10 = vpop.xlane.xlu0 %4503  ;;  %v4927_v11 = vsel %vm4498_vm0, %v4791_v5, 0.0  ;;  %v4610_v13 = vsel %vm4498_vm0, %v10023_v57, 0.0  ;;  %v4792_v18 = vmul.f32 %v10023_v57, %v10023_v57  ;;  %v5396_v57 = vld [vmem:[%s10113_s30 + $0x8] sm:$0xff] }
 0x4e0   : > { %v10039_v35 = vmul.f32 0.020408163, %v4504_v10 }
 0x4e1   : > { %v3239_v16 = vpop.f32.mrb[76].mxu1  ;;  %v4930_v54 = vsel %vm4498_vm0, %v4792_v18, 0.0 }
 0x4e2   : > { %v4395_v27 = vpop.f32.mrb[76].mxu0  ;;  %4928 = vadd.xlane.f32.xlu0 %v4927_v11  ;;  %4611 = vadd.xlane.f32.xlu1 %v4610_v13  ;;  %v3241_v28 = vpop.f32.mrb[77].mxu1  ;;  %v5076_v5 = vmul.f32 %v10039_v35, %v10039_v35 }
 0x4e3   : > { %v10037_v29 = vadd.f32 %v4395_v27, %v3239_v16  ;;  %v4397_v30 = vpop.f32.mrb[77].mxu0  ;;  %v4821_v34 = vpop.xlane.xlu0 %4820  ;;  %v5012_v28 = vmul.f32 0.020408163, %v4824_v7 }
 0x4e4   : > { %v5011_v36 = vmul.f32 0.020408163, %v4821_v34  ;;  %v10041_v37 = vpop.xlane.xlu1 %4506  ;;  %v3242_v40 = vpop.f32.mrb[78].mxu1 }
 0x4e5   : > { %11312 = vst [vmem:[#allocation35_spill] sm:$0xff] %v10037_v29  ;;  %v4398_v41 = vpop.f32.mrb[78].mxu0  ;;  %v3244_v49 = vpop.f32.mrb[79].mxu1  ;;  %v4613_v50 = vsel %vm4498_vm0, %v10037_v29, 0.0  ;;  %v4793_v56 = vmul.f32 %v10037_v29, %v10037_v29 }
 0x4e6   : > { %v10050_v61 = vadd.f32 %v4398_v41, %v3242_v40  ;;  %v4400_v2 = vpop.f32.mrb[79].mxu0  ;;  %4931 = vadd.xlane.f32.xlu1 %v4930_v54  ;;  %4614 = vadd.xlane.f32.xlu0 %v4613_v50  ;;  %v5139_v10 = vsub.f32 %v5011_v36, %v5075_v60  ;;  %v5140_v49 = vsub.f32 %v5012_v28, %v5076_v5 }
 0x4e7   : > { %v10052_v4 = vpop.xlane.xlu0 %4826  ;;  %v4933_v13 = vsel %vm4498_vm0, %v4793_v56, 0.0 }
 0x4e8   : > { %11313 = vst [vmem:[#allocation36_spill] sm:$0xff] %v10050_v61  ;;  %v10056_v11 = vpop.xlane.xlu1 %4509  ;;  %v4616_v16 = vsel %vm4498_vm0, %v10050_v61, 0.0  ;;  %v4794_v27 = vmul.f32 %v10050_v61, %v10050_v61  ;;  %v5203_v54 = vmax.f32 %v5139_v10, 0.0  ;;  %v5204_v10 = vmax.f32 %v5140_v49, 0.0 }
 0x4e9   : > { %v3247_v18 = vpop.f32.mrb[80].mxu1 }
 0x4ea   : > { %v4403_v30 = vpop.f32.mrb[80].mxu0  ;;  %4934 = vadd.xlane.f32.xlu0 %v4933_v13  ;;  %4617 = vadd.xlane.f32.xlu1 %v4616_v16  ;;  %v3249_v34 = vpop.f32.mrb[81].mxu1  ;;  %v4936_v29 = vsel %vm4498_vm0, %v4794_v27, 0.0  ;;  %v5267_v28 = vadd.f32 1e-05, %v5203_v54 }
 0x4eb   : > { %v10063_v40 = vadd.f32 %v4403_v30, %v3247_v18  ;;  %v4405_v36 = vpop.f32.mrb[81].mxu0  ;;  %v10065_v41 = vpop.xlane.xlu0 %4512 }
 0x4ec   : > { %v10067_v50 = vpop.xlane.xlu1 %4829  ;;  %v3250_v56 = vpop.f32.mrb[82].mxu1  ;;  %7534 = vrsqrt.f32 %v5267_v28 }
 0x4ed   : > { %11314 = vst [vmem:[#allocation37_spill] sm:$0xff] %v10063_v40  ;;  %v4406_v60 = vpop.f32.mrb[82].mxu0  ;;  %v3252_v2 = vpop.f32.mrb[83].mxu1  ;;  %v4619_v7 = vsel %vm4498_vm0, %v10063_v40, 0.0  ;;  %v4795_v13 = vmul.f32 %v10063_v40, %v10063_v40 }
 0x4ee   : > { %v10074_v16 = vadd.f32 %v4406_v60, %v3250_v56  ;;  %v4408_v18 = vpop.f32.mrb[83].mxu0  ;;  %4937 = vadd.xlane.f32.xlu1 %v4936_v29  ;;  %4620 = vadd.xlane.f32.xlu0 %v4619_v7  ;;  %v5268_v7 = vadd.f32 1e-05, %v5204_v10 }
 0x4ef   : > { %v10078_v5 = vpop.xlane.xlu0 %4832  ;;  %v4939_v27 = vsel %vm4498_vm0, %v4795_v13, 0.0 }
 0x4f0   : > { %11315 = vst [vmem:[#allocation38_spill] sm:$0xff] %v10074_v16  ;;  %v10080_v30 = vpop.xlane.xlu1 %4515  ;;  %v4622_v34 = vsel %vm4498_vm0, %v10074_v16, 0.0  ;;  %v4796_v56 = vmul.f32 %v10074_v16, %v10074_v16  ;;  %7536 = vrsqrt.f32 %v5268_v7 }
 0x4f1   : > { %v3255_v36 = vpop.f32.mrb[84].mxu1 }
 0x4f2   : > { %v4411_v29 = vpop.f32.mrb[84].mxu0  ;;  %4940 = vadd.xlane.f32.xlu0 %v4939_v27  ;;  %4623 = vadd.xlane.f32.xlu1 %v4622_v34  ;;  %v3257_v60 = vpop.f32.mrb[85].mxu1  ;;  %v4942_v12 = vsel %vm4498_vm0, %v4796_v56, 0.0 }
 0x4f3   : > { %v10087_v2 = vadd.f32 %v4411_v29, %v3255_v36  ;;  %v4413_v49 = vpop.f32.mrb[85].mxu0  ;;  %v10089_v54 = vpop.xlane.xlu0 %4518 }
 0x4f4   : > { %v10091_v13 = vpop.xlane.xlu1 %4835  ;;  %v3258_v18 = vpop.f32.mrb[86].mxu1 }
 0x4f5   : > { %11316 = vst [vmem:[#allocation39_spill] sm:$0xff] %v10087_v2  ;;  %v4414_v40 = vpop.f32.mrb[86].mxu0  ;;  %v3260_v47 = vpop.f32.mrb[87].mxu1 }
 0x4f6   : > { %v10095_v16 = vadd.f32 %v4414_v40, %v3258_v18  ;;  %v4416_v27 = vpop.f32.mrb[87].mxu0  ;;  %4943 = vadd.xlane.f32.xlu1 %v4942_v12  ;;  %v7535_v18 = vpop.eup %7534 }
 0x4f7   : > { %v10097_v34 = vpop.xlane.xlu0 %4838 }
 0x4f8   : > { %11317 = vst [vmem:[#allocation40_spill] sm:$0xff] %v10095_v16  ;;  %v10099_v36 = vpop.xlane.xlu1 %4521 }
 0x4f9   : > { %v3263_v10 = vpop.f32.mrb[88].mxu1 }
 0x4fa   : > { %v4419_v28 = vpop.f32.mrb[88].mxu0  ;;  %v3265_v29 = vpop.f32.mrb[89].mxu1 }
 0x4fb   : > { %v10103_v47 = vadd.f32 %v4419_v28, %v3263_v10  ;;  %v4421_v56 = vpop.f32.mrb[89].mxu0  ;;  %v10105_v60 = vpop.xlane.xlu0 %4524  ;;  %v5395_v28 = vld [vmem:[%s10113_s30] sm:$0xff] }
 0x4fc   : > { %v10107_v40 = vpop.xlane.xlu1 %4841  ;;  %v3266_v49 = vpop.f32.mrb[90].mxu1  ;;  %v5459_v61 = vmul.f32 %v7535_v18, %v5395_v28 }
 0x4fd   : > { %11318 = vst [vmem:[#allocation41_spill] sm:$0xff] %v10103_v47  ;;  %v4422_v12 = vpop.f32.mrb[90].mxu0  ;;  %v3268_v7 = vpop.f32.mrb[91].mxu1 }
 0x4fe   : > { %v10115_v27 = vadd.f32 %v4422_v12, %v3266_v49  ;;  %v4424_v10 = vpop.f32.mrb[91].mxu0  ;;  %v7537_v15 = vpop.eup %7536 }
 0x4ff   : > { %v10118_v29 = vpop.xlane.xlu0 %4844  ;;  %v10129_v10 = vmul.f32 %v7537_v15, %v5396_v57 }
 0x500   : > { %11319 = vst [vmem:[#allocation42_spill] sm:$0xff] %v10115_v27  ;;  %v10120_v56 = vpop.xlane.xlu1 %4527 }
 0x501   : > { %v3271_v44 = vpop.f32.mrb[92].mxu1 }
 0x502   : > { %v4427_v53 = vpop.f32.mrb[92].mxu0  ;;  %v3273_v21 = vpop.f32.mrb[93].mxu1 }
 0x503   : > { %v10123_v26 = vadd.f32 %v4427_v53, %v3271_v44  ;;  %v4429_v55 = vpop.f32.mrb[93].mxu0  ;;  %v10125_v7 = vpop.xlane.xlu0 %4530  ;;  %v5587_v21 = vmul.f32 %v5459_v61, %v10035_v20 }
 0x504   : > { %v10127_v49 = vpop.xlane.xlu1 %4847  ;;  %v3274_v12 = vpop.f32.mrb[94].mxu1  ;;  %v5523_v55 = vld [vmem:[%s10135_s8] sm:$0xff] }
 0x505   : > { %11320 = vst [vmem:[#allocation43_spill] sm:$0xff] %v10123_v26  ;;  %v4430_v62 = vpop.f32.mrb[94].mxu0  ;;  %v3276_v22 = vpop.f32.mrb[95].mxu1  ;;  %v5651_v57 = vsub.f32 %v5523_v55, %v5587_v21 }
 0x506   : > { %v10138_v53 = vadd.f32 %v4430_v62, %v3274_v12  ;;  %v4432_v44 = vpop.f32.mrb[95].mxu0 }
 0x507   : > { %v10141_v18 = vpop.xlane.xlu0 %4850  ;;  %5722 = vperm.xlu1 %7533, %v10129_v10  }
 0x508   : > { %11321 = vst [vmem:[#allocation44_spill] sm:$0xff] %v10138_v53  ;;  %v10144_v15 = vpop.xlane.xlu1 %4533  ;;  %5717 = vperm.xlu0 %7532, %v5459_v61  }
 0x509   : > { %v3279_v22 = vpop.f32.mrb[96].mxu1 }
 0x50a   : > { %v4435_v28 = vpop.f32.mrb[96].mxu0  ;;  %v3281_v39 = vpop.f32.mrb[97].mxu1 }
 0x50b   : > { %v10146_v58 = vadd.f32 %v4435_v28, %v3279_v22  ;;  %v4437_v31 = vpop.f32.mrb[97].mxu0  ;;  %v10148_v8 = vpop.xlane.xlu0 %4536  ;;  %6101 = vperm.xlu1 %7533, %v5651_v57  }
 0x50c   : > { %v10150_v62 = vpop.xlane.xlu1 %4853  ;;  %v3282_v20 = vpop.f32.mrb[98].mxu1 }
 0x50d   : > { %11322 = vst [vmem:[#allocation45_spill] sm:$0xff] %v10146_v58  ;;  %v4438_v12 = vpop.f32.mrb[98].mxu0  ;;  %v3284_v44 = vpop.f32.mrb[99].mxu1 }
 0x50e   : > { %v10152_v48 = vadd.f32 %v4438_v12, %v3282_v20  ;;  %v4440_v23 = vpop.f32.mrb[99].mxu0 }
 0x50f   : > { %v10154_v17 = vpop.xlane.xlu0 %4856 }
 0x510   : > { %11323 = vst [vmem:[#allocation46_spill] sm:$0xff] %v10152_v48  ;;  %v10156_v61 = vpop.xlane.xlu1 %4539 }
 0x511   : > { %v3287_v21 = vpop.f32.mrb[100].mxu1 }
 0x512   : > { %v4443_v39 = vpop.f32.mrb[100].mxu0  ;;  %v3289_v55 = vpop.f32.mrb[101].mxu1 }
 0x513   : > { %v10158_v22 = vadd.f32 %v4443_v39, %v3287_v21  ;;  %v4445_v31 = vpop.f32.mrb[101].mxu0  ;;  %v10160_v28 = vpop.xlane.xlu0 %4542 }
 0x514   : > { %11325 = vst [vmem:[#allocation48_spill] sm:$0xff] %v10160_v28  ;;  %v10162_v57 = vpop.xlane.xlu1 %4859  ;;  %v3290_v3 = vpop.f32.mrb[102].mxu1 }
 0x515   : > { %11324 = vst [vmem:[#allocation47_spill] sm:$0xff] %v10158_v22  ;;  %v4446_v59 = vpop.f32.mrb[102].mxu0  ;;  %v3292_v44 = vpop.f32.mrb[103].mxu1 }
 0x516   : > { %v10164_v20 = vadd.f32 %v4446_v59, %v3290_v3  ;;  %v4448_v23 = vpop.f32.mrb[103].mxu0 }
 0x517   : > { %v10166_v12 = vpop.xlane.xlu0 %4862 }
 0x518   : > { %11326 = vst [vmem:[#allocation49_spill] sm:$0xff] %v10164_v20  ;;  %11327 = vst [vmem:[#allocation50_spill] sm:$0xff] %v10166_v12  ;;  %v10168_v45 = vpop.xlane.xlu1 %4545 }
 0x519   : > { %v3295_v38 = vpop.f32.mrb[104].mxu1 }
 0x51a   : > { %v4451_v24 = vpop.f32.mrb[104].mxu0  ;;  %v3297_v55 = vpop.f32.mrb[105].mxu1 }
 0x51b   : > { %v10170_v21 = vadd.f32 %v4451_v24, %v3295_v38  ;;  %v4453_v39 = vpop.f32.mrb[105].mxu0  ;;  %v10172_v31 = vpop.xlane.xlu0 %4548  ;;  %v10183_v24 = vmul.f32 0.020408163, %v10041_v37  ;;  %v10201_v37 = vmul.f32 0.020408163, %v10056_v11 }
 0x51c   : > { %11329 = vst [vmem:[#allocation52_spill] sm:$0xff] %v10172_v31  ;;  %v10174_v19 = vpop.xlane.xlu1 %4865  ;;  %v3298_v0 = vpop.f32.mrb[106].mxu1 }
 0x51d   : > { %11328 = vst [vmem:[#allocation51_spill] sm:$0xff] %v10170_v21  ;;  %v4454_v1 = vpop.f32.mrb[106].mxu0  ;;  %v3300_v44 = vpop.f32.mrb[107].mxu1 }
 0x51e   : > { %v10176_v59 = vadd.f32 %v4454_v1, %v3298_v0  ;;  %v4456_v3 = vpop.f32.mrb[107].mxu0  ;;  %v5013_v0 = vmul.f32 0.020408163, %v10052_v4 }
 0x51f   : > { %v10178_v23 = vpop.xlane.xlu0 %4868 }
 0x520   : > { %11330 = vst [vmem:[#allocation53_spill] sm:$0xff] %v10176_v59  ;;  %11331 = vst [vmem:[#allocation54_spill] sm:$0xff] %v10178_v23  ;;  %v10180_v52 = vpop.xlane.xlu1 %4551 }
 0x521   : > { %11332 = vst [vmem:[#allocation55_spill] sm:$0xff] %v10180_v52  ;;  %v3303_v46 = vpop.f32.mrb[108].mxu1 }
 0x522   : > { %v4459_v32 = vpop.f32.mrb[108].mxu0  ;;  %v3305_v55 = vpop.f32.mrb[109].mxu1 }
 0x523   : > { %v10185_v38 = vadd.f32 %v4459_v32, %v3303_v46  ;;  %v4461_v39 = vpop.f32.mrb[109].mxu0  ;;  %v10187_v31 = vpop.xlane.xlu0 %4554  ;;  %v4625_v55 = vsel %vm4498_vm0, %v10087_v2, 0.0  ;;  %v4797_v32 = vmul.f32 %v10087_v2, %v10087_v2  ;;  %v5077_v46 = vmul.f32 %v10183_v24, %v10183_v24 }
 0x524   : > { %11334 = vst [vmem:[#allocation57_spill] sm:$0xff] %v10187_v31  ;;  %v10189_v12 = vpop.xlane.xlu1 %4871  ;;  %v3306_v1 = vpop.f32.mrb[110].mxu1  ;;  %v5078_v2 = vmul.f32 %v10201_v37, %v10201_v37 }
 0x525   : > { %11333 = vst [vmem:[#allocation56_spill] sm:$0xff] %v10185_v38  ;;  %11335 = vst [vmem:[#allocation58_spill] sm:$0xff] %v10189_v12  ;;  %v4462_v44 = vpop.f32.mrb[110].mxu0  ;;  %v3308_v3 = vpop.f32.mrb[111].mxu1  ;;  %v4945_v31 = vsel %vm4498_vm0, %v4797_v32, 0.0  ;;  %v4628_v38 = vsel %vm4498_vm0, %v10095_v16, 0.0 }
 0x526   : > { %v10192_v23 = vadd.f32 %v4462_v44, %v3306_v1  ;;  %v4464_v52 = vpop.f32.mrb[111].mxu0  ;;  %v5141_v1 = vsub.f32 %v5013_v0, %v5077_v46 }
 0x527   : > { %v10203_v39 = vpop.xlane.xlu0 %4874  ;;  %4626 = vadd.xlane.f32.xlu0 %v4625_v55  ;;  %v5014_v52 = vmul.f32 0.020408163, %v10067_v50 }
 0x528   : > { %11336 = vst [vmem:[#allocation59_spill] sm:$0xff] %v10192_v23  ;;  %11337 = vst [vmem:[#allocation60_spill] sm:$0xff] %v10203_v39  ;;  %v10205_v4 = vpop.xlane.xlu1 %4557 }
 0x529   : > { %11338 = vst [vmem:[#allocation61_spill] sm:$0xff] %v10205_v4  ;;  %v5205_v4 = vmax.f32 %v5141_v1, 0.0  ;;  %v5142_v0 = vsub.f32 %v5014_v52, %v5078_v2 }
 0x52a   : > { %v3311_v44 = vpop.f32.mrb[112].mxu1  ;;  %v4467_v3 = vpop.f32.mrb[112].mxu0 }
 0x52b   : > { %v10211_v12 = vadd.f32 %v4467_v3, %v3311_v44  ;;  %v4469_v23 = vpop.f32.mrb[113].mxu0  ;;  %v10213_v11 = vpop.xlane.xlu0 %4560  ;;  %4946 = vadd.xlane.f32.xlu0 %v4945_v31  ;;  %v5269_v3 = vadd.f32 1e-05, %v5205_v4  ;;  %v5206_v1 = vmax.f32 %v5142_v0, 0.0 }
 0x52c   : > { %11340 = vst [vmem:[#allocation63_spill] sm:$0xff] %v10213_v11  ;;  %v10215_v39 = vpop.xlane.xlu1 %4877  ;;  %v3313_v55 = vpop.f32.mrb[113].mxu1  ;;  %v4798_v23 = vmul.f32 %v10095_v16, %v10095_v16 }
 0x52d   : > { %11339 = vst [vmem:[#allocation62_spill] sm:$0xff] %v10211_v12  ;;  %11341 = vst [vmem:[#allocation64_spill] sm:$0xff] %v10215_v39  ;;  %v3314_v46 = vpop.f32.mrb[114].mxu1  ;;  %v4470_v50 = vpop.f32.mrb[114].mxu0  ;;  %7538 = vrsqrt.f32 %v5269_v3 }
 0x52e   : > { %v10217_v28 = vadd.f32 %v4470_v50, %v3314_v46  ;;  %v3316_v25 = vpop.f32.mrb[115].mxu1  ;;  %v4472_v32 = vpop.f32.mrb[115].mxu0  ;;  %v4948_v55 = vsel %vm4498_vm0, %v4798_v23, 0.0 }
 0x52f   : > { %v10223_v44 = vpop.xlane.xlu0 %4880  ;;  %4629 = vadd.xlane.f32.xlu1 %v4628_v38 }
 0x530   : > { %11342 = vst [vmem:[#allocation65_spill] sm:$0xff] %v10217_v28  ;;  %11343 = vst [vmem:[#allocation66_spill] sm:$0xff] %v10223_v44  ;;  %v10225_v31 = vpop.xlane.xlu1 %4563  ;;  %v5270_v44 = vadd.f32 1e-05, %v5206_v1 }
 0x531   : > { %11344 = vst [vmem:[#allocation67_spill] sm:$0xff] %v10225_v31 }
 0x532   : > { %v3319_v2 = vpop.f32.mrb[116].mxu1  ;;  %v4475_v52 = vpop.f32.mrb[116].mxu0  ;;  %7540 = vrsqrt.f32 %v5270_v44 }
 0x533   : > { %v10228_v46 = vadd.f32 %v4475_v52, %v3319_v2  ;;  %v4477_v25 = vpop.f32.mrb[117].mxu0  ;;  %v10230_v50 = vpop.xlane.xlu0 %4566  ;;  %4949 = vadd.xlane.f32.xlu1 %v4948_v55 }
 0x534   : > { %11346 = vst [vmem:[#allocation69_spill] sm:$0xff] %v10230_v50  ;;  %v10232_v32 = vpop.xlane.xlu1 %4883  ;;  %v3321_v16 = vpop.f32.mrb[117].mxu1 }
 0x535   : > { %11345 = vst [vmem:[#allocation68_spill] sm:$0xff] %v10228_v46  ;;  %11347 = vst [vmem:[#allocation70_spill] sm:$0xff] %v10232_v32  ;;  %v3322_v38 = vpop.f32.mrb[118].mxu1  ;;  %v4478_v11 = vpop.f32.mrb[118].mxu0  ;;  %v5588_v16 = vmul.f32 %v10129_v10, %v10039_v35  ;;  %v5397_v10 = vld [vmem:[%s10113_s30 + $0x10] sm:$0xff] }
 0x536   : > { %v10234_v4 = vadd.f32 %v4478_v11, %v3322_v38  ;;  %v3324_v0 = vpop.f32.mrb[119].mxu1  ;;  %v4480_v31 = vpop.f32.mrb[119].mxu0 }
 0x537   : > { %v10236_v39 = vpop.xlane.xlu0 %4886  ;;  %v5524_v31 = vld [vmem:[%s10135_s8 + $0x8] sm:$0xff] }
 0x538   : > { %11348 = vst [vmem:[#allocation71_spill] sm:$0xff] %v10234_v4  ;;  %11349 = vst [vmem:[#allocation72_spill] sm:$0xff] %v10236_v39  ;;  %v10238_v23 = vpop.xlane.xlu1 %4569  ;;  %v5652_v35 = vsub.f32 %v5524_v31, %v5588_v16 }
 0x539   : > { %11350 = vst [vmem:[#allocation73_spill] sm:$0xff] %v10238_v23  ;;  %v7539_v23 = vpop.eup %7538 }
 0x53a   : > { %v3327_v2 = vpop.f32.mrb[120].mxu1  ;;  %v4483_v52 = vpop.f32.mrb[120].mxu0 }
 0x53b   : > { %v10242_v3 = vadd.f32 %v4483_v52, %v3327_v2  ;;  %v4485_v1 = vpop.f32.mrb[121].mxu0  ;;  %v10244_v55 = vpop.xlane.xlu0 %4572 }
 0x53c   : > { %11352 = vst [vmem:[#allocation75_spill] sm:$0xff] %v10244_v55  ;;  %v10246_v11 = vpop.xlane.xlu1 %4889  ;;  %v3329_v25 = vpop.f32.mrb[121].mxu1  ;;  %v5461_v55 = vmul.f32 %v7539_v23, %v5397_v10 }
 0x53d   : > { %11351 = vst [vmem:[#allocation74_spill] sm:$0xff] %v10242_v3  ;;  %11353 = vst [vmem:[#allocation76_spill] sm:$0xff] %v10246_v11  ;;  %v3330_v38 = vpop.f32.mrb[122].mxu1  ;;  %v4486_v0 = vpop.f32.mrb[122].mxu0 }
 0x53e   : > { %v10249_v39 = vadd.f32 %v4486_v0, %v3330_v38  ;;  %v3332_v44 = vpop.f32.mrb[123].mxu1  ;;  %v4488_v50 = vpop.f32.mrb[123].mxu0  ;;  %v5589_v23 = vmul.f32 %v5461_v55, %v10183_v24 }
 0x53f   : > { %v10251_v32 = vpop.xlane.xlu0 %4892  ;;  %v7541_v25 = vpop.eup %7540  ;;  %v5398_v44 = vld [vmem:[%s10113_s30 + $0x18] sm:$0xff] }
 0x540   : > { %11354 = vst [vmem:[#allocation77_spill] sm:$0xff] %v10249_v39  ;;  %11355 = vst [vmem:[#allocation78_spill] sm:$0xff] %v10251_v32  ;;  %v10254_v2 = vpop.xlane.xlu1 %4575  ;;  %v5462_v3 = vmul.f32 %v7541_v25, %v5398_v44 }
 0x541   : > { %11356 = vst [vmem:[#allocation79_spill] sm:$0xff] %v10254_v2  ;;  %6106 = vperm.xlu0 %7532, %v5652_v35  }
 0x542   : > { %v3335_v52 = vpop.f32.mrb[124].mxu1  ;;  %v4491_v1 = vpop.f32.mrb[124].mxu0 }
 0x543   : > { %v10256_v11 = vadd.f32 %v4491_v1, %v3335_v52  ;;  %v4493_v38 = vpop.f32.mrb[125].mxu0  ;;  %v10258_v0 = vpop.xlane.xlu0 %4578  ;;  %v5525_v52 = vld [vmem:[%s10135_s8 + $0x10] sm:$0xff] }
 0x544   : > { %11358 = vst [vmem:[#allocation81_spill] sm:$0xff] %v10258_v0  ;;  %v10261_v50 = vpop.xlane.xlu1 %4895  ;;  %v3337_v39 = vpop.f32.mrb[125].mxu1  ;;  %5727 = vperm.xlu1 %7533, %v5461_v55   ;;  %v5653_v38 = vsub.f32 %v5525_v52, %v5589_v23  ;;  %v4631_v23 = vsel %vm4498_vm0, %v10103_v47, 0.0  ;;  %v4799_v52 = vmul.f32 %v10103_v47, %v10103_v47 }
 0x545   : > { %11357 = vst [vmem:[#allocation80_spill] sm:$0xff] %v10256_v11  ;;  %11359 = vst [vmem:[#allocation82_spill] sm:$0xff] %v10261_v50  ;;  %v4494_v16 = vpop.f32.mrb[126].mxu0  ;;  %v3338_v31 = vpop.f32.mrb[126].mxu1 }
 0x546   : > { %v10263_v32 = vadd.f32 %v4494_v16, %v3338_v31  ;;  %v3340_v35 = vpop.f32.mrb[127].mxu1  ;;  %v4496_v2 = vpop.f32.mrb[127].mxu0 }
 0x547   : > { %v10266_v10 = vpop.xlane.xlu0 %4898 }
 0x548   : > { %11360 = vst [vmem:[#allocation83_spill] sm:$0xff] %v10263_v32  ;;  %11361 = vst [vmem:[#allocation84_spill] sm:$0xff] %v10266_v10  ;;  %v10269_v1 = vpop.xlane.xlu1 %4581  ;;  %5732 = vperm.xlu1 %7533, %v5462_v3   ;;  %v10309_v32 = vmul.f32 0.020408163, %v10080_v30  ;;  %v4634_v30 = vsel %vm4498_vm0, %v10115_v27, 0.0 }
 0x54b   : > { %v10271_v0 = vpop.xlane.xlu0 %4584 }
 0x54c   : > { %11362 = vst [vmem:[#allocation85_spill] sm:$0xff] %v10271_v0  ;;  %v10273_v39 = vpop.xlane.xlu1 %4901  ;;  %6111 = vperm.xlu1 %7533, %v5653_v38  }
 0x54f   : > { %v10275_v50 = vpop.xlane.xlu0 %4904 }
 0x550   : > { %11363 = vst [vmem:[#allocation86_spill] sm:$0xff] %v10275_v50  ;;  %v10277_v16 = vpop.xlane.xlu1 %4587  ;;  %v4695_v50 = vmul.f32 0.020408163, %v10065_v41  ;;  %v5080_v41 = vmul.f32 %v10309_v32, %v10309_v32 }
 0x552   : > { %v5079_v10 = vmul.f32 %v4695_v50, %v4695_v50 }
 0x553   : > { %v10279_v2 = vpop.xlane.xlu0 %4590 }
 0x554   : > { %11364 = vst [vmem:[#allocation87_spill] sm:$0xff] %v10279_v2  ;;  %v10281_v25 = vpop.xlane.xlu1 %4907 }
 0x557   : > { %v10283_v24 = vpop.xlane.xlu0 %4910 }
 0x558   : > { %11365 = vst [vmem:[#allocation88_spill] sm:$0xff] %v10283_v24  ;;  %v10285_v55 = vpop.xlane.xlu1 %4593  ;;  %v4951_v24 = vsel %vm4498_vm0, %v4799_v52, 0.0 }
 0x55b   : > { %v10287_v44 = vpop.xlane.xlu0 %4596 }
 0x55c   : > { %11366 = vst [vmem:[#allocation89_spill] sm:$0xff] %v10287_v44  ;;  %v10289_v31 = vpop.xlane.xlu1 %4913 }
 0x55f   : > { %v10291_v35 = vpop.xlane.xlu0 %4916 }
 0x560   : > { %11367 = vst [vmem:[#allocation90_spill] sm:$0xff] %v10291_v35  ;;  %v10297_v38 = vpop.xlane.xlu1 %4599  ;;  %4632 = vadd.xlane.f32.xlu0 %v4631_v23  ;;  %v5015_v35 = vmul.f32 0.020408163, %v10078_v5 }
 0x561   : > { %11368 = vst [vmem:[#allocation91_spill] sm:$0xff] %v10297_v38 }
 0x562   : > { %v5143_v23 = vsub.f32 %v5015_v35, %v5079_v10  ;;  %v4800_v10 = vmul.f32 %v10115_v27, %v10115_v27 }
 0x563   : > { %v10299_v2 = vpop.xlane.xlu0 %4602 }
 0x564   : > { %11369 = vst [vmem:[#allocation92_spill] sm:$0xff] %v10299_v2  ;;  %v10303_v44 = vpop.xlane.xlu1 %4919  ;;  %4952 = vadd.xlane.f32.xlu0 %v4951_v24  ;;  %v5016_v2 = vmul.f32 0.020408163, %v10091_v13  ;;  %v5207_v5 = vmax.f32 %v5143_v23, 0.0 }
 0x565   : > { %11370 = vst [vmem:[#allocation93_spill] sm:$0xff] %v10303_v44  ;;  %v4954_v44 = vsel %vm4498_vm0, %v4800_v10, 0.0 }
 0x566   : > { %v5144_v52 = vsub.f32 %v5016_v2, %v5080_v41  ;;  %v5271_v13 = vadd.f32 1e-05, %v5207_v5  ;;  %v5590_v2 = vmul.f32 %v5462_v3, %v10201_v37  ;;  %v5526_v41 = vld [vmem:[%s10135_s8 + $0x18] sm:$0xff]  ;;  %v5399_v37 = vld [vmem:[%s10113_s30 + $0x20] sm:$0xff] }
 0x567   : > { %v10306_v0 = vpop.xlane.xlu0 %4922 }
 0x568   : > { %11371 = vst [vmem:[#allocation94_spill] sm:$0xff] %v10306_v0  ;;  %v10311_v47 = vpop.xlane.xlu1 %4605  ;;  %7542 = vrsqrt.f32 %v5271_v13  ;;  %v5654_v5 = vsub.f32 %v5526_v41, %v5590_v2 }
 0x569   : > { %11372 = vst [vmem:[#allocation95_spill] sm:$0xff] %v10311_v47 }
 0x56b   : > { %v10314_v38 = vpop.xlane.xlu0 %4608 }
 0x56c   : > { %11373 = vst [vmem:[#allocation96_spill] sm:$0xff] %v10314_v38  ;;  %v10318_v24 = vpop.xlane.xlu1 %4925  ;;  %v5208_v38 = vmax.f32 %v5144_v52, 0.0 }
 0x56f   : > { %v10320_v0 = vpop.xlane.xlu0 %4928 }
 0x570   : > { %11374 = vst [vmem:[#allocation97_spill] sm:$0xff] %v10320_v0  ;;  %v10326_v35 = vpop.xlane.xlu1 %4611  ;;  %4635 = vadd.xlane.f32.xlu1 %v4634_v30  ;;  %v5272_v0 = vadd.f32 1e-05, %v5208_v38 }
 0x571   : > { %11375 = vst [vmem:[#allocation98_spill] sm:$0xff] %v10326_v35 }
 0x572   : > { %7544 = vrsqrt.f32 %v5272_v0  ;;  %v7543_v10 = vpop.eup %7542 }
 0x573   : > { %v10328_v47 = vpop.xlane.xlu0 %4614  ;;  %v5463_v3 = vmul.f32 %v7543_v10, %v5399_v37 }
 0x574   : > { %11376 = vst [vmem:[#allocation99_spill] sm:$0xff] %v10328_v47  ;;  %v10331_v23 = vpop.xlane.xlu1 %4931  ;;  %4955 = vadd.xlane.f32.xlu1 %v4954_v44  ;;  %v5400_v47 = vld [vmem:[%s10113_s30 + $0x28] sm:$0xff] }
 0x575   : > { %v5591_v2 = vmul.f32 %v5463_v3, %v4695_v50  ;;  %v4801_v50 = vmul.f32 %v10123_v26, %v10123_v26 }
 0x577   : > { %v10335_v27 = vpop.xlane.xlu0 %4934 }
 0x578   : > { %11377 = vst [vmem:[#allocation100_spill] sm:$0xff] %v10335_v27  ;;  %v10337_v35 = vpop.xlane.xlu1 %4617 }
 0x579   : > { %11378 = vst [vmem:[#allocation101_spill] sm:$0xff] %v10337_v35 }
 0x57a   : > { %6116 = vperm.xlu0 %7532, %v5654_v5  }
 0x57b   : > { %v10341_v30 = vpop.xlane.xlu0 %4620 }
 0x57c   : > { %v10339_v52 = vpop.xlane.xlu1 %4937  ;;  %11380 = vst [vmem:[#allocation103_spill] sm:$0xff] %v10341_v30  ;;  %v7545_v13 = vpop.eup %7544 }
 0x57d   : > { %11379 = vst [vmem:[#allocation102_spill] sm:$0xff] %v10339_v52  ;;  %v5464_v0 = vmul.f32 %v7545_v13, %v5400_v47  ;;  %v5527_v52 = vld [vmem:[%s10135_s8 + $0x20] sm:$0xff]  ;;  %v4637_v47 = vsel %vm4498_vm0, %v10123_v26, 0.0 }
 0x57e   : > { %v5655_v35 = vsub.f32 %v5527_v52, %v5591_v2  ;;  %v4697_v52 = vmul.f32 0.020408163, %v10089_v54  ;;  %v5018_v2 = vmul.f32 0.020408163, %v10107_v40  ;;  %v4802_v54 = vmul.f32 %v10138_v53, %v10138_v53 }
 0x57f   : > { %v10346_v38 = vpop.xlane.xlu0 %4940 }
 0x580   : > { %v10343_v44 = vpop.xlane.xlu1 %4623  ;;  %11381 = vst [vmem:[#allocation104_spill] sm:$0xff] %v10346_v38  ;;  %v5081_v13 = vmul.f32 %v4697_v52, %v4697_v52  ;;  %v4960_v40 = vsel %vm4498_vm0, %v4802_v54, 0.0  ;;  %v5402_v54 = vld [vmem:[%s10113_s30 + $0x38] sm:$0xff] }
 0x584   : > { %v10348_v27 = vpop.xlane.xlu1 %4943 }
 0x585   : > { %5737 = vperm.xlu1 %7533, %v5463_v3   ;;  %v5017_v3 = vmul.f32 0.020408163, %v10097_v34 }
 0x587   : > { %v5718_v41 = vpop.permute.xlu0 %5717 }
 0x588   : > { %v5723_v5 = vpop.permute.xlu1 %5722  ;;  %v6035_v30 = vmul.f32 %v9742_v43, %v5718_v41  ;;  %v4957_v43 = vsel %vm4498_vm0, %v4801_v50, 0.0 }
 0x589   : > { %5742 = vperm.xlu1 %7533, %v5464_v0  }
 0x58c   : > { %v6102_v10 = vpop.permute.xlu1 %6101 }
 0x58d   : > { %v6419_v37 = vadd.f32 %v6102_v10, %v6035_v30  ;;  %6121 = vperm.xlu1 %7533, %v5655_v35   ;;  %v4698_v30 = vmul.f32 0.020408163, %v10099_v36  ;;  %v5145_v35 = vsub.f32 %v5017_v3, %v5081_v13  ;;  %v5592_v10 = vmul.f32 %v5464_v0, %v10309_v32 }
 0x58f   : > { %6483 = vst.msk [vmem:[%s10357_s11] sm:$0xff] %vm4498_vm0, %v6419_v37  ;;  %v5082_v41 = vmul.f32 %v4698_v30, %v4698_v30  ;;  %v5528_v37 = vld [vmem:[%s10135_s8 + $0x28] sm:$0xff]  ;;  %v5209_v38 = vmax.f32 %v5145_v35, 0.0 }
 0x590   : > { %v5656_v34 = vsub.f32 %v5528_v37, %v5592_v10 }
 0x591   : > { %v5146_v26 = vsub.f32 %v5018_v2, %v5082_v41  ;;  %v5273_v50 = vadd.f32 1e-05, %v5209_v38  ;;  %v6036_v38 = vmul.f32 %v9744_v51, %v5723_v5  ;;  %v5401_v41 = vld [vmem:[%s10113_s30 + $0x30] sm:$0xff] }
 0x593   : > { %v5210_v36 = vmax.f32 %v5146_v26, 0.0  ;;  %7546 = vrsqrt.f32 %v5273_v50 }
 0x595   : > { %v5274_v0 = vadd.f32 1e-05, %v5210_v36 }
 0x597   : > { %7548 = vrsqrt.f32 %v5274_v0 }
 0x599   : > { %4638 = vadd.xlane.f32.xlu0 %v4637_v47  ;;  %v4640_v47 = vsel %vm4498_vm0, %v10138_v53, 0.0 }
 0x59d   : > { %4958 = vadd.xlane.f32.xlu0 %v4957_v43  ;;  %v7547_v35 = vpop.eup %7546 }
 0x59e   : > { %v5465_v37 = vmul.f32 %v7547_v35, %v5401_v41  ;;  %v4643_v35 = vsel %vm4498_vm0, %v10146_v58, 0.0 }
 0x5a0   : > { %v5593_v36 = vmul.f32 %v5465_v37, %v4697_v52  ;;  %v4803_v52 = vmul.f32 %v10146_v58, %v10146_v58 }
 0x5b1   : > { %4641 = vadd.xlane.f32.xlu1 %v4640_v47  ;;  %v7549_v47 = vpop.eup %7548 }
 0x5b2   : > { %v5466_v50 = vmul.f32 %v7549_v47, %v5402_v54  ;;  %v5530_v54 = vld [vmem:[%s10135_s8 + $0x38] sm:$0xff] }
 0x5b3   : > { %6126 = vperm.xlu0 %7532, %v5656_v34  }
 0x5b4   : > { %v10377_v32 = vpop.xlane.xlu0 %4626  ;;  %v5594_v47 = vmul.f32 %v5466_v50, %v4698_v30 }
 0x5b5   : > { %4961 = vadd.xlane.f32.xlu1 %v4960_v40  ;;  %v5529_v40 = vld [vmem:[%s10135_s8 + $0x30] sm:$0xff] }
 0x5b6   : > { %v5657_v0 = vsub.f32 %v5529_v40, %v5593_v36  ;;  %v5658_v40 = vsub.f32 %v5530_v54, %v5594_v47 }
 0x5b8   : > { %v10379_v43 = vpop.xlane.xlu0 %4946 }
 0x5bc   : > { %v10381_v3 = vpop.xlane.xlu1 %4629 }
 0x5c0   : > { %v6107_v13 = vpop.permute.xlu0 %6106  ;;  %v10384_v26 = vpop.xlane.xlu1 %4949 }
 0x5c1   : > { %v6420_v2 = vadd.f32 %v6107_v13, %v6036_v38  ;;  %v10393_v38 = vmul.f32 0.020408163, %v10120_v56  ;;  %v5020_v13 = vmul.f32 0.020408163, %v10127_v49  ;;  %v4963_v56 = vsel %vm4498_vm0, %v4803_v52, 0.0 }
 0x5c2   : > { %v4699_v49 = vmul.f32 0.020408163, %v10105_v60  ;;  %v4646_v60 = vsel %vm4498_vm0, %v10152_v48, 0.0 }
 0x5c3   : > { %6484 = vst.msk [vmem:[%s10357_s11 + $0x8] sm:$0xff] %vm4498_vm0, %v6420_v2 }
 0x5c4   : > { %v5728_v10 = vpop.permute.xlu1 %5727 }
 0x5c5   : > { %v6037_v51 = vmul.f32 %v9763_v6, %v5728_v10  ;;  %v5084_v6 = vmul.f32 %v10393_v38, %v10393_v38  ;;  %v5019_v10 = vmul.f32 0.020408163, %v10118_v29  ;;  %v4804_v29 = vmul.f32 %v10152_v48, %v10152_v48  ;;  %v11425_v48 = vld [vmem:[#allocation78_spill] sm:$0xff] }
 0x5c6   : > { %5747 = vperm.xlu1 %7533, %v5465_v37   ;;  %v5083_v37 = vmul.f32 %v4699_v49, %v4699_v49 }
 0x5c7   : > { %v5148_v2 = vsub.f32 %v5020_v13, %v5084_v6 }
 0x5c8   : > { %v5733_v34 = vpop.permute.xlu1 %5732  ;;  %v5147_v36 = vsub.f32 %v5019_v10, %v5083_v37  ;;  %v5403_v10 = vld [vmem:[%s10113_s30 + $0x40] sm:$0xff] }
 0x5c9   : > { %v5212_v41 = vmax.f32 %v5148_v2, 0.0  ;;  %v6038_v6 = vmul.f32 %v9765_v14, %v5733_v34  ;;  %v10428_v14 = vmul.f32 0.020408163, %v10144_v15 }
 0x5ca   : > { %5752 = vperm.xlu1 %7533, %v5466_v50   ;;  %v4966_v50 = vsel %vm4498_vm0, %v4804_v29, 0.0  ;;  %v4649_v29 = vsel %vm4498_vm0, %v10158_v22, 0.0 }
 0x5cc   : > { %v6112_v5 = vpop.permute.xlu1 %6111 }
 0x5cd   : > { %v6421_v53 = vadd.f32 %v6112_v5, %v6037_v51  ;;  %v5404_v5 = vld [vmem:[%s10113_s30 + $0x48] sm:$0xff] }
 0x5ce   : > { %6131 = vperm.xlu1 %7533, %v5657_v0   ;;  %v5211_v0 = vmax.f32 %v5147_v36, 0.0 }
 0x5cf   : > { %6485 = vst.msk [vmem:[%s10357_s11 + $0x10] sm:$0xff] %vm4498_vm0, %v6421_v53  ;;  %v5276_v53 = vadd.f32 1e-05, %v5212_v41 }
 0x5d0   : > { %v5275_v52 = vadd.f32 1e-05, %v5211_v0 }
 0x5d1   : > { %7550 = vrsqrt.f32 %v5276_v53 }
 0x5d2   : > { %4644 = vadd.xlane.f32.xlu0 %v4643_v35  ;;  %7552 = vrsqrt.f32 %v5275_v52  ;;  %v5022_v52 = vmul.f32 0.020408163, %v10150_v62 }
 0x5d6   : > { %4964 = vadd.xlane.f32.xlu0 %v4963_v56 }
 0x5db   : > { %v7551_v51 = vpop.eup %7550 }
 0x5dc   : > { %v5468_v13 = vmul.f32 %v7551_v51, %v5404_v5  ;;  %v7553_v53 = vpop.eup %7552 }
 0x5dd   : > { %v5467_v47 = vmul.f32 %v7553_v53, %v5403_v10 }
 0x5de   : > { %v5596_v10 = vmul.f32 %v5468_v13, %v10393_v38  ;;  %v4806_v38 = vmul.f32 %v10164_v20, %v10164_v20 }
 0x5df   : > { %v5595_v36 = vmul.f32 %v5467_v47, %v4699_v49  ;;  %v4805_v49 = vmul.f32 %v10158_v22, %v10158_v22  ;;  %v11410_v22 = vld [vmem:[#allocation66_spill] sm:$0xff] }
 0x5ec   : > { %6136 = vperm.xlu0 %7532, %v5658_v40   ;;  %v5531_v40 = vld [vmem:[%s10135_s8 + $0x40] sm:$0xff] }
 0x5ed   : > { %v10409_v35 = vpop.xlane.xlu0 %4632  ;;  %v5659_v5 = vsub.f32 %v5531_v40, %v5595_v36 }
 0x5f0   : > { %5762 = vperm.xlu0 %7532, %v5468_v13  }
 0x5f1   : > { %v10415_v30 = vpop.xlane.xlu0 %4952 }
 0x5f2   : > { %4647 = vadd.xlane.f32.xlu1 %v4646_v60 }
 0x5f6   : > { %4967 = vadd.xlane.f32.xlu1 %v4966_v50  ;;  %v5086_v50 = vmul.f32 %v10428_v14, %v10428_v14 }
 0x5f8   : > { %v5150_v15 = vsub.f32 %v5022_v52, %v5086_v50 }
 0x5f9   : > { %v6117_v2 = vpop.permute.xlu0 %6116 }
 0x5fa   : > { %v6422_v56 = vadd.f32 %v6117_v2, %v6038_v6  ;;  %v5214_v62 = vmax.f32 %v5150_v15, 0.0  ;;  %v4701_v2 = vmul.f32 0.020408163, %v10125_v7 }
 0x5fc   : > { %6486 = vst.msk [vmem:[%s10357_s11 + $0x18] sm:$0xff] %vm4498_vm0, %v6422_v56  ;;  %v5278_v6 = vadd.f32 1e-05, %v5214_v62  ;;  %v5021_v56 = vmul.f32 0.020408163, %v10141_v18  ;;  %v5085_v53 = vmul.f32 %v4701_v2, %v4701_v2  ;;  %v4652_v18 = vsel %vm4498_vm0, %v10164_v20, 0.0 }
 0x5fd   : > { %v10421_v41 = vpop.xlane.xlu1 %4635 }
 0x5fe   : > { %7554 = vrsqrt.f32 %v5278_v6 }
 0x601   : > { %v10424_v37 = vpop.xlane.xlu1 %4955 }
 0x605   : > { %v5738_v54 = vpop.permute.xlu1 %5737 }
 0x606   : > { %v6039_v34 = vmul.f32 %v9785_v33, %v5738_v54  ;;  %v4969_v33 = vsel %vm4498_vm0, %v4805_v49, 0.0  ;;  %v5149_v54 = vsub.f32 %v5021_v56, %v5085_v53  ;;  %v4972_v49 = vsel %vm4498_vm0, %v4806_v38, 0.0 }
 0x607   : > { %5757 = vperm.xlu1 %7533, %v5467_v47   ;;  %v5532_v47 = vld [vmem:[%s10135_s8 + $0x48] sm:$0xff] }
 0x608   : > { %v5660_v36 = vsub.f32 %v5532_v47, %v5596_v10  ;;  %v7555_v40 = vpop.eup %7554  ;;  %v5533_v10 = vld [vmem:[%s10135_s8 + $0x50] sm:$0xff] }
 0x609   : > { %v5743_v51 = vpop.permute.xlu1 %5742 }
 0x60a   : > { %v6040_v13 = vmul.f32 %v9787_v42, %v5743_v51  ;;  %v10465_v51 = vmul.f32 0.020408163, %v10156_v61 }
 0x60b   : > { %6141 = vperm.xlu1 %7533, %v5659_v5  }
 0x60d   : > { %v6122_v0 = vpop.permute.xlu1 %6121 }
 0x60e   : > { %v6423_v60 = vadd.f32 %v6122_v0, %v6039_v34  ;;  %v5406_v34 = vld [vmem:[%s10113_s30 + $0x58] sm:$0xff]  ;;  %v5213_v0 = vmax.f32 %v5149_v54, 0.0 }
 0x60f   : > { %4650 = vadd.xlane.f32.xlu0 %v4649_v29  ;;  %v5470_v52 = vmul.f32 %v7555_v40, %v5406_v34  ;;  %v4655_v40 = vsel %vm4498_vm0, %v10170_v21, 0.0  ;;  %v4807_v34 = vmul.f32 %v10170_v21, %v10170_v21 }
 0x610   : > { %6487 = vst.msk [vmem:[%s10357_s11 + $0x20] sm:$0xff] %vm4498_vm0, %v6423_v60  ;;  %v5277_v60 = vadd.f32 1e-05, %v5213_v0 }
 0x611   : > { %v4975_v38 = vsel %vm4498_vm0, %v4807_v34, 0.0  ;;  %v4808_v34 = vmul.f32 %v10176_v59, %v10176_v59 }
 0x612   : > { %7556 = vrsqrt.f32 %v5277_v60 }
 0x613   : > { %4970 = vadd.xlane.f32.xlu0 %v4969_v33  ;;  %v5405_v33 = vld [vmem:[%s10113_s30 + $0x50] sm:$0xff] }
 0x61c   : > { %v7557_v15 = vpop.eup %7556 }
 0x61d   : > { %v5469_v6 = vmul.f32 %v7557_v15, %v5405_v33  ;;  %v5598_v15 = vmul.f32 %v5470_v52, %v10428_v14  ;;  %v5534_v33 = vld [vmem:[%s10135_s8 + $0x58] sm:$0xff] }
 0x61f   : > { %v5597_v53 = vmul.f32 %v5469_v6, %v4701_v2  ;;  %v5088_v2 = vmul.f32 %v10465_v51, %v10465_v51 }
 0x621   : > { %v5661_v42 = vsub.f32 %v5533_v10, %v5597_v53  ;;  %v5662_v53 = vsub.f32 %v5534_v33, %v5598_v15  ;;  %v5026_v15 = vmul.f32 0.020408163, %v10174_v19  ;;  %v11382_v33 = vld [vmem:[#allocation56_spill] sm:$0xff] }
 0x626   : > { %v10445_v5 = vpop.xlane.xlu0 %4638 }
 0x629   : > { %6146 = vperm.xlu0 %7532, %v5660_v36   ;;  %v5024_v36 = vmul.f32 0.020408163, %v10162_v57 }
 0x62a   : > { %v10448_v7 = vpop.xlane.xlu0 %4958 }
 0x62d   : > { %5772 = vperm.xlu0 %7532, %v5470_v52   ;;  %v4658_v52 = vsel %vm4498_vm0, %v10176_v59, 0.0 }
 0x62f   : > { %4653 = vadd.xlane.f32.xlu1 %v4652_v18  ;;  %v5152_v18 = vsub.f32 %v5024_v36, %v5088_v2 }
 0x631   : > { %v5216_v57 = vmax.f32 %v5152_v18, 0.0  ;;  %v5407_v18 = vld [vmem:[%s10113_s30 + $0x60] sm:$0xff] }
 0x632   : > { %v6127_v29 = vpop.permute.xlu0 %6126 }
 0x633   : > { %v6424_v50 = vadd.f32 %v6127_v29, %v6040_v13  ;;  %4973 = vadd.xlane.f32.xlu1 %v4972_v49  ;;  %v5280_v13 = vadd.f32 1e-05, %v5216_v57  ;;  %v4703_v29 = vmul.f32 0.020408163, %v10148_v8  ;;  %v5023_v49 = vmul.f32 0.020408163, %v10154_v17 }
 0x635   : > { %6488 = vst.msk [vmem:[%s10357_s11 + $0x28] sm:$0xff] %vm4498_vm0, %v6424_v50  ;;  %7558 = vrsqrt.f32 %v5280_v13  ;;  %v5087_v50 = vmul.f32 %v4703_v29, %v4703_v29 }
 0x63e   : > { %v10459_v62 = vpop.xlane.xlu1 %4641 }
 0x63f   : > { %v7559_v10 = vpop.eup %7558 }
 0x642   : > { %v10461_v56 = vpop.xlane.xlu1 %4961 }
 0x644   : > { %5767 = vperm.xlu1 %7533, %v5469_v6   ;;  %v5151_v6 = vsub.f32 %v5023_v49, %v5087_v50  ;;  %v10502_v49 = vmul.f32 0.020408163, %v10168_v45 }
 0x646   : > { %v5748_v47 = vpop.permute.xlu1 %5747 }
 0x647   : > { %v6041_v0 = vmul.f32 %v9807_v63, %v5748_v47  ;;  %v5408_v47 = vld [vmem:[%s10113_s30 + $0x68] sm:$0xff] }
 0x648   : > { %6151 = vperm.xlu1 %7533, %v5661_v42   ;;  %v5215_v42 = vmax.f32 %v5151_v6, 0.0  ;;  %v4661_v6 = vsel %vm4498_vm0, %v11382_v33, 0.0 }
 0x64a   : > { %v5753_v54 = vpop.permute.xlu1 %5752  ;;  %v5279_v8 = vadd.f32 1e-05, %v5215_v42 }
 0x64b   : > { %v6042_v17 = vmul.f32 %v9809_v9, %v5753_v54 }
 0x64c   : > { %4656 = vadd.xlane.f32.xlu0 %v4655_v40  ;;  %v5472_v40 = vmul.f32 %v7559_v10, %v5408_v47  ;;  %7560 = vrsqrt.f32 %v5279_v8  ;;  %v11383_v10 = vld [vmem:[#allocation5_spill] sm:$0xff] }
 0x64e   : > { %v6132_v60 = vpop.permute.xlu1 %6131 }
 0x64f   : > { %v6425_v61 = vadd.f32 %v6132_v60, %v6041_v0  ;;  %v4978_v0 = vsel %vm4498_vm0, %v4808_v34, 0.0 }
 0x650   : > { %4976 = vadd.xlane.f32.xlu0 %v4975_v38  ;;  %v5535_v38 = vld [vmem:[%s10135_s8 + $0x60] sm:$0xff] }
 0x651   : > { %6489 = vst.msk [vmem:[%s10357_s11 + $0x30] sm:$0xff] %vm4498_vm0, %v6425_v61 }
 0x656   : > { %v7561_v60 = vpop.eup %7560 }
 0x657   : > { %v5471_v9 = vmul.f32 %v7561_v60, %v5407_v18 }
 0x659   : > { %v5599_v61 = vmul.f32 %v5471_v9, %v4703_v29  ;;  %v5090_v29 = vmul.f32 %v10502_v49, %v10502_v49 }
 0x65b   : > { %v5663_v13 = vsub.f32 %v5535_v38, %v5599_v61  ;;  %v5154_v8 = vsub.f32 %v5026_v15, %v5090_v29  ;;  %v5536_v38 = vld [vmem:[%s10135_s8 + $0x68] sm:$0xff] }
 0x65d   : > { %v5218_v19 = vmax.f32 %v5154_v8, 0.0 }
 0x65f   : > { %v10481_v63 = vpop.xlane.xlu0 %4644 }
 0x663   : > { %v10485_v36 = vpop.xlane.xlu0 %4964 }
 0x666   : > { %6156 = vperm.xlu0 %7532, %v5662_v53   ;;  %v4809_v53 = vmul.f32 %v11382_v33, %v11382_v33 }
 0x66a   : > { %5782 = vperm.xlu0 %7532, %v5472_v40  }
 0x66b   : > { %v6137_v14 = vpop.permute.xlu0 %6136 }
 0x66c   : > { %v6426_v2 = vadd.f32 %v6137_v14, %v6042_v17  ;;  %4659 = vadd.xlane.f32.xlu1 %v4658_v52  ;;  %v4981_v17 = vsel %vm4498_vm0, %v4809_v53, 0.0  ;;  %v5282_v14 = vadd.f32 1e-05, %v5218_v19  ;;  %v11384_v52 = vld [vmem:[#allocation48_spill] sm:$0xff] }
 0x66d   : > { %v4705_v34 = vmul.f32 0.020408163, %v11384_v52 }
 0x66e   : > { %6490 = vst.msk [vmem:[%s10357_s11 + $0x38] sm:$0xff] %vm4498_vm0, %v6426_v2  ;;  %7562 = vrsqrt.f32 %v5282_v14 }
 0x66f   : > { %v5763_v2 = vpop.permute.xlu0 %5762  ;;  %v5089_v18 = vmul.f32 %v4705_v34, %v4705_v34 }
 0x670   : > { %4979 = vadd.xlane.f32.xlu1 %v4978_v0  ;;  %v11385_v0 = vld [vmem:[#allocation50_spill] sm:$0xff] }
 0x671   : > { %v5025_v60 = vmul.f32 0.020408163, %v11385_v0  ;;  %v5409_v0 = vld [vmem:[%s10113_s30 + $0x70] sm:$0xff] }
 0x678   : > { %v7563_v15 = vpop.eup %7562 }
 0x67f   : > { %v10496_v54 = vpop.xlane.xlu1 %4647 }
 0x681   : > { %5777 = vperm.xlu1 %7533, %v5471_v9   ;;  %v5600_v9 = vmul.f32 %v5472_v40, %v10465_v51  ;;  %v11388_v40 = vld [vmem:[#allocation59_spill] sm:$0xff] }
 0x683   : > { %v10499_v57 = vpop.xlane.xlu1 %4967 }
 0x685   : > { %6161 = vperm.xlu1 %7533, %v5663_v13   ;;  %v5153_v13 = vsub.f32 %v5025_v60, %v5089_v18 }
 0x687   : > { %v5758_v50 = vpop.permute.xlu1 %5757  ;;  %v5217_v53 = vmax.f32 %v5153_v13, 0.0 }
 0x688   : > { %v6043_v47 = vmul.f32 %v11383_v10, %v5758_v50  ;;  %v5664_v50 = vsub.f32 %v5536_v38, %v5600_v9  ;;  %v5537_v9 = vld [vmem:[%s10135_s8 + $0x70] sm:$0xff] }
 0x689   : > { %4662 = vadd.xlane.f32.xlu0 %v4661_v6  ;;  %v5410_v6 = vld [vmem:[%s10113_s30 + $0x78] sm:$0xff] }
 0x68a   : > { %v5474_v10 = vmul.f32 %v7563_v15, %v5410_v6 }
 0x68b   : > { %v6142_v42 = vpop.permute.xlu1 %6141 }
 0x68c   : > { %v6427_v45 = vadd.f32 %v6142_v42, %v6043_v47  ;;  %v5281_v47 = vadd.f32 1e-05, %v5217_v53  ;;  %v11387_v42 = vld [vmem:[#allocation6_spill] sm:$0xff] }
 0x68d   : > { %4982 = vadd.xlane.f32.xlu0 %v4981_v17  ;;  %v6044_v8 = vmul.f32 %v11387_v42, %v5763_v2  ;;  %v4810_v17 = vmul.f32 %v11388_v40, %v11388_v40  ;;  %v11390_v53 = vld [vmem:[#allocation58_spill] sm:$0xff]  ;;  %v4667_v42 = vsel %vm4498_vm0, %v10211_v12, 0.0 }
 0x68e   : > { %6491 = vst.msk [vmem:[%s10357_s11 + $0x40] sm:$0xff] %vm4498_vm0, %v6427_v45  ;;  %v4664_v45 = vsel %vm4498_vm0, %v11388_v40, 0.0  ;;  %7564 = vrsqrt.f32 %v5281_v47  ;;  %v5028_v47 = vmul.f32 0.020408163, %v11390_v53 }
 0x68f   : > { %v4984_v14 = vsel %vm4498_vm0, %v4810_v17, 0.0 }
 0x698   : > { %v7565_v52 = vpop.eup %7564 }
 0x699   : > { %v5473_v2 = vmul.f32 %v7565_v52, %v5409_v0 }
 0x69b   : > { %v5601_v18 = vmul.f32 %v5473_v2, %v4705_v34 }
 0x69c   : > { %v10518_v61 = vpop.xlane.xlu0 %4650 }
 0x69d   : > { %v5665_v13 = vsub.f32 %v5537_v9, %v5601_v18  ;;  %v11392_v18 = vld [vmem:[#allocation52_spill] sm:$0xff] }
 0x69e   : > { %v4707_v9 = vmul.f32 0.020408163, %v11392_v18 }
 0x6a0   : > { %v10522_v29 = vpop.xlane.xlu0 %4970 }
 0x6a1   : > { %11386 = vst [vmem:[#allocation5_spill] sm:$0xff] %v10522_v29 }
 0x6a3   : > { %6166 = vperm.xlu0 %7532, %v5664_v50   ;;  %v11389_v50 = vld [vmem:[#allocation55_spill] sm:$0xff] }
 0x6a4   : > { %v10539_v15 = vmul.f32 0.020408163, %v11389_v50  ;;  %v11393_v50 = vld [vmem:[#allocation54_spill] sm:$0xff] }
 0x6a5   : > { %v5027_v53 = vmul.f32 0.020408163, %v11393_v50  ;;  %v4812_v50 = vmul.f32 %v10217_v28, %v10217_v28 }
 0x6a6   : > { %v5092_v34 = vmul.f32 %v10539_v15, %v10539_v15 }
 0x6a7   : > { %5792 = vperm.xlu0 %7532, %v5474_v10  }
 0x6a8   : > { %v6147_v51 = vpop.permute.xlu0 %6146 }
 0x6a9   : > { %v6428_v19 = vadd.f32 %v6147_v51, %v6044_v8  ;;  %4665 = vadd.xlane.f32.xlu1 %v4664_v45  ;;  %v4811_v8 = vmul.f32 %v10211_v12, %v10211_v12  ;;  %v11391_v51 = vld [vmem:[#allocation7_spill] sm:$0xff]  ;;  %v11401_v12 = vld [vmem:[#allocation60_spill] sm:$0xff] }
 0x6aa   : > { %v5029_v33 = vmul.f32 0.020408163, %v11401_v12 }
 0x6ab   : > { %6492 = vst.msk [vmem:[%s10357_s11 + $0x48] sm:$0xff] %vm4498_vm0, %v6428_v19  ;;  %v5156_v19 = vsub.f32 %v5028_v47, %v5092_v34  ;;  %v4987_v52 = vsel %vm4498_vm0, %v4811_v8, 0.0  ;;  %v5538_v47 = vld [vmem:[%s10135_s8 + $0x78] sm:$0xff] }
 0x6ad   : > { %4985 = vadd.xlane.f32.xlu1 %v4984_v14  ;;  %v5220_v0 = vmax.f32 %v5156_v19, 0.0 }
 0x6bc   : > { %v10533_v60 = vpop.xlane.xlu1 %4653 }
 0x6be   : > { %5787 = vperm.xlu1 %7533, %v5473_v2   ;;  %v5284_v2 = vadd.f32 1e-05, %v5220_v0 }
 0x6c0   : > { %v10536_v38 = vpop.xlane.xlu1 %4973  ;;  %7566 = vrsqrt.f32 %v5284_v2  ;;  %v11396_v2 = vld [vmem:[#allocation8_spill] sm:$0xff] }
 0x6c2   : > { %6171 = vperm.xlu1 %7533, %v5665_v13   ;;  %v5773_v13 = vpop.permute.xlu0 %5772 }
 0x6c3   : > { %v6046_v18 = vmul.f32 %v11396_v2, %v5773_v13  ;;  %v11397_v2 = vld [vmem:[#allocation61_spill] sm:$0xff] }
 0x6c4   : > { %v5768_v6 = vpop.permute.xlu1 %5767 }
 0x6c5   : > { %v6045_v45 = vmul.f32 %v11391_v51, %v5768_v6  ;;  %v5602_v6 = vmul.f32 %v5474_v10, %v10502_v49  ;;  %v4670_v10 = vsel %vm4498_vm0, %v10217_v28, 0.0  ;;  %v5031_v28 = vmul.f32 0.020408163, %v11410_v22 }
 0x6c6   : > { %4668 = vadd.xlane.f32.xlu0 %v4667_v42  ;;  %v5091_v42 = vmul.f32 %v4707_v9, %v4707_v9 }
 0x6c7   : > { %v5666_v8 = vsub.f32 %v5538_v47, %v5602_v6  ;;  %v5411_v47 = vld [vmem:[%s10113_s30 + $0x80] sm:$0xff] }
 0x6c8   : > { %v6152_v17 = vpop.permute.xlu1 %6151  ;;  %v5155_v34 = vsub.f32 %v5027_v53, %v5091_v42  ;;  %v4990_v42 = vsel %vm4498_vm0, %v4812_v50, 0.0  ;;  %v4673_v50 = vsel %vm4498_vm0, %v10228_v46, 0.0 }
 0x6c9   : > { %v6429_v14 = vadd.f32 %v6152_v17, %v6045_v45  ;;  %v5412_v17 = vld [vmem:[%s10113_s30 + $0x88] sm:$0xff] }
 0x6ca   : > { %4988 = vadd.xlane.f32.xlu0 %v4987_v52  ;;  %v7567_v45 = vpop.eup %7566 }
 0x6cb   : > { %6493 = vst.msk [vmem:[%s10357_s11 + $0x50] sm:$0xff] %vm4498_vm0, %v6429_v14  ;;  %v5219_v14 = vmax.f32 %v5155_v34, 0.0  ;;  %v5476_v52 = vmul.f32 %v7567_v45, %v5412_v17  ;;  %v5539_v45 = vld [vmem:[%s10135_s8 + $0x80] sm:$0xff] }
 0x6cd   : > { %v5283_v0 = vadd.f32 1e-05, %v5219_v14 }
 0x6cf   : > { %7568 = vrsqrt.f32 %v5283_v0  ;;  %v10576_v0 = vmul.f32 0.020408163, %v11397_v2 }
 0x6d9   : > { %v10555_v51 = vpop.xlane.xlu0 %4656  ;;  %v7569_v6 = vpop.eup %7568 }
 0x6da   : > { %11394 = vst [vmem:[#allocation48_spill] sm:$0xff] %v10555_v51  ;;  %v5475_v13 = vmul.f32 %v7569_v6, %v5411_v47  ;;  %v11441_v51 = vld [vmem:[#allocation90_spill] sm:$0xff] }
 0x6dd   : > { %v10559_v19 = vpop.xlane.xlu0 %4976 }
 0x6de   : > { %11395 = vst [vmem:[#allocation50_spill] sm:$0xff] %v10559_v19  ;;  %v11431_v19 = vld [vmem:[#allocation91_spill] sm:$0xff] }
 0x6e0   : > { %6176 = vperm.xlu0 %7532, %v5666_v8   ;;  %v5603_v8 = vmul.f32 %v5475_v13, %v4707_v9  ;;  %v5094_v9 = vmul.f32 %v10576_v0, %v10576_v0 }
 0x6e2   : > { %v5667_v14 = vsub.f32 %v5539_v45, %v5603_v8 }
 0x6e4   : > { %5802 = vperm.xlu0 %7532, %v5476_v52  }
 0x6e5   : > { %v6157_v49 = vpop.permute.xlu0 %6156 }
 0x6e6   : > { %v6430_v53 = vadd.f32 %v6157_v49, %v6046_v18  ;;  %4671 = vadd.xlane.f32.xlu1 %v4670_v10  ;;  %v11398_v49 = vld [vmem:[#allocation64_spill] sm:$0xff] }
 0x6e7   : > { %v5030_v10 = vmul.f32 0.020408163, %v11398_v49  ;;  %v11400_v49 = vld [vmem:[#allocation57_spill] sm:$0xff] }
 0x6e8   : > { %6494 = vst.msk [vmem:[%s10357_s11 + $0x58] sm:$0xff] %vm4498_vm0, %v6430_v53  ;;  %v4813_v53 = vmul.f32 %v10228_v46, %v10228_v46 }
 0x6e9   : > { %v5783_v46 = vpop.permute.xlu0 %5782 }
 0x6ea   : > { %4991 = vadd.xlane.f32.xlu1 %v4990_v42  ;;  %v11399_v42 = vld [vmem:[#allocation9_spill] sm:$0xff]  ;;  %v4993_v45 = vsel %vm4498_vm0, %v4813_v53, 0.0 }
 0x6f9   : > { %v10570_v34 = vpop.xlane.xlu1 %4659 }
 0x6fb   : > { %5797 = vperm.xlu1 %7533, %v5475_v13   ;;  %v5158_v13 = vsub.f32 %v5030_v10, %v5094_v9  ;;  %v5540_v10 = vld [vmem:[%s10135_s8 + $0x88] sm:$0xff] }
 0x6fd   : > { %v10573_v17 = vpop.xlane.xlu1 %4979 }
 0x6ff   : > { %6181 = vperm.xlu1 %7533, %v5667_v14   ;;  %v5222_v14 = vmax.f32 %v5158_v13, 0.0 }
 0x701   : > { %v5778_v18 = vpop.permute.xlu1 %5777  ;;  %v5286_v2 = vadd.f32 1e-05, %v5222_v14 }
 0x702   : > { %v6047_v6 = vmul.f32 %v11399_v42, %v5778_v18  ;;  %v5604_v18 = vmul.f32 %v5476_v52, %v10539_v15  ;;  %v4676_v52 = vsel %vm4498_vm0, %v10234_v4, 0.0 }
 0x703   : > { %4674 = vadd.xlane.f32.xlu0 %v4673_v50  ;;  %7570 = vrsqrt.f32 %v5286_v2  ;;  %v4709_v50 = vmul.f32 0.020408163, %v11400_v49  ;;  %v11404_v2 = vld [vmem:[#allocation10_spill] sm:$0xff] }
 0x704   : > { %v5668_v53 = vsub.f32 %v5540_v10, %v5604_v18  ;;  %v6048_v12 = vmul.f32 %v11404_v2, %v5783_v46  ;;  %v5413_v10 = vld [vmem:[%s10113_s30 + $0x90] sm:$0xff] }
 0x705   : > { %v6162_v47 = vpop.permute.xlu1 %6161  ;;  %v5093_v21 = vmul.f32 %v4709_v50, %v4709_v50  ;;  %v11405_v2 = vld [vmem:[#allocation67_spill] sm:$0xff] }
 0x706   : > { %v6431_v8 = vadd.f32 %v6162_v47, %v6047_v6  ;;  %v5414_v47 = vld [vmem:[%s10113_s30 + $0x98] sm:$0xff] }
 0x707   : > { %4994 = vadd.xlane.f32.xlu0 %v4993_v45  ;;  %v5157_v9 = vsub.f32 %v5029_v33, %v5093_v21  ;;  %v4814_v21 = vmul.f32 %v10234_v4, %v10234_v4 }
 0x708   : > { %6495 = vst.msk [vmem:[%s10357_s11 + $0x60] sm:$0xff] %vm4498_vm0, %v6431_v8 }
 0x709   : > { %v5221_v8 = vmax.f32 %v5157_v9, 0.0  ;;  %v4996_v49 = vsel %vm4498_vm0, %v4814_v21, 0.0  ;;  %v11407_v21 = vld [vmem:[#allocation74_spill] sm:$0xff] }
 0x70b   : > { %v5285_v14 = vadd.f32 1e-05, %v5221_v8 }
 0x70d   : > { %v7571_v6 = vpop.eup %7570  ;;  %7572 = vrsqrt.f32 %v5285_v14  ;;  %v10613_v14 = vmul.f32 0.020408163, %v11405_v2 }
 0x70e   : > { %v5478_v45 = vmul.f32 %v7571_v6, %v5414_v47  ;;  %v5541_v6 = vld [vmem:[%s10135_s8 + $0x90] sm:$0xff] }
 0x716   : > { %v10592_v42 = vpop.xlane.xlu0 %4662 }
 0x717   : > { %11402 = vst [vmem:[#allocation6_spill] sm:$0xff] %v10592_v42  ;;  %v7573_v18 = vpop.eup %7572 }
 0x718   : > { %v5477_v46 = vmul.f32 %v7573_v18, %v5413_v10  ;;  %v11408_v18 = vld [vmem:[#allocation11_spill] sm:$0xff] }
 0x71a   : > { %v10596_v13 = vpop.xlane.xlu0 %4982 }
 0x71b   : > { %11403 = vst [vmem:[#allocation55_spill] sm:$0xff] %v10596_v13 }
 0x71d   : > { %6186 = vperm.xlu0 %7532, %v5668_v53   ;;  %v5605_v53 = vmul.f32 %v5477_v46, %v4709_v50  ;;  %v5096_v50 = vmul.f32 %v10613_v14, %v10613_v14 }
 0x71f   : > { %v5669_v8 = vsub.f32 %v5541_v6, %v5605_v53 }
 0x721   : > { %5812 = vperm.xlu0 %7532, %v5478_v45  }
 0x722   : > { %v6167_v15 = vpop.permute.xlu0 %6166 }
 0x723   : > { %v6432_v33 = vadd.f32 %v6167_v15, %v6048_v12  ;;  %4677 = vadd.xlane.f32.xlu1 %v4676_v52  ;;  %v11406_v15 = vld [vmem:[#allocation70_spill] sm:$0xff] }
 0x724   : > { %v5032_v52 = vmul.f32 0.020408163, %v11406_v15 }
 0x725   : > { %6496 = vst.msk [vmem:[%s10357_s11 + $0x68] sm:$0xff] %vm4498_vm0, %v6432_v33  ;;  %v4679_v33 = vsel %vm4498_vm0, %v11407_v21, 0.0 }
 0x726   : > { %v5160_v53 = vsub.f32 %v5032_v52, %v5096_v50  ;;  %v5793_v4 = vpop.permute.xlu0 %5792  ;;  %v5542_v52 = vld [vmem:[%s10135_s8 + $0x98] sm:$0xff] }
 0x727   : > { %4997 = vadd.xlane.f32.xlu1 %v4996_v49  ;;  %v4815_v49 = vmul.f32 %v11407_v21, %v11407_v21  ;;  %v11409_v21 = vld [vmem:[#allocation63_spill] sm:$0xff] }
 0x728   : > { %v5224_v2 = vmax.f32 %v5160_v53, 0.0 }
 0x72a   : > { %v5288_v15 = vadd.f32 1e-05, %v5224_v2  ;;  %v11413_v2 = vld [vmem:[#allocation12_spill] sm:$0xff] }
 0x72b   : > { %v6050_v22 = vmul.f32 %v11413_v2, %v5793_v4 }
 0x72c   : > { %7574 = vrsqrt.f32 %v5288_v15 }
 0x736   : > { %v10607_v9 = vpop.xlane.xlu1 %4665 }
 0x738   : > { %5807 = vperm.xlu1 %7533, %v5477_v46  }
 0x73a   : > { %v10610_v47 = vpop.xlane.xlu1 %4985 }
 0x73c   : > { %6191 = vperm.xlu1 %7533, %v5669_v8   ;;  %v4999_v8 = vsel %vm4498_vm0, %v4815_v49, 0.0 }
 0x73e   : > { %v5788_v12 = vpop.permute.xlu1 %5787 }
 0x73f   : > { %v6049_v10 = vmul.f32 %v11408_v18, %v5788_v12  ;;  %v5606_v12 = vmul.f32 %v5478_v45, %v10576_v0  ;;  %v11414_v45 = vld [vmem:[#allocation77_spill] sm:$0xff] }
 0x740   : > { %4680 = vadd.xlane.f32.xlu0 %v4679_v33  ;;  %v4711_v33 = vmul.f32 0.020408163, %v11409_v21  ;;  %v4682_v15 = vsel %vm4498_vm0, %v11414_v45, 0.0 }
 0x741   : > { %v5670_v49 = vsub.f32 %v5542_v52, %v5606_v12 }
 0x742   : > { %v6172_v46 = vpop.permute.xlu1 %6171  ;;  %v5095_v58 = vmul.f32 %v4711_v33, %v4711_v33 }
 0x743   : > { %v6433_v6 = vadd.f32 %v6172_v46, %v6049_v10  ;;  %v7575_v10 = vpop.eup %7574  ;;  %v5416_v46 = vld [vmem:[%s10113_s30 + $0xa8] sm:$0xff] }
 0x744   : > { %5000 = vadd.xlane.f32.xlu0 %v4999_v8  ;;  %v5159_v50 = vsub.f32 %v5031_v28, %v5095_v58  ;;  %v5480_v21 = vmul.f32 %v7575_v10, %v5416_v46  ;;  %v4816_v58 = vmul.f32 %v11414_v45, %v11414_v45  ;;  %v5543_v46 = vld [vmem:[%s10135_s8 + $0xa0] sm:$0xff] }
 0x745   : > { %6497 = vst.msk [vmem:[%s10357_s11 + $0x70] sm:$0xff] %vm4498_vm0, %v6433_v6 }
 0x746   : > { %v5223_v6 = vmax.f32 %v5159_v50, 0.0  ;;  %v5002_v12 = vsel %vm4498_vm0, %v4816_v58, 0.0  ;;  %v5415_v50 = vld [vmem:[%s10113_s30 + $0xa0] sm:$0xff] }
 0x748   : > { %v5287_v8 = vadd.f32 1e-05, %v5223_v6  ;;  %v11415_v6 = vld [vmem:[#allocation73_spill] sm:$0xff] }
 0x749   : > { %v4714_v2 = vmul.f32 0.020408163, %v11415_v6 }
 0x74a   : > { %7576 = vrsqrt.f32 %v5287_v8 }
 0x753   : > { %v10629_v18 = vpop.xlane.xlu0 %4668 }
 0x754   : > { %11411 = vst [vmem:[#allocation58_spill] sm:$0xff] %v10629_v18  ;;  %v7577_v52 = vpop.eup %7576 }
 0x755   : > { %v5479_v4 = vmul.f32 %v7577_v52, %v5415_v50  ;;  %v11418_v52 = vld [vmem:[#allocation79_spill] sm:$0xff] }
 0x756   : > { %v10656_v50 = vmul.f32 0.020408163, %v11418_v52  ;;  %v10666_v52 = vmul.f32 0.020408163, %v10269_v1  ;;  %v11422_v1 = vld [vmem:[#allocation72_spill] sm:$0xff] }
 0x757   : > { %v10633_v53 = vpop.xlane.xlu0 %4988  ;;  %v5607_v10 = vmul.f32 %v5479_v4, %v4711_v33  ;;  %v4817_v33 = vmul.f32 %v10256_v11, %v10256_v11 }
 0x758   : > { %11412 = vst [vmem:[#allocation7_spill] sm:$0xff] %v10633_v53 }
 0x759   : > { %v5005_v59 = vsel %vm4498_vm0, %v4817_v33, 0.0 }
 0x75a   : > { %6196 = vperm.xlu0 %7532, %v5670_v49  }
 0x75e   : > { %5822 = vperm.xlu0 %7532, %v5480_v21  }
 0x75f   : > { %v6177_v0 = vpop.permute.xlu0 %6176 }
 0x760   : > { %v6434_v28 = vadd.f32 %v6177_v0, %v6050_v22  ;;  %4683 = vadd.xlane.f32.xlu1 %v4682_v15  ;;  %v5671_v22 = vsub.f32 %v5543_v46, %v5607_v10  ;;  %v11417_v0 = vld [vmem:[#allocation76_spill] sm:$0xff]  ;;  %v5098_v15 = vmul.f32 %v4714_v2, %v4714_v2 }
 0x761   : > { %v5034_v8 = vmul.f32 0.020408163, %v11417_v0  ;;  %v11420_v0 = vld [vmem:[#allocation82_spill] sm:$0xff] }
 0x762   : > { %6498 = vst.msk [vmem:[%s10357_s11 + $0x78] sm:$0xff] %vm4498_vm0, %v6434_v28 }
 0x763   : > { %v5162_v28 = vsub.f32 %v5034_v8, %v5098_v15  ;;  %v5100_v8 = vmul.f32 %v10656_v50, %v10656_v50 }
 0x764   : > { %5003 = vadd.xlane.f32.xlu1 %v5002_v12  ;;  %v4685_v12 = vsel %vm4498_vm0, %v10256_v11, 0.0  ;;  %v11424_v11 = vld [vmem:[#allocation75_spill] sm:$0xff] }
 0x765   : > { %v5226_v46 = vmax.f32 %v5162_v28, 0.0  ;;  %v5038_v28 = vmul.f32 0.020408163, %v10273_v39  ;;  %v5040_v39 = vmul.f32 0.020408163, %v10281_v25 }
 0x767   : > { %v5290_v15 = vadd.f32 1e-05, %v5226_v46  ;;  %v5803_v46 = vpop.permute.xlu0 %5802 }
 0x769   : > { %7578 = vrsqrt.f32 %v5290_v15  ;;  %v5608_v15 = vmul.f32 %v5480_v21, %v10613_v14  ;;  %v5035_v14 = vmul.f32 0.020408163, %v11425_v48  ;;  %v10693_v21 = vmul.f32 0.020408163, %v10285_v55  ;;  %v5420_v55 = vld [vmem:[%s10113_s30 + $0xc8] sm:$0xff] }
 0x76b   : > { %v5106_v48 = vmul.f32 %v10693_v21, %v10693_v21 }
 0x773   : > { %v10644_v49 = vpop.xlane.xlu1 %4671 }
 0x775   : > { %5817 = vperm.xlu1 %7533, %v5479_v4   ;;  %v11419_v4 = vld [vmem:[#allocation13_spill] sm:$0xff] }
 0x777   : > { %v10648_v40 = vpop.xlane.xlu1 %4991 }
 0x778   : > { %11416 = vst [vmem:[#allocation52_spill] sm:$0xff] %v10648_v40  ;;  %v11442_v40 = vld [vmem:[#allocation101_spill] sm:$0xff] }
 0x779   : > { %6201 = vperm.xlu1 %7533, %v5671_v22   ;;  %v5036_v22 = vmul.f32 0.020408163, %v11420_v0  ;;  %v5033_v0 = vmul.f32 0.020408163, %v11422_v1  ;;  %v10689_v1 = vmul.f32 0.020408163, %v11424_v11 }
 0x77a   : > { %v5042_v11 = vmul.f32 0.020408163, %v10289_v31  ;;  %v10770_v29 = vmul.f32 0.020408163, %v11442_v40  ;;  %v5547_v40 = vld [vmem:[%s10135_s8 + $0xc0] sm:$0xff] }
 0x77b   : > { %v5798_v58 = vpop.permute.xlu1 %5797 }
 0x77c   : > { %v6051_v6 = vmul.f32 %v11419_v4, %v5798_v58  ;;  %v5102_v4 = vmul.f32 %v10666_v52, %v10666_v52  ;;  %v5170_v31 = vsub.f32 %v5042_v11, %v5106_v48  ;;  %v11432_v11 = vld [vmem:[#allocation93_spill] sm:$0xff] }
 0x77d   : > { %4686 = vadd.xlane.f32.xlu0 %v4685_v12  ;;  %v5164_v12 = vsub.f32 %v5036_v22, %v5100_v8 }
 0x77e   : > { %v5166_v33 = vsub.f32 %v5038_v28, %v5102_v4  ;;  %v5418_v4 = vld [vmem:[%s10113_s30 + $0xb8] sm:$0xff] }
 0x77f   : > { %v6182_v10 = vpop.permute.xlu1 %6181  ;;  %v5228_v58 = vmax.f32 %v5164_v12, 0.0  ;;  %v7579_v12 = vpop.eup %7578 }
 0x780   : > { %v6435_v45 = vadd.f32 %v6182_v10, %v6051_v6  ;;  %v11421_v6 = vld [vmem:[#allocation69_spill] sm:$0xff]  ;;  %v5230_v22 = vmax.f32 %v5166_v33, 0.0  ;;  %v5482_v20 = vmul.f32 %v7579_v12, %v5418_v4  ;;  %v5546_v12 = vld [vmem:[%s10135_s8 + $0xb8] sm:$0xff] }
 0x781   : > { %5006 = vadd.xlane.f32.xlu0 %v5005_v59  ;;  %v5292_v59 = vadd.f32 1e-05, %v5228_v58  ;;  %v10672_v10 = vmul.f32 0.020408163, %v11421_v6 }
 0x782   : > { %6499 = vst.msk [vmem:[%s10357_s11 + $0x80] sm:$0xff] %vm4498_vm0, %v6435_v45  ;;  %v10675_v45 = vmul.f32 0.020408163, %v10277_v16  ;;  %v5544_v16 = vld [vmem:[%s10135_s8 + $0xa8] sm:$0xff] }
 0x783   : > { %7580 = vrsqrt.f32 %v5292_v59  ;;  %v5097_v8 = vmul.f32 %v10672_v10, %v10672_v10  ;;  %v5294_v59 = vadd.f32 1e-05, %v5230_v22  ;;  %v5672_v25 = vsub.f32 %v5544_v16, %v5608_v15  ;;  %v11427_v16 = vld [vmem:[#allocation81_spill] sm:$0xff] }
 0x784   : > { %v5104_v58 = vmul.f32 %v10675_v45, %v10675_v45  ;;  %v10705_v4 = vmul.f32 0.020408163, %v11427_v16  ;;  %v11430_v16 = vld [vmem:[#allocation84_spill] sm:$0xff] }
 0x785   : > { %v5161_v6 = vsub.f32 %v5033_v0, %v5097_v8  ;;  %7582 = vrsqrt.f32 %v5294_v59  ;;  %v5037_v42 = vmul.f32 0.020408163, %v11430_v16  ;;  %v5046_v16 = vmul.f32 0.020408163, %v10318_v24 }
 0x786   : > { %v5168_v33 = vsub.f32 %v5040_v39, %v5104_v58  ;;  %v5610_v39 = vmul.f32 %v5482_v20, %v4714_v2 }
 0x787   : > { %v5225_v53 = vmax.f32 %v5161_v6, 0.0  ;;  %v11428_v6 = vld [vmem:[#allocation14_spill] sm:$0xff] }
 0x788   : > { %v5232_v0 = vmax.f32 %v5168_v33, 0.0  ;;  %v5674_v18 = vsub.f32 %v5546_v12, %v5610_v39  ;;  %v5044_v39 = vmul.f32 0.020408163, %v11432_v11 }
 0x789   : > { %v5289_v58 = vadd.f32 1e-05, %v5225_v53 }
 0x78a   : > { %v5296_v59 = vadd.f32 1e-05, %v5232_v0  ;;  %v5234_v0 = vmax.f32 %v5170_v31, 0.0 }
 0x78b   : > { %7584 = vrsqrt.f32 %v5289_v58  ;;  %v5548_v58 = vld [vmem:[%s10135_s8 + $0xc8] sm:$0xff] }
 0x78c   : > { %7586 = vrsqrt.f32 %v5296_v59  ;;  %v11433_v59 = vld [vmem:[#allocation85_spill] sm:$0xff] }
 0x78d   : > { %v7581_v8 = vpop.eup %7580  ;;  %v10728_v31 = vmul.f32 0.020408163, %v11433_v59 }
 0x78e   : > { %v5484_v53 = vmul.f32 %v7581_v8, %v5420_v55 }
 0x78f   : > { %v7583_v48 = vpop.eup %7582 }
 0x790   : > { %v10684_v28 = vpop.xlane.xlu0 %4674 }
 0x791   : > { %11423 = vst [vmem:[#allocation54_spill] sm:$0xff] %v10684_v28  ;;  %v5099_v28 = vmul.f32 %v10689_v1, %v10689_v1 }
 0x793   : > { %v5163_v15 = vsub.f32 %v5035_v14, %v5099_v28 }
 0x794   : > { %v10698_v22 = vpop.xlane.xlu0 %4994 }
 0x795   : > { %11426 = vst [vmem:[#allocation8_spill] sm:$0xff] %v10698_v22  ;;  %v11429_v22 = vld [vmem:[#allocation83_spill] sm:$0xff]  ;;  %v5227_v13 = vmax.f32 %v5163_v15, 0.0  ;;  %v5612_v15 = vmul.f32 %v5484_v53, %v10656_v50 }
 0x796   : > { %v4688_v2 = vsel %vm4498_vm0, %v11429_v22, 0.0  ;;  %v4818_v28 = vmul.f32 %v11429_v22, %v11429_v22 }
 0x797   : > { %6206 = vperm.xlu0 %7532, %v5672_v25   ;;  %v6052_v25 = vmul.f32 %v11428_v6, %v5803_v46  ;;  %v10714_v46 = vmul.f32 0.020408163, %v11431_v19  ;;  %v5291_v19 = vadd.f32 1e-05, %v5227_v13  ;;  %v5422_v6 = vld [vmem:[%s10113_s30 + $0xd8] sm:$0xff]  ;;  %v11434_v13 = vld [vmem:[#allocation95_spill] sm:$0xff] }
 0x798   : > { %v5008_v8 = vsel %vm4498_vm0, %v4818_v28, 0.0  ;;  %v11435_v28 = vld [vmem:[#allocation86_spill] sm:$0xff] }
 0x799   : > { %v5108_v55 = vmul.f32 %v10714_v46, %v10714_v46  ;;  %7588 = vrsqrt.f32 %v5291_v19  ;;  %v5550_v19 = vld [vmem:[%s10135_s8 + $0xd8] sm:$0xff] }
 0x79b   : > { %5832 = vperm.xlu0 %7532, %v5482_v20   ;;  %v5101_v20 = vmul.f32 %v10705_v4, %v10705_v4 }
 0x79c   : > { %v6187_v33 = vpop.permute.xlu0 %6186 }
 0x79d   : > { %v6436_v14 = vadd.f32 %v6187_v33, %v6052_v25  ;;  %4689 = vadd.xlane.f32.xlu1 %v4688_v2  ;;  %v5165_v12 = vsub.f32 %v5037_v42, %v5101_v20  ;;  %v5298_v25 = vadd.f32 1e-05, %v5234_v0  ;;  %v5676_v33 = vsub.f32 %v5548_v58, %v5612_v15  ;;  %v7585_v20 = vpop.eup %7584 }
 0x79e   : > { %v5486_v2 = vmul.f32 %v7583_v48, %v5422_v6  ;;  %v10731_v42 = vmul.f32 0.020408163, %v11434_v13  ;;  %v5103_v0 = vmul.f32 %v10728_v31, %v10728_v31 }
 0x79f   : > { %6500 = vst.msk [vmem:[%s10357_s11 + $0x88] sm:$0xff] %vm4498_vm0, %v6436_v14  ;;  %6216 = vperm.xlu0 %7532, %v5674_v18   ;;  %v5172_v18 = vsub.f32 %v5044_v39, %v5108_v55  ;;  %v5229_v50 = vmax.f32 %v5165_v12, 0.0  ;;  %v5039_v14 = vmul.f32 0.020408163, %v11435_v28  ;;  %7590 = vrsqrt.f32 %v5298_v25  ;;  %v5417_v39 = vld [vmem:[%s10113_s30 + $0xb0] sm:$0xff]  ;;  %v5424_v12 = vld [vmem:[%s10113_s30 + $0xe8] sm:$0xff] }
 0x7a0   : > { %v5614_v11 = vmul.f32 %v5486_v2, %v10666_v52  ;;  %v5110_v48 = vmul.f32 %v10731_v42, %v10731_v42  ;;  %v5481_v24 = vmul.f32 %v7585_v20, %v5417_v39  ;;  %v11436_v25 = vld [vmem:[#allocation87_spill] sm:$0xff]  ;;  %v11438_v28 = vld [vmem:[#allocation88_spill] sm:$0xff] }
 0x7a1   : > { %5009 = vadd.xlane.f32.xlu1 %v5008_v8  ;;  %v7587_v8 = vpop.eup %7586  ;;  %v5293_v15 = vadd.f32 1e-05, %v5229_v50  ;;  %v5167_v55 = vsub.f32 %v5039_v14, %v5103_v0  ;;  %v5041_v22 = vmul.f32 0.020408163, %v11438_v28  ;;  %v5419_v0 = vld [vmem:[%s10113_s30 + $0xc0] sm:$0xff]  ;;  %v5545_v39 = vld [vmem:[%s10135_s8 + $0xb0] sm:$0xff] }
 0x7a2   : > { %v5174_v6 = vsub.f32 %v5046_v16, %v5110_v48  ;;  %v5678_v59 = vsub.f32 %v5550_v19, %v5614_v11  ;;  %v5488_v52 = vmul.f32 %v7587_v8, %v5424_v12  ;;  %v5609_v20 = vmul.f32 %v5481_v24, %v10672_v10  ;;  %v5552_v19 = vld [vmem:[%s10135_s8 + $0xe8] sm:$0xff]  ;;  %v5426_v12 = vld [vmem:[%s10113_s30 + $0xf8] sm:$0xff] }
 0x7a3   : > { %5842 = vperm.xlu0 %7532, %v5484_v53   ;;  %v5236_v53 = vmax.f32 %v5172_v18, 0.0  ;;  %v10744_v18 = vmul.f32 0.020408163, %v11436_v25  ;;  %7592 = vrsqrt.f32 %v5293_v15  ;;  %v5231_v13 = vmax.f32 %v5167_v55, 0.0 }
 0x7a4   : > { %v5238_v14 = vmax.f32 %v5174_v6, 0.0  ;;  %v5616_v8 = vmul.f32 %v5488_v52, %v10675_v45  ;;  %v11440_v6 = vld [vmem:[#allocation89_spill] sm:$0xff]  ;;  %v5673_v28 = vsub.f32 %v5545_v39, %v5609_v20 }
 0x7a5   : > { %v5300_v58 = vadd.f32 1e-05, %v5236_v53  ;;  %v5048_v53 = vmul.f32 0.020408163, %v10331_v23  ;;  %v5105_v11 = vmul.f32 %v10744_v18, %v10744_v18  ;;  %v5295_v55 = vadd.f32 1e-05, %v5231_v13 }
 0x7a6   : > { %v10764_v10 = vmul.f32 0.020408163, %v11440_v6  ;;  %v5302_v25 = vadd.f32 1e-05, %v5238_v14  ;;  %v5680_v45 = vsub.f32 %v5552_v19, %v5616_v8 }
 0x7a7   : > { %6226 = vperm.xlu0 %7532, %v5676_v33   ;;  %v11437_v33 = vld [vmem:[#allocation98_spill] sm:$0xff]  ;;  %7594 = vrsqrt.f32 %v5300_v58  ;;  %v5169_v23 = vsub.f32 %v5041_v22, %v5105_v11 }
 0x7a8   : > { %v10747_v50 = vmul.f32 0.020408163, %v11437_v33  ;;  %7596 = vrsqrt.f32 %v5295_v55 }
 0x7a9   : > { %v5233_v22 = vmax.f32 %v5169_v23, 0.0  ;;  %7598 = vrsqrt.f32 %v5302_v25 }
 0x7aa   : > { %v5112_v48 = vmul.f32 %v10747_v50, %v10747_v50 }
 0x7ab   : > { %5852 = vperm.xlu0 %7532, %v5486_v2   ;;  %v7589_v2 = vpop.eup %7588  ;;  %v5297_v19 = vadd.f32 1e-05, %v5233_v22  ;;  %v10788_v22 = vmul.f32 0.020408163, %v10343_v44 }
 0x7ac   : > { %v7591_v15 = vpop.eup %7590  ;;  %v5483_v58 = vmul.f32 %v7589_v2, %v5419_v0  ;;  %v5107_v2 = vmul.f32 %v10764_v10, %v10764_v10  ;;  %v5421_v0 = vld [vmem:[%s10113_s30 + $0xd0] sm:$0xff] }
 0x7ad   : > { %v7593_v13 = vpop.eup %7592  ;;  %7600 = vrsqrt.f32 %v5297_v19 }
 0x7ae   : > { %v5485_v23 = vmul.f32 %v7593_v13, %v5421_v0 }
 0x7af   : > { %6236 = vperm.xlu0 %7532, %v5678_v59   ;;  %v5176_v59 = vsub.f32 %v5048_v53, %v5112_v48  ;;  %v11443_v53 = vld [vmem:[#allocation102_spill] sm:$0xff] }
 0x7b0   : > { %v10751_v16 = vpop.xlane.xlu1 %4677  ;;  %v5050_v20 = vmul.f32 0.020408163, %v11443_v53  ;;  %v5428_v48 = vld [vmem:[%s10113_s30 + $0x108] sm:$0xff] }
 0x7b1   : > { %11439 = vst [vmem:[#allocation61_spill] sm:$0xff] %v10751_v16  ;;  %v5490_v16 = vmul.f32 %v7591_v15, %v5426_v12  ;;  %v5240_v14 = vmax.f32 %v5176_v59, 0.0  ;;  %v7595_v39 = vpop.eup %7594  ;;  %v5114_v15 = vmul.f32 %v10770_v29, %v10770_v29  ;;  %v11444_v12 = vld [vmem:[#allocation15_spill] sm:$0xff] }
 0x7b2   : > { %5827 = vperm.xlu1 %7533, %v5481_v24   ;;  %v5043_v24 = vmul.f32 0.020408163, %v11441_v51  ;;  %v5492_v53 = vmul.f32 %v7595_v39, %v5428_v48  ;;  %v7597_v0 = vpop.eup %7596 }
 0x7b3   : > { %5862 = vperm.xlu0 %7532, %v5488_v52   ;;  %v5611_v52 = vmul.f32 %v5483_v58, %v10689_v1  ;;  %v5618_v11 = vmul.f32 %v5490_v16, %v10693_v21  ;;  %v5554_v1 = vld [vmem:[%s10135_s8 + $0xf8] sm:$0xff]  ;;  %v5304_v6 = vadd.f32 1e-05, %v5240_v14  ;;  %v5178_v25 = vsub.f32 %v5050_v20, %v5114_v15  ;;  %v7599_v39 = vpop.eup %7598 }
 0x7b4   : > { %v10766_v33 = vpop.xlane.xlu1 %4997  ;;  %v5171_v8 = vsub.f32 %v5043_v24, %v5107_v2  ;;  %v5052_v20 = vmul.f32 0.020408163, %v10348_v27  ;;  %v5116_v15 = vmul.f32 %v10788_v22, %v10788_v22  ;;  %v11447_v27 = vld [vmem:[#allocation96_spill] sm:$0xff] }
 0x7b5   : > { %v5682_v2 = vsub.f32 %v5554_v1, %v5618_v11  ;;  %7602 = vrsqrt.f32 %v5304_v6  ;;  %v5242_v14 = vmax.f32 %v5178_v25, 0.0  ;;  %v5423_v11 = vld [vmem:[%s10113_s30 + $0xe0] sm:$0xff]  ;;  %v5556_v1 = vld [vmem:[%s10135_s8 + $0x108] sm:$0xff] }
 0x7b6   : > { %6211 = vperm.xlu1 %7533, %v5673_v28   ;;  %v5675_v28 = vsub.f32 %v5547_v40, %v5611_v52  ;;  %v5613_v52 = vmul.f32 %v5485_v23, %v10705_v4  ;;  %v5620_v40 = vmul.f32 %v5492_v53, %v10714_v46  ;;  %v5430_v4 = vld [vmem:[%s10113_s30 + $0x118] sm:$0xff]  ;;  %v5180_v6 = vsub.f32 %v5052_v20, %v5116_v15 }
 0x7b7   : > { %6246 = vperm.xlu0 %7532, %v5680_v45   ;;  %v11445_v45 = vld [vmem:[#allocation92_spill] sm:$0xff]  ;;  %v5487_v25 = vmul.f32 %v7597_v0, %v5423_v11  ;;  %v10808_v46 = vmul.f32 0.020408163, %v10381_v3 }
 0x7b8   : > { %v5808_v51 = vpop.permute.xlu1 %5807  ;;  %v10785_v21 = vmul.f32 0.020408163, %v11445_v45  ;;  %v5244_v3 = vmax.f32 %v5180_v6, 0.0 }
 0x7b9   : > { %v6053_v55 = vmul.f32 %v11444_v12, %v5808_v51  ;;  %v5549_v51 = vld [vmem:[%s10135_s8 + $0xd0] sm:$0xff]  ;;  %v10805_v12 = vmul.f32 0.020408163, %v11447_v27 }
 0x7ba   : > { %5837 = vperm.xlu1 %7533, %v5483_v58   ;;  %v5235_v58 = vmax.f32 %v5171_v8, 0.0  ;;  %v5109_v44 = vmul.f32 %v10785_v21, %v10785_v21  ;;  %v5677_v19 = vsub.f32 %v5549_v51, %v5613_v52  ;;  %v10817_v52 = vpop.permute.xlu0 %5812  ;;  %v5425_v51 = vld [vmem:[%s10113_s30 + $0xf0] sm:$0xff] }
 0x7bb   : > { %5872 = vperm.xlu0 %7532, %v5490_v16   ;;  %v11446_v16 = vld [vmem:[#allocation94_spill] sm:$0xff] }
 0x7bc   : > { %v6192_v59 = vpop.permute.xlu1 %6191  ;;  %v5045_v13 = vmul.f32 0.020408163, %v11446_v16  ;;  %v5299_v8 = vadd.f32 1e-05, %v5235_v58  ;;  %v5615_v58 = vmul.f32 %v5487_v25, %v10728_v31  ;;  %v7601_v16 = vpop.eup %7600 }
 0x7bd   : > { %v6437_v24 = vadd.f32 %v6192_v59, %v6053_v55  ;;  %v5306_v55 = vadd.f32 1e-05, %v5242_v14  ;;  %v5684_v59 = vsub.f32 %v5556_v1, %v5620_v40  ;;  %v5551_v14 = vld [vmem:[%s10135_s8 + $0xe0] sm:$0xff]  ;;  %v5432_v40 = vld [vmem:[%s10113_s30 + $0x128] sm:$0xff]  ;;  %v5489_v15 = vmul.f32 %v7601_v16, %v5425_v51  ;;  %v11449_v1 = vld [vmem:[#allocation99_spill] sm:$0xff] }
 0x7be   : > { %6221 = vperm.xlu1 %7533, %v5675_v28   ;;  %v5173_v48 = vsub.f32 %v5045_v13, %v5109_v44  ;;  %v5494_v28 = vmul.f32 %v7599_v39, %v5430_v4  ;;  %7604 = vrsqrt.f32 %v5299_v8  ;;  %v5118_v13 = vmul.f32 %v10808_v46, %v10808_v46  ;;  %v5558_v44 = vld [vmem:[%s10135_s8 + $0x118] sm:$0xff] }
 0x7bf   : > { %6501 = vst.msk [vmem:[%s10357_s11 + $0x90] sm:$0xff] %vm4498_vm0, %v6437_v24  ;;  %6256 = vperm.xlu0 %7532, %v5682_v2   ;;  %v5054_v2 = vmul.f32 0.020408163, %v10384_v26  ;;  %7606 = vrsqrt.f32 %v5306_v55  ;;  %v7603_v26 = vpop.eup %7602  ;;  %v5308_v8 = vadd.f32 1e-05, %v5244_v3  ;;  %v5679_v31 = vsub.f32 %v5551_v14, %v5615_v58  ;;  %v5553_v3 = vld [vmem:[%s10135_s8 + $0xf0] sm:$0xff] }
 0x7c0   : > { %v5237_v24 = vmax.f32 %v5173_v48, 0.0  ;;  %v5622_v20 = vmul.f32 %v5494_v28, %v10731_v42  ;;  %v10825_v4 = vmul.f32 0.020408163, %v11449_v1  ;;  %v5496_v27 = vmul.f32 %v7603_v26, %v5432_v40 }
 0x7c1   : > { %v5182_v39 = vsub.f32 %v5054_v2, %v5118_v13  ;;  %v10828_v55 = vmul.f32 0.020408163, %v10421_v41  ;;  %v5427_v2 = vld [vmem:[%s10113_s30 + $0x100] sm:$0xff] }
 0x7c2   : > { %5847 = vperm.xlu1 %7533, %v5485_v23   ;;  %v11448_v23 = vld [vmem:[#allocation97_spill] sm:$0xff]  ;;  %v5301_v11 = vadd.f32 1e-05, %v5237_v24  ;;  %v5617_v24 = vmul.f32 %v5489_v15, %v10744_v18  ;;  %v5113_v41 = vmul.f32 %v10825_v4, %v10825_v4  ;;  %v5624_v58 = vmul.f32 %v5496_v27, %v10747_v50  ;;  %v5434_v18 = vld [vmem:[%s10113_s30 + $0x138] sm:$0xff] }
 0x7c3   : > { %5882 = vperm.xlu0 %7532, %v5492_v53   ;;  %v5047_v45 = vmul.f32 0.020408163, %v11448_v23  ;;  %v5111_v53 = vmul.f32 %v10805_v12, %v10805_v12  ;;  %v5120_v14 = vmul.f32 %v10828_v55, %v10828_v55 }
 0x7c4   : > { %7608 = vrsqrt.f32 %v5301_v11 }
 0x7c5   : > { %v5175_v0 = vsub.f32 %v5047_v45, %v5111_v53  ;;  %7610 = vrsqrt.f32 %v5308_v8  ;;  %v5056_v45 = vmul.f32 0.020408163, %v10424_v37  ;;  %v5560_v37 = vld [vmem:[%s10135_s8 + $0x128] sm:$0xff]  ;;  %v5681_v8 = vsub.f32 %v5553_v3, %v5617_v24 }
 0x7c6   : > { %6231 = vperm.xlu1 %7533, %v5677_v19   ;;  %v5686_v19 = vsub.f32 %v5558_v44, %v5622_v20 }
 0x7c7   : > { %6266 = vperm.xlu0 %7532, %v5684_v59   ;;  %v5239_v42 = vmax.f32 %v5175_v0, 0.0  ;;  %v11451_v0 = vld [vmem:[#allocation103_spill] sm:$0xff]  ;;  %v5184_v50 = vsub.f32 %v5056_v45, %v5120_v14  ;;  %v11453_v45 = vld [vmem:[#allocation16_spill] sm:$0xff] }
 0x7c8   : > { %v7605_v23 = vpop.eup %7604  ;;  %v10847_v44 = vmul.f32 0.020408163, %v11451_v0 }
 0x7c9   : > { %v7607_v16 = vpop.eup %7606  ;;  %v5303_v13 = vadd.f32 1e-05, %v5239_v42  ;;  %v5491_v11 = vmul.f32 %v7605_v23, %v5427_v2  ;;  %v5058_v23 = vmul.f32 0.020408163, %v10461_v56  ;;  %v5562_v56 = vld [vmem:[%s10135_s8 + $0x138] sm:$0xff] }
 0x7ca   : > { %5857 = vperm.xlu1 %7533, %v5487_v25   ;;  %v11450_v25 = vld [vmem:[#allocation100_spill] sm:$0xff]  ;;  %v5498_v1 = vmul.f32 %v7607_v16, %v5434_v18 }
 0x7cb   : > { %5892 = vperm.xlu0 %7532, %v5494_v28   ;;  %v5049_v59 = vmul.f32 0.020408163, %v11450_v25  ;;  %v5246_v28 = vmax.f32 %v5182_v39, 0.0  ;;  %7612 = vrsqrt.f32 %v5303_v13 }
 0x7cc   : > { %v5626_v3 = vmul.f32 %v5498_v1, %v10770_v29  ;;  %v10869_v29 = vmul.f32 0.020408163, %v10377_v32 }
 0x7cd   : > { %v4681_v48 = vpop.xlane.xlu0 %4680  ;;  %v5177_v26 = vsub.f32 %v5049_v59, %v5113_v41  ;;  %v5310_v40 = vadd.f32 1e-05, %v5246_v28  ;;  %v5619_v59 = vmul.f32 %v5491_v11, %v10764_v10  ;;  %v5248_v28 = vmax.f32 %v5184_v50, 0.0 }
 0x7ce   : > { %v10830_v6 = vmul.f32 0.020408163, %v4681_v48  ;;  %6241 = vperm.xlu1 %7533, %v5679_v31   ;;  %v5688_v31 = vsub.f32 %v5560_v37, %v5624_v58  ;;  %v11452_v48 = vld [vmem:[#allocation104_spill] sm:$0xff]  ;;  %v7609_v2 = vpop.eup %7608  ;;  %v5429_v58 = vld [vmem:[%s10113_s30 + $0x110] sm:$0xff]  ;;  %v5690_v0 = vsub.f32 %v5562_v56, %v5626_v3 }
 0x7cf   : > { %6276 = vperm.xlu0 %7532, %v5686_v19   ;;  %v5051_v19 = vmul.f32 0.020408163, %v11452_v48  ;;  %v5241_v25 = vmax.f32 %v5177_v26, 0.0  ;;  %7614 = vrsqrt.f32 %v5310_v40  ;;  %v7611_v16 = vpop.eup %7610  ;;  %v5493_v26 = vmul.f32 %v7609_v2, %v5429_v58 }
 0x7d0   : > { %v5135_v20 = vmul.f32 %v10830_v6, %v10830_v6  ;;  %v10893_v58 = vmul.f32 0.020408163, %v10533_v60 }
 0x7d1   : > { %v5001_v53 = vpop.xlane.xlu0 %5000 }
 0x7d2   : > { %v5071_v51 = vmul.f32 0.020408163, %v5001_v53  ;;  %5867 = vperm.xlu1 %7533, %v5489_v15   ;;  %v10851_v15 = vmul.f32 0.020408163, %v10459_v62  ;;  %v6054_v62 = vmul.f32 %v11453_v45, %v10817_v52  ;;  %v5555_v53 = vld [vmem:[%s10135_s8 + $0x100] sm:$0xff] }
 0x7d3   : > { %5902 = vperm.xlu0 %7532, %v5496_v27   ;;  %v5115_v27 = vmul.f32 %v10847_v44, %v10847_v44  ;;  %v5312_v52 = vadd.f32 1e-05, %v5248_v28  ;;  %v5683_v18 = vsub.f32 %v5555_v53, %v5619_v59  ;;  %v5564_v59 = vld [vmem:[%s10135_s8 + $0x148] sm:$0xff]  ;;  %v5438_v28 = vld [vmem:[%s10113_s30 + $0x158] sm:$0xff] }
 0x7d4   : > { %v5199_v39 = vsub.f32 %v5071_v51, %v5135_v20  ;;  %v5122_v10 = vmul.f32 %v10851_v15, %v10851_v15  ;;  %v5436_v20 = vld [vmem:[%s10113_s30 + $0x148] sm:$0xff]  ;;  %v5305_v51 = vadd.f32 1e-05, %v5241_v25  ;;  %v5431_v25 = vld [vmem:[%s10113_s30 + $0x120] sm:$0xff] }
 0x7d5   : > { %v5179_v13 = vsub.f32 %v5051_v19, %v5115_v27  ;;  %v5500_v40 = vmul.f32 %v7611_v16, %v5436_v20  ;;  %v5557_v19 = vld [vmem:[%s10135_s8 + $0x110] sm:$0xff] }
 0x7d6   : > { %v5263_v42 = vmax.f32 %v5199_v39, 0.0  ;;  %6251 = vperm.xlu1 %7533, %v5681_v8   ;;  %v5186_v37 = vsub.f32 %v5058_v23, %v5122_v10  ;;  %v5053_v39 = vmul.f32 0.020408163, %v10379_v43  ;;  %v7613_v8 = vpop.eup %7612  ;;  %v5455_v23 = vld [vmem:[%s10113_s30 + $0x1e0] sm:$0xff] }
 0x7d7   : > { %6286 = vperm.xlu0 %7532, %v5688_v31   ;;  %v5243_v50 = vmax.f32 %v5179_v13, 0.0  ;;  %v5060_v31 = vmul.f32 0.020408163, %v10499_v57  ;;  %v5495_v2 = vmul.f32 %v7613_v8, %v5431_v25  ;;  %v5055_v13 = vmul.f32 0.020408163, %v10415_v30  ;;  %v5433_v30 = vld [vmem:[%s10113_s30 + $0x130] sm:$0xff] }
 0x7d8   : > { %v5327_v24 = vadd.f32 1e-05, %v5263_v42  ;;  %v5250_v32 = vmax.f32 %v5186_v37, 0.0  ;;  %v5628_v42 = vmul.f32 %v5500_v40, %v10788_v22  ;;  %v10912_v8 = vmul.f32 0.020408163, %v10445_v5 }
 0x7d9   : > { %v6197_v41 = vpop.permute.xlu0 %6196  ;;  %v7615_v48 = vpop.eup %7614  ;;  %v5307_v27 = vadd.f32 1e-05, %v5243_v50  ;;  %v5623_v56 = vmul.f32 %v5495_v2, %v10805_v12 }
 0x7da   : > { %7616 = vrsqrt.f32 %v5327_v24  ;;  %v6438_v14 = vadd.f32 %v6197_v41, %v6054_v62  ;;  %5877 = vperm.xlu1 %7533, %v5491_v11   ;;  %v10872_v11 = vmul.f32 0.020408163, %v10496_v54  ;;  %v5117_v54 = vmul.f32 %v10869_v29, %v10869_v29 }
 0x7db   : > { %5912 = vperm.xlu0 %7532, %v5498_v1   ;;  %7618 = vrsqrt.f32 %v5305_v51  ;;  %v5621_v1 = vmul.f32 %v5493_v26, %v10785_v21  ;;  %v5314_v21 = vadd.f32 1e-05, %v5250_v32  ;;  %v10888_v41 = vmul.f32 0.020408163, %v10409_v35  ;;  %v5559_v51 = vld [vmem:[%s10135_s8 + $0x120] sm:$0xff] }
 0x7dc   : > { %6502 = vst.msk [vmem:[%s10357_s11 + $0x98] sm:$0xff] %vm4498_vm0, %v6438_v14  ;;  %7620 = vrsqrt.f32 %v5312_v52  ;;  %v5124_v43 = vmul.f32 %v10872_v11, %v10872_v11  ;;  %v5181_v45 = vsub.f32 %v5053_v39, %v5117_v54  ;;  %v5692_v22 = vsub.f32 %v5564_v59, %v5628_v42  ;;  %v5561_v59 = vld [vmem:[%s10135_s8 + $0x130] sm:$0xff] }
 0x7dd   : > { %v5685_v24 = vsub.f32 %v5557_v19, %v5621_v1  ;;  %v5502_v53 = vmul.f32 %v7615_v48, %v5438_v28  ;;  %7622 = vrsqrt.f32 %v5307_v27  ;;  %v5062_v14 = vmul.f32 0.020408163, %v10536_v38  ;;  %v5435_v27 = vld [vmem:[%s10113_s30 + $0x140] sm:$0xff] }
 0x7de   : > { %6261 = vperm.xlu1 %7533, %v5683_v18   ;;  %v5188_v62 = vsub.f32 %v5060_v31, %v5124_v43  ;;  %v5245_v16 = vmax.f32 %v5181_v45, 0.0  ;;  %7624 = vrsqrt.f32 %v5314_v21  ;;  %v5119_v60 = vmul.f32 %v10888_v41, %v10888_v41  ;;  %v5568_v45 = vld [vmem:[%s10135_s8 + $0x168] sm:$0xff] }
 0x7df   : > { %6296 = vperm.xlu0 %7532, %v5690_v0   ;;  %v5630_v52 = vmul.f32 %v5502_v53, %v10808_v46  ;;  %v5126_v18 = vmul.f32 %v10893_v58, %v10893_v58  ;;  %v5687_v50 = vsub.f32 %v5559_v51, %v5623_v56  ;;  %v10917_v1 = vmul.f32 0.020408163, %v10570_v34 }
 0x7e0   : > { %v5252_v10 = vmax.f32 %v5188_v62, 0.0  ;;  %v5309_v0 = vadd.f32 1e-05, %v5245_v16  ;;  %v5057_v54 = vmul.f32 0.020408163, %v10448_v7  ;;  %v5121_v34 = vmul.f32 %v10912_v8, %v10912_v8 }
 0x7e1   : > { %v5190_v12 = vsub.f32 %v5062_v14, %v5126_v18  ;;  %v5064_v42 = vmul.f32 0.020408163, %v10573_v17  ;;  %v5128_v7 = vmul.f32 %v10917_v1, %v10917_v1  ;;  %v5059_v14 = vmul.f32 0.020408163, %v10485_v36  ;;  %v5437_v18 = vld [vmem:[%s10113_s30 + $0x150] sm:$0xff] }
 0x7e2   : > { %5887 = vperm.xlu1 %7533, %v5493_v26   ;;  %v5440_v26 = vld [vmem:[%s10113_s30 + $0x168] sm:$0xff]  ;;  %v5316_v38 = vadd.f32 1e-05, %v5252_v10  ;;  %7626 = vrsqrt.f32 %v5309_v0  ;;  %v5185_v17 = vsub.f32 %v5057_v54, %v5121_v34  ;;  %v5570_v0 = vld [vmem:[%s10135_s8 + $0x178] sm:$0xff]  ;;  %v10958_v54 = vmul.f32 0.020408163, %v10644_v49 }
 0x7e3   : > { %5922 = vperm.xlu0 %7532, %v5500_v40   ;;  %v5183_v40 = vsub.f32 %v5055_v13, %v5119_v60  ;;  %v5254_v5 = vmax.f32 %v5190_v12, 0.0  ;;  %v10937_v13 = vmul.f32 0.020408163, %v10607_v9  ;;  %v11454_v60 = vld [vmem:[#allocation17_spill] sm:$0xff]  ;;  %v5565_v49 = vld [vmem:[%s10135_s8 + $0x150] sm:$0xff] }
 0x7e4   : > { %v7617_v57 = vpop.eup %7616  ;;  %7628 = vrsqrt.f32 %v5316_v38  ;;  %v5249_v10 = vmax.f32 %v5185_v17, 0.0  ;;  %v5446_v17 = vld [vmem:[%s10113_s30 + $0x198] sm:$0xff] }
 0x7e5   : > { %v10890_v3 = vmul.f32 %v7617_v57, %v5455_v23  ;;  %v7619_v20 = vpop.eup %7618  ;;  %v5247_v48 = vmax.f32 %v5183_v40, 0.0  ;;  %v5442_v57 = vld [vmem:[%s10113_s30 + $0x178] sm:$0xff]  ;;  %v5318_v62 = vadd.f32 1e-05, %v5254_v5  ;;  %v11455_v5 = vld [vmem:[#allocation5_spill] sm:$0xff] }
 0x7e6   : > { %6271 = vperm.xlu1 %7533, %v5685_v24   ;;  %v7621_v37 = vpop.eup %7620  ;;  %v5497_v39 = vmul.f32 %v7619_v20, %v5433_v30  ;;  %v5192_v24 = vsub.f32 %v5064_v42, %v5128_v7  ;;  %v5066_v20 = vmul.f32 0.020408163, %v10610_v47  ;;  %v5444_v47 = vld [vmem:[%s10113_s30 + $0x188] sm:$0xff]  ;;  %v5313_v40 = vadd.f32 1e-05, %v5249_v10  ;;  %v5439_v7 = vld [vmem:[%s10113_s30 + $0x160] sm:$0xff] }
 0x7e7   : > { %6306 = vperm.xlu0 %7532, %v5692_v22   ;;  %v10898_v35 = vmul.f32 %v10890_v3, %v10830_v6  ;;  %v5566_v6 = vld [vmem:[%s10135_s8 + $0x158] sm:$0xff]  ;;  %v5504_v31 = vmul.f32 %v7621_v37, %v5440_v26  ;;  %v7623_v19 = vpop.eup %7622  ;;  %v5311_v21 = vadd.f32 1e-05, %v5247_v48  ;;  %v10934_v22 = vmul.f32 0.020408163, %v10481_v63  ;;  %v5563_v37 = vld [vmem:[%s10135_s8 + $0x140] sm:$0xff] }
 0x7e8   : > { %v5694_v32 = vsub.f32 %v5566_v6, %v5630_v52  ;;  %v5625_v25 = vmul.f32 %v5497_v39, %v10825_v4  ;;  %v7625_v23 = vpop.eup %7624  ;;  %v5499_v4 = vmul.f32 %v7623_v19, %v5435_v27  ;;  %v5256_v63 = vmax.f32 %v5192_v24, 0.0  ;;  %v11456_v27 = vld [vmem:[#allocation52_spill] sm:$0xff] }
 0x7e9   : > { %v5632_v28 = vmul.f32 %v5504_v31, %v10828_v55  ;;  %v5506_v55 = vmul.f32 %v7625_v23, %v5442_v57  ;;  %7630 = vrsqrt.f32 %v5311_v21  ;;  %v5123_v9 = vmul.f32 %v10934_v22, %v10934_v22  ;;  %v5572_v21 = vld [vmem:[%s10135_s8 + $0x188] sm:$0xff] }
 0x7ea   : > { %5897 = vperm.xlu1 %7533, %v5495_v2   ;;  %v5689_v2 = vsub.f32 %v5561_v59, %v5625_v25  ;;  %v5627_v56 = vmul.f32 %v5499_v4, %v10847_v44  ;;  %7632 = vrsqrt.f32 %v5318_v62  ;;  %v5130_v44 = vmul.f32 %v10937_v13, %v10937_v13 }
 0x7eb   : > { %5932 = vperm.xlu0 %7532, %v5502_v53   ;;  %v5696_v16 = vsub.f32 %v5568_v45, %v5632_v28  ;;  %v5634_v36 = vmul.f32 %v5506_v55, %v10851_v15  ;;  %v5187_v38 = vsub.f32 %v5059_v14, %v5123_v9  ;;  %v5320_v12 = vadd.f32 1e-05, %v5256_v63  ;;  %v11458_v14 = vld [vmem:[#allocation61_spill] sm:$0xff]  ;;  %v5823_v9 = vpop.permute.xlu0 %5822 }
 0x7ec   : > { %v7627_v52 = vpop.eup %7626  ;;  %v10955_v15 = vmul.f32 0.020408163, %v10518_v61  ;;  %7634 = vrsqrt.f32 %v5313_v40  ;;  %v5061_v42 = vmul.f32 0.020408163, %v11455_v5  ;;  %v5068_v34 = vmul.f32 0.020408163, %v11456_v27 }
 0x7ed   : > { %v10914_v46 = vpop.xlane.xlu1 %4683  ;;  %v5251_v19 = vmax.f32 %v5187_v38, 0.0  ;;  %7636 = vrsqrt.f32 %v5320_v12  ;;  %v5132_v57 = vmul.f32 %v10958_v54, %v10958_v54  ;;  %v5448_v40 = vld [vmem:[%s10113_s30 + $0x1a8] sm:$0xff] }
 0x7ee   : > { %6281 = vperm.xlu1 %7533, %v5687_v50   ;;  %v7629_v6 = vpop.eup %7628  ;;  %v5194_v50 = vsub.f32 %v5066_v20, %v5130_v44  ;;  %v5125_v28 = vmul.f32 %v10955_v15, %v10955_v15  ;;  %v11459_v20 = vld [vmem:[#allocation50_spill] sm:$0xff]  ;;  %v5441_v44 = vld [vmem:[%s10113_s30 + $0x170] sm:$0xff]  ;;  %v10996_v5 = vmul.f32 0.020408163, %v10914_v46 }
 0x7ef   : > { %6316 = vperm.xlu0 %7532, %v5694_v32   ;;  %v5501_v32 = vmul.f32 %v7627_v52, %v5437_v18  ;;  %v5508_v48 = vmul.f32 %v7629_v6, %v5444_v47  ;;  %v5070_v52 = vmul.f32 0.020408163, %v10766_v33  ;;  %v5567_v18 = vld [vmem:[%s10135_s8 + $0x160] sm:$0xff]  ;;  %v5574_v47 = vld [vmem:[%s10135_s8 + $0x198] sm:$0xff]  ;;  %v5569_v46 = vld [vmem:[%s10135_s8 + $0x170] sm:$0xff] }
 0x7f0   : > { %v5258_v25 = vmax.f32 %v5194_v50, 0.0  ;;  %v5189_v62 = vsub.f32 %v5061_v42, %v5125_v28 }
 0x7f1   : > { %v10925_v43 = vpop.xlane.xlu1 %5003  ;;  %v5629_v61 = vmul.f32 %v5501_v32, %v10869_v29  ;;  %v5636_v23 = vmul.f32 %v5508_v48, %v10872_v11  ;;  %v5196_v29 = vsub.f32 %v5068_v34, %v5132_v57  ;;  %v5136_v57 = vmul.f32 %v10996_v5, %v10996_v5 }
 0x7f2   : > { %5907 = vperm.xlu1 %7533, %v5497_v39   ;;  %v5691_v39 = vsub.f32 %v5563_v37, %v5627_v56  ;;  %v5322_v24 = vadd.f32 1e-05, %v5258_v25  ;;  %v10976_v56 = vmul.f32 0.020408163, %v11458_v14  ;;  %v5253_v63 = vmax.f32 %v5189_v62, 0.0  ;;  %v11461_v25 = vld [vmem:[#allocation55_spill] sm:$0xff] }
 0x7f3   : > { %5942 = vperm.xlu0 %7532, %v5504_v31   ;;  %v5698_v31 = vsub.f32 %v5570_v0, %v5634_v36  ;;  %v7631_v59 = vpop.eup %7630  ;;  %v5700_v11 = vsub.f32 %v5572_v21, %v5636_v23  ;;  %v5065_v27 = vmul.f32 0.020408163, %v11461_v25 }
 0x7f4   : > { %v7633_v45 = vpop.eup %7632  ;;  %v5134_v0 = vmul.f32 %v10976_v56, %v10976_v56  ;;  %v5317_v38 = vadd.f32 1e-05, %v5253_v63 }
 0x7f5   : > { %v5818_v53 = vpop.permute.xlu1 %5817  ;;  %v5510_v10 = vmul.f32 %v7633_v45, %v5446_v17  ;;  %v5576_v17 = vld [vmem:[%s10135_s8 + $0x1a8] sm:$0xff] }
 0x7f6   : > { %6291 = vperm.xlu1 %7533, %v5689_v2   ;;  %v6055_v51 = vmul.f32 %v11454_v60, %v5818_v53  ;;  %v5693_v2 = vsub.f32 %v5565_v49, %v5629_v61  ;;  %v5503_v53 = vmul.f32 %v7631_v59, %v5439_v7  ;;  %v5063_v60 = vmul.f32 0.020408163, %v11459_v20  ;;  %v7635_v37 = vpop.eup %7634  ;;  %v5443_v7 = vld [vmem:[%s10113_s30 + $0x180] sm:$0xff] }
 0x7f7   : > { %6326 = vperm.xlu0 %7532, %v5696_v16   ;;  %v11457_v16 = vld [vmem:[#allocation48_spill] sm:$0xff]  ;;  %v5638_v6 = vmul.f32 %v5510_v10, %v10893_v58  ;;  %v5072_v61 = vmul.f32 0.020408163, %v10925_v43 }
 0x7f9   : > { %v6202_v30 = vpop.permute.xlu1 %6201 }
 0x7fa   : > { %v6439_v26 = vadd.f32 %v6202_v30, %v6055_v51  ;;  %5917 = vperm.xlu1 %7533, %v5499_v4   ;;  %v5315_v4 = vadd.f32 1e-05, %v5251_v19  ;;  %v5260_v51 = vmax.f32 %v5196_v29, 0.0  ;;  %v5631_v30 = vmul.f32 %v5503_v53, %v10888_v41 }
 0x7fb   : > { %5952 = vperm.xlu0 %7532, %v5506_v55   ;;  %v10973_v55 = vmul.f32 0.020408163, %v11457_v16  ;;  %v5198_v41 = vsub.f32 %v5070_v52, %v5134_v0 }
 0x7fc   : > { %6503 = vst.msk [vmem:[%s10357_s11 + $0xa0] sm:$0xff] %vm4498_vm0, %v6439_v26  ;;  %7638 = vrsqrt.f32 %v5315_v4  ;;  %v7637_v26 = vpop.eup %7636  ;;  %v5324_v12 = vadd.f32 1e-05, %v5260_v51  ;;  %v5450_v4 = vld [vmem:[%s10113_s30 + $0x1b8] sm:$0xff] }
 0x7fd   : > { %7640 = vrsqrt.f32 %v5322_v24  ;;  %v5127_v36 = vmul.f32 %v10973_v55, %v10973_v55  ;;  %v5512_v19 = vmul.f32 %v7637_v26, %v5448_v40  ;;  %v5262_v34 = vmax.f32 %v5198_v41, 0.0  ;;  %v5452_v40 = vld [vmem:[%s10113_s30 + $0x1c8] sm:$0xff] }
 0x7fe   : > { %6301 = vperm.xlu1 %7533, %v5691_v39   ;;  %v5695_v39 = vsub.f32 %v5567_v18, %v5631_v30  ;;  %7642 = vrsqrt.f32 %v5317_v38  ;;  %v5200_v24 = vsub.f32 %v5072_v61, %v5136_v57  ;;  %v5571_v18 = vld [vmem:[%s10135_s8 + $0x180] sm:$0xff] }
 0x7ff   : > { %6336 = vperm.xlu0 %7532, %v5698_v31   ;;  %v5191_v33 = vsub.f32 %v5063_v60, %v5127_v36  ;;  %v11460_v31 = vld [vmem:[#allocation6_spill] sm:$0xff]  ;;  %7644 = vrsqrt.f32 %v5324_v12  ;;  %v5640_v23 = vmul.f32 %v5512_v19, %v10917_v1  ;;  %v11464_v60 = vld [vmem:[#allocation7_spill] sm:$0xff] }
 0x800   : > { %v10993_v58 = vmul.f32 0.020408163, %v11460_v31  ;;  %v11463_v1 = vld [vmem:[#allocation18_spill] sm:$0xff]  ;;  %v5067_v51 = vmul.f32 0.020408163, %v11464_v60  ;;  %v5264_v30 = vmax.f32 %v5200_v24, 0.0 }
 0x801   : > { %v5255_v42 = vmax.f32 %v5191_v33, 0.0  ;;  %v11465_v12 = vld [vmem:[#allocation54_spill] sm:$0xff]  ;;  %v11466_v31 = vld [vmem:[#allocation20_spill] sm:$0xff]  ;;  %v5449_v60 = vld [vmem:[%s10113_s30 + $0x1b0] sm:$0xff] }
 0x802   : > { %5927 = vperm.xlu1 %7533, %v5501_v32   ;;  %v5505_v32 = vmul.f32 %v7635_v37, %v5441_v44  ;;  %v5129_v49 = vmul.f32 %v10993_v58, %v10993_v58  ;;  %v5445_v44 = vld [vmem:[%s10113_s30 + $0x190] sm:$0xff]  ;;  %v5328_v41 = vadd.f32 1e-05, %v5264_v30  ;;  %v11468_v24 = vld [vmem:[#allocation22_spill] sm:$0xff] }
 0x803   : > { %5962 = vperm.xlu0 %7532, %v5508_v48   ;;  %v5702_v48 = vsub.f32 %v5574_v47, %v5638_v6  ;;  %v5319_v43 = vadd.f32 1e-05, %v5255_v42  ;;  %v5578_v47 = vld [vmem:[%s10135_s8 + $0x1b8] sm:$0xff] }
 0x804   : > { %v5633_v59 = vmul.f32 %v5505_v32, %v10912_v8  ;;  %v5193_v62 = vsub.f32 %v5065_v27, %v5129_v49  ;;  %v5326_v8 = vadd.f32 1e-05, %v5262_v34  ;;  %v11467_v42 = vld [vmem:[#allocation8_spill] sm:$0xff] }
 0x805   : > { %7646 = vrsqrt.f32 %v5319_v43  ;;  %v5069_v25 = vmul.f32 0.020408163, %v11467_v42  ;;  %v5454_v43 = vld [vmem:[%s10113_s30 + $0x1d8] sm:$0xff] }
 0x806   : > { %6311 = vperm.xlu1 %7533, %v5693_v2   ;;  %v7639_v28 = vpop.eup %7638  ;;  %v5697_v29 = vsub.f32 %v5569_v46, %v5633_v59  ;;  %v5257_v20 = vmax.f32 %v5193_v62, 0.0  ;;  %7648 = vrsqrt.f32 %v5326_v8  ;;  %v5573_v46 = vld [vmem:[%s10135_s8 + $0x190] sm:$0xff] }
 0x807   : > { %6346 = vperm.xlu0 %7532, %v5700_v11   ;;  %v7641_v45 = vpop.eup %7640  ;;  %v5507_v2 = vmul.f32 %v7639_v28, %v5443_v7  ;;  %v6056_v11 = vmul.f32 %v11463_v1, %v5823_v9  ;;  %v5447_v7 = vld [vmem:[%s10113_s30 + $0x1a0] sm:$0xff] }
 0x808   : > { %v5514_v14 = vmul.f32 %v7641_v45, %v5450_v4  ;;  %v7643_v36 = vpop.eup %7642  ;;  %v5321_v38 = vadd.f32 1e-05, %v5257_v20  ;;  %v5580_v4 = vld [vmem:[%s10135_s8 + $0x1c8] sm:$0xff] }
 0x809   : > { %v5635_v37 = vmul.f32 %v5507_v2, %v10934_v22  ;;  %v7645_v26 = vpop.eup %7644  ;;  %v11028_v22 = vmul.f32 0.020408163, %v11465_v12 }
 0x80a   : > { %5937 = vperm.xlu1 %7533, %v5503_v53   ;;  %v10990_v50 = vpop.xlane.xlu0 %4686  ;;  %v11462_v53 = vld [vmem:[#allocation58_spill] sm:$0xff]  ;;  %v5642_v6 = vmul.f32 %v5514_v14, %v10937_v13  ;;  %7650 = vrsqrt.f32 %v5321_v38 }
 0x80b   : > { %5972 = vperm.xlu0 %7532, %v5510_v10   ;;  %v11013_v16 = vmul.f32 0.020408163, %v11462_v53  ;;  %v5704_v10 = vsub.f32 %v5576_v17, %v5640_v23  ;;  %v5133_v59 = vmul.f32 %v11028_v22, %v11028_v22  ;;  %7652 = vrsqrt.f32 %v5328_v41 }
 0x80c   : > { %v5706_v13 = vsub.f32 %v5578_v47, %v5642_v6 }
 0x80d   : > { %v5131_v9 = vmul.f32 %v11013_v16, %v11013_v16  ;;  %v5197_v57 = vsub.f32 %v5069_v25, %v5133_v59 }
 0x80e   : > { %6321 = vperm.xlu1 %7533, %v5695_v39   ;;  %v11008_v21 = vpop.xlane.xlu0 %5006  ;;  %v5699_v39 = vsub.f32 %v5571_v18, %v5635_v37 }
 0x80f   : > { %6356 = vperm.xlu0 %7532, %v5702_v48   ;;  %v5195_v33 = vsub.f32 %v5067_v51, %v5131_v9  ;;  %v7647_v49 = vpop.eup %7646  ;;  %v5261_v1 = vmax.f32 %v5197_v57, 0.0  ;;  %v5456_v9 = vld [vmem:[%s10113_s30 + $0x1e8] sm:$0xff] }
 0x810   : > { %v7649_v45 = vpop.eup %7648 }
 0x811   : > { %v5259_v34 = vmax.f32 %v5195_v33, 0.0  ;;  %v5518_v53 = vmul.f32 %v7649_v45, %v5454_v43  ;;  %v5073_v33 = vmul.f32 0.020408163, %v11008_v21  ;;  %v5451_v21 = vld [vmem:[%s10113_s30 + $0x1c0] sm:$0xff] }
 0x812   : > { %5947 = vperm.xlu1 %7533, %v5505_v32   ;;  %v5509_v32 = vmul.f32 %v7643_v36, %v5445_v44  ;;  %v5582_v36 = vld [vmem:[%s10135_s8 + $0x1d8] sm:$0xff] }
 0x813   : > { %5982 = vperm.xlu0 %7532, %v5512_v19   ;;  %v5516_v19 = vmul.f32 %v7645_v26, %v5452_v40  ;;  %v5323_v62 = vadd.f32 1e-05, %v5259_v34  ;;  %v5646_v20 = vmul.f32 %v5518_v53, %v10976_v56  ;;  %v11469_v26 = vld [vmem:[#allocation24_spill] sm:$0xff] }
 0x814   : > { %v5637_v28 = vmul.f32 %v5509_v32, %v10955_v15  ;;  %v5511_v15 = vmul.f32 %v7647_v49, %v5447_v7  ;;  %v11470_v49 = vld [vmem:[#allocation26_spill] sm:$0xff] }
 0x815   : > { %v5644_v23 = vmul.f32 %v5516_v19, %v10958_v54  ;;  %7654 = vrsqrt.f32 %v5323_v62  ;;  %v5710_v56 = vsub.f32 %v5582_v36, %v5646_v20  ;;  %v5581_v36 = vld [vmem:[%s10135_s8 + $0x1d0] sm:$0xff] }
 0x816   : > { %v6207_v63 = vpop.permute.xlu0 %6206  ;;  %6331 = vperm.xlu1 %7533, %v5697_v29   ;;  %v5701_v8 = vsub.f32 %v5573_v46, %v5637_v28 }
 0x817   : > { %v6440_v52 = vadd.f32 %v6207_v63, %v6056_v11  ;;  %6366 = vperm.xlu0 %7532, %v5704_v10   ;;  %v5639_v10 = vmul.f32 %v5511_v15, %v10973_v55  ;;  %v5575_v63 = vld [vmem:[%s10135_s8 + $0x1a0] sm:$0xff]  ;;  %v11054_v55 = vmul.f32 0.020408163, %v10990_v50 }
 0x819   : > { %6504 = vst.msk [vmem:[%s10357_s11 + $0xa8] sm:$0xff] %vm4498_vm0, %v6440_v52  ;;  %v5325_v52 = vadd.f32 1e-05, %v5261_v1  ;;  %v5703_v6 = vsub.f32 %v5575_v63, %v5639_v10 }
 0x81a   : > { %v5833_v0 = vpop.permute.xlu0 %5832  ;;  %5957 = vperm.xlu1 %7533, %v5507_v2   ;;  %v5708_v2 = vsub.f32 %v5580_v4, %v5644_v23  ;;  %v11471_v23 = vld [vmem:[#allocation19_spill] sm:$0xff] }
 0x81b   : > { %5992 = vperm.xlu0 %7532, %v5514_v14   ;;  %v6058_v48 = vmul.f32 %v11466_v31, %v5833_v0  ;;  %v7651_v14 = vpop.eup %7650  ;;  %7656 = vrsqrt.f32 %v5325_v52  ;;  %v5137_v31 = vmul.f32 %v11054_v55, %v11054_v55  ;;  %v5458_v52 = vld [vmem:[%s10113_s30 + $0x1f8] sm:$0xff] }
 0x81c   : > { %v7653_v51 = vpop.eup %7652  ;;  %v5513_v44 = vmul.f32 %v7651_v14, %v5449_v60  ;;  %v11473_v14 = vld [vmem:[#allocation21_spill] sm:$0xff] }
 0x81d   : > { %v5520_v47 = vmul.f32 %v7653_v51, %v5456_v9  ;;  %v5201_v34 = vsub.f32 %v5073_v33, %v5137_v31  ;;  %v5583_v31 = vld [vmem:[%s10135_s8 + $0x1e0] sm:$0xff] }
 0x81e   : > { %v6217_v27 = vpop.permute.xlu0 %6216  ;;  %6341 = vperm.xlu1 %7533, %v5699_v39   ;;  %v5641_v39 = vmul.f32 %v5513_v44, %v10993_v58 }
 0x81f   : > { %v6442_v61 = vadd.f32 %v6217_v27, %v6058_v48  ;;  %6376 = vperm.xlu0 %7532, %v5706_v13   ;;  %v5577_v13 = vld [vmem:[%s10135_s8 + $0x1b0] sm:$0xff]  ;;  %v5584_v27 = vld [vmem:[%s10135_s8 + $0x1e8] sm:$0xff] }
 0x820   : > { %v5705_v59 = vsub.f32 %v5577_v13, %v5641_v39 }
 0x821   : > { %6506 = vst.msk [vmem:[%s10357_s11 + $0xb8] sm:$0xff] %vm4498_vm0, %v6442_v61 }
 0x822   : > { %v5843_v17 = vpop.permute.xlu0 %5842  ;;  %5967 = vperm.xlu1 %7533, %v5509_v32   ;;  %v7655_v32 = vpop.eup %7654 }
 0x823   : > { %6002 = vperm.xlu0 %7532, %v5516_v19   ;;  %v6060_v29 = vmul.f32 %v11468_v24, %v5843_v17  ;;  %v5648_v19 = vmul.f32 %v5520_v47, %v10996_v5  ;;  %v5515_v58 = vmul.f32 %v7655_v32, %v5451_v21  ;;  %v5265_v17 = vmax.f32 %v5201_v34, 0.0  ;;  %v5453_v24 = vld [vmem:[%s10113_s30 + $0x1d0] sm:$0xff] }
 0x825   : > { %v5712_v5 = vsub.f32 %v5584_v27, %v5648_v19  ;;  %v7657_v62 = vpop.eup %7656  ;;  %v5711_v19 = vsub.f32 %v5583_v31, %v10898_v35  ;;  %v11477_v27 = vld [vmem:[#allocation25_spill] sm:$0xff] }
 0x826   : > { %v6227_v54 = vpop.permute.xlu0 %6226  ;;  %6351 = vperm.xlu1 %7533, %v5701_v8   ;;  %v5643_v8 = vmul.f32 %v5515_v58, %v11013_v16 }
 0x827   : > { %v6444_v11 = vadd.f32 %v6227_v54, %v6060_v29  ;;  %6386 = vperm.xlu0 %7532, %v5708_v2   ;;  %v5517_v54 = vmul.f32 %v7657_v62, %v5453_v24 }
 0x829   : > { %6508 = vst.msk [vmem:[%s10357_s11 + $0xc8] sm:$0xff] %vm4498_vm0, %v6444_v11  ;;  %v11472_v11 = vld [vmem:[#allocation28_spill] sm:$0xff] }
 0x82a   : > { %v5853_v30 = vpop.permute.xlu0 %5852  ;;  %5977 = vperm.xlu1 %7533, %v5511_v15   ;;  %v4690_v37 = vpop.xlane.xlu1 %4689  ;;  %v5579_v15 = vld [vmem:[%s10135_s8 + $0x1c0] sm:$0xff] }
 0x82b   : > { %v11051_v18 = vmul.f32 0.020408163, %v4690_v37  ;;  %6012 = vperm.xlu0 %7532, %v5518_v53   ;;  %v6062_v0 = vmul.f32 %v11469_v26, %v5853_v30  ;;  %v5329_v53 = vadd.f32 1e-05, %v5265_v17  ;;  %v5707_v1 = vsub.f32 %v5579_v15, %v5643_v8  ;;  %v5586_v26 = vld [vmem:[%s10135_s8 + $0x1f8] sm:$0xff] }
 0x82c   : > { %v5645_v30 = vmul.f32 %v5517_v54, %v11028_v22  ;;  %v11474_v22 = vld [vmem:[#allocation30_spill] sm:$0xff]  ;;  %v11480_v15 = vld [vmem:[#allocation36_spill] sm:$0xff] }
 0x82d   : > { %v5138_v12 = vmul.f32 %v11051_v18, %v11051_v18 }
 0x82e   : > { %v6237_v40 = vpop.permute.xlu0 %6236  ;;  %6361 = vperm.xlu1 %7533, %v5703_v6   ;;  %v5010_v38 = vpop.xlane.xlu1 %5009 }
 0x82f   : > { %v6446_v41 = vadd.f32 %v6237_v40, %v6062_v0  ;;  %v5074_v50 = vmul.f32 0.020408163, %v5010_v38  ;;  %6396 = vperm.xlu0 %7532, %v5710_v56   ;;  %v5709_v0 = vsub.f32 %v5581_v36, %v5645_v30  ;;  %v11475_v40 = vld [vmem:[#allocation23_spill] sm:$0xff] }
 0x831   : > { %6510 = vst.msk [vmem:[%s10357_s11 + $0xd8] sm:$0xff] %vm4498_vm0, %v6446_v41  ;;  %v5202_v48 = vsub.f32 %v5074_v50, %v5138_v12 }
 0x832   : > { %v5863_v42 = vpop.permute.xlu0 %5862  ;;  %5987 = vperm.xlu1 %7533, %v5513_v44   ;;  %v5828_v25 = vpop.permute.xlu1 %5827 }
 0x833   : > { %v5266_v61 = vmax.f32 %v5202_v48, 0.0  ;;  %6022 = vperm.xlu0 %7532, %v5520_v47   ;;  %v6064_v46 = vmul.f32 %v11470_v49, %v5863_v42  ;;  %v6057_v7 = vmul.f32 %v11471_v23, %v5828_v25  ;;  %v11476_v42 = vld [vmem:[#allocation32_spill] sm:$0xff] }
 0x835   : > { %v5330_v28 = vadd.f32 1e-05, %v5266_v61 }
 0x836   : > { %v6247_v45 = vpop.permute.xlu0 %6246  ;;  %6371 = vperm.xlu1 %7533, %v5705_v59   ;;  %v6212_v57 = vpop.permute.xlu1 %6211 }
 0x837   : > { %7658 = vrsqrt.f32 %v5330_v28  ;;  %v6448_v4 = vadd.f32 %v6247_v45, %v6064_v46  ;;  %v6441_v43 = vadd.f32 %v6212_v57, %v6057_v7  ;;  %6406 = vperm.xlu0 %7532, %v5712_v5   ;;  %v11478_v7 = vld [vmem:[#allocation34_spill] sm:$0xff]  ;;  %v11479_v45 = vld [vmem:[#allocation27_spill] sm:$0xff] }
 0x838   : > { %7660 = vrsqrt.f32 %v5329_v53 }
 0x839   : > { %6512 = vst.msk [vmem:[%s10357_s11 + $0xe8] sm:$0xff] %vm4498_vm0, %v6448_v4  ;;  %6505 = vst.msk [vmem:[%s10357_s11 + $0xb0] sm:$0xff] %vm4498_vm0, %v6441_v43 }
 0x83a   : > { %v5873_v29 = vpop.permute.xlu0 %5872  ;;  %5997 = vperm.xlu1 %7533, %v5515_v58   ;;  %v5838_v2 = vpop.permute.xlu1 %5837 }
 0x83b   : > { %v6066_v10 = vmul.f32 %v11472_v11, %v5873_v29  ;;  %v6059_v16 = vmul.f32 %v11473_v14, %v5838_v2  ;;  %v11481_v29 = vld [vmem:[#allocation29_spill] sm:$0xff] }
 0x83e   : > { %v6257_v63 = vpop.permute.xlu0 %6256  ;;  %6381 = vperm.xlu1 %7533, %v5707_v1   ;;  %v6222_v20 = vpop.permute.xlu1 %6221 }
 0x83f   : > { %v6450_v60 = vadd.f32 %v6257_v63, %v6066_v10  ;;  %v6443_v51 = vadd.f32 %v6222_v20, %v6059_v16  ;;  %v11482_v16 = vld [vmem:[#allocation38_spill] sm:$0xff]  ;;  %v11483_v20 = vld [vmem:[#allocation31_spill] sm:$0xff] }
 0x841   : > { %v7659_v37 = vpop.eup %7658  ;;  %6514 = vst.msk [vmem:[%s10357_s11 + $0xf8] sm:$0xff] %vm4498_vm0, %v6450_v60  ;;  %6507 = vst.msk [vmem:[%s10357_s11 + $0xc0] sm:$0xff] %vm4498_vm0, %v6443_v51 }
 0x842   : > { %v5883_v9 = vpop.permute.xlu0 %5882  ;;  %6007 = vperm.xlu1 %7533, %v5517_v54   ;;  %v5848_v6 = vpop.permute.xlu1 %5847  ;;  %v5522_v44 = vmul.f32 %v7659_v37, %v5458_v52 }
 0x843   : > { %v6068_v47 = vmul.f32 %v11474_v22, %v5883_v9  ;;  %v6061_v38 = vmul.f32 %v11475_v40, %v5848_v6  ;;  %v7661_v32 = vpop.eup %7660  ;;  %v11484_v6 = vld [vmem:[#allocation40_spill] sm:$0xff] }
 0x844   : > { %6032 = vperm.xlu0 %7532, %v5522_v44   ;;  %v5650_v56 = vmul.f32 %v5522_v44, %v11051_v18  ;;  %v5457_v18 = vld [vmem:[%s10113_s30 + $0x1f0] sm:$0xff] }
 0x845   : > { %v5521_v21 = vmul.f32 %v7661_v32, %v5457_v18 }
 0x846   : > { %v6267_v33 = vpop.permute.xlu0 %6266  ;;  %6391 = vperm.xlu1 %7533, %v5709_v0   ;;  %v6232_v12 = vpop.permute.xlu1 %6231  ;;  %v5714_v41 = vsub.f32 %v5586_v26, %v5650_v56  ;;  %v11485_v26 = vld [vmem:[#allocation33_spill] sm:$0xff] }
 0x847   : > { %v6452_v50 = vadd.f32 %v6267_v33, %v6068_v47  ;;  %v6445_v39 = vadd.f32 %v6232_v12, %v6061_v38  ;;  %v5649_v49 = vmul.f32 %v5521_v21, %v11054_v55  ;;  %v11486_v12 = vld [vmem:[#allocation42_spill] sm:$0xff] }
 0x848   : > { %6416 = vperm.xlu0 %7532, %v5714_v41  }
 0x849   : > { %6516 = vst.msk [vmem:[%s10357_s11 + $0x108] sm:$0xff] %vm4498_vm0, %v6452_v50  ;;  %6509 = vst.msk [vmem:[%s10357_s11 + $0xd0] sm:$0xff] %vm4498_vm0, %v6445_v39  ;;  %v11487_v50 = vld [vmem:[#allocation35_spill] sm:$0xff] }
 0x84a   : > { %v5893_v48 = vpop.permute.xlu0 %5892  ;;  %6017 = vperm.xlu1 %7533, %v10890_v3   ;;  %v5858_v13 = vpop.permute.xlu1 %5857  ;;  %v5585_v3 = vld [vmem:[%s10135_s8 + $0x1f0] sm:$0xff] }
 0x84b   : > { %v6070_v25 = vmul.f32 %v11476_v42, %v5893_v48  ;;  %v6063_v34 = vmul.f32 %v11477_v27, %v5858_v13  ;;  %v5713_v23 = vsub.f32 %v5585_v3, %v5649_v49  ;;  %v11490_v3 = vld [vmem:[#allocation46_spill] sm:$0xff] }
 0x84e   : > { %v6277_v61 = vpop.permute.xlu0 %6276  ;;  %6401 = vperm.xlu1 %7533, %v5711_v19   ;;  %v6242_v59 = vpop.permute.xlu1 %6241 }
 0x84f   : > { %v6454_v58 = vadd.f32 %v6277_v61, %v6070_v25  ;;  %v6447_v28 = vadd.f32 %v6242_v59, %v6063_v34  ;;  %v11489_v25 = vld [vmem:[#allocation37_spill] sm:$0xff] }
 0x851   : > { %6518 = vst.msk [vmem:[%s10357_s11 + $0x118] sm:$0xff] %vm4498_vm0, %v6454_v58  ;;  %6511 = vst.msk [vmem:[%s10357_s11 + $0xe0] sm:$0xff] %vm4498_vm0, %v6447_v28 }
 0x852   : > { %v5903_v35 = vpop.permute.xlu0 %5902  ;;  %6027 = vperm.xlu1 %7533, %v5521_v21   ;;  %v5868_v46 = vpop.permute.xlu1 %5867  ;;  %v11488_v21 = vld [vmem:[#allocation44_spill] sm:$0xff] }
 0x853   : > { %v6072_v5 = vmul.f32 %v11478_v7, %v5903_v35  ;;  %v6065_v57 = vmul.f32 %v11479_v45, %v5868_v46  ;;  %v11491_v46 = vld [vmem:[#allocation39_spill] sm:$0xff] }
 0x856   : > { %v6287_v17 = vpop.permute.xlu0 %6286  ;;  %6411 = vperm.xlu1 %7533, %v5713_v23   ;;  %v6252_v4 = vpop.permute.xlu1 %6251 }
 0x857   : > { %v6456_v55 = vadd.f32 %v6287_v17, %v6072_v5  ;;  %v6449_v43 = vadd.f32 %v6252_v4, %v6065_v57 }
 0x859   : > { %6520 = vst.msk [vmem:[%s10357_s11 + $0x128] sm:$0xff] %vm4498_vm0, %v6456_v55  ;;  %6513 = vst.msk [vmem:[%s10357_s11 + $0xf0] sm:$0xff] %vm4498_vm0, %v6449_v43  ;;  %v11492_v55 = vld [vmem:[#allocation49_spill] sm:$0xff] }
 0x85a   : > { %v5913_v62 = vpop.permute.xlu0 %5912  ;;  %v5878_v8 = vpop.permute.xlu1 %5877 }
 0x85b   : > { %v6074_v24 = vmul.f32 %v11480_v15, %v5913_v62  ;;  %v6067_v2 = vmul.f32 %v11481_v29, %v5878_v8  ;;  %v11493_v62 = vld [vmem:[#allocation41_spill] sm:$0xff] }
 0x85e   : > { %v6297_v53 = vpop.permute.xlu0 %6296  ;;  %v6262_v1 = vpop.permute.xlu1 %6261 }
 0x85f   : > { %v6458_v54 = vadd.f32 %v6297_v53, %v6074_v24  ;;  %v6451_v11 = vadd.f32 %v6262_v1, %v6067_v2 }
 0x861   : > { %6522 = vst.msk [vmem:[%s10357_s11 + $0x138] sm:$0xff] %vm4498_vm0, %v6458_v54  ;;  %6515 = vst.msk [vmem:[%s10357_s11 + $0x100] sm:$0xff] %vm4498_vm0, %v6451_v11  ;;  %v11494_v54 = vld [vmem:[#allocation53_spill] sm:$0xff] }
 0x862   : > { %v5923_v10 = vpop.permute.xlu0 %5922  ;;  %v5888_v14 = vpop.permute.xlu1 %5887 }
 0x863   : > { %v6076_v63 = vmul.f32 %v11482_v16, %v5923_v10  ;;  %v6069_v60 = vmul.f32 %v11483_v20, %v5888_v14  ;;  %v11495_v10 = vld [vmem:[#allocation43_spill] sm:$0xff] }
 0x866   : > { %v6307_v51 = vpop.permute.xlu0 %6306  ;;  %v6272_v52 = vpop.permute.xlu1 %6271 }
 0x867   : > { %v6460_v30 = vadd.f32 %v6307_v51, %v6076_v63  ;;  %v6453_v37 = vadd.f32 %v6272_v52, %v6069_v60 }
 0x869   : > { %6524 = vst.msk [vmem:[%s10357_s11 + $0x148] sm:$0xff] %vm4498_vm0, %v6460_v30  ;;  %6517 = vst.msk [vmem:[%s10357_s11 + $0x110] sm:$0xff] %vm4498_vm0, %v6453_v37  ;;  %v11496_v30 = vld [vmem:[#allocation59_spill] sm:$0xff] }
 0x86a   : > { %v5933_v36 = vpop.permute.xlu0 %5932  ;;  %v5898_v9 = vpop.permute.xlu1 %5897 }
 0x86b   : > { %v6078_v44 = vmul.f32 %v11484_v6, %v5933_v36  ;;  %v6071_v0 = vmul.f32 %v11485_v26, %v5898_v9  ;;  %v11497_v36 = vld [vmem:[#allocation45_spill] sm:$0xff] }
 0x86e   : > { %v6317_v56 = vpop.permute.xlu0 %6316  ;;  %v6282_v22 = vpop.permute.xlu1 %6281 }
 0x86f   : > { %v6462_v47 = vadd.f32 %v6317_v56, %v6078_v44  ;;  %v6455_v40 = vadd.f32 %v6282_v22, %v6071_v0 }
 0x871   : > { %6526 = vst.msk [vmem:[%s10357_s11 + $0x158] sm:$0xff] %vm4498_vm0, %v6462_v47  ;;  %6519 = vst.msk [vmem:[%s10357_s11 + $0x120] sm:$0xff] %vm4498_vm0, %v6455_v40  ;;  %v11498_v47 = vld [vmem:[#allocation65_spill] sm:$0xff] }
 0x872   : > { %v5943_v38 = vpop.permute.xlu0 %5942  ;;  %v5908_v33 = vpop.permute.xlu1 %5907 }
 0x873   : > { %v6080_v41 = vmul.f32 %v11486_v12, %v5943_v38  ;;  %v6073_v39 = vmul.f32 %v11487_v50, %v5908_v33  ;;  %v11499_v38 = vld [vmem:[#allocation47_spill] sm:$0xff] }
 0x876   : > { %v6327_v32 = vpop.permute.xlu0 %6326  ;;  %v6292_v31 = vpop.permute.xlu1 %6291 }
 0x877   : > { %v6464_v18 = vadd.f32 %v6327_v32, %v6080_v41  ;;  %v6457_v48 = vadd.f32 %v6292_v31, %v6073_v39 }
 0x879   : > { %6528 = vst.msk [vmem:[%s10357_s11 + $0x168] sm:$0xff] %vm4498_vm0, %v6464_v18  ;;  %6521 = vst.msk [vmem:[%s10357_s11 + $0x130] sm:$0xff] %vm4498_vm0, %v6457_v48  ;;  %v11500_v18 = vld [vmem:[#allocation71_spill] sm:$0xff] }
 0x87a   : > { %v5953_v13 = vpop.permute.xlu0 %5952  ;;  %v5918_v19 = vpop.permute.xlu1 %5917 }
 0x87b   : > { %v6082_v42 = vmul.f32 %v11488_v21, %v5953_v13  ;;  %v6075_v27 = vmul.f32 %v11489_v25, %v5918_v19  ;;  %v11501_v13 = vld [vmem:[#allocation51_spill] sm:$0xff] }
 0x87e   : > { %v6337_v34 = vpop.permute.xlu0 %6336  ;;  %v6302_v61 = vpop.permute.xlu1 %6301 }
 0x87f   : > { %v6466_v59 = vadd.f32 %v6337_v34, %v6082_v42  ;;  %v6459_v58 = vadd.f32 %v6302_v61, %v6075_v27 }
 0x881   : > { %6530 = vst.msk [vmem:[%s10357_s11 + $0x178] sm:$0xff] %vm4498_vm0, %v6466_v59  ;;  %6523 = vst.msk [vmem:[%s10357_s11 + $0x140] sm:$0xff] %vm4498_vm0, %v6459_v58  ;;  %v11502_v59 = vld [vmem:[#allocation77_spill] sm:$0xff] }
 0x882   : > { %v5963_v28 = vpop.permute.xlu0 %5962  ;;  %v5928_v49 = vpop.permute.xlu1 %5927 }
 0x883   : > { %v6084_v35 = vmul.f32 %v11490_v3, %v5963_v28  ;;  %v6077_v23 = vmul.f32 %v11491_v46, %v5928_v49  ;;  %v11503_v28 = vld [vmem:[#allocation56_spill] sm:$0xff] }
 0x886   : > { %v6347_v7 = vpop.permute.xlu0 %6346  ;;  %v6312_v5 = vpop.permute.xlu1 %6311 }
 0x887   : > { %v6468_v45 = vadd.f32 %v6347_v7, %v6084_v35  ;;  %v6461_v57 = vadd.f32 %v6312_v5, %v6077_v23  ;;  %v11504_v5 = vld [vmem:[#allocation62_spill] sm:$0xff] }
 0x889   : > { %6532 = vst.msk [vmem:[%s10357_s11 + $0x188] sm:$0xff] %vm4498_vm0, %v6468_v45  ;;  %6525 = vst.msk [vmem:[%s10357_s11 + $0x150] sm:$0xff] %vm4498_vm0, %v6461_v57 }
 0x88a   : > { %v5973_v17 = vpop.permute.xlu0 %5972  ;;  %v5938_v4 = vpop.permute.xlu1 %5937 }
 0x88b   : > { %v6086_v43 = vmul.f32 %v11492_v55, %v5973_v17  ;;  %v6079_v8 = vmul.f32 %v11493_v62, %v5938_v4 }
 0x88e   : > { %v6357_v15 = vpop.permute.xlu0 %6356  ;;  %v6322_v24 = vpop.permute.xlu1 %6321 }
 0x88f   : > { %v6470_v29 = vadd.f32 %v6357_v15, %v6086_v43  ;;  %v6463_v2 = vadd.f32 %v6322_v24, %v6079_v8  ;;  %v11505_v43 = vld [vmem:[#allocation68_spill] sm:$0xff]  ;;  %v11506_v8 = vld [vmem:[#allocation83_spill] sm:$0xff] }
 0x891   : > { %6534 = vst.msk [vmem:[%s10357_s11 + $0x198] sm:$0xff] %vm4498_vm0, %v6470_v29  ;;  %6527 = vst.msk [vmem:[%s10357_s11 + $0x160] sm:$0xff] %vm4498_vm0, %v6463_v2 }
 0x892   : > { %v5983_v53 = vpop.permute.xlu0 %5982  ;;  %v5948_v1 = vpop.permute.xlu1 %5947 }
 0x893   : > { %v6088_v11 = vmul.f32 %v11494_v54, %v5983_v53  ;;  %v6081_v14 = vmul.f32 %v11495_v10, %v5948_v1  ;;  %v11507_v54 = vld [vmem:[#allocation74_spill] sm:$0xff] }
 0x896   : > { %v6367_v16 = vpop.permute.xlu0 %6366  ;;  %v6332_v63 = vpop.permute.xlu1 %6331 }
 0x897   : > { %v6472_v20 = vadd.f32 %v6367_v16, %v6088_v11  ;;  %v6465_v60 = vadd.f32 %v6332_v63, %v6081_v14  ;;  %v11508_v63 = vld [vmem:[#allocation80_spill] sm:$0xff] }
 0x899   : > { %6536 = vst.msk [vmem:[%s10357_s11 + $0x1a8] sm:$0xff] %vm4498_vm0, %v6472_v20  ;;  %6529 = vst.msk [vmem:[%s10357_s11 + $0x170] sm:$0xff] %vm4498_vm0, %v6465_v60 }
 0x89a   : > { %v5993_v51 = vpop.permute.xlu0 %5992  ;;  %v5958_v52 = vpop.permute.xlu1 %5957 }
 0x89b   : > { %v6090_v37 = vmul.f32 %v11496_v30, %v5993_v51  ;;  %v6083_v9 = vmul.f32 %v11497_v36, %v5958_v52 }
 0x89e   : > { %v6377_v6 = vpop.permute.xlu0 %6376  ;;  %v6342_v44 = vpop.permute.xlu1 %6341 }
 0x89f   : > { %v6474_v26 = vadd.f32 %v6377_v6, %v6090_v37  ;;  %v6467_v0 = vadd.f32 %v6342_v44, %v6083_v9 }
 0x8a1   : > { %6538 = vst.msk [vmem:[%s10357_s11 + $0x1b8] sm:$0xff] %vm4498_vm0, %v6474_v26  ;;  %6531 = vst.msk [vmem:[%s10357_s11 + $0x180] sm:$0xff] %vm4498_vm0, %v6467_v0 }
 0x8a2   : > { %v6003_v56 = vpop.permute.xlu0 %6002  ;;  %v5968_v22 = vpop.permute.xlu1 %5967 }
 0x8a3   : > { %v6092_v40 = vmul.f32 %v11498_v47, %v6003_v56  ;;  %v6085_v33 = vmul.f32 %v11499_v38, %v5968_v22 }
 0x8a6   : > { %v6387_v12 = vpop.permute.xlu0 %6386  ;;  %v6352_v41 = vpop.permute.xlu1 %6351 }
 0x8a7   : > { %v6476_v50 = vadd.f32 %v6387_v12, %v6092_v40  ;;  %v6469_v39 = vadd.f32 %v6352_v41, %v6085_v33 }
 0x8a9   : > { %6540 = vst.msk [vmem:[%s10357_s11 + $0x1c8] sm:$0xff] %vm4498_vm0, %v6476_v50  ;;  %6533 = vst.msk [vmem:[%s10357_s11 + $0x190] sm:$0xff] %vm4498_vm0, %v6469_v39 }
 0x8aa   : > { %v6013_v32 = vpop.permute.xlu0 %6012  ;;  %v5978_v31 = vpop.permute.xlu1 %5977 }
 0x8ab   : > { %v6094_v48 = vmul.f32 %v11500_v18, %v6013_v32  ;;  %v6087_v19 = vmul.f32 %v11501_v13, %v5978_v31 }
 0x8ae   : > { %v6397_v21 = vpop.permute.xlu0 %6396  ;;  %v6362_v42 = vpop.permute.xlu1 %6361 }
 0x8af   : > { %v6478_v25 = vadd.f32 %v6397_v21, %v6094_v48  ;;  %v6471_v27 = vadd.f32 %v6362_v42, %v6087_v19 }
 0x8b1   : > { %6542 = vst.msk [vmem:[%s10357_s11 + $0x1d8] sm:$0xff] %vm4498_vm0, %v6478_v25  ;;  %6535 = vst.msk [vmem:[%s10357_s11 + $0x1a0] sm:$0xff] %vm4498_vm0, %v6471_v27 }
 0x8b2   : > { %v6023_v34 = vpop.permute.xlu0 %6022  ;;  %v5988_v61 = vpop.permute.xlu1 %5987 }
 0x8b3   : > { %v6096_v58 = vmul.f32 %v11502_v59, %v6023_v34  ;;  %v6089_v49 = vmul.f32 %v11503_v28, %v5988_v61 }
 0x8b6   : > { %v6407_v3 = vpop.permute.xlu0 %6406  ;;  %v6372_v35 = vpop.permute.xlu1 %6371 }
 0x8b7   : > { %v6480_v46 = vadd.f32 %v6407_v3, %v6096_v58  ;;  %v6473_v23 = vadd.f32 %v6372_v35, %v6089_v49 }
 0x8b9   : > { %6544 = vst.msk [vmem:[%s10357_s11 + $0x1e8] sm:$0xff] %vm4498_vm0, %v6480_v46  ;;  %6537 = vst.msk [vmem:[%s10357_s11 + $0x1b0] sm:$0xff] %vm4498_vm0, %v6473_v23 }
 0x8ba   : > { %v5998_v7 = vpop.permute.xlu1 %5997 }
 0x8bb   : > { %v6091_v45 = vmul.f32 %v11504_v5, %v5998_v7 }
 0x8be   : > { %v6382_v57 = vpop.permute.xlu1 %6381 }
 0x8bf   : > { %v6475_v17 = vadd.f32 %v6382_v57, %v6091_v45 }
 0x8c1   : > { %6539 = vst.msk [vmem:[%s10357_s11 + $0x1c0] sm:$0xff] %vm4498_vm0, %v6475_v17 }
 0x8c2   : > { %v6008_v4 = vpop.permute.xlu1 %6007 }
 0x8c3   : > { %v6033_v55 = vpop.permute.xlu0 %6032  ;;  %v6093_v62 = vmul.f32 %v11505_v43, %v6008_v4 }
 0x8c4   : > { %v6098_v15 = vmul.f32 %v11506_v8, %v6033_v55 }
 0x8c6   : > { %v6392_v24 = vpop.permute.xlu1 %6391 }
 0x8c7   : > { %v6477_v29 = vadd.f32 %v6392_v24, %v6093_v62  ;;  %v6417_v2 = vpop.permute.xlu0 %6416 }
 0x8c8   : > { %v6482_v53 = vadd.f32 %v6417_v2, %v6098_v15 }
 0x8c9   : > { %6541 = vst.msk [vmem:[%s10357_s11 + $0x1d0] sm:$0xff] %vm4498_vm0, %v6477_v29 }
 0x8ca   : > { %6546 = vst.msk [vmem:[%s10357_s11 + $0x1f8] sm:$0xff] %vm4498_vm0, %v6482_v53  ;;  %v6018_v1 = vpop.permute.xlu1 %6017 }
 0x8cb   : > { %v6095_v11 = vmul.f32 %v11507_v54, %v6018_v1 }
 0x8ce   : > { %v6402_v10 = vpop.permute.xlu1 %6401 }
 0x8cf   : > { %v6479_v14 = vadd.f32 %v6402_v10, %v6095_v11 }
 0x8d1   : > { %6543 = vst.msk [vmem:[%s10357_s11 + $0x1e0] sm:$0xff] %vm4498_vm0, %v6479_v14 }
 0x8d2   : > { %v6028_v16 = vpop.permute.xlu1 %6027 }
 0x8d3   : > { %v6097_v20 = vmul.f32 %v11508_v63, %v6028_v16 }
 0x8d6   : > { %v6412_v60 = vpop.permute.xlu1 %6411 }
 0x8d7   : > { %v6481_v51 = vadd.f32 %v6412_v60, %v6097_v20 }
 0x8d9   : > { %6545 = vst.msk [vmem:[%s10357_s11 + $0x1f0] sm:$0xff] %vm4498_vm0, %v6481_v51 }
 0x8da PF: > { %p14_p8 = scmp.ge.s32.totalorder %s7777_s20, 4   ;;  %s11509_s15 = smov %s7718_s16 }
 0x8db   : > { %s11510_s16 = smov %s7722_s17  ;;  %s11511_s17 = smov %s7787_s23 }
 0x8dc   : > { %s11512_s18 = smov %s7777_s20  ;;  %16 = sbr.rel (!%p14_p8) target bundleno = 3 (0x3), region = 82 }
 0x8e3   :  { %6569 = vsyncpa [#allocation3], 1 }
 0x8e4   :  { %6571 = vsyncpa [#allocation3 + $0x1], 1 }

</bundles_post_ra>
